<compile_context>
chip_gen: v7x
topology: tpu7x:2x2x1
jax: 0.10.0
libtpu: 0.0.40
codegen_flags: <defaults>
</compile_context>

<pallas_src>
import functools

import jax
import jax.numpy as jnp
from jax.experimental import pallas as pl
from jax.experimental.pallas import tpu as pltpu

EPS = 1e-5
NUM_FTRS = 2048
FEATURE_SIZE = 128
CLASSES_NUM = 8
BF16 = jnp.bfloat16


# ----------------------------------------------------------------------------
# Kernel 1: batched conv1x1 + BN + ReLU   (all three blocks in one call)
# ----------------------------------------------------------------------------
def _conv1x1_kernel(x_ref, w_ref, s_ref, t_ref, o_ref):
    y = jnp.dot(x_ref[0], w_ref[0], preferred_element_type=jnp.float32)
    y = y * s_ref[0] + t_ref[0]
    o_ref[0] = jnp.maximum(y, 0.0).astype(o_ref.dtype)


def conv1x1_bn_relu_batched(x, w, s, t):
    G, MP, K = x.shape
    _, K2, F = w.shape
    assert K == K2
    return pl.pallas_call(
        _conv1x1_kernel,
        out_shape=jax.ShapeDtypeStruct((G, MP, F), BF16),
        grid_spec=pltpu.PrefetchScalarGridSpec(
            num_scalar_prefetch=0,
            grid=(G,),
            in_specs=[
                pl.BlockSpec((1, MP, K), lambda g: (g, 0, 0)),
                pl.BlockSpec((1, K, F), lambda g: (g, 0, 0)),
                pl.BlockSpec((1, 1, F), lambda g: (g, 0, 0)),
                pl.BlockSpec((1, 1, F), lambda g: (g, 0, 0)),
            ],
            out_specs=pl.BlockSpec((1, MP, F), lambda g: (g, 0, 0)),
        ),
        compiler_params=pltpu.CompilerParams(
            dimension_semantics=("parallel",)),
    )(x.astype(BF16), w, s, t)


# ----------------------------------------------------------------------------
# Kernel 2: batched conv3x3(im2col) + BN + ReLU + AdaptiveMaxPool((1,1)) fused
# ----------------------------------------------------------------------------
def _conv3x3_pool_kernel(x_ref, w_ref, s_ref, t_ref, mask_ref, o_ref,
                         *, batch, max_hw):
    y = jnp.dot(x_ref[0], w_ref[0], preferred_element_type=jnp.float32)
    y = y * s_ref[0] + t_ref[0]
    y = jnp.maximum(y, 0.0)          # ReLU: all valid values >= 0 ...
    y = y * mask_ref[0]              # ... so zeroed padded rows never win the max
    o_ref[0] = jnp.max(y.reshape(batch, max_hw, y.shape[-1]), axis=1)


def conv3x3_bn_relu_pool(xcols, w, s, t, mask, batch, max_hw, tn=None):
    G, M, K = xcols.shape            # (3, batch*max_hw, 9*128)
    _, K2, N = w.shape               # (3, 9*128, 1024)
    assert K == K2 and M == batch * max_hw
    if tn is None:
        tn = N                       # full-N tile; pass tn=N//2 on v7x for 2-TC balance
    assert N % tn == 0
    return pl.pallas_call(
        functools.partial(_conv3x3_pool_kernel, batch=batch, max_hw=max_hw),
        out_shape=jax.ShapeDtypeStruct((G, batch, N), jnp.float32),
        grid_spec=pltpu.PrefetchScalarGridSpec(
            num_scalar_prefetch=0,
            grid=(G, N // tn),
            in_specs=[
                pl.BlockSpec((1, M, K), lambda g, n: (g, 0, 0)),
                pl.BlockSpec((1, K, tn), lambda g, n: (g, 0, n)),
                pl.BlockSpec((1, 1, tn), lambda g, n: (g, 0, n)),
                pl.BlockSpec((1, 1, tn), lambda g, n: (g, 0, n)),
                pl.BlockSpec((1, M, 1), lambda g, n: (g, 0, 0)),
            ],
            out_specs=pl.BlockSpec((1, batch, tn), lambda g, n: (g, 0, n)),
        ),
        compiler_params=pltpu.CompilerParams(
            dimension_semantics=("parallel", "parallel")),
    )(xcols.astype(BF16), w, s, t, mask)


# ----------------------------------------------------------------------------
# Kernel 3: fused tail
#   map1 -> dropout(eval) -> map2 -> sigmoid gates -> classifiers 1-3
#   -> classifier_concat, all in one kernel; output is a lane-dense
#   (4, B, 128) slab (classes padded to 128), sliced outside.
# ----------------------------------------------------------------------------
def _tail_kernel(xl_ref, m1w_ref, m1b_ref, m2w_ref, m2b_ref,
                 c_w1_ref, c_s_ref, c_b_ref, c_w2_ref, c_b2_ref,
                 cc_w1_ref, cc_s_ref, cc_b_ref, cc_w2_ref, cc_b2_ref, o_ref):
    G = xl_ref.shape[0]

    def elu(v):  # PyTorch ELU, alpha=1
        return jnp.where(v > 0.0, v, jnp.exp(jnp.minimum(v, 0.0)) - 1.0)

    # feas = map1(cat(xl1, xl2, xl3))  built as a sum of per-branch dots
    feas = m1b_ref[...]
    for g in range(G):
        feas = feas + jnp.dot(xl_ref[g].astype(BF16), m1w_ref[g],
                              preferred_element_type=jnp.float32)
    # Dropout(p=0.5) is identity in eval mode.
    z = jnp.dot(feas.astype(BF16), m2w_ref[...],
                preferred_element_type=jnp.float32) + m2b_ref[...]

    acc_cc = jnp.zeros((xl_ref.shape[1], cc_w1_ref.shape[2]), jnp.float32)
    for g in range(G):
        xl = xl_ref[g]
        gate = jax.nn.sigmoid(z * xl)               # sigmoid(feas * xl_g)
        xg = gate * xl + xl                         # x_g = gate*xl_g + xl_g
        xgb = xg.astype(BF16)
        # classifier_g: BN1d -> Linear -> BN1d -> ELU -> Linear (BNs folded)
        h = jnp.dot(xgb, c_w1_ref[g], preferred_element_type=jnp.float32)
        h = elu(h * c_s_ref[g] + c_b_ref[g])
        o_ref[g] = jnp.dot(h.astype(BF16), c_w2_ref[g],
                           preferred_element_type=jnp.float32) + c_b2_ref[g]
        # classifier_concat first layer, accumulated across branches
        acc_cc = acc_cc + jnp.dot(xgb, cc_w1_ref[g],
                                  preferred_element_type=jnp.float32)

    h = elu(acc_cc * cc_s_ref[...] + cc_b_ref[...])
    o_ref[G] = jnp.dot(h.astype(BF16), cc_w2_ref[...],
                       preferred_element_type=jnp.float32) + cc_b2_ref[...]


def _full_spec(shape):
    n = len(shape)
    return pl.BlockSpec(shape, lambda i, n=n: (0,) * n)


def tail_fused(pooled, prep):
    G, B, _ = pooled.shape
    CP = prep["cls_w2"].shape[2]
    in_arrays = [pooled,
                 prep["map1_w"], prep["map1_b"], prep["map2_w"], prep["map2_b"],
                 prep["cls_w1"], prep["cls_s"], prep["cls_b"],
                 prep["cls_w2"], prep["cls_b2"],
                 prep["cc_w1"], prep["cc_s"], prep["cc_b"],
                 prep["cc_w2"], prep["cc_b2"]]
    return pl.pallas_call(
        _tail_kernel,
        out_shape=jax.ShapeDtypeStruct((G + 1, B, CP), jnp.float32),
        grid_spec=pltpu.PrefetchScalarGridSpec(
            num_scalar_prefetch=0,
            grid=(1,),
            in_specs=[_full_spec(a.shape) for a in in_arrays],
            out_specs=_full_spec((G + 1, B, CP)),
        ),
        compiler_params=pltpu.CompilerParams(
            dimension_semantics=("arbitrary",)),
    )(*in_arrays)


# ----------------------------------------------------------------------------
# Parameter folding (done ONCE, outside jit)
# ----------------------------------------------------------------------------
def bn_fold(bn):
    s = bn["gamma"] / jnp.sqrt(bn["var"] + EPS)
    t = bn["beta"] - bn["mean"] * s
    return s, t


def fold_classifier(p):
    """BN1d(Cin)->Linear(Cin,F)->BN1d(F)->ELU->Linear(F,C), BNs folded.
    The final Linear's output is zero-padded to a 128-lane slab."""
    s0, t0 = bn_fold(p["bn0"])
    w1 = p["w1"]                               # (F, Cin) PyTorch layout
    wf = s0[:, None] * w1.T                    # (Cin, F), BN0 folded into W1
    bf = t0 @ w1.T + p["b1"]                   # (F,)
    s1, t1 = bn_fold(p["bn1"])
    scale = s1.reshape(1, -1).astype(jnp.float32)
    bias = (bf * s1 + t1).reshape(1, -1).astype(jnp.float32)
    w2 = p["w2"].T                             # (F, C)
    b2 = p["b2"].reshape(1, -1)
    cpad = ((w2.shape[1] + 127) // 128) * 128
    w2 = jnp.pad(w2, ((0, 0), (0, cpad - w2.shape[1])))
    b2 = jnp.pad(b2, ((0, 0), (0, cpad - b2.shape[1])))
    return (wf.astype(BF16), scale, bias, w2.astype(BF16), b2.astype(jnp.float32))


def prepare_params(params):
    f32 = jnp.float32
    prep = {}
    K1 = NUM_FTRS                              # common (padded) Cin for 1x1 convs
    F = FEATURE_SIZE
    # batched 1x1 convs: Cin zero-padded to 2048, weights stacked (3, 2048, F)
    w1s, s1s, t1s = [], [], []
    for name in ("cb1", "cb2", "cb3"):
        p = params[name]
        cout, cin = p["w1"].shape[:2]
        w = p["w1"].reshape(cout, cin).T
        w1s.append(jnp.pad(w, ((0, K1 - cin), (0, 0))))
        s, t = bn_fold(p["bn1"])
        s1s.append(s)
        t1s.append(t)
    prep["c1_w"] = jnp.stack(w1s).astype(BF16)
    prep["c1_s"] = jnp.stack(s1s)[:, None, :].astype(f32)
    prep["c1_t"] = jnp.stack(t1s)[:, None, :].astype(f32)
    # 3x3 convs: identical (1152, 1024) weight shape -> stacked (3, 1152, 1024)
    w3, s3, t3 = [], [], []
    for name in ("cb1", "cb2", "cb3"):
        p = params[name]
        w = p["w2"]                            # (Cout, Cin, 3, 3)
        w3.append(jnp.transpose(w, (2, 3, 1, 0)).reshape(-1, w.shape[0]))
        s, t = bn_fold(p["bn2"])
        s3.append(s)
        t3.append(t)
    prep["w3x3"] = jnp.stack(w3).astype(BF16)
    prep["s3x3"] = jnp.stack(s3)[:, None, :].astype(f32)
    prep["t3x3"] = jnp.stack(t3)[:, None, :].astype(f32)
    # tail: maps split per branch so xcat/feat never materialize
    prep["map1_w"] = params["map1_w"].T.reshape(3, NUM_FTRS // 2, F).astype(BF16)
    prep["map1_b"] = params["map1_b"].reshape(1, F).astype(f32)
    prep["map2_w"] = params["map2_w"].T.astype(BF16)           # (F, 1024)
    prep["map2_b"] = params["map2_b"].reshape(1, -1).astype(f32)
    folded = [fold_classifier(params[n]) for n in ("cls1", "cls2", "cls3")]
    prep["cls_w1"] = jnp.stack([x[0] for x in folded])         # (3, 1024, F)
    prep["cls_s"] = jnp.stack([x[1] for x in folded])          # (3, 1, F)
    prep["cls_b"] = jnp.stack([x[2] for x in folded])
    prep["cls_w2"] = jnp.stack([x[3] for x in folded])         # (3, F, 128)
    prep["cls_b2"] = jnp.stack([x[4] for x in folded])         # (3, 1, 128)
    fc = fold_classifier(params["cls_concat"])
    prep["cc_w1"] = fc[0].reshape(3, NUM_FTRS // 2, F)         # 3072 split -> 3x1024
    prep["cc_s"] = fc[1]
    prep["cc_b"] = fc[2]
    prep["cc_w2"] = fc[3]
    prep["cc_b2"] = fc[4]
    return prep


# ----------------------------------------------------------------------------
# XLA-glue helper (small)
# ----------------------------------------------------------------------------
def im2col_3x3_pad(x_nhwc, max_hw):
    """3x3, stride 1, pad 1 -> (Nb*max_hw, 9*C) with spatial padded to max_hw."""
    Nb, H, W, C = x_nhwc.shape
    xp = jnp.pad(x_nhwc, ((0, 0), (1, 1), (1, 1), (0, 0)))
    cols = [xp[:, kh:kh + H, kw:kw + W, :] for kh in range(3) for kw in range(3)]
    xm = jnp.concatenate(cols, axis=-1).reshape(Nb, H * W, 9 * C)
    xm = jnp.pad(xm, ((0, 0), (0, max_hw - H * W), (0, 0)))
    return xm.reshape(Nb * max_hw, 9 * C)


# ----------------------------------------------------------------------------
# Model forward (PMGI_V3.forward, minus the external backbone)
# ----------------------------------------------------------------------------
def pmgi_v3_forward(prep, xf3, xf4, xf5):
    xs_in = (xf3, xf4, xf5)
    B = xf3.shape[0]
    hw_list = [int(x.shape[2]) * int(x.shape[3]) for x in xs_in]
    max_hw = max(hw_list)
    K1 = prep["c1_w"].shape[1]                           # 2048 (padded Cin)
    MP = max(B * hw for hw in hw_list)
    MP = ((MP + 7) // 8) * 8                             # common padded row count

    # ---- batched conv1x1 + BN + ReLU (one pallas_call for all 3 blocks) ----
    xm_list = []
    for x in xs_in:
        Nb, C, H, W = x.shape
        xm = jnp.transpose(x, (0, 2, 3, 1)).reshape(Nb * H * W, C)
        xm_list.append(jnp.pad(xm, ((0, MP - Nb * H * W), (0, K1 - C))))
    xstk = jnp.stack(xm_list)                            # (3, MP, 2048)
    h1 = conv1x1_bn_relu_batched(xstk, prep["c1_w"], prep["c1_s"], prep["c1_t"])

    # ---- im2col (XLA glue) for the 3x3 convs ----
    # TODO(synk): fold im2col into the conv3x3 kernel as a 9-tap in-kernel reduction.
    cols = []
    for g, x in enumerate(xs_in):
        Nb, _, H, W = x.shape
        hb = h1[g, :Nb * H * W, :].reshape(Nb, H, W, -1)
        cols.append(im2col_3x3_pad(hb, max_hw))
    xcols = jnp.stack(cols)                              # (3, B*max_hw, 1152) bf16

    # Per-block valid-row mask (padded spatial rows zeroed; safe only because
    # the in-kernel ReLU makes every valid value >= 0 before the max pool).
    sp = jnp.arange(max_hw)
    mask = jnp.stack([(sp < hw).astype(jnp.float32) for hw in hw_list])
    mask = jnp.broadcast_to(mask[:, None, :], (3, B, max_hw))
    mask = mask.reshape(3, B * max_hw, 1)

    # ---- batched conv3x3 + BN + ReLU + AdaptiveMaxPool((1,1)) -> (3, B, 1024)
    pooled = conv3x3_bn_relu_pool(xcols, prep["w3x3"], prep["s3x3"],
                                  prep["t3x3"], mask, B, max_hw)

    # ---- fused tail: map1 -> drop(eval) -> map2 -> gates -> 4 classifiers ----
    outs = tail_fused(pooled, prep)                      # (4, B, 128) lane-dense
    xc1 = outs[0, :, :CLASSES_NUM]
    xc2 = outs[1, :, :CLASSES_NUM]
    xc3 = outs[2, :, :CLASSES_NUM]
    xcc = outs[3, :, :CLASSES_NUM]
    return xc1, xc2, xc3, xcc


# ----------------------------------------------------------------------------
# Deterministic parameter initialization (synthetic, shapes from __init__)
# ----------------------------------------------------------------------------
def init_params(key, feature_size=FEATURE_SIZE, classes_num=CLASSES_NUM):
    keys = iter(jax.random.split(key, 128))

    def nk():
        return next(keys)

    def w(shape, scale=0.05):
        return scale * jax.random.normal(nk(), shape, jnp.float32)

    def bn(c):
        return {
            "gamma": 1.0 + 0.1 * jax.random.normal(nk(), (c,), jnp.float32),
            "beta": 0.1 * jax.random.normal(nk(), (c,), jnp.float32),
            "mean": 0.1 * jax.random.normal(nk(), (c,), jnp.float32),
            "var": 0.5 + jax.random.uniform(nk(), (c,), jnp.float32),
        }

    def conv_block(cin):
        return {
            "w1": w((feature_size, cin, 1, 1)), "bn1": bn(feature_size),
            "w2": w((NUM_FTRS // 2, feature_size, 3, 3)), "bn2": bn(NUM_FTRS // 2),
        }

    def cls(cin):
        return {
            "bn0": bn(cin),
            "w1": w((feature_size, cin)), "b1": w((feature_size,)),
            "bn1": bn(feature_size),
            "w2": w((classes_num, feature_size)), "b2": w((classes_num,)),
        }

    return {
        "cb1": conv_block(NUM_FTRS // 4),
        "cb2": conv_block(NUM_FTRS // 2),
        "cb3": conv_block(NUM_FTRS),
        "cls1": cls(NUM_FTRS // 2),
        "cls2": cls(NUM_FTRS // 2),
        "cls3": cls(NUM_FTRS // 2),
        "cls_concat": cls(1024 * 3),
        "map1_w": w((feature_size, NUM_FTRS // 2 * 3)),
        "map1_b": w((feature_size,)),
        "map2_w": w((NUM_FTRS // 2, feature_size)),
        "map2_b": w((NUM_FTRS // 2,)),
        # note: self.fc / self.elu are unused in PMGI_V3.forward
    }


if __name__ == "__main__":
    key = jax.random.PRNGKey(0)
    kp, k3, k4, k5 = jax.random.split(key, 4)
    params = init_params(kp)
    prep = prepare_params(params)   # BN folding / bf16 casts hoisted out of jit

    B = 2
    # Synthetic backbone features (ResNet-style stage outputs), NCHW:
    xf3 = jax.random.normal(k3, (B, NUM_FTRS // 4, 8, 8), jnp.float32)   # (2, 512, 8, 8)
    xf4 = jax.random.normal(k4, (B, NUM_FTRS // 2, 4, 4), jnp.float32)   # (2, 1024, 4, 4)
    xf5 = jax.random.normal(k5, (B, NUM_FTRS, 2, 2), jnp.float32)        # (2, 2048, 2, 2)

    fwd = jax.jit(pmgi_v3_forward)
    xc1, xc2, xc3, x_out = jax.block_until_ready(fwd(prep, xf3, xf4, xf5))

    assert xc1.shape == (B, CLASSES_NUM)
    assert xc2.shape == (B, CLASSES_NUM)
    assert xc3.shape == (B, CLASSES_NUM)
    assert x_out.shape == (B, CLASSES_NUM)
    assert all(bool(jnp.isfinite(o).all()) for o in (xc1, xc2, xc3, x_out))
    print("KERNEL_OK")
</pallas_src>

<mosaic_0001>
module attributes {stable_mosaic.version = 11 : i64} {
  func.func @_conv1x1_kernel(%arg0: i32, %arg1: memref<1x128x2048xbf16, #tpu.memory_space<vmem>>, %arg2: memref<1x2048x128xbf16, #tpu.memory_space<vmem>>, %arg3: memref<1x1x128xf32, #tpu.memory_space<vmem>>, %arg4: memref<1x1x128xf32, #tpu.memory_space<vmem>>, %arg5: memref<1x128x128xbf16, #tpu.memory_space<vmem>>) attributes {dimension_semantics = [#tpu.dimension_semantics<parallel>], iteration_bounds = array<i64: 3>, scalar_prefetch = 0 : i64, scratch_operands = 0 : i64, tpu.core_type = #tpu.core_type<tc>, window_params = [{transform_indices = @transform_0, window_bounds = array<i64: 1, 128, 2048>}, {transform_indices = @transform_1, window_bounds = array<i64: 1, 2048, 128>}, {transform_indices = @transform_2, window_bounds = array<i64: 1, 1, 128>}, {transform_indices = @transform_3, window_bounds = array<i64: 1, 1, 128>}, {transform_indices = @transform_4, window_bounds = array<i64: 1, 128, 128>}]} {
    %c0 = arith.constant 0 : index
    %c0_0 = arith.constant 0 : index
    %c0_1 = arith.constant 0 : index
    %0 = vector.load %arg1[%c0, %c0_0, %c0_1] : memref<1x128x2048xbf16, #tpu.memory_space<vmem>>, vector<1x128x2048xbf16>
    %1 = vector.shape_cast %0 : vector<1x128x2048xbf16> to vector<128x2048xbf16>
    %c0_2 = arith.constant 0 : index
    %c0_3 = arith.constant 0 : index
    %c0_4 = arith.constant 0 : index
    %2 = vector.load %arg2[%c0_2, %c0_3, %c0_4] : memref<1x2048x128xbf16, #tpu.memory_space<vmem>>, vector<1x2048x128xbf16>
    %3 = vector.shape_cast %2 : vector<1x2048x128xbf16> to vector<2048x128xbf16>
    %cst = arith.constant dense<0.000000e+00> : vector<128x128xf32>
    %4 = tpu.matmul %1, %3, %cst {dimension_numbers = #tpu.dot_dimension_numbers<[1], [0], [0], [1], [0, 0, 1, 1], [], []>} : vector<128x2048xbf16>, vector<2048x128xbf16>, vector<128x128xf32> -> vector<128x128xf32>
    %c0_5 = arith.constant 0 : index
    %c0_6 = arith.constant 0 : index
    %c0_7 = arith.constant 0 : index
    %5 = vector.load %arg3[%c0_5, %c0_6, %c0_7] : memref<1x1x128xf32, #tpu.memory_space<vmem>>, vector<1x1x128xf32>
    %6 = vector.shape_cast %5 : vector<1x1x128xf32> to vector<1x128xf32>
    %7 = vector.broadcast %6 : vector<1x128xf32> to vector<128x128xf32>
    %8 = arith.mulf %4, %7 : vector<128x128xf32>
    %c0_8 = arith.constant 0 : index
    %c0_9 = arith.constant 0 : index
    %c0_10 = arith.constant 0 : index
    %9 = vector.load %arg4[%c0_8, %c0_9, %c0_10] : memref<1x1x128xf32, #tpu.memory_space<vmem>>, vector<1x1x128xf32>
    %10 = vector.shape_cast %9 : vector<1x1x128xf32> to vector<1x128xf32>
    %11 = vector.broadcast %10 : vector<1x128xf32> to vector<128x128xf32>
    %12 = arith.addf %8, %11 : vector<128x128xf32>
    %cst_11 = arith.constant 0.000000e+00 : f32
    %13 = vector.broadcast %cst_11 : f32 to vector<128x128xf32>
    %14 = arith.maximumf %12, %13 : vector<128x128xf32>
    %15 = arith.truncf %14 : vector<128x128xf32> to vector<128x128xbf16>
    %c0_12 = arith.constant 0 : index
    %c0_13 = arith.constant 0 : index
    %c0_14 = arith.constant 0 : index
    %16 = vector.load %arg5[%c0_12, %c0_13, %c0_14] : memref<1x128x128xbf16, #tpu.memory_space<vmem>>, vector<1x128x128xbf16>
    %17 = vector.shape_cast %16 : vector<1x128x128xbf16> to vector<128x128xbf16>
    %18 = vector.shape_cast %15 : vector<128x128xbf16> to vector<1x128x128xbf16>
    tpu.vector_store %arg5[%c0_12, %c0_13, %c0_14], %18 {strides = array<i32>} : memref<1x128x128xbf16, #tpu.memory_space<vmem>>, vector<1x128x128xbf16>,
    return
  }
  func.func @transform_0(%arg0: i32) -> (i32, i32, i32) {
    %c0_i32 = arith.constant 0 : i32
    %c0_i32_0 = arith.constant 0 : i32
    %c0_i32_1 = arith.constant 0 : i32
    return %arg0, %c0_i32, %c0_i32_0 : i32, i32, i32
  }
  func.func @transform_1(%arg0: i32) -> (i32, i32, i32) {
    %c0_i32 = arith.constant 0 : i32
    %c0_i32_0 = arith.constant 0 : i32
    %c0_i32_1 = arith.constant 0 : i32
    return %arg0, %c0_i32, %c0_i32_0 : i32, i32, i32
  }
  func.func @transform_2(%arg0: i32) -> (i32, i32, i32) {
    %c0_i32 = arith.constant 0 : i32
    %c0_i32_0 = arith.constant 0 : i32
    %c0_i32_1 = arith.constant 0 : i32
    return %arg0, %c0_i32, %c0_i32_0 : i32, i32, i32
  }
  func.func @transform_3(%arg0: i32) -> (i32, i32, i32) {
    %c0_i32 = arith.constant 0 : i32
    %c0_i32_0 = arith.constant 0 : i32
    %c0_i32_1 = arith.constant 0 : i32
    return %arg0, %c0_i32, %c0_i32_0 : i32, i32, i32
  }
  func.func @transform_4(%arg0: i32) -> (i32, i32, i32) {
    %c0_i32 = arith.constant 0 : i32
    %c0_i32_0 = arith.constant 0 : i32
    %c0_i32_1 = arith.constant 0 : i32
    return %arg0, %c0_i32, %c0_i32_0 : i32, i32, i32
  }
}

module attributes {stable_mosaic.version = 11 : i64} {
  func.func @_conv3x3_pool_kernel(%arg0: i32, %arg1: i32, %arg2: memref<1x128x1152xbf16, #tpu.memory_space<vmem>>, %arg3: memref<1x1152x1024xbf16, #tpu.memory_space<vmem>>, %arg4: memref<1x1x1024xf32, #tpu.memory_space<vmem>>, %arg5: memref<1x1x1024xf32, #tpu.memory_space<vmem>>, %arg6: memref<1x128x1xf32, #tpu.memory_space<vmem>>, %arg7: memref<1x2x1024xf32, #tpu.memory_space<vmem>>) attributes {dimension_semantics = [#tpu.dimension_semantics<parallel>, #tpu.dimension_semantics<parallel>], iteration_bounds = array<i64: 3, 1>, scalar_prefetch = 0 : i64, scratch_operands = 0 : i64, tpu.core_type = #tpu.core_type<tc>, window_params = [{transform_indices = @transform_0, window_bounds = array<i64: 1, 128, 1152>}, {transform_indices = @transform_1, window_bounds = array<i64: 1, 1152, 1024>}, {transform_indices = @transform_2, window_bounds = array<i64: 1, 1, 1024>}, {transform_indices = @transform_3, window_bounds = array<i64: 1, 1, 1024>}, {transform_indices = @transform_4, window_bounds = array<i64: 1, 128, 1>}, {transform_indices = @transform_5, window_bounds = array<i64: 1, 2, 1024>}]} {
    %c0 = arith.constant 0 : index
    %c0_0 = arith.constant 0 : index
    %c0_1 = arith.constant 0 : index
    %0 = vector.load %arg2[%c0, %c0_0, %c0_1] : memref<1x128x1152xbf16, #tpu.memory_space<vmem>>, vector<1x128x1152xbf16>
    %1 = vector.shape_cast %0 : vector<1x128x1152xbf16> to vector<128x1152xbf16>
    %c0_2 = arith.constant 0 : index
    %c0_3 = arith.constant 0 : index
    %c0_4 = arith.constant 0 : index
    %2 = vector.load %arg3[%c0_2, %c0_3, %c0_4] : memref<1x1152x1024xbf16, #tpu.memory_space<vmem>>, vector<1x1152x1024xbf16>
    %3 = vector.shape_cast %2 : vector<1x1152x1024xbf16> to vector<1152x1024xbf16>
    %cst = arith.constant dense<0.000000e+00> : vector<128x1024xf32>
    %4 = tpu.matmul %1, %3, %cst {dimension_numbers = #tpu.dot_dimension_numbers<[1], [0], [0], [1], [0, 0, 1, 1], [], []>} : vector<128x1152xbf16>, vector<1152x1024xbf16>, vector<128x1024xf32> -> vector<128x1024xf32>
    %c0_5 = arith.constant 0 : index
    %c0_6 = arith.constant 0 : index
    %c0_7 = arith.constant 0 : index
    %5 = vector.load %arg4[%c0_5, %c0_6, %c0_7] : memref<1x1x1024xf32, #tpu.memory_space<vmem>>, vector<1x1x1024xf32>
    %6 = vector.shape_cast %5 : vector<1x1x1024xf32> to vector<1x1024xf32>
    %7 = vector.broadcast %6 : vector<1x1024xf32> to vector<128x1024xf32>
    %8 = arith.mulf %4, %7 : vector<128x1024xf32>
    %c0_8 = arith.constant 0 : index
    %c0_9 = arith.constant 0 : index
    %c0_10 = arith.constant 0 : index
    %9 = vector.load %arg5[%c0_8, %c0_9, %c0_10] : memref<1x1x1024xf32, #tpu.memory_space<vmem>>, vector<1x1x1024xf32>
    %10 = vector.shape_cast %9 : vector<1x1x1024xf32> to vector<1x1024xf32>
    %11 = vector.broadcast %10 : vector<1x1024xf32> to vector<128x1024xf32>
    %12 = arith.addf %8, %11 : vector<128x1024xf32>
    %cst_11 = arith.constant 0.000000e+00 : f32
    %13 = vector.broadcast %cst_11 : f32 to vector<128x1024xf32>
    %14 = arith.maximumf %12, %13 : vector<128x1024xf32>
    %c0_12 = arith.constant 0 : index
    %c0_13 = arith.constant 0 : index
    %c0_14 = arith.constant 0 : index
    %15 = vector.load %arg6[%c0_12, %c0_13, %c0_14] : memref<1x128x1xf32, #tpu.memory_space<vmem>>, vector<1x128x1xf32>
    %16 = vector.shape_cast %15 : vector<1x128x1xf32> to vector<128x1xf32>
    %17 = vector.broadcast %16 : vector<128x1xf32> to vector<128x1024xf32>
    %18 = arith.mulf %14, %17 : vector<128x1024xf32>
    %19 = vector.shape_cast %18 : vector<128x1024xf32> to vector<2x64x1024xf32>
    %cst_15 = arith.constant dense<0xFF800000> : vector<2x1024xf32>
    %20 = vector.multi_reduction <maximumf>, %19, %cst_15 [1] : vector<2x64x1024xf32> to vector<2x1024xf32>
    %c0_16 = arith.constant 0 : index
    %c0_17 = arith.constant 0 : index
    %c0_18 = arith.constant 0 : index
    %21 = vector.load %arg7[%c0_16, %c0_17, %c0_18] : memref<1x2x1024xf32, #tpu.memory_space<vmem>>, vector<1x2x1024xf32>
    %22 = vector.shape_cast %21 : vector<1x2x1024xf32> to vector<2x1024xf32>
    %23 = vector.shape_cast %20 : vector<2x1024xf32> to vector<1x2x1024xf32>
    tpu.vector_store %arg7[%c0_16, %c0_17, %c0_18], %23 {strides = array<i32>} : memref<1x2x1024xf32, #tpu.memory_space<vmem>>, vector<1x2x1024xf32>,
    return
  }
  func.func @transform_0(%arg0: i32, %arg1: i32) -> (i32, i32, i32) {
    %c0_i32 = arith.constant 0 : i32
    %c0_i32_0 = arith.constant 0 : i32
    %c0_i32_1 = arith.constant 0 : i32
    return %arg0, %c0_i32, %c0_i32_0 : i32, i32, i32
  }
  func.func @transform_1(%arg0: i32, %arg1: i32) -> (i32, i32, i32) {
    %c0_i32 = arith.constant 0 : i32
    %c0_i32_0 = arith.constant 0 : i32
    return %arg0, %c0_i32, %arg1 : i32, i32, i32
  }
  func.func @transform_2(%arg0: i32, %arg1: i32) -> (i32, i32, i32) {
    %c0_i32 = arith.constant 0 : i32
    %c0_i32_0 = arith.constant 0 : i32
    return %arg0, %c0_i32, %arg1 : i32, i32, i32
  }
  func.func @transform_3(%arg0: i32, %arg1: i32) -> (i32, i32, i32) {
    %c0_i32 = arith.constant 0 : i32
    %c0_i32_0 = arith.constant 0 : i32
    return %arg0, %c0_i32, %arg1 : i32, i32, i32
  }
  func.func @transform_4(%arg0: i32, %arg1: i32) -> (i32, i32, i32) {
    %c0_i32 = arith.constant 0 : i32
    %c0_i32_0 = arith.constant 0 : i32
    %c0_i32_1 = arith.constant 0 : i32
    return %arg0, %c0_i32, %c0_i32_0 : i32, i32, i32
  }
  func.func @transform_5(%arg0: i32, %arg1: i32) -> (i32, i32, i32) {
    %c0_i32 = arith.constant 0 : i32
    %c0_i32_0 = arith.constant 0 : i32
    return %arg0, %c0_i32, %arg1 : i32, i32, i32
  }
}

module attributes {stable_mosaic.version = 11 : i64} {
  func.func @_tail_kernel(%arg0: i32, %arg1: memref<3x2x1024xf32, #tpu.memory_space<vmem>>, %arg2: memref<3x1024x128xbf16, #tpu.memory_space<vmem>>, %arg3: memref<1x128xf32, #tpu.memory_space<vmem>>, %arg4: memref<128x1024xbf16, #tpu.memory_space<vmem>>, %arg5: memref<1x1024xf32, #tpu.memory_space<vmem>>, %arg6: memref<3x1024x128xbf16, #tpu.memory_space<vmem>>, %arg7: memref<3x1x128xf32, #tpu.memory_space<vmem>>, %arg8: memref<3x1x128xf32, #tpu.memory_space<vmem>>, %arg9: memref<3x128x128xbf16, #tpu.memory_space<vmem>>, %arg10: memref<3x1x128xf32, #tpu.memory_space<vmem>>, %arg11: memref<3x1024x128xbf16, #tpu.memory_space<vmem>>, %arg12: memref<1x128xf32, #tpu.memory_space<vmem>>, %arg13: memref<1x128xf32, #tpu.memory_space<vmem>>, %arg14: memref<128x128xbf16, #tpu.memory_space<vmem>>, %arg15: memref<1x128xf32, #tpu.memory_space<vmem>>, %arg16: memref<4x2x128xf32, #tpu.memory_space<vmem>>) attributes {dimension_semantics = [#tpu.dimension_semantics<arbitrary>], iteration_bounds = array<i64: 1>, scalar_prefetch = 0 : i64, scratch_operands = 0 : i64, tpu.core_type = #tpu.core_type<tc>, window_params = [{pipeline_mode = #tpu.pipeline_mode<synchronous>, transform_indices = @transform_0, window_bounds = array<i64: 3, 2, 1024>}, {pipeline_mode = #tpu.pipeline_mode<synchronous>, transform_indices = @transform_1, window_bounds = array<i64: 3, 1024, 128>}, {pipeline_mode = #tpu.pipeline_mode<synchronous>, transform_indices = @transform_2, window_bounds = array<i64: 1, 128>}, {pipeline_mode = #tpu.pipeline_mode<synchronous>, transform_indices = @transform_3, window_bounds = array<i64: 128, 1024>}, {pipeline_mode = #tpu.pipeline_mode<synchronous>, transform_indices = @transform_4, window_bounds = array<i64: 1, 1024>}, {pipeline_mode = #tpu.pipeline_mode<synchronous>, transform_indices = @transform_5, window_bounds = array<i64: 3, 1024, 128>}, {pipeline_mode = #tpu.pipeline_mode<synchronous>, transform_indices = @transform_6, window_bounds = array<i64: 3, 1, 128>}, {pipeline_mode = #tpu.pipeline_mode<synchronous>, transform_indices = @transform_7, window_bounds = array<i64: 3, 1, 128>}, {pipeline_mode = #tpu.pipeline_mode<synchronous>, transform_indices = @transform_8, window_bounds = array<i64: 3, 128, 128>}, {pipeline_mode = #tpu.pipeline_mode<synchronous>, transform_indices = @transform_9, window_bounds = array<i64: 3, 1, 128>}, {pipeline_mode = #tpu.pipeline_mode<synchronous>, transform_indices = @transform_10, window_bounds = array<i64: 3, 1024, 128>}, {pipeline_mode = #tpu.pipeline_mode<synchronous>, transform_indices = @transform_11, window_bounds = array<i64: 1, 128>}, {pipeline_mode = #tpu.pipeline_mode<synchronous>, transform_indices = @transform_12, window_bounds = array<i64: 1, 128>}, {pipeline_mode = #tpu.pipeline_mode<synchronous>, transform_indices = @transform_13, window_bounds = array<i64: 128, 128>}, {pipeline_mode = #tpu.pipeline_mode<synchronous>, transform_indices = @transform_14, window_bounds = array<i64: 1, 128>}, {pipeline_mode = #tpu.pipeline_mode<synchronous>, transform_indices = @transform_15, window_bounds = array<i64: 4, 2, 128>}]} {
    %c0 = arith.constant 0 : index
    %c0_0 = arith.constant 0 : index
    %0 = vector.load %arg3[%c0, %c0_0] : memref<1x128xf32, #tpu.memory_space<vmem>>, vector<1x128xf32>
    %c0_1 = arith.constant 0 : index
    %c0_2 = arith.constant 0 : index
    %c0_3 = arith.constant 0 : index
    %1 = vector.load %arg1[%c0_1, %c0_2, %c0_3] : memref<3x2x1024xf32, #tpu.memory_space<vmem>>, vector<1x2x1024xf32>
    %2 = vector.shape_cast %1 : vector<1x2x1024xf32> to vector<2x1024xf32>
    %3 = arith.truncf %2 : vector<2x1024xf32> to vector<2x1024xbf16>
    %c0_4 = arith.constant 0 : index
    %c0_5 = arith.constant 0 : index
    %c0_6 = arith.constant 0 : index
    %4 = vector.load %arg2[%c0_4, %c0_5, %c0_6] : memref<3x1024x128xbf16, #tpu.memory_space<vmem>>, vector<1x1024x128xbf16>
    %5 = vector.shape_cast %4 : vector<1x1024x128xbf16> to vector<1024x128xbf16>
    %cst = arith.constant dense<0.000000e+00> : vector<2x128xf32>
    %6 = tpu.matmul %3, %5, %cst {dimension_numbers = #tpu.dot_dimension_numbers<[1], [0], [0], [1], [0, 0, 1, 1], [], []>} : vector<2x1024xbf16>, vector<1024x128xbf16>, vector<2x128xf32> -> vector<2x128xf32>
    %7 = vector.broadcast %0 : vector<1x128xf32> to vector<2x128xf32>
    %8 = arith.addf %7, %6 : vector<2x128xf32>
    %c1 = arith.constant 1 : index
    %c0_7 = arith.constant 0 : index
    %c0_8 = arith.constant 0 : index
    %9 = vector.load %arg1[%c1, %c0_7, %c0_8] : memref<3x2x1024xf32, #tpu.memory_space<vmem>>, vector<1x2x1024xf32>
    %10 = vector.shape_cast %9 : vector<1x2x1024xf32> to vector<2x1024xf32>
    %11 = arith.truncf %10 : vector<2x1024xf32> to vector<2x1024xbf16>
    %c1_9 = arith.constant 1 : index
    %c0_10 = arith.constant 0 : index
    %c0_11 = arith.constant 0 : index
    %12 = vector.load %arg2[%c1_9, %c0_10, %c0_11] : memref<3x1024x128xbf16, #tpu.memory_space<vmem>>, vector<1x1024x128xbf16>
    %13 = vector.shape_cast %12 : vector<1x1024x128xbf16> to vector<1024x128xbf16>
    %cst_12 = arith.constant dense<0.000000e+00> : vector<2x128xf32>
    %14 = tpu.matmul %11, %13, %cst_12 {dimension_numbers = #tpu.dot_dimension_numbers<[1], [0], [0], [1], [0, 0, 1, 1], [], []>} : vector<2x1024xbf16>, vector<1024x128xbf16>, vector<2x128xf32> -> vector<2x128xf32>
    %15 = arith.addf %8, %14 : vector<2x128xf32>
    %c2 = arith.constant 2 : index
    %c0_13 = arith.constant 0 : index
    %c0_14 = arith.constant 0 : index
    %16 = vector.load %arg1[%c2, %c0_13, %c0_14] : memref<3x2x1024xf32, #tpu.memory_space<vmem>>, vector<1x2x1024xf32>
    %17 = vector.shape_cast %16 : vector<1x2x1024xf32> to vector<2x1024xf32>
    %18 = arith.truncf %17 : vector<2x1024xf32> to vector<2x1024xbf16>
    %c2_15 = arith.constant 2 : index
    %c0_16 = arith.constant 0 : index
    %c0_17 = arith.constant 0 : index
    %19 = vector.load %arg2[%c2_15, %c0_16, %c0_17] : memref<3x1024x128xbf16, #tpu.memory_space<vmem>>, vector<1x1024x128xbf16>
    %20 = vector.shape_cast %19 : vector<1x1024x128xbf16> to vector<1024x128xbf16>
    %cst_18 = arith.constant dense<0.000000e+00> : vector<2x128xf32>
    %21 = tpu.matmul %18, %20, %cst_18 {dimension_numbers = #tpu.dot_dimension_numbers<[1], [0], [0], [1], [0, 0, 1, 1], [], []>} : vector<2x1024xbf16>, vector<1024x128xbf16>, vector<2x128xf32> -> vector<2x128xf32>
    %22 = arith.addf %15, %21 : vector<2x128xf32>
    %23 = arith.truncf %22 : vector<2x128xf32> to vector<2x128xbf16>
    %c0_19 = arith.constant 0 : index
    %c0_20 = arith.constant 0 : index
    %24 = vector.load %arg4[%c0_19, %c0_20] : memref<128x1024xbf16, #tpu.memory_space<vmem>>, vector<128x1024xbf16>
    %cst_21 = arith.constant dense<0.000000e+00> : vector<2x1024xf32>
    %25 = tpu.matmul %23, %24, %cst_21 {dimension_numbers = #tpu.dot_dimension_numbers<[1], [0], [0], [1], [0, 0, 1, 1], [], []>} : vector<2x128xbf16>, vector<128x1024xbf16>, vector<2x1024xf32> -> vector<2x1024xf32>
    %c0_22 = arith.constant 0 : index
    %c0_23 = arith.constant 0 : index
    %26 = vector.load %arg5[%c0_22, %c0_23] : memref<1x1024xf32, #tpu.memory_space<vmem>>, vector<1x1024xf32>
    %27 = vector.broadcast %26 : vector<1x1024xf32> to vector<2x1024xf32>
    %28 = arith.addf %25, %27 : vector<2x1024xf32>
    %cst_24 = arith.constant 0.000000e+00 : f32
    %29 = vector.broadcast %cst_24 : f32 to vector<2x128xf32>
    %c0_25 = arith.constant 0 : index
    %c0_26 = arith.constant 0 : index
    %c0_27 = arith.constant 0 : index
    %30 = vector.load %arg1[%c0_25, %c0_26, %c0_27] : memref<3x2x1024xf32, #tpu.memory_space<vmem>>, vector<1x2x1024xf32>
    %31 = vector.shape_cast %30 : vector<1x2x1024xf32> to vector<2x1024xf32>
    %32 = arith.mulf %28, %31 : vector<2x1024xf32>
    %33 = arith.negf %32 : vector<2x1024xf32>
    %34 = math.exp %33 : vector<2x1024xf32>
    %cst_28 = arith.constant 1.000000e+00 : f32
    %35 = vector.broadcast %cst_28 : f32 to vector<2x1024xf32>
    %36 = arith.addf %35, %34 : vector<2x1024xf32>
    %37 = arith.divf %35, %36 : vector<2x1024xf32>
    %38 = arith.mulf %37, %31 : vector<2x1024xf32>
    %39 = arith.addf %38, %31 : vector<2x1024xf32>
    %40 = arith.truncf %39 : vector<2x1024xf32> to vector<2x1024xbf16>
    %c0_29 = arith.constant 0 : index
    %c0_30 = arith.constant 0 : index
    %c0_31 = arith.constant 0 : index
    %41 = vector.load %arg6[%c0_29, %c0_30, %c0_31] : memref<3x1024x128xbf16, #tpu.memory_space<vmem>>, vector<1x1024x128xbf16>
    %42 = vector.shape_cast %41 : vector<1x1024x128xbf16> to vector<1024x128xbf16>
    %cst_32 = arith.constant dense<0.000000e+00> : vector<2x128xf32>
    %43 = tpu.matmul %40, %42, %cst_32 {dimension_numbers = #tpu.dot_dimension_numbers<[1], [0], [0], [1], [0, 0, 1, 1], [], []>} : vector<2x1024xbf16>, vector<1024x128xbf16>, vector<2x128xf32> -> vector<2x128xf32>
    %c0_33 = arith.constant 0 : index
    %c0_34 = arith.constant 0 : index
    %c0_35 = arith.constant 0 : index
    %44 = vector.load %arg7[%c0_33, %c0_34, %c0_35] : memref<3x1x128xf32, #tpu.memory_space<vmem>>, vector<1x1x128xf32>
    %45 = vector.shape_cast %44 : vector<1x1x128xf32> to vector<1x128xf32>
    %46 = vector.broadcast %45 : vector<1x128xf32> to vector<2x128xf32>
    %47 = arith.mulf %43, %46 : vector<2x128xf32>
    %c0_36 = arith.constant 0 : index
    %c0_37 = arith.constant 0 : index
    %c0_38 = arith.constant 0 : index
    %48 = vector.load %arg8[%c0_36, %c0_37, %c0_38] : memref<3x1x128xf32, #tpu.memory_space<vmem>>, vector<1x1x128xf32>
    %49 = vector.shape_cast %48 : vector<1x1x128xf32> to vector<1x128xf32>
    %50 = vector.broadcast %49 : vector<1x128xf32> to vector<2x128xf32>
    %51 = arith.addf %47, %50 : vector<2x128xf32>
    %cst_39 = arith.constant 0.000000e+00 : f32
    %52 = vector.broadcast %cst_39 : f32 to vector<2x128xf32>
    %53 = arith.cmpf ogt, %51, %52 : vector<2x128xf32>
    %cst_40 = arith.constant 0.000000e+00 : f32
    %54 = vector.broadcast %cst_40 : f32 to vector<2x128xf32>
    %55 = arith.minimumf %51, %54 : vector<2x128xf32>
    %56 = math.exp %55 : vector<2x128xf32>
    %cst_41 = arith.constant 1.000000e+00 : f32
    %57 = vector.broadcast %cst_41 : f32 to vector<2x128xf32>
    %58 = arith.subf %56, %57 : vector<2x128xf32>
    %59 = arith.select %53, %51, %58 : vector<2x128xi1>, vector<2x128xf32>
    %60 = arith.truncf %59 : vector<2x128xf32> to vector<2x128xbf16>
    %c0_42 = arith.constant 0 : index
    %c0_43 = arith.constant 0 : index
    %c0_44 = arith.constant 0 : index
    %61 = vector.load %arg9[%c0_42, %c0_43, %c0_44] : memref<3x128x128xbf16, #tpu.memory_space<vmem>>, vector<1x128x128xbf16>
    %62 = vector.shape_cast %61 : vector<1x128x128xbf16> to vector<128x128xbf16>
    %cst_45 = arith.constant dense<0.000000e+00> : vector<2x128xf32>
    %63 = tpu.matmul %60, %62, %cst_45 {dimension_numbers = #tpu.dot_dimension_numbers<[1], [0], [0], [1], [0, 0, 1, 1], [], []>} : vector<2x128xbf16>, vector<128x128xbf16>, vector<2x128xf32> -> vector<2x128xf32>
    %c0_46 = arith.constant 0 : index
    %c0_47 = arith.constant 0 : index
    %c0_48 = arith.constant 0 : index
    %64 = vector.load %arg10[%c0_46, %c0_47, %c0_48] : memref<3x1x128xf32, #tpu.memory_space<vmem>>, vector<1x1x128xf32>
    %65 = vector.shape_cast %64 : vector<1x1x128xf32> to vector<1x128xf32>
    %66 = vector.broadcast %65 : vector<1x128xf32> to vector<2x128xf32>
    %67 = arith.addf %63, %66 : vector<2x128xf32>
    %c0_49 = arith.constant 0 : index
    %c0_50 = arith.constant 0 : index
    %c0_51 = arith.constant 0 : index
    %68 = vector.load %arg16[%c0_49, %c0_50, %c0_51] : memref<4x2x128xf32, #tpu.memory_space<vmem>>, vector<1x2x128xf32>
    %69 = vector.shape_cast %68 : vector<1x2x128xf32> to vector<2x128xf32>
    %70 = vector.shape_cast %67 : vector<2x128xf32> to vector<1x2x128xf32>
    tpu.vector_store %arg16[%c0_49, %c0_50, %c0_51], %70 {strides = array<i32>} : memref<4x2x128xf32, #tpu.memory_space<vmem>>, vector<1x2x128xf32>,
    %c0_52 = arith.constant 0 : index
    %c0_53 = arith.constant 0 : index
    %c0_54 = arith.constant 0 : index
    %71 = vector.load %arg11[%c0_52, %c0_53, %c0_54] : memref<3x1024x128xbf16, #tpu.memory_space<vmem>>, vector<1x1024x128xbf16>
    %72 = vector.shape_cast %71 : vector<1x1024x128xbf16> to vector<1024x128xbf16>
    %cst_55 = arith.constant dense<0.000000e+00> : vector<2x128xf32>
    %73 = tpu.matmul %40, %72, %cst_55 {dimension_numbers = #tpu.dot_dimension_numbers<[1], [0], [0], [1], [0, 0, 1, 1], [], []>} : vector<2x1024xbf16>, vector<1024x128xbf16>, vector<2x128xf32> -> vector<2x128xf32>
    %74 = arith.addf %29, %73 : vector<2x128xf32>
    %c1_56 = arith.constant 1 : index
    %c0_57 = arith.constant 0 : index
    %c0_58 = arith.constant 0 : index
    %75 = vector.load %arg1[%c1_56, %c0_57, %c0_58] : memref<3x2x1024xf32, #tpu.memory_space<vmem>>, vector<1x2x1024xf32>
    %76 = vector.shape_cast %75 : vector<1x2x1024xf32> to vector<2x1024xf32>
    %77 = arith.mulf %28, %76 : vector<2x1024xf32>
    %78 = arith.negf %77 : vector<2x1024xf32>
    %79 = math.exp %78 : vector<2x1024xf32>
    %cst_59 = arith.constant 1.000000e+00 : f32
    %80 = vector.broadcast %cst_59 : f32 to vector<2x1024xf32>
    %81 = arith.addf %80, %79 : vector<2x1024xf32>
    %82 = arith.divf %80, %81 : vector<2x1024xf32>
    %83 = arith.mulf %82, %76 : vector<2x1024xf32>
    %84 = arith.addf %83, %76 : vector<2x1024xf32>
    %85 = arith.truncf %84 : vector<2x1024xf32> to vector<2x1024xbf16>
    %c1_60 = arith.constant 1 : index
    %c0_61 = arith.constant 0 : index
    %c0_62 = arith.constant 0 : index
    %86 = vector.load %arg6[%c1_60, %c0_61, %c0_62] : memref<3x1024x128xbf16, #tpu.memory_space<vmem>>, vector<1x1024x128xbf16>
    %87 = vector.shape_cast %86 : vector<1x1024x128xbf16> to vector<1024x128xbf16>
    %cst_63 = arith.constant dense<0.000000e+00> : vector<2x128xf32>
    %88 = tpu.matmul %85, %87, %cst_63 {dimension_numbers = #tpu.dot_dimension_numbers<[1], [0], [0], [1], [0, 0, 1, 1], [], []>} : vector<2x1024xbf16>, vector<1024x128xbf16>, vector<2x128xf32> -> vector<2x128xf32>
    %c1_64 = arith.constant 1 : index
    %c0_65 = arith.constant 0 : index
    %c0_66 = arith.constant 0 : index
    %89 = vector.load %arg7[%c1_64, %c0_65, %c0_66] : memref<3x1x128xf32, #tpu.memory_space<vmem>>, vector<1x1x128xf32>
    %90 = vector.shape_cast %89 : vector<1x1x128xf32> to vector<1x128xf32>
    %91 = vector.broadcast %90 : vector<1x128xf32> to vector<2x128xf32>
    %92 = arith.mulf %88, %91 : vector<2x128xf32>
    %c1_67 = arith.constant 1 : index
    %c0_68 = arith.constant 0 : index
    %c0_69 = arith.constant 0 : index
    %93 = vector.load %arg8[%c1_67, %c0_68, %c0_69] : memref<3x1x128xf32, #tpu.memory_space<vmem>>, vector<1x1x128xf32>
    %94 = vector.shape_cast %93 : vector<1x1x128xf32> to vector<1x128xf32>
    %95 = vector.broadcast %94 : vector<1x128xf32> to vector<2x128xf32>
    %96 = arith.addf %92, %95 : vector<2x128xf32>
    %cst_70 = arith.constant 0.000000e+00 : f32
    %97 = vector.broadcast %cst_70 : f32 to vector<2x128xf32>
    %98 = arith.cmpf ogt, %96, %97 : vector<2x128xf32>
    %cst_71 = arith.constant 0.000000e+00 : f32
    %99 = vector.broadcast %cst_71 : f32 to vector<2x128xf32>
    %100 = arith.minimumf %96, %99 : vector<2x128xf32>
    %101 = math.exp %100 : vector<2x128xf32>
    %cst_72 = arith.constant 1.000000e+00 : f32
    %102 = vector.broadcast %cst_72 : f32 to vector<2x128xf32>
    %103 = arith.subf %101, %102 : vector<2x128xf32>
    %104 = arith.select %98, %96, %103 : vector<2x128xi1>, vector<2x128xf32>
    %105 = arith.truncf %104 : vector<2x128xf32> to vector<2x128xbf16>
    %c1_73 = arith.constant 1 : index
    %c0_74 = arith.constant 0 : index
    %c0_75 = arith.constant 0 : index
    %106 = vector.load %arg9[%c1_73, %c0_74, %c0_75] : memref<3x128x128xbf16, #tpu.memory_space<vmem>>, vector<1x128x128xbf16>
    %107 = vector.shape_cast %106 : vector<1x128x128xbf16> to vector<128x128xbf16>
    %cst_76 = arith.constant dense<0.000000e+00> : vector<2x128xf32>
    %108 = tpu.matmul %105, %107, %cst_76 {dimension_numbers = #tpu.dot_dimension_numbers<[1], [0], [0], [1], [0, 0, 1, 1], [], []>} : vector<2x128xbf16>, vector<128x128xbf16>, vector<2x128xf32> -> vector<2x128xf32>
    %c1_77 = arith.constant 1 : index
    %c0_78 = arith.constant 0 : index
    %c0_79 = arith.constant 0 : index
    %109 = vector.load %arg10[%c1_77, %c0_78, %c0_79] : memref<3x1x128xf32, #tpu.memory_space<vmem>>, vector<1x1x128xf32>
    %110 = vector.shape_cast %109 : vector<1x1x128xf32> to vector<1x128xf32>
    %111 = vector.broadcast %110 : vector<1x128xf32> to vector<2x128xf32>
    %112 = arith.addf %108, %111 : vector<2x128xf32>
    %c1_80 = arith.constant 1 : index
    %c0_81 = arith.constant 0 : index
    %c0_82 = arith.constant 0 : index
    %113 = vector.load %arg16[%c1_80, %c0_81, %c0_82] : memref<4x2x128xf32, #tpu.memory_space<vmem>>, vector<1x2x128xf32>
    %114 = vector.shape_cast %113 : vector<1x2x128xf32> to vector<2x128xf32>
    %115 = vector.shape_cast %112 : vector<2x128xf32> to vector<1x2x128xf32>
    tpu.vector_store %arg16[%c1_80, %c0_81, %c0_82], %115 {strides = array<i32>} : memref<4x2x128xf32, #tpu.memory_space<vmem>>, vector<1x2x128xf32>,
    %c1_83 = arith.constant 1 : index
    %c0_84 = arith.constant 0 : index
    %c0_85 = arith.constant 0 : index
    %116 = vector.load %arg11[%c1_83, %c0_84, %c0_85] : memref<3x1024x128xbf16, #tpu.memory_space<vmem>>, vector<1x1024x128xbf16>
    %117 = vector.shape_cast %116 : vector<1x1024x128xbf16> to vector<1024x128xbf16>
    %cst_86 = arith.constant dense<0.000000e+00> : vector<2x128xf32>
    %118 = tpu.matmul %85, %117, %cst_86 {dimension_numbers = #tpu.dot_dimension_numbers<[1], [0], [0], [1], [0, 0, 1, 1], [], []>} : vector<2x1024xbf16>, vector<1024x128xbf16>, vector<2x128xf32> -> vector<2x128xf32>
    %119 = arith.addf %74, %118 : vector<2x128xf32>
    %c2_87 = arith.constant 2 : index
    %c0_88 = arith.constant 0 : index
    %c0_89 = arith.constant 0 : index
    %120 = vector.load %arg1[%c2_87, %c0_88, %c0_89] : memref<3x2x1024xf32, #tpu.memory_space<vmem>>, vector<1x2x1024xf32>
    %121 = vector.shape_cast %120 : vector<1x2x1024xf32> to vector<2x1024xf32>
    %122 = arith.mulf %28, %121 : vector<2x1024xf32>
    %123 = arith.negf %122 : vector<2x1024xf32>
    %124 = math.exp %123 : vector<2x1024xf32>
    %cst_90 = arith.constant 1.000000e+00 : f32
    %125 = vector.broadcast %cst_90 : f32 to vector<2x1024xf32>
    %126 = arith.addf %125, %124 : vector<2x1024xf32>
    %127 = arith.divf %125, %126 : vector<2x1024xf32>
    %128 = arith.mulf %127, %121 : vector<2x1024xf32>
    %129 = arith.addf %128, %121 : vector<2x1024xf32>
    %130 = arith.truncf %129 : vector<2x1024xf32> to vector<2x1024xbf16>
    %c2_91 = arith.constant 2 : index
    %c0_92 = arith.constant 0 : index
    %c0_93 = arith.constant 0 : index
    %131 = vector.load %arg6[%c2_91, %c0_92, %c0_93] : memref<3x1024x128xbf16, #tpu.memory_space<vmem>>, vector<1x1024x128xbf16>
    %132 = vector.shape_cast %131 : vector<1x1024x128xbf16> to vector<1024x128xbf16>
    %cst_94 = arith.constant dense<0.000000e+00> : vector<2x128xf32>
    %133 = tpu.matmul %130, %132, %cst_94 {dimension_numbers = #tpu.dot_dimension_numbers<[1], [0], [0], [1], [0, 0, 1, 1], [], []>} : vector<2x1024xbf16>, vector<1024x128xbf16>, vector<2x128xf32> -> vector<2x128xf32>
    %c2_95 = arith.constant 2 : index
    %c0_96 = arith.constant 0 : index
    %c0_97 = arith.constant 0 : index
    %134 = vector.load %arg7[%c2_95, %c0_96, %c0_97] : memref<3x1x128xf32, #tpu.memory_space<vmem>>, vector<1x1x128xf32>
    %135 = vector.shape_cast %134 : vector<1x1x128xf32> to vector<1x128xf32>
    %136 = vector.broadcast %135 : vector<1x128xf32> to vector<2x128xf32>
    %137 = arith.mulf %133, %136 : vector<2x128xf32>
    %c2_98 = arith.constant 2 : index
    %c0_99 = arith.constant 0 : index
    %c0_100 = arith.constant 0 : index
    %138 = vector.load %arg8[%c2_98, %c0_99, %c0_100] : memref<3x1x128xf32, #tpu.memory_space<vmem>>, vector<1x1x128xf32>
    %139 = vector.shape_cast %138 : vector<1x1x128xf32> to vector<1x128xf32>
    %140 = vector.broadcast %139 : vector<1x128xf32> to vector<2x128xf32>
    %141 = arith.addf %137, %140 : vector<2x128xf32>
    %cst_101 = arith.constant 0.000000e+00 : f32
    %142 = vector.broadcast %cst_101 : f32 to vector<2x128xf32>
    %143 = arith.cmpf ogt, %141, %142 : vector<2x128xf32>
    %cst_102 = arith.constant 0.000000e+00 : f32
    %144 = vector.broadcast %cst_102 : f32 to vector<2x128xf32>
    %145 = arith.minimumf %141, %144 : vector<2x128xf32>
    %146 = math.exp %145 : vector<2x128xf32>
    %cst_103 = arith.constant 1.000000e+00 : f32
    %147 = vector.broadcast %cst_103 : f32 to vector<2x128xf32>
    %148 = arith.subf %146, %147 : vector<2x128xf32>
    %149 = arith.select %143, %141, %148 : vector<2x128xi1>, vector<2x128xf32>
    %150 = arith.truncf %149 : vector<2x128xf32> to vector<2x128xbf16>
    %c2_104 = arith.constant 2 : index
    %c0_105 = arith.constant 0 : index
    %c0_106 = arith.constant 0 : index
    %151 = vector.load %arg9[%c2_104, %c0_105, %c0_106] : memref<3x128x128xbf16, #tpu.memory_space<vmem>>, vector<1x128x128xbf16>
    %152 = vector.shape_cast %151 : vector<1x128x128xbf16> to vector<128x128xbf16>
    %cst_107 = arith.constant dense<0.000000e+00> : vector<2x128xf32>
    %153 = tpu.matmul %150, %152, %cst_107 {dimension_numbers = #tpu.dot_dimension_numbers<[1], [0], [0], [1], [0, 0, 1, 1], [], []>} : vector<2x128xbf16>, vector<128x128xbf16>, vector<2x128xf32> -> vector<2x128xf32>
    %c2_108 = arith.constant 2 : index
    %c0_109 = arith.constant 0 : index
    %c0_110 = arith.constant 0 : index
    %154 = vector.load %arg10[%c2_108, %c0_109, %c0_110] : memref<3x1x128xf32, #tpu.memory_space<vmem>>, vector<1x1x128xf32>
    %155 = vector.shape_cast %154 : vector<1x1x128xf32> to vector<1x128xf32>
    %156 = vector.broadcast %155 : vector<1x128xf32> to vector<2x128xf32>
    %157 = arith.addf %153, %156 : vector<2x128xf32>
    %c2_111 = arith.constant 2 : index
    %c0_112 = arith.constant 0 : index
    %c0_113 = arith.constant 0 : index
    %158 = vector.load %arg16[%c2_111, %c0_112, %c0_113] : memref<4x2x128xf32, #tpu.memory_space<vmem>>, vector<1x2x128xf32>
    %159 = vector.shape_cast %158 : vector<1x2x128xf32> to vector<2x128xf32>
    %160 = vector.shape_cast %157 : vector<2x128xf32> to vector<1x2x128xf32>
    tpu.vector_store %arg16[%c2_111, %c0_112, %c0_113], %160 {strides = array<i32>} : memref<4x2x128xf32, #tpu.memory_space<vmem>>, vector<1x2x128xf32>,
    %c2_114 = arith.constant 2 : index
    %c0_115 = arith.constant 0 : index
    %c0_116 = arith.constant 0 : index
    %161 = vector.load %arg11[%c2_114, %c0_115, %c0_116] : memref<3x1024x128xbf16, #tpu.memory_space<vmem>>, vector<1x1024x128xbf16>
    %162 = vector.shape_cast %161 : vector<1x1024x128xbf16> to vector<1024x128xbf16>
    %cst_117 = arith.constant dense<0.000000e+00> : vector<2x128xf32>
    %163 = tpu.matmul %130, %162, %cst_117 {dimension_numbers = #tpu.dot_dimension_numbers<[1], [0], [0], [1], [0, 0, 1, 1], [], []>} : vector<2x1024xbf16>, vector<1024x128xbf16>, vector<2x128xf32> -> vector<2x128xf32>
    %164 = arith.addf %119, %163 : vector<2x128xf32>
    %c0_118 = arith.constant 0 : index
    %c0_119 = arith.constant 0 : index
    %165 = vector.load %arg12[%c0_118, %c0_119] : memref<1x128xf32, #tpu.memory_space<vmem>>, vector<1x128xf32>
    %166 = vector.broadcast %165 : vector<1x128xf32> to vector<2x128xf32>
    %167 = arith.mulf %164, %166 : vector<2x128xf32>
    %c0_120 = arith.constant 0 : index
    %c0_121 = arith.constant 0 : index
    %168 = vector.load %arg13[%c0_120, %c0_121] : memref<1x128xf32, #tpu.memory_space<vmem>>, vector<1x128xf32>
    %169 = vector.broadcast %168 : vector<1x128xf32> to vector<2x128xf32>
    %170 = arith.addf %167, %169 : vector<2x128xf32>
    %cst_122 = arith.constant 0.000000e+00 : f32
    %171 = vector.broadcast %cst_122 : f32 to vector<2x128xf32>
    %172 = arith.cmpf ogt, %170, %171 : vector<2x128xf32>
    %cst_123 = arith.constant 0.000000e+00 : f32
    %173 = vector.broadcast %cst_123 : f32 to vector<2x128xf32>
    %174 = arith.minimumf %170, %173 : vector<2x128xf32>
    %175 = math.exp %174 : vector<2x128xf32>
    %cst_124 = arith.constant 1.000000e+00 : f32
    %176 = vector.broadcast %cst_124 : f32 to vector<2x128xf32>
    %177 = arith.subf %175, %176 : vector<2x128xf32>
    %178 = arith.select %172, %170, %177 : vector<2x128xi1>, vector<2x128xf32>
    %179 = arith.truncf %178 : vector<2x128xf32> to vector<2x128xbf16>
    %c0_125 = arith.constant 0 : index
    %c0_126 = arith.constant 0 : index
    %180 = vector.load %arg14[%c0_125, %c0_126] : memref<128x128xbf16, #tpu.memory_space<vmem>>, vector<128x128xbf16>
    %cst_127 = arith.constant dense<0.000000e+00> : vector<2x128xf32>
    %181 = tpu.matmul %179, %180, %cst_127 {dimension_numbers = #tpu.dot_dimension_numbers<[1], [0], [0], [1], [0, 0, 1, 1], [], []>} : vector<2x128xbf16>, vector<128x128xbf16>, vector<2x128xf32> -> vector<2x128xf32>
    %c0_128 = arith.constant 0 : index
    %c0_129 = arith.constant 0 : index
    %182 = vector.load %arg15[%c0_128, %c0_129] : memref<1x128xf32, #tpu.memory_space<vmem>>, vector<1x128xf32>
    %183 = vector.broadcast %182 : vector<1x128xf32> to vector<2x128xf32>
    %184 = arith.addf %181, %183 : vector<2x128xf32>
    %c3 = arith.constant 3 : index
    %c0_130 = arith.constant 0 : index
    %c0_131 = arith.constant 0 : index
    %185 = vector.load %arg16[%c3, %c0_130, %c0_131] : memref<4x2x128xf32, #tpu.memory_space<vmem>>, vector<1x2x128xf32>
    %186 = vector.shape_cast %185 : vector<1x2x128xf32> to vector<2x128xf32>
    %187 = vector.shape_cast %184 : vector<2x128xf32> to vector<1x2x128xf32>
    tpu.vector_store %arg16[%c3, %c0_130, %c0_131], %187 {strides = array<i32>} : memref<4x2x128xf32, #tpu.memory_space<vmem>>, vector<1x2x128xf32>,
    return
  }
  func.func @transform_0(%arg0: i32) -> (i32, i32, i32) {
    %c0_i32 = arith.constant 0 : i32
    %c0_i32_0 = arith.constant 0 : i32
    %c0_i32_1 = arith.constant 0 : i32
    %c0_i32_2 = arith.constant 0 : i32
    return %c0_i32, %c0_i32_0, %c0_i32_1 : i32, i32, i32
  }
  func.func @transform_1(%arg0: i32) -> (i32, i32, i32) {
    %c0_i32 = arith.constant 0 : i32
    %c0_i32_0 = arith.constant 0 : i32
    %c0_i32_1 = arith.constant 0 : i32
    %c0_i32_2 = arith.constant 0 : i32
    return %c0_i32, %c0_i32_0, %c0_i32_1 : i32, i32, i32
  }
  func.func @transform_2(%arg0: i32) -> (i32, i32) {
    %c0_i32 = arith.constant 0 : i32
    %c0_i32_0 = arith.constant 0 : i32
    %c0_i32_1 = arith.constant 0 : i32
    return %c0_i32, %c0_i32_0 : i32, i32
  }
  func.func @transform_3(%arg0: i32) -> (i32, i32) {
    %c0_i32 = arith.constant 0 : i32
    %c0_i32_0 = arith.constant 0 : i32
    %c0_i32_1 = arith.constant 0 : i32
    return %c0_i32, %c0_i32_0 : i32, i32
  }
  func.func @transform_4(%arg0: i32) -> (i32, i32) {
    %c0_i32 = arith.constant 0 : i32
    %c0_i32_0 = arith.constant 0 : i32
    %c0_i32_1 = arith.constant 0 : i32
    return %c0_i32, %c0_i32_0 : i32, i32
  }
  func.func @transform_5(%arg0: i32) -> (i32, i32, i32) {
    %c0_i32 = arith.constant 0 : i32
    %c0_i32_0 = arith.constant 0 : i32
    %c0_i32_1 = arith.constant 0 : i32
    %c0_i32_2 = arith.constant 0 : i32
    return %c0_i32, %c0_i32_0, %c0_i32_1 : i32, i32, i32
  }
  func.func @transform_6(%arg0: i32) -> (i32, i32, i32) {
    %c0_i32 = arith.constant 0 : i32
    %c0_i32_0 = arith.constant 0 : i32
    %c0_i32_1 = arith.constant 0 : i32
    %c0_i32_2 = arith.constant 0 : i32
    return %c0_i32, %c0_i32_0, %c0_i32_1 : i32, i32, i32
  }
  func.func @transform_7(%arg0: i32) -> (i32, i32, i32) {
    %c0_i32 = arith.constant 0 : i32
    %c0_i32_0 = arith.constant 0 : i32
    %c0_i32_1 = arith.constant 0 : i32
    %c0_i32_2 = arith.constant 0 : i32
    return %c0_i32, %c0_i32_0, %c0_i32_1 : i32, i32, i32
  }
  func.func @transform_8(%arg0: i32) -> (i32, i32, i32) {
    %c0_i32 = arith.constant 0 : i32
    %c0_i32_0 = arith.constant 0 : i32
    %c0_i32_1 = arith.constant 0 : i32
    %c0_i32_2 = arith.constant 0 : i32
    return %c0_i32, %c0_i32_0, %c0_i32_1 : i32, i32, i32
  }
  func.func @transform_9(%arg0: i32) -> (i32, i32, i32) {
    %c0_i32 = arith.constant 0 : i32
    %c0_i32_0 = arith.constant 0 : i32
    %c0_i32_1 = arith.constant 0 : i32
    %c0_i32_2 = arith.constant 0 : i32
    return %c0_i32, %c0_i32_0, %c0_i32_1 : i32, i32, i32
  }
  func.func @transform_10(%arg0: i32) -> (i32, i32, i32) {
    %c0_i32 = arith.constant 0 : i32
    %c0_i32_0 = arith.constant 0 : i32
    %c0_i32_1 = arith.constant 0 : i32
    %c0_i32_2 = arith.constant 0 : i32
    return %c0_i32, %c0_i32_0, %c0_i32_1 : i32, i32, i32
  }
  func.func @transform_11(%arg0: i32) -> (i32, i32) {
    %c0_i32 = arith.constant 0 : i32
    %c0_i32_0 = arith.constant 0 : i32
    %c0_i32_1 = arith.constant 0 : i32
    return %c0_i32, %c0_i32_0 : i32, i32
  }
  func.func @transform_12(%arg0: i32) -> (i32, i32) {
    %c0_i32 = arith.constant 0 : i32
    %c0_i32_0 = arith.constant 0 : i32
    %c0_i32_1 = arith.constant 0 : i32
    return %c0_i32, %c0_i32_0 : i32, i32
  }
  func.func @transform_13(%arg0: i32) -> (i32, i32) {
    %c0_i32 = arith.constant 0 : i32
    %c0_i32_0 = arith.constant 0 : i32
    %c0_i32_1 = arith.constant 0 : i32
    return %c0_i32, %c0_i32_0 : i32, i32
  }
  func.func @transform_14(%arg0: i32) -> (i32, i32) {
    %c0_i32 = arith.constant 0 : i32
    %c0_i32_0 = arith.constant 0 : i32
    %c0_i32_1 = arith.constant 0 : i32
    return %c0_i32, %c0_i32_0 : i32, i32
  }
  func.func @transform_15(%arg0: i32) -> (i32, i32, i32) {
    %c0_i32 = arith.constant 0 : i32
    %c0_i32_0 = arith.constant 0 : i32
    %c0_i32_1 = arith.constant 0 : i32
    %c0_i32_2 = arith.constant 0 : i32
    return %c0_i32, %c0_i32_0, %c0_i32_1 : i32, i32, i32
  }
}

</mosaic_0001>

<bundles_post_ra>
// kernel: pmgi_v3_forward.3
= control target key start
LH: loop header
LB: loop body
LE: loop exit
PB: predicated region body
PF: predicated region fallthrough
CT: control target
= control target key end

     0   :  { %s4076_s15 = smov 0   ;;  %s4562_s0 = inlined_call_operand.vmem [shape: bf16[3,128,2048], index: 0, kind: input, shape index: {}]   ;;  %s4563_s1 = inlined_call_operand.vmem [shape: bf16[3,2048,128], index: 1, kind: input, shape index: {}]   ;;  %s4564_s2 = inlined_call_operand.vmem [shape: f32[3,1,128], index: 2, kind: input, shape index: {}]   ;;  %s4565_s3 = inlined_call_operand.vmem [shape: f32[3,1,128], index: 3, kind: input, shape index: {}]   ;;  %s4566_s4 = inlined_call_operand.vmem [shape: bf16[3,128,128], index: 4, kind: output, shape index: {}]  }
   0x1 LB: > { %s3042_s16 = sadd.s32 4294967295, %s4049_s15   ;;  %p3046_p0 = scmp.ge.s32.totalorder %s4049_s15, 1  ;;  %s4049_s15 = sphi %s4076_s15, %s14_s15  }
   0x2   : > { %p188_p1 = scmp.lt.s32.totalorder %s4049_s15, 4 }
   0x4   : > { %p189_p2 = pnand %p3046_p0, %p188_p1 }
   0x5   : > { %p225_p3 = scmp.lt.s32.totalorder (!%p189_p2), %s3042_s16, 2 }
   0x6   : > { %192 = sbr.rel (%p189_p2) target bundleno = 528 (0x210), region = 36 }
   0xd   : > { %s4568_s16 = smov (!%p225_p3, %s3042_s16), 2 }
   0xe   : > { %s3329_s17 = sshll.u32 %s4568_s16, 10  ;;  %s237_s26 = scalar_lea.vmem %s4564_s2, %s4568_s16 }
   0xf   : > { %s4092_s20 = scalar_lea.vmem %s4563_s1, %s3329_s17  ;;  %s4129_s23 = scalar_lea.vmem %s4562_s0, %s3329_s17 }
  0x10   : > { %v3915_v0 = vld [vmem:[%s4092_s20 + $0x40] sm:$0xff]   ;;  %v3919_v4 = vld [vmem:[%s4092_s20 + $0x48] sm:$0xff]   ;;  %v3923_v8 = vld [vmem:[%s4092_s20 + $0x50] sm:$0xff]   ;;  %s240_s29 = scalar_lea.vmem %s4565_s3, %s4568_s16  ;;  %s3331_s30 = sshll.u32 %s4568_s16, 6 }
  0x11   : > { %v3916_v1 = vld [vmem:[%s4092_s20 + $0xc0] sm:$0xff]   ;;  %3395 = vmatprep.subr.bf16.mxu0 %v3915_v0  ;;  %v3920_v5 = vld [vmem:[%s4092_s20 + $0xc8] sm:$0xff]   ;;  %v3924_v9 = vld [vmem:[%s4092_s20 + $0xd0] sm:$0xff]   ;;  %s4509_s7 = scalar_lea.vmem %s4566_s4, %s3331_s30 }
  0x12   : > { %v3917_v2 = vld [vmem:[%s4092_s20] sm:$0xff]   ;;  %3459 = vmatprep.subr.bf16.mxu1 %v3916_v1  ;;  %v3921_v6 = vld [vmem:[%s4092_s20 + $0x8] sm:$0xff]   ;;  %v3925_v10 = vld [vmem:[%s4092_s20 + $0x10] sm:$0xff]  }
  0x13   : > { %v3918_v3 = vld [vmem:[%s4092_s20 + $0x80] sm:$0xff]   ;;  %3396 = vmatpush3.bf16.msra.mxu0 %v3917_v2  ;;  %v3922_v7 = vld [vmem:[%s4092_s20 + $0x88] sm:$0xff]   ;;  %v3926_v11 = vld [vmem:[%s4092_s20 + $0x90] sm:$0xff]  }
  0x14   : > { %3460 = vmatpush3.bf16.msra.mxu1 %v3918_v3  ;;  %3397 = vmatprep.subr.bf16.mxu0 %v3919_v4  ;;  %v3927_v12 = vld [vmem:[%s4092_s20 + $0x58] sm:$0xff]   ;;  %v3931_v16 = vld [vmem:[%s4092_s20 + $0x60] sm:$0xff]   ;;  %v3935_v20 = vld [vmem:[%s4092_s20 + $0x68] sm:$0xff]  }
  0x15   : > { %3461 = vmatprep.subr.bf16.mxu1 %v3920_v5  ;;  %v3928_v13 = vld [vmem:[%s4092_s20 + $0xd8] sm:$0xff]   ;;  %v3932_v17 = vld [vmem:[%s4092_s20 + $0xe0] sm:$0xff]   ;;  %v3936_v21 = vld [vmem:[%s4092_s20 + $0xe8] sm:$0xff]  }
  0x16   : > { %v3929_v14 = vld [vmem:[%s4092_s20 + $0x18] sm:$0xff]   ;;  %v3933_v18 = vld [vmem:[%s4092_s20 + $0x20] sm:$0xff]   ;;  %v3937_v22 = vld [vmem:[%s4092_s20 + $0x28] sm:$0xff]  }
  0x17   : > { %3398 = vmatpush3.bf16.msra.mxu0 %v3921_v6  ;;  %v3930_v15 = vld [vmem:[%s4092_s20 + $0x98] sm:$0xff]   ;;  %v3934_v19 = vld [vmem:[%s4092_s20 + $0xa0] sm:$0xff]   ;;  %v3938_v23 = vld [vmem:[%s4092_s20 + $0xa8] sm:$0xff]  }
  0x18   : > { %3462 = vmatpush3.bf16.msra.mxu1 %v3922_v7  ;;  %3399 = vmatprep.subr.bf16.mxu0 %v3923_v8  ;;  %v3939_v24 = vld [vmem:[%s4092_s20 + $0x70] sm:$0xff]   ;;  %v3943_v28 = vld [vmem:[%s4092_s20 + $0x78] sm:$0xff]   ;;  %v247_v32 = vld [vmem:[%s4129_s23] sm:$0xff] }
  0x19   : > { %3463 = vmatprep.subr.bf16.mxu1 %v3924_v9  ;;  %v3940_v25 = vld [vmem:[%s4092_s20 + $0xf0] sm:$0xff]   ;;  %v3944_v29 = vld [vmem:[%s4092_s20 + $0xf8] sm:$0xff]   ;;  %v255_v33 = vld [vmem:[%s4129_s23 + $0x40] sm:$0xff] }
  0x1a   : > { %v3941_v26 = vld [vmem:[%s4092_s20 + $0x30] sm:$0xff]   ;;  %v3945_v30 = vld [vmem:[%s4092_s20 + $0x38] sm:$0xff]   ;;  %v248_v34 = vld [vmem:[%s4129_s23 + $0x8] sm:$0xff]  ;;  %v3053_v35 = vcombine.low %v247_v32, %v255_v33  ;;  %v3054_v36 = vcombine.high %v247_v32, %v255_v33 }
  0x1b   : > { %3400 = vmatpush3.bf16.msra.mxu0 %v3925_v10  ;;  %v3942_v27 = vld [vmem:[%s4092_s20 + $0xb0] sm:$0xff]   ;;  %v3946_v31 = vld [vmem:[%s4092_s20 + $0xb8] sm:$0xff]   ;;  %v256_v37 = vld [vmem:[%s4129_s23 + $0x48] sm:$0xff] }
  0x1c   : > { %3464 = vmatpush3.bf16.msra.mxu1 %v3926_v11  ;;  %3401 = vmatprep.subr.bf16.mxu0 %v3927_v12  ;;  %v3055_v38 = vcombine.low %v248_v34, %v256_v37  ;;  %v3056_v39 = vcombine.high %v248_v34, %v256_v37  ;;  %v3947_v40 = vld [vmem:[%s4092_s20 + $0x140] sm:$0xff]   ;;  %v264_v47 = vld [vmem:[%s4129_s23 + $0x88] sm:$0xff]  ;;  %v3955_v62 = vld [vmem:[%s4092_s20 + $0x150] sm:$0xff]  }
  0x1d   : > { %3465 = vmatprep.subr.bf16.mxu1 %v3928_v13  ;;  %2071 = vmatprep.mubr.bf16.mxu0 %v3054_v36  ;;  %v3948_v41 = vld [vmem:[%s4092_s20 + $0x100] sm:$0xff]   ;;  %v272_v48 = vld [vmem:[%s4129_s23 + $0xc8] sm:$0xff]  ;;  %v3956_v63 = vld [vmem:[%s4092_s20 + $0x110] sm:$0xff]  }
  0x1e   : > { %2168 = vmatprep.mubr.bf16.mxu1 %v3056_v39  ;;  %v3949_v42 = vld [vmem:[%s4092_s20 + $0x1c0] sm:$0xff]   ;;  %v3072_v49 = vcombine.high %v264_v47, %v272_v48  ;;  %v3951_v50 = vld [vmem:[%s4092_s20 + $0x148] sm:$0xff]   ;;  %v3071_v53 = vcombine.low %v264_v47, %v272_v48  ;;  %v3957_v0 = vld [vmem:[%s4092_s20 + $0x1d0] sm:$0xff]  }
  0x1f   : > { %3402 = vmatpush3.bf16.msra.mxu0 %v3929_v14  ;;  %v3950_v43 = vld [vmem:[%s4092_s20 + $0x180] sm:$0xff]   ;;  %v3952_v52 = vld [vmem:[%s4092_s20 + $0x108] sm:$0xff]   ;;  %v3958_v1 = vld [vmem:[%s4092_s20 + $0x190] sm:$0xff]  }
  0x20   : > { %3466 = vmatpush3.bf16.msra.mxu1 %v3930_v15  ;;  %3403 = vmatprep.subr.bf16.mxu0 %v3931_v16  ;;  %v263_v44 = vld [vmem:[%s4129_s23 + $0x80] sm:$0xff]  ;;  %v3953_v54 = vld [vmem:[%s4092_s20 + $0x1c8] sm:$0xff]   ;;  %v3959_v10 = vld [vmem:[%s4092_s20 + $0x158] sm:$0xff]  }
  0x21   : > { %3467 = vmatprep.subr.bf16.mxu1 %v3932_v17  ;;  %v271_v45 = vld [vmem:[%s4129_s23 + $0xc0] sm:$0xff]  ;;  %v3954_v55 = vld [vmem:[%s4092_s20 + $0x188] sm:$0xff]   ;;  %v3960_v11 = vld [vmem:[%s4092_s20 + $0x118] sm:$0xff]  }
  0x22   : > { %v3070_v46 = vcombine.high %v263_v44, %v271_v45  ;;  %v3069_v51 = vcombine.low %v263_v44, %v271_v45  ;;  %v279_v56 = vld [vmem:[%s4129_s23 + $0x100] sm:$0xff]  ;;  %v280_v58 = vld [vmem:[%s4129_s23 + $0x108] sm:$0xff]  ;;  %v3961_v12 = vld [vmem:[%s4092_s20 + $0x1d8] sm:$0xff]  }
  0x23   : > { %3404 = vmatpush3.bf16.msra.mxu0 %v3933_v18  ;;  %v287_v57 = vld [vmem:[%s4129_s23 + $0x140] sm:$0xff]  ;;  %v288_v59 = vld [vmem:[%s4129_s23 + $0x148] sm:$0xff]  ;;  %v3962_v13 = vld [vmem:[%s4092_s20 + $0x198] sm:$0xff]  }
  0x24   : > { %3468 = vmatpush3.bf16.msra.mxu1 %v3934_v19  ;;  %3405 = vmatprep.subr.bf16.mxu0 %v3935_v20  ;;  %v3086_v60 = vcombine.high %v279_v56, %v287_v57  ;;  %v3088_v61 = vcombine.high %v280_v58, %v288_v59  ;;  %v3085_v2 = vcombine.low %v279_v56, %v287_v57  ;;  %v295_v3 = vld [vmem:[%s4129_s23 + $0x180] sm:$0xff]  ;;  %v296_v5 = vld [vmem:[%s4129_s23 + $0x188] sm:$0xff]  ;;  %v3972_v39 = vld [vmem:[%s4092_s20 + $0x130] sm:$0xff]  }
  0x25   : > { %3469 = vmatprep.subr.bf16.mxu1 %v3936_v21  ;;  %v303_v4 = vld [vmem:[%s4129_s23 + $0x1c0] sm:$0xff]  ;;  %v3087_v6 = vcombine.low %v280_v58, %v288_v59  ;;  %v304_v8 = vld [vmem:[%s4129_s23 + $0x1c8] sm:$0xff]  ;;  %v3976_v48 = vld [vmem:[%s4092_s20 + $0x138] sm:$0xff]  }
  0x26   : > { %v3102_v7 = vcombine.high %v295_v3, %v303_v4  ;;  %v3104_v9 = vcombine.high %v296_v5, %v304_v8  ;;  %v311_v14 = vld [vmem:[%s4129_s23 + $0x200] sm:$0xff]  ;;  %v312_v16 = vld [vmem:[%s4129_s23 + $0x208] sm:$0xff]  ;;  %v3101_v19 = vcombine.low %v295_v3, %v303_v4  ;;  %v3103_v21 = vcombine.low %v296_v5, %v304_v8  ;;  %v258_v3 = vld [vmem:[%s4129_s23 + $0x58] sm:$0xff] }
  0x27   : > { %3406 = vmatpush3.bf16.msra.mxu0 %v3937_v22  ;;  %v319_v15 = vld [vmem:[%s4129_s23 + $0x240] sm:$0xff]  ;;  %v320_v17 = vld [vmem:[%s4129_s23 + $0x248] sm:$0xff]  ;;  %v265_v8 = vld [vmem:[%s4129_s23 + $0x90] sm:$0xff] }
  0x28   : > { %3470 = vmatpush3.bf16.msra.mxu1 %v3938_v23  ;;  %3407 = vmatprep.subr.bf16.mxu0 %v3939_v24  ;;  %v3963_v18 = vld [vmem:[%s4092_s20 + $0x160] sm:$0xff]   ;;  %v3118_v22 = vcombine.high %v311_v14, %v319_v15  ;;  %v3120_v24 = vcombine.high %v312_v16, %v320_v17  ;;  %v3969_v32 = vld [vmem:[%s4092_s20 + $0x1e8] sm:$0xff]   ;;  %v3117_v34 = vcombine.low %v311_v14, %v319_v15 }
  0x29   : > { %3471 = vmatprep.subr.bf16.mxu1 %v3940_v25  ;;  %v3964_v20 = vld [vmem:[%s4092_s20 + $0x120] sm:$0xff]   ;;  %v3970_v33 = vld [vmem:[%s4092_s20 + $0x1a8] sm:$0xff]  }
  0x2a   : > { %v3965_v23 = vld [vmem:[%s4092_s20 + $0x1e0] sm:$0xff]   ;;  %v344_v44 = vld [vmem:[%s4129_s23 + $0x308] sm:$0xff] }
  0x2b   : > { %3408 = vmatpush3.bf16.msra.mxu0 %v3941_v26  ;;  %v3966_v25 = vld [vmem:[%s4092_s20 + $0x1a0] sm:$0xff]   ;;  %v352_v45 = vld [vmem:[%s4129_s23 + $0x348] sm:$0xff] }
  0x2c   : > { %3472 = vmatpush3.bf16.msra.mxu1 %v3942_v27  ;;  %3409 = vmatprep.subr.bf16.mxu0 %v3943_v28  ;;  %v327_v26 = vld [vmem:[%s4129_s23 + $0x280] sm:$0xff]  ;;  %v3967_v28 = vld [vmem:[%s4092_s20 + $0x168] sm:$0xff]  }
  0x2d   : > { %3473 = vmatprep.subr.bf16.mxu1 %v3944_v29  ;;  %v335_v27 = vld [vmem:[%s4129_s23 + $0x2c0] sm:$0xff]  ;;  %v328_v29 = vld [vmem:[%s4129_s23 + $0x288] sm:$0xff] }
  0x2e   : > { %v3134_v36 = vcombine.high %v327_v26, %v335_v27  ;;  %v3133_v47 = vcombine.low %v327_v26, %v335_v27  ;;  %v3979_v56 = vld [vmem:[%s4092_s20 + $0x240] sm:$0xff]   ;;  %v360_v57 = vld [vmem:[%s4129_s23 + $0x388] sm:$0xff]  ;;  %v3987_v26 = vld [vmem:[%s4092_s20 + $0x250] sm:$0xff]  }
  0x2f   : > { %3410 = vmatpush3.bf16.msra.mxu0 %v3945_v30  ;;  %v336_v30 = vld [vmem:[%s4129_s23 + $0x2c8] sm:$0xff]  ;;  %v3981_v58 = vld [vmem:[%s4092_s20 + $0x2c0] sm:$0xff]   ;;  %v3989_v27 = vld [vmem:[%s4092_s20 + $0x2d0] sm:$0xff]  }
  0x30   : > { %3474 = vmatpush3.bf16.msra.mxu1 %v3946_v31  ;;  %3523 = vmatprep.subr.bf16.mxu0 %v3947_v40  ;;  %v3968_v31 = vld [vmem:[%s4092_s20 + $0x128] sm:$0xff]   ;;  %v3136_v37 = vcombine.high %v328_v29, %v336_v30  ;;  %v3973_v40 = vld [vmem:[%s4092_s20 + $0x1f0] sm:$0xff]   ;;  %v3982_v15 = vld [vmem:[%s4092_s20 + $0x280] sm:$0xff]  }
  0x31   : > { %3587 = vmatprep.subr.bf16.mxu1 %v3949_v42  ;;  %v351_v42 = vld [vmem:[%s4129_s23 + $0x340] sm:$0xff]  ;;  %v368_v59 = vld [vmem:[%s4129_s23 + $0x3c8] sm:$0xff] }
  0x32   : > { %2072 = vmatmul.mubr.bf16.vlgmr.msra.gmra.mrb[0].mxu0 %v3053_v35  ;;  %v3119_v35 = vcombine.low %v312_v16, %v320_v17  ;;  %v3167_v5 = vcombine.low %v360_v57, %v368_v59  ;;  %v3983_v17 = vld [vmem:[%s4092_s20 + $0x248] sm:$0xff]  }
  0x33   : > { %2169 = vmatmul.mubr.bf16.vlgmr.msra.gmra.mrb[0].mxu1 %v3055_v38  ;;  %3524 = vmatpush3.bf16.msra.mxu0 %v3948_v41  ;;  %v3971_v38 = vld [vmem:[%s4092_s20 + $0x170] sm:$0xff]   ;;  %v343_v41 = vld [vmem:[%s4129_s23 + $0x300] sm:$0xff] }
  0x34   : > { %3588 = vmatpush3.bf16.msra.mxu1 %v3950_v43  ;;  %2079 = vmatprep.mubr.bf16.mxu0 %v3070_v46  ;;  %v3974_v43 = vld [vmem:[%s4092_s20 + $0x1b0] sm:$0xff]   ;;  %v3975_v46 = vld [vmem:[%s4092_s20 + $0x178] sm:$0xff]  }
  0x35   : > { %2176 = vmatprep.mubr.bf16.mxu1 %v3072_v49  ;;  %3525 = vmatprep.subr.bf16.mxu0 %v3951_v50  ;;  %v3135_v49 = vcombine.low %v328_v29, %v336_v30  ;;  %v3150_v50 = vcombine.high %v343_v41, %v351_v42 }
  0x36   : > { %3589 = vmatprep.subr.bf16.mxu1 %v3953_v54  ;;  %v359_v54 = vld [vmem:[%s4129_s23 + $0x380] sm:$0xff] }
  0x37   : > { %3526 = vmatpush3.bf16.msra.mxu0 %v3952_v52  ;;  %v3152_v52 = vcombine.high %v344_v44, %v352_v45 }
  0x38   : > { %3590 = vmatpush3.bf16.msra.mxu1 %v3954_v55  ;;  %3527 = vmatprep.subr.bf16.mxu0 %v3955_v62  ;;  %v367_v55 = vld [vmem:[%s4129_s23 + $0x3c0] sm:$0xff] }
  0x39   : > { %3591 = vmatprep.subr.bf16.mxu1 %v3957_v0  ;;  %v3166_v62 = vcombine.high %v359_v54, %v367_v55  ;;  %v249_v0 = vld [vmem:[%s4129_s23 + $0x10] sm:$0xff]  ;;  %v3165_v4 = vcombine.low %v359_v54, %v367_v55  ;;  %v314_v54 = vld [vmem:[%s4129_s23 + $0x218] sm:$0xff] }
  0x3a   : > { %2080 = vmatmul.mubr.bf16.gmra.mrb[4].mxu0 %v3069_v51  ;;  %v3977_v51 = vld [vmem:[%s4092_s20 + $0x1f8] sm:$0xff]  }
  0x3b   : > { %2177 = vmatmul.mubr.bf16.gmra.mrb[4].mxu1 %v3071_v53  ;;  %2087 = vmatprep.mubr.bf16.mxu0 %v3086_v60  ;;  %v3978_v53 = vld [vmem:[%s4092_s20 + $0x1b8] sm:$0xff]   ;;  %v3149_v60 = vcombine.low %v343_v41, %v351_v42  ;;  %v3995_v42 = vld [vmem:[%s4092_s20 + $0x260] sm:$0xff]  }
  0x3c   : > { %2184 = vmatprep.mubr.bf16.mxu1 %v3088_v61  ;;  %3528 = vmatpush3.bf16.msra.mxu0 %v3956_v63  ;;  %v3151_v61 = vcombine.low %v344_v44, %v352_v45  ;;  %v3168_v63 = vcombine.high %v360_v57, %v368_v59  ;;  %v3994_v41 = vld [vmem:[%s4092_s20 + $0x298] sm:$0xff]   ;;  %v3997_v44 = vld [vmem:[%s4092_s20 + $0x2e0] sm:$0xff]   ;;  %v4002_v57 = vld [vmem:[%s4092_s20 + $0x2a8] sm:$0xff]  }
  0x3d   : > { %3592 = vmatpush3.bf16.msra.mxu1 %v3958_v1  ;;  %3529 = vmatprep.subr.bf16.mxu0 %v3959_v10  ;;  %v257_v1 = vld [vmem:[%s4129_s23 + $0x50] sm:$0xff]  ;;  %v322_v55 = vld [vmem:[%s4129_s23 + $0x258] sm:$0xff] }
  0x3e   : > { %3593 = vmatprep.subr.bf16.mxu1 %v3961_v12  ;;  %v3057_v10 = vcombine.low %v249_v0, %v257_v1  ;;  %v266_v12 = vld [vmem:[%s4129_s23 + $0x98] sm:$0xff] }
  0x40   : > { %3530 = vmatpush3.bf16.msra.mxu0 %v3960_v11  ;;  %v3980_v11 = vld [vmem:[%s4092_s20 + $0x200] sm:$0xff]  }
  0x41   : > { %3594 = vmatpush3.bf16.msra.mxu1 %v3962_v13  ;;  %3531 = vmatprep.subr.bf16.mxu0 %v3963_v18  ;;  %v274_v13 = vld [vmem:[%s4129_s23 + $0xd8] sm:$0xff] }
  0x42   : > { %2088 = vmatmul.mubr.bf16.gmra.mrb[8].mxu0 %v3085_v2  ;;  %3595 = vmatprep.subr.bf16.mxu1 %v3965_v23  ;;  %v250_v2 = vld [vmem:[%s4129_s23 + $0x18] sm:$0xff]  ;;  %v3076_v18 = vcombine.high %v266_v12, %v274_v13  ;;  %v289_v23 = vld [vmem:[%s4129_s23 + $0x150] sm:$0xff]  ;;  %v3075_v29 = vcombine.low %v266_v12, %v274_v13  ;;  %v4013_v12 = vld [vmem:[%s4092_s20 + $0x3c0] sm:$0xff]   ;;  %v3123_v13 = vcombine.low %v314_v54, %v322_v55 }
  0x43   : > { %2185 = vmatmul.mubr.bf16.gmra.mrb[8].mxu1 %v3087_v6  ;;  %2095 = vmatprep.mubr.bf16.mxu0 %v3102_v7  ;;  %v3058_v6 = vcombine.high %v249_v0, %v257_v1  ;;  %v3060_v7 = vcombine.high %v250_v2, %v258_v3  ;;  %v3059_v14 = vcombine.low %v250_v2, %v258_v3  ;;  %v4004_v0 = vld [vmem:[%s4092_s20 + $0x230] sm:$0xff]   ;;  %v4007_v2 = vld [vmem:[%s4092_s20 + $0x278] sm:$0xff]  }
  0x44   : > { %2192 = vmatprep.mubr.bf16.mxu1 %v3104_v9  ;;  %3532 = vmatpush3.bf16.msra.mxu0 %v3964_v20  ;;  %v273_v9 = vld [vmem:[%s4129_s23 + $0xd0] sm:$0xff]  ;;  %v3985_v20 = vld [vmem:[%s4092_s20 + $0x2c8] sm:$0xff]  }
  0x45   : > { %3596 = vmatpush3.bf16.msra.mxu1 %v3966_v25  ;;  %3533 = vmatprep.subr.bf16.mxu0 %v3967_v28  ;;  %v3074_v16 = vcombine.high %v265_v8, %v273_v9  ;;  %v290_v25 = vld [vmem:[%s4129_s23 + $0x158] sm:$0xff]  ;;  %v3073_v28 = vcombine.low %v265_v8, %v273_v9  ;;  %v4006_v1 = vld [vmem:[%s4092_s20 + $0x2b0] sm:$0xff]  }
  0x46   : > { %3597 = vmatprep.subr.bf16.mxu1 %v3969_v32  ;;  %v3988_v32 = vld [vmem:[%s4092_s20 + $0x210] sm:$0xff]   ;;  %v4008_v8 = vld [vmem:[%s4092_s20 + $0x238] sm:$0xff]  }
  0x47   : > { %v329_v3 = vld [vmem:[%s4129_s23 + $0x290] sm:$0xff]  ;;  %v4010_v9 = vld [vmem:[%s4092_s20 + $0x2b8] sm:$0xff]  }
  0x48   : > { %3534 = vmatpush3.bf16.msra.mxu0 %v3968_v31 }
  0x49   : > { %3598 = vmatpush3.bf16.msra.mxu1 %v3970_v33  ;;  %3535 = vmatprep.subr.bf16.mxu0 %v3971_v38  ;;  %v3990_v33 = vld [vmem:[%s4092_s20 + $0x290] sm:$0xff]   ;;  %v298_v38 = vld [vmem:[%s4129_s23 + $0x198] sm:$0xff] }
  0x4a   : > { %2096 = vmatmul.mubr.bf16.gmra.mrb[12].mxu0 %v3101_v19  ;;  %3599 = vmatprep.subr.bf16.mxu1 %v3973_v40  ;;  %v3984_v19 = vld [vmem:[%s4092_s20 + $0x208] sm:$0xff]   ;;  %v3992_v40 = vld [vmem:[%s4092_s20 + $0x218] sm:$0xff]  }
  0x4b   : > { %2193 = vmatmul.mubr.bf16.gmra.mrb[12].mxu1 %v3103_v21  ;;  %2103 = vmatprep.mubr.bf16.mxu0 %v3118_v22  ;;  %v3986_v21 = vld [vmem:[%s4092_s20 + $0x288] sm:$0xff]   ;;  %v281_v22 = vld [vmem:[%s4129_s23 + $0x110] sm:$0xff] }
  0x4c   : > { %2200 = vmatprep.mubr.bf16.mxu1 %v3120_v24  ;;  %3536 = vmatpush3.bf16.msra.mxu0 %v3972_v39  ;;  %v282_v24 = vld [vmem:[%s4129_s23 + $0x118] sm:$0xff]  ;;  %v3090_v30 = vcombine.high %v281_v22, %v289_v23 }
  0x4d   : > { %3600 = vmatpush3.bf16.msra.mxu1 %v3974_v43  ;;  %3537 = vmatprep.subr.bf16.mxu0 %v3975_v46  ;;  %v3092_v31 = vcombine.high %v282_v24, %v290_v25  ;;  %v306_v39 = vld [vmem:[%s4129_s23 + $0x1d8] sm:$0xff]  ;;  %v3089_v43 = vcombine.low %v281_v22, %v289_v23  ;;  %v3091_v45 = vcombine.low %v282_v24, %v290_v25  ;;  %v361_v24 = vld [vmem:[%s4129_s23 + $0x390] sm:$0xff] }
  0x4e   : > { %3601 = vmatprep.subr.bf16.mxu1 %v3977_v51  ;;  %v313_v51 = vld [vmem:[%s4129_s23 + $0x210] sm:$0xff] }
  0x4f   : > { %v369_v25 = vld [vmem:[%s4129_s23 + $0x3d0] sm:$0xff] }
  0x50   : > { %3538 = vmatpush3.bf16.msra.mxu0 %v3976_v48  ;;  %v3108_v48 = vcombine.high %v298_v38, %v306_v39 }
  0x51   : > { %3602 = vmatpush3.bf16.msra.mxu1 %v3978_v53  ;;  %3651 = vmatprep.subr.bf16.mxu0 %v3979_v56  ;;  %v321_v53 = vld [vmem:[%s4129_s23 + $0x250] sm:$0xff]  ;;  %v4000_v56 = vld [vmem:[%s4092_s20 + $0x228] sm:$0xff]  }
  0x52   : > { %2104 = vmatmul.mubr.bf16.gmra.mrb[16].mxu0 %v3117_v34  ;;  %3715 = vmatprep.subr.bf16.mxu1 %v3981_v58  ;;  %v3991_v34 = vld [vmem:[%s4092_s20 + $0x258] sm:$0xff]   ;;  %v4003_v58 = vld [vmem:[%s4092_s20 + $0x270] sm:$0xff]  }
  0x53   : > { %2201 = vmatmul.mubr.bf16.gmra.mrb[16].mxu1 %v3119_v35  ;;  %2111 = vmatprep.mubr.bf16.mxu0 %v3134_v36  ;;  %v297_v35 = vld [vmem:[%s4129_s23 + $0x190] sm:$0xff] }
  0x54   : > { %2208 = vmatprep.mubr.bf16.mxu1 %v3136_v37  ;;  %v305_v36 = vld [vmem:[%s4129_s23 + $0x1d0] sm:$0xff]  ;;  %v3993_v37 = vld [vmem:[%s4092_s20 + $0x2d8] sm:$0xff]  }
  0x55   : > { %v3106_v46 = vcombine.high %v297_v35, %v305_v36  ;;  %v3105_v59 = vcombine.low %v297_v35, %v305_v36  ;;  %v260_v35 = vld [vmem:[%s4129_s23 + $0x68] sm:$0xff]  ;;  %v3169_v36 = vcombine.low %v361_v24, %v369_v25 }
  0x5a   : > { %2112 = vmatmul.mubr.bf16.gmra.mrb[20].mxu0 %v3133_v47  ;;  %v3996_v47 = vld [vmem:[%s4092_s20 + $0x220] sm:$0xff]  }
  0x5b   : > { %2209 = vmatmul.mubr.bf16.gmra.mrb[20].mxu1 %v3135_v49  ;;  %2119 = vmatprep.mubr.bf16.mxu0 %v3150_v50  ;;  %v3998_v49 = vld [vmem:[%s4092_s20 + $0x2a0] sm:$0xff]   ;;  %v3999_v50 = vld [vmem:[%s4092_s20 + $0x268] sm:$0xff]  }
  0x5c   : > { %2216 = vmatprep.mubr.bf16.mxu1 %v3152_v52  ;;  %v4001_v52 = vld [vmem:[%s4092_s20 + $0x2e8] sm:$0xff]  }
  0x62   : > { %2120 = vmatmul.mubr.bf16.gmra.mrb[24].mxu0 %v3149_v60  ;;  %v4005_v60 = vld [vmem:[%s4092_s20 + $0x2f0] sm:$0xff]  }
  0x63   : > { %2217 = vmatmul.mubr.bf16.gmra.mrb[24].mxu1 %v3151_v61  ;;  %2127 = vmatprep.mubr.bf16.mxu0 %v3166_v62  ;;  %v3107_v61 = vcombine.low %v298_v38, %v306_v39  ;;  %v3122_v62 = vcombine.high %v313_v51, %v321_v53 }
  0x64   : > { %2224 = vmatprep.mubr.bf16.mxu1 %v3168_v63  ;;  %v3124_v63 = vcombine.high %v314_v54, %v322_v55  ;;  %v283_v54 = vld [vmem:[%s4129_s23 + $0x120] sm:$0xff] }
  0x65   : > { %v291_v55 = vld [vmem:[%s4129_s23 + $0x160] sm:$0xff] }
  0x6a   : > { %2128 = vmatmul.mubr.bf16.gmra.mrb[28].mxu0 %v3165_v4  ;;  %v337_v4 = vld [vmem:[%s4129_s23 + $0x2d0] sm:$0xff] }
  0x6b   : > { %2225 = vmatmul.mubr.bf16.gmra.mrb[28].mxu1 %v3167_v5  ;;  %2265 = vmatprep.mubr.bf16.mxu0 %v3058_v6  ;;  %v4009_v5 = vld [vmem:[%s4092_s20 + $0x2f8] sm:$0xff]  }
  0x6c   : > { %2362 = vmatprep.mubr.bf16.mxu1 %v3060_v7  ;;  %v330_v6 = vld [vmem:[%s4129_s23 + $0x298] sm:$0xff] }
  0x6d   : > { %v338_v7 = vld [vmem:[%s4129_s23 + $0x2d8] sm:$0xff] }
  0x72   : > { %2266 = vmatmul.mubr.bf16.vlgmr.msra.gmra.mrb[32].mxu0 %v3057_v10  ;;  %v4011_v10 = vld [vmem:[%s4092_s20 + $0x340] sm:$0xff]  }
  0x73   : > { %2363 = vmatmul.mubr.bf16.vlgmr.msra.gmra.mrb[32].mxu1 %v3059_v14  ;;  %3652 = vmatpush3.bf16.msra.mxu0 %v3980_v11  ;;  %v3121_v11 = vcombine.low %v313_v51, %v321_v53  ;;  %v3138_v14 = vcombine.high %v329_v3, %v337_v4  ;;  %v4017_v51 = vld [vmem:[%s4092_s20 + $0x3c8] sm:$0xff]  }
  0x74   : > { %3716 = vmatpush3.bf16.msra.mxu1 %v3982_v15  ;;  %2273 = vmatprep.mubr.bf16.mxu0 %v3074_v16  ;;  %v3140_v15 = vcombine.high %v330_v6, %v338_v7  ;;  %v345_v16 = vld [vmem:[%s4129_s23 + $0x310] sm:$0xff]  ;;  %v4018_v53 = vld [vmem:[%s4092_s20 + $0x388] sm:$0xff]  }
  0x75   : > { %2370 = vmatprep.mubr.bf16.mxu1 %v3076_v18  ;;  %3653 = vmatprep.subr.bf16.mxu0 %v3983_v17  ;;  %v353_v17 = vld [vmem:[%s4129_s23 + $0x350] sm:$0xff]  ;;  %v346_v18 = vld [vmem:[%s4129_s23 + $0x318] sm:$0xff] }
  0x76   : > { %3717 = vmatprep.subr.bf16.mxu1 %v3985_v20  ;;  %v3137_v20 = vcombine.low %v329_v3, %v337_v4  ;;  %v3154_v22 = vcombine.high %v345_v16, %v353_v17  ;;  %v4025_v3 = vld [vmem:[%s4092_s20 + $0x3d8] sm:$0xff]   ;;  %v299_v4 = vld [vmem:[%s4129_s23 + $0x1a0] sm:$0xff] }
  0x77   : > { %3654 = vmatpush3.bf16.msra.mxu0 %v3984_v19  ;;  %v354_v19 = vld [vmem:[%s4129_s23 + $0x358] sm:$0xff] }
  0x78   : > { %3718 = vmatpush3.bf16.msra.mxu1 %v3986_v21  ;;  %3655 = vmatprep.subr.bf16.mxu0 %v3987_v26  ;;  %v3139_v21 = vcombine.low %v330_v6, %v338_v7  ;;  %v3156_v23 = vcombine.high %v346_v18, %v354_v19  ;;  %v362_v26 = vld [vmem:[%s4129_s23 + $0x398] sm:$0xff]  ;;  %v300_v6 = vld [vmem:[%s4129_s23 + $0x1a8] sm:$0xff] }
  0x79   : > { %3719 = vmatprep.subr.bf16.mxu1 %v3989_v27  ;;  %v370_v27 = vld [vmem:[%s4129_s23 + $0x3d8] sm:$0xff] }
  0x7a   : > { %2274 = vmatmul.mubr.bf16.gmra.mrb[36].mxu0 %v3073_v28  ;;  %v3153_v28 = vcombine.low %v345_v16, %v353_v17  ;;  %v4024_v7 = vld [vmem:[%s4092_s20 + $0x318] sm:$0xff]   ;;  %v4028_v16 = vld [vmem:[%s4092_s20 + $0x320] sm:$0xff]  }
  0x7b   : > { %2371 = vmatmul.mubr.bf16.gmra.mrb[36].mxu1 %v3075_v29  ;;  %2281 = vmatprep.mubr.bf16.mxu0 %v3090_v30  ;;  %v3155_v29 = vcombine.low %v346_v18, %v354_v19  ;;  %v3170_v30 = vcombine.high %v361_v24, %v369_v25  ;;  %v4030_v17 = vld [vmem:[%s4092_s20 + $0x3a0] sm:$0xff]   ;;  %v4031_v18 = vld [vmem:[%s4092_s20 + $0x368] sm:$0xff]  }
  0x7c   : > { %2378 = vmatprep.mubr.bf16.mxu1 %v3092_v31  ;;  %3656 = vmatpush3.bf16.msra.mxu0 %v3988_v32  ;;  %v3172_v31 = vcombine.high %v362_v26, %v370_v27  ;;  %v251_v32 = vld [vmem:[%s4129_s23 + $0x20] sm:$0xff]  ;;  %v4033_v19 = vld [vmem:[%s4092_s20 + $0x3e8] sm:$0xff]  }
  0x7d   : > { %3720 = vmatpush3.bf16.msra.mxu1 %v3990_v33  ;;  %3657 = vmatprep.subr.bf16.mxu0 %v3991_v34  ;;  %v259_v33 = vld [vmem:[%s4129_s23 + $0x60] sm:$0xff]  ;;  %v252_v34 = vld [vmem:[%s4129_s23 + $0x28] sm:$0xff] }
  0x7e   : > { %3721 = vmatprep.subr.bf16.mxu1 %v3993_v37  ;;  %v3171_v37 = vcombine.low %v362_v26, %v370_v27  ;;  %v3062_v38 = vcombine.high %v251_v32, %v259_v33  ;;  %v3064_v39 = vcombine.high %v252_v34, %v260_v35  ;;  %v324_v24 = vld [vmem:[%s4129_s23 + $0x268] sm:$0xff]  ;;  %v4035_v26 = vld [vmem:[%s4092_s20 + $0x370] sm:$0xff]  }
  0x7f   : > { %v4034_v25 = vld [vmem:[%s4092_s20 + $0x3a8] sm:$0xff]  }
  0x80   : > { %3658 = vmatpush3.bf16.msra.mxu0 %v3992_v40  ;;  %v267_v40 = vld [vmem:[%s4129_s23 + $0xa0] sm:$0xff] }
  0x81   : > { %3722 = vmatpush3.bf16.msra.mxu1 %v3994_v41  ;;  %3659 = vmatprep.subr.bf16.mxu0 %v3995_v42  ;;  %v275_v41 = vld [vmem:[%s4129_s23 + $0xe0] sm:$0xff]  ;;  %v3061_v42 = vcombine.low %v251_v32, %v259_v33  ;;  %v4036_v32 = vld [vmem:[%s4092_s20 + $0x330] sm:$0xff]  }
  0x82   : > { %2282 = vmatmul.mubr.bf16.gmra.mrb[40].mxu0 %v3089_v43  ;;  %3723 = vmatprep.subr.bf16.mxu1 %v3997_v44  ;;  %v268_v43 = vld [vmem:[%s4129_s23 + $0xa8] sm:$0xff]  ;;  %v4038_v33 = vld [vmem:[%s4092_s20 + $0x3b0] sm:$0xff]  }
  0x83   : > { %2379 = vmatmul.mubr.bf16.gmra.mrb[40].mxu1 %v3091_v45  ;;  %2289 = vmatprep.mubr.bf16.mxu0 %v3106_v46  ;;  %v276_v44 = vld [vmem:[%s4129_s23 + $0xe8] sm:$0xff]  ;;  %v3063_v45 = vcombine.low %v252_v34, %v260_v35  ;;  %v4012_v46 = vld [vmem:[%s4092_s20 + $0x300] sm:$0xff]   ;;  %v4039_v34 = vld [vmem:[%s4092_s20 + $0x378] sm:$0xff]  }
  0x84   : > { %2386 = vmatprep.mubr.bf16.mxu1 %v3108_v48  ;;  %3660 = vmatpush3.bf16.msra.mxu0 %v3996_v47  ;;  %v4014_v47 = vld [vmem:[%s4092_s20 + $0x380] sm:$0xff]   ;;  %v3078_v48 = vcombine.high %v267_v40, %v275_v41  ;;  %v4041_v35 = vld [vmem:[%s4092_s20 + $0x3f8] sm:$0xff]  }
  0x85   : > { %3724 = vmatpush3.bf16.msra.mxu1 %v3998_v49  ;;  %3661 = vmatprep.subr.bf16.mxu0 %v3999_v50  ;;  %v3080_v49 = vcombine.high %v268_v43, %v276_v44  ;;  %v4015_v50 = vld [vmem:[%s4092_s20 + $0x348] sm:$0xff]  }
  0x86   : > { %3725 = vmatprep.subr.bf16.mxu1 %v4001_v52  ;;  %v4016_v52 = vld [vmem:[%s4092_s20 + $0x308] sm:$0xff]  }
  0x88   : > { %3662 = vmatpush3.bf16.msra.mxu0 %v4000_v56  ;;  %v4019_v56 = vld [vmem:[%s4092_s20 + $0x350] sm:$0xff]  }
  0x89   : > { %3726 = vmatpush3.bf16.msra.mxu1 %v4002_v57  ;;  %3663 = vmatprep.subr.bf16.mxu0 %v4003_v58  ;;  %v284_v57 = vld [vmem:[%s4129_s23 + $0x128] sm:$0xff] }
  0x8a   : > { %2290 = vmatmul.mubr.bf16.gmra.mrb[44].mxu0 %v3105_v59  ;;  %3727 = vmatprep.subr.bf16.mxu1 %v4005_v60  ;;  %v292_v58 = vld [vmem:[%s4129_s23 + $0x168] sm:$0xff]  ;;  %v4021_v59 = vld [vmem:[%s4092_s20 + $0x3d0] sm:$0xff]   ;;  %v3077_v60 = vcombine.low %v267_v40, %v275_v41  ;;  %v4042_v41 = vld [vmem:[%s4092_s20 + $0x3b8] sm:$0xff]  }
  0x8b   : > { %2387 = vmatmul.mubr.bf16.gmra.mrb[44].mxu1 %v3107_v61  ;;  %2297 = vmatprep.mubr.bf16.mxu0 %v3122_v62  ;;  %v3079_v61 = vcombine.low %v268_v43, %v276_v44  ;;  %v3094_v62 = vcombine.high %v283_v54, %v291_v55  ;;  %v340_v40 = vld [vmem:[%s4129_s23 + $0x2e8] sm:$0xff] }
  0x8c   : > { %2394 = vmatprep.mubr.bf16.mxu1 %v3124_v63  ;;  %3664 = vmatpush3.bf16.msra.mxu0 %v4004_v0  ;;  %v3096_v63 = vcombine.high %v284_v57, %v292_v58  ;;  %v4020_v0 = vld [vmem:[%s4092_s20 + $0x310] sm:$0xff]  }
  0x8d   : > { %3728 = vmatpush3.bf16.msra.mxu1 %v4006_v1  ;;  %3665 = vmatprep.subr.bf16.mxu0 %v4007_v2  ;;  %v4022_v1 = vld [vmem:[%s4092_s20 + $0x390] sm:$0xff]   ;;  %v4023_v2 = vld [vmem:[%s4092_s20 + $0x358] sm:$0xff]  }
  0x8e   : > { %3729 = vmatprep.subr.bf16.mxu1 %v4009_v5  ;;  %v307_v5 = vld [vmem:[%s4129_s23 + $0x1e0] sm:$0xff] }
  0x8f   : > { %v3109_v27 = vcombine.low %v299_v4, %v307_v5 }
  0x90   : > { %3666 = vmatpush3.bf16.msra.mxu0 %v4008_v8  ;;  %v308_v8 = vld [vmem:[%s4129_s23 + $0x1e8] sm:$0xff] }
  0x91   : > { %3730 = vmatpush3.bf16.msra.mxu1 %v4010_v9  ;;  %3779 = vmatprep.subr.bf16.mxu0 %v4011_v10  ;;  %v4026_v9 = vld [vmem:[%s4092_s20 + $0x398] sm:$0xff]   ;;  %v4027_v10 = vld [vmem:[%s4092_s20 + $0x360] sm:$0xff]  }
  0x92   : > { %2298 = vmatmul.mubr.bf16.gmra.mrb[48].mxu0 %v3121_v11  ;;  %3843 = vmatprep.subr.bf16.mxu1 %v4013_v12  ;;  %v3093_v11 = vcombine.low %v283_v54, %v291_v55  ;;  %v4029_v12 = vld [vmem:[%s4092_s20 + $0x3e0] sm:$0xff]  }
  0x93   : > { %2395 = vmatmul.mubr.bf16.gmra.mrb[48].mxu1 %v3123_v13  ;;  %2305 = vmatprep.mubr.bf16.mxu0 %v3138_v14  ;;  %v3095_v13 = vcombine.low %v284_v57, %v292_v58  ;;  %v3110_v14 = vcombine.high %v299_v4, %v307_v5  ;;  %v363_v54 = vld [vmem:[%s4129_s23 + $0x3a0] sm:$0xff]  ;;  %v372_v57 = vld [vmem:[%s4129_s23 + $0x3e8] sm:$0xff] }
  0x94   : > { %2402 = vmatprep.mubr.bf16.mxu1 %v3140_v15  ;;  %v3112_v15 = vcombine.high %v300_v6, %v308_v8  ;;  %v371_v55 = vld [vmem:[%s4129_s23 + $0x3e0] sm:$0xff] }
  0x9a   : > { %2306 = vmatmul.mubr.bf16.gmra.mrb[52].mxu0 %v3137_v20  ;;  %v315_v20 = vld [vmem:[%s4129_s23 + $0x220] sm:$0xff] }
  0x9b   : > { %2403 = vmatmul.mubr.bf16.gmra.mrb[52].mxu1 %v3139_v21  ;;  %2313 = vmatprep.mubr.bf16.mxu0 %v3154_v22  ;;  %v323_v21 = vld [vmem:[%s4129_s23 + $0x260] sm:$0xff]  ;;  %v316_v22 = vld [vmem:[%s4129_s23 + $0x228] sm:$0xff] }
  0x9c   : > { %2410 = vmatprep.mubr.bf16.mxu1 %v3156_v23  ;;  %v4032_v23 = vld [vmem:[%s4092_s20 + $0x328] sm:$0xff]   ;;  %v3127_v43 = vcombine.low %v316_v22, %v324_v24 }
  0xa2   : > { %2314 = vmatmul.mubr.bf16.gmra.mrb[56].mxu0 %v3153_v28  ;;  %v4037_v28 = vld [vmem:[%s4092_s20 + $0x3f0] sm:$0xff]  }
  0xa3   : > { %2411 = vmatmul.mubr.bf16.gmra.mrb[56].mxu1 %v3155_v29  ;;  %2321 = vmatprep.mubr.bf16.mxu0 %v3170_v30  ;;  %v3111_v29 = vcombine.low %v300_v6, %v308_v8  ;;  %v3126_v30 = vcombine.high %v315_v20, %v323_v21  ;;  %v269_v6 = vld [vmem:[%s4129_s23 + $0xb0] sm:$0xff]  ;;  %v270_v8 = vld [vmem:[%s4129_s23 + $0xb8] sm:$0xff] }
  0xa4   : > { %2418 = vmatprep.mubr.bf16.mxu1 %v3172_v31  ;;  %v3128_v31 = vcombine.high %v316_v22, %v324_v24  ;;  %v301_v22 = vld [vmem:[%s4129_s23 + $0x1b0] sm:$0xff]  ;;  %v302_v24 = vld [vmem:[%s4129_s23 + $0x1b8] sm:$0xff] }
  0xaa   : > { %2322 = vmatmul.mubr.bf16.gmra.mrb[60].mxu0 %v3169_v36  ;;  %v331_v36 = vld [vmem:[%s4129_s23 + $0x2a0] sm:$0xff] }
  0xab   : > { %2419 = vmatmul.mubr.bf16.gmra.mrb[60].mxu1 %v3171_v37  ;;  %2459 = vmatprep.mubr.bf16.mxu0 %v3062_v38  ;;  %v339_v37 = vld [vmem:[%s4129_s23 + $0x2e0] sm:$0xff]  ;;  %v4040_v38 = vld [vmem:[%s4092_s20 + $0x338] sm:$0xff]  }
  0xac   : > { %2556 = vmatprep.mubr.bf16.mxu1 %v3064_v39  ;;  %v332_v39 = vld [vmem:[%s4129_s23 + $0x2a8] sm:$0xff]  ;;  %v3142_v44 = vcombine.high %v331_v36, %v339_v37 }
  0xb2   : > { %2460 = vmatmul.mubr.bf16.vlgmr.msra.gmra.mrb[64].mxu0 %v3061_v42  ;;  %v3125_v42 = vcombine.low %v315_v20, %v323_v21 }
  0xb3   : > { %2557 = vmatmul.mubr.bf16.vlgmr.msra.gmra.mrb[64].mxu1 %v3063_v45  ;;  %3780 = vmatpush3.bf16.msra.mxu0 %v4012_v46  ;;  %v3144_v45 = vcombine.high %v332_v39, %v340_v40  ;;  %v347_v46 = vld [vmem:[%s4129_s23 + $0x320] sm:$0xff] }
  0xb4   : > { %3844 = vmatpush3.bf16.msra.mxu1 %v4014_v47  ;;  %2467 = vmatprep.mubr.bf16.mxu0 %v3078_v48  ;;  %v355_v47 = vld [vmem:[%s4129_s23 + $0x360] sm:$0xff]  ;;  %v348_v48 = vld [vmem:[%s4129_s23 + $0x328] sm:$0xff] }
  0xb5   : > { %2564 = vmatprep.mubr.bf16.mxu1 %v3080_v49  ;;  %3781 = vmatprep.subr.bf16.mxu0 %v4015_v50  ;;  %v356_v49 = vld [vmem:[%s4129_s23 + $0x368] sm:$0xff]  ;;  %v3141_v50 = vcombine.low %v331_v36, %v339_v37  ;;  %v3157_v58 = vcombine.low %v347_v46, %v355_v47 }
  0xb6   : > { %3845 = vmatprep.subr.bf16.mxu1 %v4017_v51  ;;  %v3143_v51 = vcombine.low %v332_v39, %v340_v40 }
  0xb7   : > { %3782 = vmatpush3.bf16.msra.mxu0 %v4016_v52  ;;  %v3158_v52 = vcombine.high %v347_v46, %v355_v47 }
  0xb8   : > { %3846 = vmatpush3.bf16.msra.mxu1 %v4018_v53  ;;  %3783 = vmatprep.subr.bf16.mxu0 %v4019_v56  ;;  %v3160_v53 = vcombine.high %v348_v48, %v356_v49  ;;  %v364_v56 = vld [vmem:[%s4129_s23 + $0x3a8] sm:$0xff] }
  0xb9   : > { %3847 = vmatprep.subr.bf16.mxu1 %v4021_v59  ;;  %v3159_v59 = vcombine.low %v348_v48, %v356_v49 }
  0xba   : > { %2468 = vmatmul.mubr.bf16.gmra.mrb[68].mxu0 %v3077_v60  ;;  %v3174_v60 = vcombine.high %v363_v54, %v371_v55 }
  0xbb   : > { %2565 = vmatmul.mubr.bf16.gmra.mrb[68].mxu1 %v3079_v61  ;;  %2475 = vmatprep.mubr.bf16.mxu0 %v3094_v62  ;;  %v3176_v61 = vcombine.high %v364_v56, %v372_v57  ;;  %v253_v62 = vld [vmem:[%s4129_s23 + $0x30] sm:$0xff] }
  0xbc   : > { %2572 = vmatprep.mubr.bf16.mxu1 %v3096_v63  ;;  %3784 = vmatpush3.bf16.msra.mxu0 %v4020_v0  ;;  %v261_v63 = vld [vmem:[%s4129_s23 + $0x70] sm:$0xff]  ;;  %v254_v0 = vld [vmem:[%s4129_s23 + $0x38] sm:$0xff] }
  0xbd   : > { %3848 = vmatpush3.bf16.msra.mxu1 %v4022_v1  ;;  %3785 = vmatprep.subr.bf16.mxu0 %v4023_v2  ;;  %v262_v1 = vld [vmem:[%s4129_s23 + $0x78] sm:$0xff]  ;;  %v3173_v2 = vcombine.low %v363_v54, %v371_v55  ;;  %v3066_v4 = vcombine.high %v253_v62, %v261_v63 }
  0xbe   : > { %3849 = vmatprep.subr.bf16.mxu1 %v4025_v3  ;;  %v3175_v3 = vcombine.low %v364_v56, %v372_v57  ;;  %v3068_v5 = vcombine.high %v254_v0, %v262_v1  ;;  %v334_v55 = vld [vmem:[%s4129_s23 + $0x2b8] sm:$0xff] }
  0xbf   : > { %v342_v56 = vld [vmem:[%s4129_s23 + $0x2f8] sm:$0xff] }
  0xc0   : > { %3786 = vmatpush3.bf16.msra.mxu0 %v4024_v7  ;;  %v277_v7 = vld [vmem:[%s4129_s23 + $0xf0] sm:$0xff] }
  0xc1   : > { %3850 = vmatpush3.bf16.msra.mxu1 %v4026_v9  ;;  %3787 = vmatprep.subr.bf16.mxu0 %v4027_v10  ;;  %v278_v9 = vld [vmem:[%s4129_s23 + $0xf8] sm:$0xff]  ;;  %v3065_v10 = vcombine.low %v253_v62, %v261_v63 }
  0xc2   : > { %2476 = vmatmul.mubr.bf16.gmra.mrb[72].mxu0 %v3093_v11  ;;  %3851 = vmatprep.subr.bf16.mxu1 %v4029_v12  ;;  %v3067_v11 = vcombine.low %v254_v0, %v262_v1  ;;  %v3082_v12 = vcombine.high %v269_v6, %v277_v7 }
  0xc3   : > { %2573 = vmatmul.mubr.bf16.gmra.mrb[72].mxu1 %v3095_v13  ;;  %2483 = vmatprep.mubr.bf16.mxu0 %v3110_v14  ;;  %v3084_v13 = vcombine.high %v270_v8, %v278_v9  ;;  %v285_v14 = vld [vmem:[%s4129_s23 + $0x130] sm:$0xff] }
  0xc4   : > { %2580 = vmatprep.mubr.bf16.mxu1 %v3112_v15  ;;  %3788 = vmatpush3.bf16.msra.mxu0 %v4028_v16  ;;  %v293_v15 = vld [vmem:[%s4129_s23 + $0x170] sm:$0xff]  ;;  %v286_v16 = vld [vmem:[%s4129_s23 + $0x138] sm:$0xff] }
  0xc5   : > { %3852 = vmatpush3.bf16.msra.mxu1 %v4030_v17  ;;  %3789 = vmatprep.subr.bf16.mxu0 %v4031_v18  ;;  %v294_v17 = vld [vmem:[%s4129_s23 + $0x178] sm:$0xff]  ;;  %v3081_v18 = vcombine.low %v269_v6, %v277_v7  ;;  %v3098_v20 = vcombine.high %v285_v14, %v293_v15 }
  0xc6   : > { %3853 = vmatprep.subr.bf16.mxu1 %v4033_v19  ;;  %v3083_v19 = vcombine.low %v270_v8, %v278_v9  ;;  %v3100_v21 = vcombine.high %v286_v16, %v294_v17 }
  0xc8   : > { %3790 = vmatpush3.bf16.msra.mxu0 %v4032_v23  ;;  %v309_v23 = vld [vmem:[%s4129_s23 + $0x1f0] sm:$0xff] }
  0xc9   : > { %3854 = vmatpush3.bf16.msra.mxu1 %v4034_v25  ;;  %3791 = vmatprep.subr.bf16.mxu0 %v4035_v26  ;;  %v310_v25 = vld [vmem:[%s4129_s23 + $0x1f8] sm:$0xff]  ;;  %v3097_v26 = vcombine.low %v285_v14, %v293_v15  ;;  %v3113_v37 = vcombine.low %v301_v22, %v309_v23 }
  0xca   : > { %2484 = vmatmul.mubr.bf16.gmra.mrb[76].mxu0 %v3109_v27  ;;  %3855 = vmatprep.subr.bf16.mxu1 %v4037_v28  ;;  %v3099_v27 = vcombine.low %v286_v16, %v294_v17  ;;  %v3114_v28 = vcombine.high %v301_v22, %v309_v23  ;;  %v358_v14 = vld [vmem:[%s4129_s23 + $0x378] sm:$0xff] }
  0xcb   : > { %2581 = vmatmul.mubr.bf16.gmra.mrb[76].mxu1 %v3111_v29  ;;  %2491 = vmatprep.mubr.bf16.mxu0 %v3126_v30  ;;  %v3116_v29 = vcombine.high %v302_v24, %v310_v25  ;;  %v317_v30 = vld [vmem:[%s4129_s23 + $0x230] sm:$0xff] }
  0xcc   : > { %2588 = vmatprep.mubr.bf16.mxu1 %v3128_v31  ;;  %3792 = vmatpush3.bf16.msra.mxu0 %v4036_v32  ;;  %v325_v31 = vld [vmem:[%s4129_s23 + $0x270] sm:$0xff] }
  0xcd   : > { %3856 = vmatpush3.bf16.msra.mxu1 %v4038_v33  ;;  %3793 = vmatprep.subr.bf16.mxu0 %v4039_v34  ;;  %v318_v33 = vld [vmem:[%s4129_s23 + $0x238] sm:$0xff] }
  0xce   : > { %3857 = vmatprep.subr.bf16.mxu1 %v4041_v35  ;;  %v326_v34 = vld [vmem:[%s4129_s23 + $0x278] sm:$0xff] }
  0xcf   : > { %v3132_v46 = vcombine.high %v318_v33, %v326_v34  ;;  %v3131_v63 = vcombine.low %v318_v33, %v326_v34  ;;  %v373_v33 = vld [vmem:[%s4129_s23 + $0x3f0] sm:$0xff] }
  0xd0   : > { %3794 = vmatpush3.bf16.msra.mxu0 %v4040_v38 }
  0xd1   : > { %3858 = vmatpush3.bf16.msra.mxu1 %v4042_v41  ;;  %v3115_v41 = vcombine.low %v302_v24, %v310_v25 }
  0xd2   : > { %2492 = vmatmul.mubr.bf16.gmra.mrb[80].mxu0 %v3125_v42  ;;  %v3130_v42 = vcombine.high %v317_v30, %v325_v31 }
  0xd3   : > { %2589 = vmatmul.mubr.bf16.gmra.mrb[80].mxu1 %v3127_v43  ;;  %2499 = vmatprep.mubr.bf16.mxu0 %v3142_v44 }
  0xd4   : > { %2596 = vmatprep.mubr.bf16.mxu1 %v3144_v45 }
  0xda   : > { %2500 = vmatmul.mubr.bf16.gmra.mrb[84].mxu0 %v3141_v50 }
  0xdb   : > { %2597 = vmatmul.mubr.bf16.gmra.mrb[84].mxu1 %v3143_v51  ;;  %2507 = vmatprep.mubr.bf16.mxu0 %v3158_v52  ;;  %v333_v52 = vld [vmem:[%s4129_s23 + $0x2b0] sm:$0xff] }
  0xdc   : > { %2604 = vmatprep.mubr.bf16.mxu1 %v3160_v53  ;;  %v341_v53 = vld [vmem:[%s4129_s23 + $0x2f0] sm:$0xff] }
  0xdd   : > { %v3146_v0 = vcombine.high %v333_v52, %v341_v53  ;;  %v3145_v17 = vcombine.low %v333_v52, %v341_v53 }
  0xe2   : > { %2508 = vmatmul.mubr.bf16.gmra.mrb[88].mxu0 %v3157_v58 }
  0xe3   : > { %2605 = vmatmul.mubr.bf16.gmra.mrb[88].mxu1 %v3159_v59  ;;  %2515 = vmatprep.mubr.bf16.mxu0 %v3174_v60  ;;  %v3129_v59 = vcombine.low %v317_v30, %v325_v31 }
  0xe4   : > { %2612 = vmatprep.mubr.bf16.mxu1 %v3176_v61 }
  0xea   : > { %2516 = vmatmul.mubr.bf16.gmra.mrb[92].mxu0 %v3173_v2 }
  0xeb   : > { %2613 = vmatmul.mubr.bf16.gmra.mrb[92].mxu1 %v3175_v3  ;;  %2653 = vmatprep.mubr.bf16.mxu0 %v3066_v4  ;;  %v3148_v4 = vcombine.high %v334_v55, %v342_v56 }
  0xec   : > { %2750 = vmatprep.mubr.bf16.mxu1 %v3068_v5 }
  0xf2   : > { %2654 = vmatmul.mubr.bf16.vlgmr.msra.gmra.mrb[96].mxu0 %v3065_v10  ;;  %v349_v10 = vld [vmem:[%s4129_s23 + $0x330] sm:$0xff] }
  0xf3   : > { %2751 = vmatmul.mubr.bf16.vlgmr.msra.gmra.mrb[96].mxu1 %v3067_v11  ;;  %2661 = vmatprep.mubr.bf16.mxu0 %v3082_v12  ;;  %v357_v11 = vld [vmem:[%s4129_s23 + $0x370] sm:$0xff] }
  0xf4   : > { %2758 = vmatprep.mubr.bf16.mxu1 %v3084_v13  ;;  %v350_v13 = vld [vmem:[%s4129_s23 + $0x338] sm:$0xff]  ;;  %v3162_v22 = vcombine.high %v349_v10, %v357_v11 }
  0xfa   : > { %2662 = vmatmul.mubr.bf16.gmra.mrb[100].mxu0 %v3081_v18 }
  0xfb   : > { %2759 = vmatmul.mubr.bf16.gmra.mrb[100].mxu1 %v3083_v19  ;;  %2669 = vmatprep.mubr.bf16.mxu0 %v3098_v20 }
  0xfc   : > { %2766 = vmatprep.mubr.bf16.mxu1 %v3100_v21  ;;  %v3147_v21 = vcombine.low %v334_v55, %v342_v56 }
 0x102   : > { %2670 = vmatmul.mubr.bf16.gmra.mrb[104].mxu0 %v3097_v26  ;;  %v3164_v26 = vcombine.high %v350_v13, %v358_v14 }
 0x103   : > { %2767 = vmatmul.mubr.bf16.gmra.mrb[104].mxu1 %v3099_v27  ;;  %2677 = vmatprep.mubr.bf16.mxu0 %v3114_v28 }
 0x104   : > { %2774 = vmatprep.mubr.bf16.mxu1 %v3116_v29 }
 0x105   : > { %v3411_v32 = vpop.f32.mrb[0].mxu0 }
 0x106   : > { %v3475_v35 = vpop.f32.mrb[0].mxu1  ;;  %v3412_v36 = vpop.f32.mrb[1].mxu0 }
 0x107   : > { %v3413_v38 = vadd.f32 %v3412_v36, %v3411_v32  ;;  %v3476_v39 = vpop.f32.mrb[1].mxu1  ;;  %v3414_v40 = vpop.f32.mrb[2].mxu0  ;;  %v365_v32 = vld [vmem:[%s4129_s23 + $0x3b0] sm:$0xff]  ;;  %v374_v36 = vld [vmem:[%s4129_s23 + $0x3f8] sm:$0xff] }
 0x108   : > { %v3477_v43 = vadd.f32 %v3476_v39, %v3475_v35  ;;  %v3478_v44 = vpop.f32.mrb[2].mxu1  ;;  %v3415_v45 = vpop.f32.mrb[3].mxu0  ;;  %v366_v35 = vld [vmem:[%s4129_s23 + $0x3b8] sm:$0xff]  ;;  %v3161_v39 = vcombine.low %v349_v10, %v357_v11 }
 0x109   : > { %v3416_v47 = vadd.f32 %v3415_v45, %v3414_v40  ;;  %v3479_v48 = vpop.f32.mrb[3].mxu1 }
 0x10a   : > { %v4345_v49 = vadd.f32 %v3477_v43, %v3413_v38  ;;  %v3480_v50 = vadd.f32 %v3479_v48, %v3478_v44  ;;  %2678 = vmatmul.mubr.bf16.gmra.mrb[108].mxu0 %v3113_v37  ;;  %v3163_v43 = vcombine.low %v350_v13, %v358_v14  ;;  %v3178_v44 = vcombine.high %v365_v32, %v373_v33 }
 0x10b   : > { %2775 = vmatmul.mubr.bf16.gmra.mrb[108].mxu1 %v3115_v41  ;;  %2685 = vmatprep.mubr.bf16.mxu0 %v3130_v42  ;;  %v3180_v48 = vcombine.high %v366_v35, %v374_v36 }
 0x10c   : > { %v4347_v51 = vadd.f32 %v3480_v50, %v3416_v47  ;;  %2782 = vmatprep.mubr.bf16.mxu1 %v3132_v46 }
 0x10d   : > { %v3417_v54 = vpop.f32.mrb[4].mxu0 }
 0x10e   : > { %v3481_v57 = vpop.f32.mrb[4].mxu1  ;;  %v3418_v58 = vpop.f32.mrb[5].mxu0 }
 0x10f   : > { %v3419_v60 = vadd.f32 %v3418_v58, %v3417_v54  ;;  %v3482_v61 = vpop.f32.mrb[5].mxu1  ;;  %v3420_v62 = vpop.f32.mrb[6].mxu0 }
 0x110   : > { %v3483_v1 = vadd.f32 %v3482_v61, %v3481_v57  ;;  %v3484_v2 = vpop.f32.mrb[6].mxu1  ;;  %v3421_v3 = vpop.f32.mrb[7].mxu0 }
 0x111   : > { %v3422_v5 = vadd.f32 %v3421_v3, %v3420_v62  ;;  %v3485_v6 = vpop.f32.mrb[7].mxu1 }
 0x112   : > { %v4353_v7 = vadd.f32 %v3483_v1, %v3419_v60  ;;  %v3486_v8 = vadd.f32 %v3485_v6, %v3484_v2  ;;  %2686 = vmatmul.mubr.bf16.gmra.mrb[112].mxu0 %v3129_v59  ;;  %v3177_v59 = vcombine.low %v365_v32, %v373_v33 }
 0x113   : > { %2783 = vmatmul.mubr.bf16.gmra.mrb[112].mxu1 %v3131_v63  ;;  %2693 = vmatprep.mubr.bf16.mxu0 %v3146_v0  ;;  %v3179_v63 = vcombine.low %v366_v35, %v374_v36 }
 0x114   : > { %v4355_v9 = vadd.f32 %v3486_v8, %v3422_v5  ;;  %2790 = vmatprep.mubr.bf16.mxu1 %v3148_v4 }
 0x115   : > { %v3423_v12 = vpop.f32.mrb[8].mxu0 }
 0x116   : > { %v3487_v15 = vpop.f32.mrb[8].mxu1  ;;  %v3424_v16 = vpop.f32.mrb[9].mxu0 }
 0x117   : > { %v3425_v18 = vadd.f32 %v3424_v16, %v3423_v12  ;;  %v3488_v19 = vpop.f32.mrb[9].mxu1  ;;  %v3426_v20 = vpop.f32.mrb[10].mxu0 }
 0x118   : > { %v3489_v23 = vadd.f32 %v3488_v19, %v3487_v15  ;;  %v3490_v24 = vpop.f32.mrb[10].mxu1  ;;  %v3427_v25 = vpop.f32.mrb[11].mxu0 }
 0x119   : > { %v3428_v27 = vadd.f32 %v3427_v25, %v3426_v20  ;;  %v3491_v28 = vpop.f32.mrb[11].mxu1 }
 0x11a   : > { %v4361_v29 = vadd.f32 %v3489_v23, %v3425_v18  ;;  %v3492_v30 = vadd.f32 %v3491_v28, %v3490_v24  ;;  %2694 = vmatmul.mubr.bf16.gmra.mrb[116].mxu0 %v3145_v17 }
 0x11b   : > { %2791 = vmatmul.mubr.bf16.gmra.mrb[116].mxu1 %v3147_v21  ;;  %2701 = vmatprep.mubr.bf16.mxu0 %v3162_v22 }
 0x11c   : > { %v4363_v31 = vadd.f32 %v3492_v30, %v3428_v27  ;;  %2798 = vmatprep.mubr.bf16.mxu1 %v3164_v26 }
 0x11d   : > { %v3429_v34 = vpop.f32.mrb[12].mxu0 }
 0x11e   : > { %v3493_v37 = vpop.f32.mrb[12].mxu1  ;;  %v3430_v38 = vpop.f32.mrb[13].mxu0 }
 0x11f   : > { %v3431_v40 = vadd.f32 %v3430_v38, %v3429_v34  ;;  %v3494_v41 = vpop.f32.mrb[13].mxu1  ;;  %v3432_v42 = vpop.f32.mrb[14].mxu0 }
 0x120   : > { %v3495_v45 = vadd.f32 %v3494_v41, %v3493_v37  ;;  %v3496_v46 = vpop.f32.mrb[14].mxu1  ;;  %v3433_v47 = vpop.f32.mrb[15].mxu0 }
 0x121   : > { %v3434_v50 = vadd.f32 %v3433_v47, %v3432_v42  ;;  %v3497_v52 = vpop.f32.mrb[15].mxu1 }
 0x122   : > { %v4369_v53 = vadd.f32 %v3495_v45, %v3431_v40  ;;  %v3498_v54 = vadd.f32 %v3497_v52, %v3496_v46  ;;  %2702 = vmatmul.mubr.bf16.gmra.mrb[120].mxu0 %v3161_v39 }
 0x123   : > { %2799 = vmatmul.mubr.bf16.gmra.mrb[120].mxu1 %v3163_v43  ;;  %2709 = vmatprep.mubr.bf16.mxu0 %v3178_v44 }
 0x124   : > { %v4371_v55 = vadd.f32 %v3498_v54, %v3434_v50  ;;  %2806 = vmatprep.mubr.bf16.mxu1 %v3180_v48 }
 0x125   : > { %v3435_v56 = vpop.f32.mrb[16].mxu0 }
 0x126   : > { %v3499_v57 = vpop.f32.mrb[16].mxu1  ;;  %v3436_v58 = vpop.f32.mrb[17].mxu0 }
 0x127   : > { %v3437_v60 = vadd.f32 %v3436_v58, %v3435_v56  ;;  %v3500_v61 = vpop.f32.mrb[17].mxu1  ;;  %v3438_v62 = vpop.f32.mrb[18].mxu0 }
 0x128   : > { %v3501_v0 = vadd.f32 %v3500_v61, %v3499_v57  ;;  %v3502_v1 = vpop.f32.mrb[18].mxu1  ;;  %v3439_v2 = vpop.f32.mrb[19].mxu0 }
 0x129   : > { %v3440_v3 = vadd.f32 %v3439_v2, %v3438_v62  ;;  %v3503_v4 = vpop.f32.mrb[19].mxu1 }
 0x12a   : > { %v4373_v5 = vadd.f32 %v3501_v0, %v3437_v60  ;;  %v3504_v6 = vadd.f32 %v3503_v4, %v3502_v1  ;;  %2710 = vmatmul.mubr.bf16.gmra.mrb[124].mxu0 %v3177_v59 }
 0x12b   : > { %2807 = vmatmul.mubr.bf16.gmra.mrb[124].mxu1 %v3179_v63 }
 0x12c   : > { %v4375_v8 = vadd.f32 %v3504_v6, %v3440_v3 }
 0x12d   : > { %v3441_v10 = vpop.f32.mrb[20].mxu0 }
 0x12e   : > { %v3505_v11 = vpop.f32.mrb[20].mxu1  ;;  %v3442_v12 = vpop.f32.mrb[21].mxu0 }
 0x12f   : > { %v3443_v13 = vadd.f32 %v3442_v12, %v3441_v10  ;;  %v3506_v14 = vpop.f32.mrb[21].mxu1  ;;  %v3444_v15 = vpop.f32.mrb[22].mxu0 }
 0x130   : > { %v3507_v16 = vadd.f32 %v3506_v14, %v3505_v11  ;;  %v3508_v17 = vpop.f32.mrb[22].mxu1  ;;  %v3445_v18 = vpop.f32.mrb[23].mxu0 }
 0x131   : > { %v3446_v19 = vadd.f32 %v3445_v18, %v3444_v15  ;;  %v3509_v20 = vpop.f32.mrb[23].mxu1 }
 0x132   : > { %v4377_v21 = vadd.f32 %v3507_v16, %v3443_v13  ;;  %v3510_v22 = vadd.f32 %v3509_v20, %v3508_v17 }
 0x134   : > { %v4379_v23 = vadd.f32 %v3510_v22, %v3446_v19 }
 0x135   : > { %v3447_v24 = vpop.f32.mrb[24].mxu0 }
 0x136   : > { %v3511_v25 = vpop.f32.mrb[24].mxu1  ;;  %v3448_v26 = vpop.f32.mrb[25].mxu0 }
 0x137   : > { %v3449_v27 = vadd.f32 %v3448_v26, %v3447_v24  ;;  %v3512_v28 = vpop.f32.mrb[25].mxu1  ;;  %v3450_v30 = vpop.f32.mrb[26].mxu0 }
 0x138   : > { %v3513_v32 = vadd.f32 %v3512_v28, %v3511_v25  ;;  %v3514_v33 = vpop.f32.mrb[26].mxu1  ;;  %v3451_v34 = vpop.f32.mrb[27].mxu0 }
 0x139   : > { %v3452_v35 = vadd.f32 %v3451_v34, %v3450_v30  ;;  %v3515_v36 = vpop.f32.mrb[27].mxu1 }
 0x13a   : > { %v4381_v37 = vadd.f32 %v3513_v32, %v3449_v27  ;;  %v3516_v38 = vadd.f32 %v3515_v36, %v3514_v33 }
 0x13c   : > { %v4383_v39 = vadd.f32 %v3516_v38, %v3452_v35 }
 0x13d   : > { %v3453_v40 = vpop.f32.mrb[28].mxu0 }
 0x13e   : > { %v3517_v41 = vpop.f32.mrb[28].mxu1  ;;  %v3454_v42 = vpop.f32.mrb[29].mxu0 }
 0x13f   : > { %v3455_v43 = vadd.f32 %v3454_v42, %v3453_v40  ;;  %v3518_v44 = vpop.f32.mrb[29].mxu1  ;;  %v3456_v45 = vpop.f32.mrb[30].mxu0 }
 0x140   : > { %v3519_v46 = vadd.f32 %v3518_v44, %v3517_v41  ;;  %v3520_v47 = vpop.f32.mrb[30].mxu1  ;;  %v3457_v48 = vpop.f32.mrb[31].mxu0 }
 0x141   : > { %v3458_v50 = vadd.f32 %v3457_v48, %v3456_v45  ;;  %v3521_v52 = vpop.f32.mrb[31].mxu1 }
 0x142   : > { %v4385_v54 = vadd.f32 %v3519_v46, %v3455_v43  ;;  %v3522_v56 = vadd.f32 %v3521_v52, %v3520_v47 }
 0x144   : > { %v4387_v57 = vadd.f32 %v3522_v56, %v3458_v50 }
 0x145   : > { %v3539_v58 = vpop.f32.mrb[32].mxu0 }
 0x146   : > { %v3603_v59 = vpop.f32.mrb[32].mxu1  ;;  %v3540_v60 = vpop.f32.mrb[33].mxu0 }
 0x147   : > { %v3541_v61 = vadd.f32 %v3540_v60, %v3539_v58  ;;  %v3604_v62 = vpop.f32.mrb[33].mxu1  ;;  %v3542_v63 = vpop.f32.mrb[34].mxu0 }
 0x148   : > { %v3605_v0 = vadd.f32 %v3604_v62, %v3603_v59  ;;  %v3606_v1 = vpop.f32.mrb[34].mxu1  ;;  %v3543_v2 = vpop.f32.mrb[35].mxu0 }
 0x149   : > { %v2268_v3 = vadd.f32 %v3541_v61, %v4345_v49  ;;  %v3544_v4 = vadd.f32 %v3543_v2, %v3542_v63  ;;  %v3607_v6 = vpop.f32.mrb[35].mxu1 }
 0x14a   : > { %v3608_v10 = vadd.f32 %v3607_v6, %v3606_v1 }
 0x14b   : > { %v4390_v11 = vadd.f32 %v3605_v0, %v2268_v3  ;;  %v2271_v12 = vadd.f32 %v3544_v4, %v4347_v51 }
 0x14d   : > { %v4393_v13 = vadd.f32 %v3608_v10, %v2271_v12  ;;  %v3545_v14 = vpop.f32.mrb[36].mxu0 }
 0x14e   : > { %v3609_v15 = vpop.f32.mrb[36].mxu1  ;;  %v3546_v16 = vpop.f32.mrb[37].mxu0 }
 0x14f   : > { %v3547_v17 = vadd.f32 %v3546_v16, %v3545_v14  ;;  %v3610_v18 = vpop.f32.mrb[37].mxu1  ;;  %v3548_v19 = vpop.f32.mrb[38].mxu0 }
 0x150   : > { %v3611_v20 = vadd.f32 %v3610_v18, %v3609_v15  ;;  %v3612_v22 = vpop.f32.mrb[38].mxu1  ;;  %v3549_v24 = vpop.f32.mrb[39].mxu0 }
 0x151   : > { %v2276_v49 = vadd.f32 %v3547_v17, %v4353_v7  ;;  %v3550_v25 = vadd.f32 %v3549_v24, %v3548_v19  ;;  %v3613_v26 = vpop.f32.mrb[39].mxu1 }
 0x152   : > { %v3614_v27 = vadd.f32 %v3613_v26, %v3612_v22 }
 0x153   : > { %v4396_v28 = vadd.f32 %v3611_v20, %v2276_v49  ;;  %v2279_v51 = vadd.f32 %v3550_v25, %v4355_v9 }
 0x155   : > { %v4399_v30 = vadd.f32 %v3614_v27, %v2279_v51  ;;  %v3551_v32 = vpop.f32.mrb[40].mxu0 }
 0x156   : > { %v3615_v33 = vpop.f32.mrb[40].mxu1  ;;  %v3552_v34 = vpop.f32.mrb[41].mxu0 }
 0x157   : > { %v3553_v35 = vadd.f32 %v3552_v34, %v3551_v32  ;;  %v3616_v36 = vpop.f32.mrb[41].mxu1  ;;  %v3554_v38 = vpop.f32.mrb[42].mxu0 }
 0x158   : > { %v3617_v40 = vadd.f32 %v3616_v36, %v3615_v33  ;;  %v3618_v41 = vpop.f32.mrb[42].mxu1  ;;  %v3555_v42 = vpop.f32.mrb[43].mxu0 }
 0x159   : > { %v2284_v7 = vadd.f32 %v3553_v35, %v4361_v29  ;;  %v3556_v43 = vadd.f32 %v3555_v42, %v3554_v38  ;;  %v3619_v44 = vpop.f32.mrb[43].mxu1 }
 0x15a   : > { %v3620_v45 = vadd.f32 %v3619_v44, %v3618_v41 }
 0x15b   : > { %v4402_v46 = vadd.f32 %v3617_v40, %v2284_v7  ;;  %v2287_v9 = vadd.f32 %v3556_v43, %v4363_v31 }
 0x15d   : > { %v4405_v47 = vadd.f32 %v3620_v45, %v2287_v9  ;;  %v3557_v48 = vpop.f32.mrb[44].mxu0 }
 0x15e   : > { %v3621_v50 = vpop.f32.mrb[44].mxu1  ;;  %v3558_v52 = vpop.f32.mrb[45].mxu0 }
 0x15f   : > { %v3559_v56 = vadd.f32 %v3558_v52, %v3557_v48  ;;  %v3622_v58 = vpop.f32.mrb[45].mxu1  ;;  %v3560_v59 = vpop.f32.mrb[46].mxu0 }
 0x160   : > { %v3623_v60 = vadd.f32 %v3622_v58, %v3621_v50  ;;  %v3624_v61 = vpop.f32.mrb[46].mxu1  ;;  %v3561_v62 = vpop.f32.mrb[47].mxu0 }
 0x161   : > { %v2292_v29 = vadd.f32 %v3559_v56, %v4369_v53  ;;  %v3562_v63 = vadd.f32 %v3561_v62, %v3560_v59  ;;  %v3625_v0 = vpop.f32.mrb[47].mxu1 }
 0x162   : > { %v3626_v1 = vadd.f32 %v3625_v0, %v3624_v61 }
 0x163   : > { %v4408_v2 = vadd.f32 %v3623_v60, %v2292_v29  ;;  %v2295_v31 = vadd.f32 %v3562_v63, %v4371_v55 }
 0x165   : > { %v4411_v3 = vadd.f32 %v3626_v1, %v2295_v31  ;;  %v3563_v4 = vpop.f32.mrb[48].mxu0 }
 0x166   : > { %v3627_v6 = vpop.f32.mrb[48].mxu1  ;;  %v3564_v10 = vpop.f32.mrb[49].mxu0 }
 0x167   : > { %v3565_v12 = vadd.f32 %v3564_v10, %v3563_v4  ;;  %v3628_v14 = vpop.f32.mrb[49].mxu1  ;;  %v3566_v15 = vpop.f32.mrb[50].mxu0 }
 0x168   : > { %v3629_v16 = vadd.f32 %v3628_v14, %v3627_v6  ;;  %v3630_v17 = vpop.f32.mrb[50].mxu1  ;;  %v3567_v18 = vpop.f32.mrb[51].mxu0 }
 0x169   : > { %v2300_v53 = vadd.f32 %v3565_v12, %v4373_v5  ;;  %v3568_v19 = vadd.f32 %v3567_v18, %v3566_v15  ;;  %v3631_v20 = vpop.f32.mrb[51].mxu1 }
 0x16a   : > { %v3632_v22 = vadd.f32 %v3631_v20, %v3630_v17 }
 0x16b   : > { %v4414_v24 = vadd.f32 %v3629_v16, %v2300_v53  ;;  %v2303_v55 = vadd.f32 %v3568_v19, %v4375_v8 }
 0x16d   : > { %v4417_v49 = vadd.f32 %v3632_v22, %v2303_v55  ;;  %v3569_v25 = vpop.f32.mrb[52].mxu0 }
 0x16e   : > { %v3633_v26 = vpop.f32.mrb[52].mxu1  ;;  %v3570_v27 = vpop.f32.mrb[53].mxu0 }
 0x16f   : > { %v3571_v51 = vadd.f32 %v3570_v27, %v3569_v25  ;;  %v3634_v32 = vpop.f32.mrb[53].mxu1  ;;  %v3572_v33 = vpop.f32.mrb[54].mxu0 }
 0x170   : > { %v3635_v34 = vadd.f32 %v3634_v32, %v3633_v26  ;;  %v3636_v35 = vpop.f32.mrb[54].mxu1  ;;  %v3573_v36 = vpop.f32.mrb[55].mxu0 }
 0x171   : > { %v2308_v5 = vadd.f32 %v3571_v51, %v4377_v21  ;;  %v3574_v38 = vadd.f32 %v3573_v36, %v3572_v33  ;;  %v3637_v40 = vpop.f32.mrb[55].mxu1 }
 0x172   : > { %v3638_v41 = vadd.f32 %v3637_v40, %v3636_v35 }
 0x173   : > { %v4420_v42 = vadd.f32 %v3635_v34, %v2308_v5  ;;  %v2311_v8 = vadd.f32 %v3574_v38, %v4379_v23 }
 0x175   : > { %v4423_v7 = vadd.f32 %v3638_v41, %v2311_v8  ;;  %v3575_v43 = vpop.f32.mrb[56].mxu0 }
 0x176   : > { %v3639_v44 = vpop.f32.mrb[56].mxu1  ;;  %v3576_v45 = vpop.f32.mrb[57].mxu0 }
 0x177   : > { %v3577_v9 = vadd.f32 %v3576_v45, %v3575_v43  ;;  %v3640_v48 = vpop.f32.mrb[57].mxu1  ;;  %v3578_v50 = vpop.f32.mrb[58].mxu0 }
 0x178   : > { %v3641_v52 = vadd.f32 %v3640_v48, %v3639_v44  ;;  %v3642_v56 = vpop.f32.mrb[58].mxu1  ;;  %v3579_v58 = vpop.f32.mrb[59].mxu0 }
 0x179   : > { %v2316_v21 = vadd.f32 %v3577_v9, %v4381_v37  ;;  %v3580_v59 = vadd.f32 %v3579_v58, %v3578_v50  ;;  %v3643_v60 = vpop.f32.mrb[59].mxu1 }
 0x17a   : > { %v3644_v61 = vadd.f32 %v3643_v60, %v3642_v56 }
 0x17b   : > { %v4426_v62 = vadd.f32 %v3641_v52, %v2316_v21  ;;  %v2319_v23 = vadd.f32 %v3580_v59, %v4383_v39 }
 0x17d   : > { %v4429_v29 = vadd.f32 %v3644_v61, %v2319_v23  ;;  %v3581_v63 = vpop.f32.mrb[60].mxu0 }
 0x17e   : > { %v3645_v0 = vpop.f32.mrb[60].mxu1  ;;  %v3582_v1 = vpop.f32.mrb[61].mxu0 }
 0x17f   : > { %v3583_v31 = vadd.f32 %v3582_v1, %v3581_v63  ;;  %v3646_v4 = vpop.f32.mrb[61].mxu1  ;;  %v3584_v6 = vpop.f32.mrb[62].mxu0 }
 0x180   : > { %v3647_v10 = vadd.f32 %v3646_v4, %v3645_v0  ;;  %v3648_v12 = vpop.f32.mrb[62].mxu1  ;;  %v3585_v14 = vpop.f32.mrb[63].mxu0 }
 0x181   : > { %v2324_v37 = vadd.f32 %v3583_v31, %v4385_v54  ;;  %v3586_v15 = vadd.f32 %v3585_v14, %v3584_v6  ;;  %v3649_v16 = vpop.f32.mrb[63].mxu1 }
 0x182   : > { %v3650_v17 = vadd.f32 %v3649_v16, %v3648_v12 }
 0x183   : > { %v4432_v18 = vadd.f32 %v3647_v10, %v2324_v37  ;;  %v2327_v39 = vadd.f32 %v3586_v15, %v4387_v57 }
 0x185   : > { %v4435_v53 = vadd.f32 %v3650_v17, %v2327_v39  ;;  %v3667_v19 = vpop.f32.mrb[64].mxu0 }
 0x186   : > { %v3731_v20 = vpop.f32.mrb[64].mxu1  ;;  %v3668_v22 = vpop.f32.mrb[65].mxu0 }
 0x187   : > { %v3669_v55 = vadd.f32 %v3668_v22, %v3667_v19  ;;  %v3732_v25 = vpop.f32.mrb[65].mxu1  ;;  %v3670_v26 = vpop.f32.mrb[66].mxu0 }
 0x188   : > { %v3733_v27 = vadd.f32 %v3732_v25, %v3731_v20  ;;  %v3734_v51 = vpop.f32.mrb[66].mxu1  ;;  %v3671_v32 = vpop.f32.mrb[67].mxu0 }
 0x189   : > { %v2462_v54 = vadd.f32 %v3669_v55, %v4390_v11  ;;  %v3672_v33 = vadd.f32 %v3671_v32, %v3670_v26  ;;  %v3735_v34 = vpop.f32.mrb[67].mxu1 }
 0x18a   : > { %v3736_v35 = vadd.f32 %v3735_v34, %v3734_v51 }
 0x18b   : > { %v4438_v36 = vadd.f32 %v3733_v27, %v2462_v54  ;;  %v2465_v57 = vadd.f32 %v3672_v33, %v4393_v13 }
 0x18d   : > { %v4441_v5 = vadd.f32 %v3736_v35, %v2465_v57  ;;  %v3673_v38 = vpop.f32.mrb[68].mxu0 }
 0x18e   : > { %v3737_v40 = vpop.f32.mrb[68].mxu1  ;;  %v3674_v41 = vpop.f32.mrb[69].mxu0 }
 0x18f   : > { %v3675_v8 = vadd.f32 %v3674_v41, %v3673_v38  ;;  %v3738_v43 = vpop.f32.mrb[69].mxu1  ;;  %v3676_v44 = vpop.f32.mrb[70].mxu0 }
 0x190   : > { %v3739_v45 = vadd.f32 %v3738_v43, %v3737_v40  ;;  %v3740_v9 = vpop.f32.mrb[70].mxu1  ;;  %v3677_v48 = vpop.f32.mrb[71].mxu0 }
 0x191   : > { %v2470_v11 = vadd.f32 %v3675_v8, %v4396_v28  ;;  %v3678_v50 = vadd.f32 %v3677_v48, %v3676_v44  ;;  %v3741_v52 = vpop.f32.mrb[71].mxu1 }
 0x192   : > { %v3742_v56 = vadd.f32 %v3741_v52, %v3740_v9 }
 0x193   : > { %v4444_v58 = vadd.f32 %v3739_v45, %v2470_v11  ;;  %v2473_v13 = vadd.f32 %v3678_v50, %v4399_v30 }
 0x195   : > { %v4447_v21 = vadd.f32 %v3742_v56, %v2473_v13  ;;  %v3679_v59 = vpop.f32.mrb[72].mxu0 }
 0x196   : > { %v3743_v60 = vpop.f32.mrb[72].mxu1  ;;  %v3680_v61 = vpop.f32.mrb[73].mxu0 }
 0x197   : > { %v3681_v23 = vadd.f32 %v3680_v61, %v3679_v59  ;;  %v3744_v63 = vpop.f32.mrb[73].mxu1  ;;  %v3682_v0 = vpop.f32.mrb[74].mxu0 }
 0x198   : > { %v3745_v1 = vadd.f32 %v3744_v63, %v3743_v60  ;;  %v3746_v31 = vpop.f32.mrb[74].mxu1  ;;  %v3683_v4 = vpop.f32.mrb[75].mxu0 }
 0x199   : > { %v2478_v28 = vadd.f32 %v3681_v23, %v4402_v46  ;;  %v3684_v6 = vadd.f32 %v3683_v4, %v3682_v0  ;;  %v3747_v10 = vpop.f32.mrb[75].mxu1 }
 0x19a   : > { %v3748_v12 = vadd.f32 %v3747_v10, %v3746_v31 }
 0x19b   : > { %v4450_v14 = vadd.f32 %v3745_v1, %v2478_v28  ;;  %v2481_v30 = vadd.f32 %v3684_v6, %v4405_v47 }
 0x19d   : > { %v4453_v37 = vadd.f32 %v3748_v12, %v2481_v30  ;;  %v3685_v15 = vpop.f32.mrb[76].mxu0 }
 0x19e   : > { %v3749_v16 = vpop.f32.mrb[76].mxu1  ;;  %v3686_v17 = vpop.f32.mrb[77].mxu0 }
 0x19f   : > { %v3687_v39 = vadd.f32 %v3686_v17, %v3685_v15  ;;  %v3750_v19 = vpop.f32.mrb[77].mxu1  ;;  %v3688_v20 = vpop.f32.mrb[78].mxu0 }
 0x1a0   : > { %v3751_v22 = vadd.f32 %v3750_v19, %v3749_v16  ;;  %v3752_v55 = vpop.f32.mrb[78].mxu1  ;;  %v3689_v25 = vpop.f32.mrb[79].mxu0 }
 0x1a1   : > { %v2486_v46 = vadd.f32 %v3687_v39, %v4408_v2  ;;  %v3690_v26 = vadd.f32 %v3689_v25, %v3688_v20  ;;  %v3753_v27 = vpop.f32.mrb[79].mxu1 }
 0x1a2   : > { %v3754_v51 = vadd.f32 %v3753_v27, %v3752_v55 }
 0x1a3   : > { %v4456_v32 = vadd.f32 %v3751_v22, %v2486_v46  ;;  %v2489_v47 = vadd.f32 %v3690_v26, %v4411_v3 }
 0x1a5   : > { %v4459_v54 = vadd.f32 %v3754_v51, %v2489_v47  ;;  %v3691_v33 = vpop.f32.mrb[80].mxu0 }
 0x1a6   : > { %v3755_v34 = vpop.f32.mrb[80].mxu1  ;;  %v3692_v35 = vpop.f32.mrb[81].mxu0 }
 0x1a7   : > { %v3693_v57 = vadd.f32 %v3692_v35, %v3691_v33  ;;  %v3756_v38 = vpop.f32.mrb[81].mxu1  ;;  %v3694_v40 = vpop.f32.mrb[82].mxu0 }
 0x1a8   : > { %v3757_v41 = vadd.f32 %v3756_v38, %v3755_v34  ;;  %v3758_v8 = vpop.f32.mrb[82].mxu1  ;;  %v3695_v43 = vpop.f32.mrb[83].mxu0 }
 0x1a9   : > { %v2494_v2 = vadd.f32 %v3693_v57, %v4414_v24  ;;  %v3696_v44 = vadd.f32 %v3695_v43, %v3694_v40  ;;  %v3759_v45 = vpop.f32.mrb[83].mxu1 }
 0x1aa   : > { %v3760_v9 = vadd.f32 %v3759_v45, %v3758_v8 }
 0x1ab   : > { %v4462_v48 = vadd.f32 %v3757_v41, %v2494_v2  ;;  %v2497_v3 = vadd.f32 %v3696_v44, %v4417_v49 }
 0x1ad   : > { %v4465_v11 = vadd.f32 %v3760_v9, %v2497_v3  ;;  %v3697_v50 = vpop.f32.mrb[84].mxu0 }
 0x1ae   : > { %v3761_v52 = vpop.f32.mrb[84].mxu1  ;;  %v3698_v56 = vpop.f32.mrb[85].mxu0 }
 0x1af   : > { %v3699_v13 = vadd.f32 %v3698_v56, %v3697_v50  ;;  %v3762_v59 = vpop.f32.mrb[85].mxu1  ;;  %v3700_v60 = vpop.f32.mrb[86].mxu0 }
 0x1b0   : > { %v3763_v61 = vadd.f32 %v3762_v59, %v3761_v52  ;;  %v3764_v23 = vpop.f32.mrb[86].mxu1  ;;  %v3701_v63 = vpop.f32.mrb[87].mxu0 }
 0x1b1   : > { %v2502_v24 = vadd.f32 %v3699_v13, %v4420_v42  ;;  %v3702_v0 = vadd.f32 %v3701_v63, %v3700_v60  ;;  %v3765_v1 = vpop.f32.mrb[87].mxu1 }
 0x1b2   : > { %v3766_v31 = vadd.f32 %v3765_v1, %v3764_v23 }
 0x1b3   : > { %v4468_v4 = vadd.f32 %v3763_v61, %v2502_v24  ;;  %v2505_v49 = vadd.f32 %v3702_v0, %v4423_v7  ;;  %v4494_v61 = vld [vmem:[%s237_s26] ss:$0 sm:$0xff] }
 0x1b4   : > { %v4497_v0 = vld [vmem:[%s240_s29] ss:$0 sm:$0xff] }
 0x1b5   : > { %v4471_v28 = vadd.f32 %v3766_v31, %v2505_v49  ;;  %v3703_v6 = vpop.f32.mrb[88].mxu0 }
 0x1b6   : > { %v3767_v10 = vpop.f32.mrb[88].mxu1  ;;  %v3704_v12 = vpop.f32.mrb[89].mxu0 }
 0x1b7   : > { %v3705_v30 = vadd.f32 %v3704_v12, %v3703_v6  ;;  %v3768_v15 = vpop.f32.mrb[89].mxu1  ;;  %v3706_v16 = vpop.f32.mrb[90].mxu0 }
 0x1b8   : > { %v3769_v17 = vadd.f32 %v3768_v15, %v3767_v10  ;;  %v3770_v39 = vpop.f32.mrb[90].mxu1  ;;  %v3707_v19 = vpop.f32.mrb[91].mxu0 }
 0x1b9   : > { %v2510_v42 = vadd.f32 %v3705_v30, %v4426_v62  ;;  %v3708_v20 = vadd.f32 %v3707_v19, %v3706_v16  ;;  %v3771_v22 = vpop.f32.mrb[91].mxu1 }
 0x1ba   : > { %v3772_v55 = vadd.f32 %v3771_v22, %v3770_v39 }
 0x1bb   : > { %v4474_v25 = vadd.f32 %v3769_v17, %v2510_v42  ;;  %v2513_v7 = vadd.f32 %v3708_v20, %v4429_v29 }
 0x1bd   : > { %v4477_v46 = vadd.f32 %v3772_v55, %v2513_v7  ;;  %v3709_v26 = vpop.f32.mrb[92].mxu0 }
 0x1be   : > { %v3773_v27 = vpop.f32.mrb[92].mxu1  ;;  %v3710_v51 = vpop.f32.mrb[93].mxu0 }
 0x1bf   : > { %v3711_v47 = vadd.f32 %v3710_v51, %v3709_v26  ;;  %v3774_v33 = vpop.f32.mrb[93].mxu1  ;;  %v3712_v34 = vpop.f32.mrb[94].mxu0 }
 0x1c0   : > { %v3775_v35 = vadd.f32 %v3774_v33, %v3773_v27  ;;  %v3776_v57 = vpop.f32.mrb[94].mxu1  ;;  %v3713_v38 = vpop.f32.mrb[95].mxu0 }
 0x1c1   : > { %v2518_v62 = vadd.f32 %v3711_v47, %v4432_v18  ;;  %v3714_v40 = vadd.f32 %v3713_v38, %v3712_v34  ;;  %v3777_v41 = vpop.f32.mrb[95].mxu1 }
 0x1c2   : > { %v3778_v8 = vadd.f32 %v3777_v41, %v3776_v57 }
 0x1c3   : > { %v4480_v43 = vadd.f32 %v3775_v35, %v2518_v62  ;;  %v2521_v29 = vadd.f32 %v3714_v40, %v4435_v53 }
 0x1c5   : > { %v4483_v2 = vadd.f32 %v3778_v8, %v2521_v29  ;;  %v3795_v44 = vpop.f32.mrb[96].mxu0 }
 0x1c6   : > { %v3859_v45 = vpop.f32.mrb[96].mxu1  ;;  %v3796_v9 = vpop.f32.mrb[97].mxu0 }
 0x1c7   : > { %v3797_v3 = vadd.f32 %v3796_v9, %v3795_v44  ;;  %v3860_v50 = vpop.f32.mrb[97].mxu1  ;;  %v3798_v18 = vpop.f32.mrb[98].mxu0 }
 0x1c8   : > { %v3861_v52 = vadd.f32 %v3860_v50, %v3859_v45  ;;  %v3862_v56 = vpop.f32.mrb[98].mxu1  ;;  %v3799_v13 = vpop.f32.mrb[99].mxu0 }
 0x1c9   : > { %v2656_v59 = vadd.f32 %v3797_v3, %v4438_v36  ;;  %v3800_v53 = vadd.f32 %v3799_v13, %v3798_v18  ;;  %v3863_v60 = vpop.f32.mrb[99].mxu1 }
 0x1ca   : > { %v3864_v23 = vadd.f32 %v3863_v60, %v3862_v56 }
 0x1cb   : > { %v2753_v63 = vadd.f32 %v3861_v52, %v2656_v59  ;;  %v2659_v24 = vadd.f32 %v3800_v53, %v4441_v5 }
 0x1cd   : > { %v2822_v1 = vmul.f32 %v4494_v61, %v2753_v63  ;;  %v2756_v31 = vadd.f32 %v3864_v23, %v2659_v24  ;;  %v3801_v49 = vpop.f32.mrb[100].mxu0 }
 0x1ce   : > { %v3865_v36 = vpop.f32.mrb[100].mxu1  ;;  %v3802_v6 = vpop.f32.mrb[101].mxu0 }
 0x1cf   : > { %v2845_v10 = vadd.f32 %v4497_v0, %v2822_v1  ;;  %v2823_v12 = vmul.f32 %v4494_v61, %v2756_v31  ;;  %v3803_v30 = vadd.f32 %v3802_v6, %v3801_v49  ;;  %v3866_v15 = vpop.f32.mrb[101].mxu1  ;;  %v3804_v16 = vpop.f32.mrb[102].mxu0 }
 0x1d0   : > { %v3867_v17 = vadd.f32 %v3866_v15, %v3865_v36  ;;  %v3868_v39 = vpop.f32.mrb[102].mxu1  ;;  %v3805_v19 = vpop.f32.mrb[103].mxu0 }
 0x1d1   : > { %v2846_v5 = vadd.f32 %v4497_v0, %v2823_v12  ;;  %v2664_v42 = vadd.f32 %v3803_v30, %v4444_v58  ;;  %v3806_v20 = vadd.f32 %v3805_v19, %v3804_v16  ;;  %v3869_v22 = vpop.f32.mrb[103].mxu1  ;;  %v2861_v7 = vmax.f32 %v2845_v10, 0.0 }
 0x1d2   : > { %v3870_v55 = vadd.f32 %v3869_v22, %v3868_v39 }
 0x1d3   : > { %v2862_v26 = vmax.f32 %v2846_v5, 0.0  ;;  %v2761_v27 = vadd.f32 %v3867_v17, %v2664_v42  ;;  %v2667_v51 = vadd.f32 %v3806_v20, %v4447_v21 }
 0x1d5   : > { %v3351_v47 = vpack.c.bf16 %v2862_v26, %v2861_v7  ;;  %v2824_v33 = vmul.f32 %v4494_v61, %v2761_v27  ;;  %v2764_v34 = vadd.f32 %v3870_v55, %v2667_v51  ;;  %v3807_v35 = vpop.f32.mrb[104].mxu0 }
 0x1d6   : > { %v3871_v58 = vpop.f32.mrb[104].mxu1  ;;  %v3808_v57 = vpop.f32.mrb[105].mxu0 }
 0x1d7   : > { %3352 = vst [vmem:[%s4509_s7] sm:$0xff] %v3351_v47   ;;  %v2847_v38 = vadd.f32 %v4497_v0, %v2824_v33  ;;  %v2825_v62 = vmul.f32 %v4494_v61, %v2764_v34  ;;  %v3809_v40 = vadd.f32 %v3808_v57, %v3807_v35  ;;  %v3872_v21 = vpop.f32.mrb[105].mxu1  ;;  %v3810_v41 = vpop.f32.mrb[106].mxu0 }
 0x1d8   : > { %v3873_v8 = vadd.f32 %v3872_v21, %v3871_v58  ;;  %v3874_v29 = vpop.f32.mrb[106].mxu1  ;;  %v3811_v44 = vpop.f32.mrb[107].mxu0 }
 0x1d9   : > { %v2848_v45 = vadd.f32 %v4497_v0, %v2825_v62  ;;  %v2672_v9 = vadd.f32 %v3809_v40, %v4450_v14  ;;  %v3812_v3 = vadd.f32 %v3811_v44, %v3810_v41  ;;  %v3875_v50 = vpop.f32.mrb[107].mxu1  ;;  %v2863_v52 = vmax.f32 %v2847_v38, 0.0 }
 0x1da   : > { %v3876_v18 = vadd.f32 %v3875_v50, %v3874_v29 }
 0x1db   : > { %v2864_v56 = vmax.f32 %v2848_v45, 0.0  ;;  %v2769_v13 = vadd.f32 %v3873_v8, %v2672_v9  ;;  %v2675_v59 = vadd.f32 %v3812_v3, %v4453_v37 }
 0x1dd   : > { %v3356_v53 = vpack.c.bf16 %v2864_v56, %v2863_v52  ;;  %v2826_v60 = vmul.f32 %v4494_v61, %v2769_v13  ;;  %v2772_v23 = vadd.f32 %v3876_v18, %v2675_v59  ;;  %v3813_v63 = vpop.f32.mrb[108].mxu0 }
 0x1de   : > { %v3877_v24 = vpop.f32.mrb[108].mxu1  ;;  %v3814_v1 = vpop.f32.mrb[109].mxu0 }
 0x1df   : > { %3388 = vst [vmem:[%s4509_s7 + $0x8] sm:$0xff] %v3356_v53   ;;  %v2849_v31 = vadd.f32 %v4497_v0, %v2826_v60  ;;  %v2827_v14 = vmul.f32 %v4494_v61, %v2772_v23  ;;  %v3815_v49 = vadd.f32 %v3814_v1, %v3813_v63  ;;  %v3878_v36 = vpop.f32.mrb[109].mxu1  ;;  %v3816_v6 = vpop.f32.mrb[110].mxu0 }
 0x1e0   : > { %v3879_v10 = vadd.f32 %v3878_v36, %v3877_v24  ;;  %v3880_v12 = vpop.f32.mrb[110].mxu1  ;;  %v3817_v30 = vpop.f32.mrb[111].mxu0 }
 0x1e1   : > { %v2850_v37 = vadd.f32 %v4497_v0, %v2827_v14  ;;  %v2680_v15 = vadd.f32 %v3815_v49, %v4456_v32  ;;  %v3818_v16 = vadd.f32 %v3817_v30, %v3816_v6  ;;  %v3881_v17 = vpop.f32.mrb[111].mxu1  ;;  %v2865_v19 = vmax.f32 %v2849_v31, 0.0 }
 0x1e2   : > { %v3882_v39 = vadd.f32 %v3881_v17, %v3880_v12 }
 0x1e3   : > { %v2866_v5 = vmax.f32 %v2850_v37, 0.0  ;;  %v2777_v42 = vadd.f32 %v3879_v10, %v2680_v15  ;;  %v2683_v20 = vadd.f32 %v3818_v16, %v4459_v54 }
 0x1e5   : > { %v3361_v22 = vpack.c.bf16 %v2866_v5, %v2865_v19  ;;  %v2828_v55 = vmul.f32 %v4494_v61, %v2777_v42  ;;  %v2780_v7 = vadd.f32 %v3882_v39, %v2683_v20  ;;  %v3819_v26 = vpop.f32.mrb[112].mxu0 }
 0x1e6   : > { %v3883_v27 = vpop.f32.mrb[112].mxu1  ;;  %v3820_v51 = vpop.f32.mrb[113].mxu0 }
 0x1e7   : > { %3389 = vst [vmem:[%s4509_s7 + $0x10] sm:$0xff] %v3361_v22   ;;  %v2851_v47 = vadd.f32 %v4497_v0, %v2828_v55  ;;  %v2829_v32 = vmul.f32 %v4494_v61, %v2780_v7  ;;  %v3821_v33 = vadd.f32 %v3820_v51, %v3819_v26  ;;  %v3884_v34 = vpop.f32.mrb[113].mxu1  ;;  %v3822_v35 = vpop.f32.mrb[114].mxu0 }
 0x1e8   : > { %v3885_v58 = vadd.f32 %v3884_v34, %v3883_v27  ;;  %v3886_v57 = vpop.f32.mrb[114].mxu1  ;;  %v3823_v38 = vpop.f32.mrb[115].mxu0 }
 0x1e9   : > { %v2852_v54 = vadd.f32 %v4497_v0, %v2829_v32  ;;  %v2688_v62 = vadd.f32 %v3821_v33, %v4462_v48  ;;  %v3824_v40 = vadd.f32 %v3823_v38, %v3822_v35  ;;  %v3887_v21 = vpop.f32.mrb[115].mxu1  ;;  %v2867_v8 = vmax.f32 %v2851_v47, 0.0 }
 0x1ea   : > { %v3888_v41 = vadd.f32 %v3887_v21, %v3886_v57 }
 0x1eb   : > { %v2868_v29 = vmax.f32 %v2852_v54, 0.0  ;;  %v2785_v44 = vadd.f32 %v3885_v58, %v2688_v62  ;;  %v2691_v45 = vadd.f32 %v3824_v40, %v4465_v11 }
 0x1ed   : > { %v3366_v9 = vpack.c.bf16 %v2868_v29, %v2867_v8  ;;  %v2830_v3 = vmul.f32 %v4494_v61, %v2785_v44  ;;  %v2788_v50 = vadd.f32 %v3888_v41, %v2691_v45  ;;  %v3825_v18 = vpop.f32.mrb[116].mxu0 }
 0x1ee   : > { %v3889_v52 = vpop.f32.mrb[116].mxu1  ;;  %v3826_v56 = vpop.f32.mrb[117].mxu0 }
 0x1ef   : > { %3390 = vst [vmem:[%s4509_s7 + $0x18] sm:$0xff] %v3366_v9   ;;  %v2853_v13 = vadd.f32 %v4497_v0, %v2830_v3  ;;  %v2831_v48 = vmul.f32 %v4494_v61, %v2788_v50  ;;  %v3827_v59 = vadd.f32 %v3826_v56, %v3825_v18  ;;  %v3890_v53 = vpop.f32.mrb[117].mxu1  ;;  %v3828_v60 = vpop.f32.mrb[118].mxu0 }
 0x1f0   : > { %v3891_v23 = vadd.f32 %v3890_v53, %v3889_v52  ;;  %v3892_v63 = vpop.f32.mrb[118].mxu1  ;;  %v3829_v24 = vpop.f32.mrb[119].mxu0 }
 0x1f1   : > { %v2854_v11 = vadd.f32 %v4497_v0, %v2831_v48  ;;  %v2696_v1 = vadd.f32 %v3827_v59, %v4468_v4  ;;  %v3830_v31 = vadd.f32 %v3829_v24, %v3828_v60  ;;  %v3893_v14 = vpop.f32.mrb[119].mxu1  ;;  %v2869_v36 = vmax.f32 %v2853_v13, 0.0 }
 0x1f2   : > { %v3894_v49 = vadd.f32 %v3893_v14, %v3892_v63 }
 0x1f3   : > { %v2870_v6 = vmax.f32 %v2854_v11, 0.0  ;;  %v2793_v10 = vadd.f32 %v3891_v23, %v2696_v1  ;;  %v2699_v12 = vadd.f32 %v3830_v31, %v4471_v28 }
 0x1f5   : > { %v3371_v30 = vpack.c.bf16 %v2870_v6, %v2869_v36  ;;  %v2832_v37 = vmul.f32 %v4494_v61, %v2793_v10  ;;  %v2796_v15 = vadd.f32 %v3894_v49, %v2699_v12  ;;  %v3831_v16 = vpop.f32.mrb[120].mxu0 }
 0x1f6   : > { %v3895_v17 = vpop.f32.mrb[120].mxu1  ;;  %v3832_v39 = vpop.f32.mrb[121].mxu0 }
 0x1f7   : > { %3391 = vst [vmem:[%s4509_s7 + $0x20] sm:$0xff] %v3371_v30   ;;  %v2855_v19 = vadd.f32 %v4497_v0, %v2832_v37  ;;  %v2833_v4 = vmul.f32 %v4494_v61, %v2796_v15  ;;  %v3833_v5 = vadd.f32 %v3832_v39, %v3831_v16  ;;  %v3896_v42 = vpop.f32.mrb[121].mxu1  ;;  %v3834_v20 = vpop.f32.mrb[122].mxu0 }
 0x1f8   : > { %v3897_v22 = vadd.f32 %v3896_v42, %v3895_v17  ;;  %v3898_v55 = vpop.f32.mrb[122].mxu1  ;;  %v3835_v7 = vpop.f32.mrb[123].mxu0 }
 0x1f9   : > { %v2856_v28 = vadd.f32 %v4497_v0, %v2833_v4  ;;  %v2704_v26 = vadd.f32 %v3833_v5, %v4474_v25  ;;  %v3836_v27 = vadd.f32 %v3835_v7, %v3834_v20  ;;  %v3899_v51 = vpop.f32.mrb[123].mxu1  ;;  %v2871_v32 = vmax.f32 %v2855_v19, 0.0 }
 0x1fa   : > { %v3900_v47 = vadd.f32 %v3899_v51, %v3898_v55 }
 0x1fb   : > { %v2872_v33 = vmax.f32 %v2856_v28, 0.0  ;;  %v2801_v34 = vadd.f32 %v3897_v22, %v2704_v26  ;;  %v2707_v35 = vadd.f32 %v3836_v27, %v4477_v46 }
 0x1fd   : > { %v3376_v58 = vpack.c.bf16 %v2872_v33, %v2871_v32  ;;  %v2834_v57 = vmul.f32 %v4494_v61, %v2801_v34  ;;  %v2804_v38 = vadd.f32 %v3900_v47, %v2707_v35  ;;  %v3837_v54 = vpop.f32.mrb[124].mxu0 }
 0x1fe   : > { %v3901_v62 = vpop.f32.mrb[124].mxu1  ;;  %v3838_v40 = vpop.f32.mrb[125].mxu0 }
 0x1ff   : > { %3392 = vst [vmem:[%s4509_s7 + $0x28] sm:$0xff] %v3376_v58   ;;  %v2857_v21 = vadd.f32 %v4497_v0, %v2834_v57  ;;  %v2835_v25 = vmul.f32 %v4494_v61, %v2804_v38  ;;  %v3839_v41 = vadd.f32 %v3838_v40, %v3837_v54  ;;  %v3902_v8 = vpop.f32.mrb[125].mxu1  ;;  %v3840_v29 = vpop.f32.mrb[126].mxu0 }
 0x200   : > { %v3903_v44 = vadd.f32 %v3902_v8, %v3901_v62  ;;  %v3904_v45 = vpop.f32.mrb[126].mxu1  ;;  %v3841_v9 = vpop.f32.mrb[127].mxu0 }
 0x201   : > { %v2858_v46 = vadd.f32 %v4497_v0, %v2835_v25  ;;  %v2712_v3 = vadd.f32 %v3839_v41, %v4480_v43  ;;  %v3842_v50 = vadd.f32 %v3841_v9, %v3840_v29  ;;  %v3905_v18 = vpop.f32.mrb[127].mxu1  ;;  %v2873_v56 = vmax.f32 %v2857_v21, 0.0 }
 0x202   : > { %v3906_v52 = vadd.f32 %v3905_v18, %v3904_v45 }
 0x203   : > { %v2874_v13 = vmax.f32 %v2858_v46, 0.0  ;;  %v2809_v48 = vadd.f32 %v3903_v44, %v2712_v3  ;;  %v2715_v59 = vadd.f32 %v3842_v50, %v4483_v2 }
 0x205   : > { %v3381_v53 = vpack.c.bf16 %v2874_v13, %v2873_v56  ;;  %v2836_v60 = vmul.f32 %v4494_v61, %v2809_v48  ;;  %v2812_v23 = vadd.f32 %v3906_v52, %v2715_v59 }
 0x207   : > { %3393 = vst [vmem:[%s4509_s7 + $0x30] sm:$0xff] %v3381_v53   ;;  %v2859_v63 = vadd.f32 %v4497_v0, %v2836_v60  ;;  %v2837_v24 = vmul.f32 %v4494_v61, %v2812_v23 }
 0x209   : > { %v2860_v43 = vadd.f32 %v4497_v0, %v2837_v24  ;;  %v2875_v11 = vmax.f32 %v2859_v63, 0.0 }
 0x20b   : > { %v2876_v1 = vmax.f32 %v2860_v43, 0.0 }
 0x20d   : > { %v3386_v31 = vpack.c.bf16 %v2876_v1, %v2875_v11 }
 0x20f   : > { %3394 = vst [vmem:[%s4509_s7 + $0x38] sm:$0xff] %v3386_v31  }
 0x210 PF: > { %s14_s15 = sadd.s32 1, %s4049_s15  }
 0x211   : > { %p11_p4 = scmp.ge.s32.totalorder %s14_s15, 5  }
 0x213   :  { %13 = sbr.rel (!%p11_p4) target bundleno = 1 (0x1), region = 75 }

// kernel: pmgi_v3_forward.4
= control target key start
LH: loop header
LB: loop body
LE: loop exit
PB: predicated region body
PF: predicated region fallthrough
CT: control target
= control target key end

     0   :  { %s9125_s18 = smov 0   ;;  %s9127_s19 = smov 0   ;;  %s11448_s0 = inlined_call_operand.vmem [shape: bf16[3,128,1152], index: 0, kind: input, shape index: {}]   ;;  %s11449_s1 = inlined_call_operand.vmem [shape: bf16[3,1152,1024], index: 1, kind: input, shape index: {}]   ;;  %s11450_s2 = inlined_call_operand.vmem [shape: f32[3,1,1024], index: 2, kind: input, shape index: {}]   ;;  %s11451_s3 = inlined_call_operand.vmem [shape: f32[3,1,1024], index: 3, kind: input, shape index: {}]   ;;  %s11452_s4 = inlined_call_operand.vmem [shape: f32[3,128,1], index: 4, kind: input, shape index: {}]   ;;  %s11453_s5 = inlined_call_operand.vmem [shape: f32[3,2,1024], index: 5, kind: output, shape index: {}]  }
   0x1   :  { %s9129_s20 = smov 0  }
   0x2 LB: > { %s27_s21 = sadd.s32 1, %s9087_s19  ;;  %p7688_p0 = scmp.ge.s32.totalorder %s9091_s20, 1  ;;  %s9091_s20 = sphi %s9129_s20, %s15_s20   ;;  %s9087_s19 = sphi %s9127_s19, %s11748_s19   ;;  %s9083_s18 = sphi %s9125_s18, %s11747_s18  }
   0x3   : > { %p29_p1 = scmp.ge.s32.totalorder %s27_s21, 3  ;;  %p260_p2 = scmp.lt.s32.totalorder %s9091_s20, 4 }
   0x5   : > { %s11750_s21 = smov (%p29_p1, %s27_s21), 0  ;;  %p261_p3 = pnand %p7688_p0, %p260_p2 }
   0x7   : > { %264 = sbr.rel (%p261_p3) target bundleno = 1012 (0x3f4), region = 40 }
   0xe   : > { %p322_p4 = scmp.lt.s32.totalorder %s9083_s18, 2  ;;  %vm7524_vm0 = vcmask 1041409   ;;  %vm7526_vm1 = vcmask 1043459   ;;  %vm7528_vm2 = vcmask 1045509   ;;  %vm7530_vm3 = vcmask 1047559  }
  0x10   : > { %s11752_s18 = smov (!%p322_p4, %s9083_s18), 2 }
  0x11   : > { %s8862_s22 = smul.u32 4608, %s11752_s18  ;;  %s8347_s30 = sshll.u32 %s11752_s18, 7 }
  0x12   : > { %s8861_s26 = smul.u32 576, %s11752_s18  ;;  %s9508_s8 = scalar_lea.vmem %s11452_s4, %s8347_s30 }
  0x13   : > { %s9149_s25 = scalar_lea.vmem %s11449_s1, %s8862_s22  ;;  %s7691_s9 = sshll.u32 %s11752_s18, 3 }
  0x14   : > { %v451_v0 = vld [vmem:[%s9149_s25] sm:$0xff]  ;;  %v452_v2 = vld [vmem:[%s9149_s25 + $0x8] sm:$0xff]  ;;  %s9183_s29 = scalar_lea.vmem %s11448_s0, %s8861_s26  ;;  %s9876_s12 = scalar_lea.vmem %s11450_s2, %s7691_s9 }
  0x15   : > { %v455_v1 = vld [vmem:[%s9149_s25 + $0x20] sm:$0xff]  ;;  %v456_v4 = vld [vmem:[%s9149_s25 + $0x28] sm:$0xff]  ;;  %s9915_s15 = scalar_lea.vmem %s11451_s3, %s7691_s9  ;;  %s8348_s16 = sshll.u32 %s11752_s18, 4 }
  0x16   : > { %v7770_v3 = vcombine.high %v451_v0, %v455_v1  ;;  %v7769_v5 = vcombine.low %v451_v0, %v455_v1  ;;  %v459_v6 = vld [vmem:[%s9149_s25 + $0x40] sm:$0xff]  ;;  %v7772_v8 = vcombine.high %v452_v2, %v456_v4  ;;  %v7771_v9 = vcombine.low %v452_v2, %v456_v4  ;;  %v460_v11 = vld [vmem:[%s9149_s25 + $0x48] sm:$0xff]  ;;  %s11095_s18 = scalar_lea.vmem %s11453_s5, %s8348_s16 }
  0x17   : > { %v463_v7 = vld [vmem:[%s9149_s25 + $0x60] sm:$0xff]  ;;  %v464_v12 = vld [vmem:[%s9149_s25 + $0x68] sm:$0xff] }
  0x18   : > { %v7778_v10 = vcombine.high %v459_v6, %v463_v7  ;;  %v467_v13 = vld [vmem:[%s9149_s25 + $0x80] sm:$0xff]  ;;  %4275 = vmatprep.subr.bf16.mxu0 %v7770_v3  ;;  %v7780_v14 = vcombine.high %v460_v11, %v464_v12  ;;  %v468_v16 = vld [vmem:[%s9149_s25 + $0x88] sm:$0xff]  ;;  %4840 = vmatprep.subr.bf16.mxu1 %v7772_v8  ;;  %v7777_v18 = vcombine.low %v459_v6, %v463_v7 }
  0x19   : > { %v471_v15 = vld [vmem:[%s9149_s25 + $0xa0] sm:$0xff]  ;;  %v472_v17 = vld [vmem:[%s9149_s25 + $0xa8] sm:$0xff]  ;;  %4276 = vmatpush1.bf16.msra.mxu0 %v7769_v5  ;;  %4841 = vmatpush1.bf16.msra.mxu1 %v7771_v9  ;;  %v7779_v19 = vcombine.low %v460_v11, %v464_v12 }
  0x1a   : > { %4277 = vmatprep.subr.bf16.mxu0 %v7778_v10  ;;  %v7786_v20 = vcombine.high %v467_v13, %v471_v15  ;;  %4842 = vmatprep.subr.bf16.mxu1 %v7780_v14  ;;  %v7788_v21 = vcombine.high %v468_v16, %v472_v17  ;;  %v475_v22 = vld [vmem:[%s9149_s25 + $0xc0] sm:$0xff]  ;;  %v476_v24 = vld [vmem:[%s9149_s25 + $0xc8] sm:$0xff]  ;;  %v7785_v26 = vcombine.low %v467_v13, %v471_v15 }
  0x1b   : > { %v479_v23 = vld [vmem:[%s9149_s25 + $0xe0] sm:$0xff]  ;;  %v480_v25 = vld [vmem:[%s9149_s25 + $0xe8] sm:$0xff]  ;;  %v7787_v27 = vcombine.low %v468_v16, %v472_v17 }
  0x1c   : > { %v7794_v28 = vcombine.high %v475_v22, %v479_v23  ;;  %v7796_v29 = vcombine.high %v476_v24, %v480_v25  ;;  %v483_v30 = vld [vmem:[%s9149_s25 + $0x100] sm:$0xff]  ;;  %v484_v32 = vld [vmem:[%s9149_s25 + $0x108] sm:$0xff]  ;;  %v7793_v34 = vcombine.low %v475_v22, %v479_v23  ;;  %v7795_v35 = vcombine.low %v476_v24, %v480_v25 }
  0x1d   : > { %4278 = vmatpush1.bf16.msra.mxu0 %v7777_v18  ;;  %4843 = vmatpush1.bf16.msra.mxu1 %v7779_v19  ;;  %v487_v31 = vld [vmem:[%s9149_s25 + $0x120] sm:$0xff]  ;;  %v488_v33 = vld [vmem:[%s9149_s25 + $0x128] sm:$0xff] }
  0x1e   : > { %4279 = vmatprep.subr.bf16.mxu0 %v7786_v20  ;;  %4844 = vmatprep.subr.bf16.mxu1 %v7788_v21  ;;  %v7802_v36 = vcombine.high %v483_v30, %v487_v31  ;;  %v7804_v37 = vcombine.high %v484_v32, %v488_v33  ;;  %v491_v38 = vld [vmem:[%s9149_s25 + $0x140] sm:$0xff]  ;;  %v492_v40 = vld [vmem:[%s9149_s25 + $0x148] sm:$0xff]  ;;  %v7801_v42 = vcombine.low %v483_v30, %v487_v31 }
  0x1f   : > { %v495_v39 = vld [vmem:[%s9149_s25 + $0x160] sm:$0xff]  ;;  %v496_v41 = vld [vmem:[%s9149_s25 + $0x168] sm:$0xff]  ;;  %v7803_v43 = vcombine.low %v484_v32, %v488_v33 }
  0x20   : > { %v7810_v44 = vcombine.high %v491_v38, %v495_v39  ;;  %v7812_v45 = vcombine.high %v492_v40, %v496_v41  ;;  %v499_v46 = vld [vmem:[%s9149_s25 + $0x180] sm:$0xff]  ;;  %v500_v48 = vld [vmem:[%s9149_s25 + $0x188] sm:$0xff]  ;;  %v7809_v50 = vcombine.low %v491_v38, %v495_v39  ;;  %v7811_v51 = vcombine.low %v492_v40, %v496_v41 }
  0x21   : > { %4280 = vmatpush1.bf16.msra.mxu0 %v7785_v26  ;;  %4845 = vmatpush1.bf16.msra.mxu1 %v7787_v27  ;;  %v503_v47 = vld [vmem:[%s9149_s25 + $0x1a0] sm:$0xff]  ;;  %v504_v49 = vld [vmem:[%s9149_s25 + $0x1a8] sm:$0xff] }
  0x22   : > { %4281 = vmatprep.subr.bf16.mxu0 %v7794_v28  ;;  %4846 = vmatprep.subr.bf16.mxu1 %v7796_v29  ;;  %v7818_v52 = vcombine.high %v499_v46, %v503_v47  ;;  %v7820_v53 = vcombine.high %v500_v48, %v504_v49  ;;  %v507_v54 = vld [vmem:[%s9149_s25 + $0x1c0] sm:$0xff]  ;;  %v508_v57 = vld [vmem:[%s9149_s25 + $0x1c8] sm:$0xff]  ;;  %v7817_v59 = vcombine.low %v499_v46, %v503_v47 }
  0x23   : > { %v511_v55 = vld [vmem:[%s9149_s25 + $0x1e0] sm:$0xff]  ;;  %v512_v58 = vld [vmem:[%s9149_s25 + $0x1e8] sm:$0xff]  ;;  %v7819_v60 = vcombine.low %v500_v48, %v504_v49 }
  0x24   : > { %v8891_v56 = vld [vmem:[%s9183_s29 + $0x4] ss:$36 sps:$4 sm:$0xff]   ;;  %v7826_v61 = vcombine.high %v507_v54, %v511_v55  ;;  %v7828_v62 = vcombine.high %v508_v57, %v512_v58  ;;  %v7825_v3 = vcombine.low %v507_v54, %v511_v55  ;;  %v7827_v4 = vcombine.low %v508_v57, %v512_v58 }
  0x25   : > { %4282 = vmatpush1.bf16.msra.mxu0 %v7793_v34  ;;  %4847 = vmatpush1.bf16.msra.mxu1 %v7795_v35  ;;  %v515_v63 = vld [vmem:[%s9149_s25 + $0x200] sm:$0xff]  ;;  %v516_v1 = vld [vmem:[%s9149_s25 + $0x208] sm:$0xff] }
  0x26   : > { %4283 = vmatprep.subr.bf16.mxu0 %v7802_v36  ;;  %4848 = vmatprep.subr.bf16.mxu1 %v7804_v37  ;;  %v519_v0 = vld [vmem:[%s9149_s25 + $0x220] sm:$0xff]  ;;  %v520_v2 = vld [vmem:[%s9149_s25 + $0x228] sm:$0xff] }
  0x27   : > { %4307 = vmatprep.mubr.bf16.mxu0 %v8891_v56  ;;  %4872 = vmatprep.mubr.bf16.mxu1 %v8891_v56  ;;  %v7834_v5 = vcombine.high %v515_v63, %v519_v0  ;;  %v7836_v6 = vcombine.high %v516_v1, %v520_v2  ;;  %v523_v7 = vld [vmem:[%s9149_s25 + $0x240] sm:$0xff]  ;;  %v524_v9 = vld [vmem:[%s9149_s25 + $0x248] sm:$0xff]  ;;  %v7833_v11 = vcombine.low %v515_v63, %v519_v0 }
  0x28   : > { %v527_v8 = vld [vmem:[%s9149_s25 + $0x260] sm:$0xff]  ;;  %v528_v10 = vld [vmem:[%s9149_s25 + $0x268] sm:$0xff]  ;;  %v7835_v12 = vcombine.low %v516_v1, %v520_v2 }
  0x29   : > { %4284 = vmatpush1.bf16.msra.mxu0 %v7801_v42  ;;  %4849 = vmatpush1.bf16.msra.mxu1 %v7803_v43  ;;  %v7842_v13 = vcombine.high %v523_v7, %v527_v8  ;;  %v7844_v14 = vcombine.high %v524_v9, %v528_v10  ;;  %v531_v15 = vld [vmem:[%s9149_s25 + $0x280] sm:$0xff]  ;;  %v532_v17 = vld [vmem:[%s9149_s25 + $0x288] sm:$0xff]  ;;  %v7841_v19 = vcombine.low %v523_v7, %v527_v8 }
  0x2a   : > { %4285 = vmatprep.subr.bf16.mxu0 %v7810_v44  ;;  %4850 = vmatprep.subr.bf16.mxu1 %v7812_v45  ;;  %v535_v16 = vld [vmem:[%s9149_s25 + $0x2a0] sm:$0xff]  ;;  %v536_v18 = vld [vmem:[%s9149_s25 + $0x2a8] sm:$0xff]  ;;  %v7843_v20 = vcombine.low %v524_v9, %v528_v10 }
  0x2b   : > { %v7850_v21 = vcombine.high %v531_v15, %v535_v16  ;;  %v7852_v22 = vcombine.high %v532_v17, %v536_v18  ;;  %v539_v23 = vld [vmem:[%s9149_s25 + $0x2c0] sm:$0xff]  ;;  %v540_v25 = vld [vmem:[%s9149_s25 + $0x2c8] sm:$0xff]  ;;  %v7849_v27 = vcombine.low %v531_v15, %v535_v16  ;;  %v7851_v28 = vcombine.low %v532_v17, %v536_v18 }
  0x2c   : > { %v543_v24 = vld [vmem:[%s9149_s25 + $0x2e0] sm:$0xff]  ;;  %v544_v26 = vld [vmem:[%s9149_s25 + $0x2e8] sm:$0xff] }
  0x2d   : > { %4286 = vmatpush1.bf16.msra.mxu0 %v7809_v50  ;;  %4851 = vmatpush1.bf16.msra.mxu1 %v7811_v51  ;;  %v7858_v29 = vcombine.high %v539_v23, %v543_v24  ;;  %v7860_v30 = vcombine.high %v540_v25, %v544_v26  ;;  %v547_v31 = vld [vmem:[%s9149_s25 + $0x300] sm:$0xff]  ;;  %v548_v33 = vld [vmem:[%s9149_s25 + $0x308] sm:$0xff]  ;;  %v7857_v35 = vcombine.low %v539_v23, %v543_v24 }
  0x2e   : > { %4287 = vmatprep.subr.bf16.mxu0 %v7818_v52  ;;  %4852 = vmatprep.subr.bf16.mxu1 %v7820_v53  ;;  %v551_v32 = vld [vmem:[%s9149_s25 + $0x320] sm:$0xff]  ;;  %v552_v34 = vld [vmem:[%s9149_s25 + $0x328] sm:$0xff]  ;;  %v7859_v36 = vcombine.low %v540_v25, %v544_v26 }
  0x2f   : > { %v7866_v37 = vcombine.high %v547_v31, %v551_v32  ;;  %v7868_v38 = vcombine.high %v548_v33, %v552_v34  ;;  %v555_v39 = vld [vmem:[%s9149_s25 + $0x340] sm:$0xff]  ;;  %v556_v41 = vld [vmem:[%s9149_s25 + $0x348] sm:$0xff]  ;;  %v7865_v43 = vcombine.low %v547_v31, %v551_v32  ;;  %v7867_v44 = vcombine.low %v548_v33, %v552_v34  ;;  %v8897_v34 = vld [vmem:[%s9183_s29 + $0x94] ss:$36 sps:$4 sm:$0xff]  }
  0x30   : > { %v559_v40 = vld [vmem:[%s9149_s25 + $0x360] sm:$0xff]  ;;  %v560_v42 = vld [vmem:[%s9149_s25 + $0x368] sm:$0xff] }
  0x31   : > { %4288 = vmatpush1.bf16.msra.mxu0 %v7817_v59  ;;  %4853 = vmatpush1.bf16.msra.mxu1 %v7819_v60  ;;  %v7874_v45 = vcombine.high %v555_v39, %v559_v40  ;;  %v7876_v46 = vcombine.high %v556_v41, %v560_v42  ;;  %v563_v47 = vld [vmem:[%s9149_s25 + $0x380] sm:$0xff]  ;;  %v564_v49 = vld [vmem:[%s9149_s25 + $0x388] sm:$0xff]  ;;  %v7873_v51 = vcombine.low %v555_v39, %v559_v40 }
  0x32   : > { %4289 = vmatprep.subr.bf16.mxu0 %v7826_v61  ;;  %4854 = vmatprep.subr.bf16.mxu1 %v7828_v62  ;;  %v567_v48 = vld [vmem:[%s9149_s25 + $0x3a0] sm:$0xff]  ;;  %v568_v50 = vld [vmem:[%s9149_s25 + $0x3a8] sm:$0xff]  ;;  %v7875_v52 = vcombine.low %v556_v41, %v560_v42 }
  0x33   : > { %v7882_v53 = vcombine.high %v563_v47, %v567_v48  ;;  %v7884_v54 = vcombine.high %v564_v49, %v568_v50  ;;  %v571_v55 = vld [vmem:[%s9149_s25 + $0x3c0] sm:$0xff]  ;;  %v572_v57 = vld [vmem:[%s9149_s25 + $0x3c8] sm:$0xff]  ;;  %v7881_v59 = vcombine.low %v563_v47, %v567_v48  ;;  %v7883_v60 = vcombine.low %v564_v49, %v568_v50 }
  0x34   : > { %v575_v56 = vld [vmem:[%s9149_s25 + $0x3e0] sm:$0xff]  ;;  %v576_v58 = vld [vmem:[%s9149_s25 + $0x3e8] sm:$0xff] }
  0x35   : > { %4290 = vmatpush1.bf16.msra.mxu0 %v7825_v3  ;;  %4855 = vmatpush1.bf16.msra.mxu1 %v7827_v4  ;;  %v7890_v61 = vcombine.high %v571_v55, %v575_v56  ;;  %v7892_v62 = vcombine.high %v572_v57, %v576_v58  ;;  %v579_v63 = vld [vmem:[%s9149_s25 + $0x400] sm:$0xff]  ;;  %v580_v1 = vld [vmem:[%s9149_s25 + $0x408] sm:$0xff]  ;;  %v7889_v3 = vcombine.low %v571_v55, %v575_v56 }
  0x36   : > { %4291 = vmatprep.subr.bf16.mxu0 %v7834_v5  ;;  %4856 = vmatprep.subr.bf16.mxu1 %v7836_v6  ;;  %v583_v0 = vld [vmem:[%s9149_s25 + $0x420] sm:$0xff]  ;;  %v584_v2 = vld [vmem:[%s9149_s25 + $0x428] sm:$0xff]  ;;  %v7891_v4 = vcombine.low %v572_v57, %v576_v58 }
  0x37   : > { %v7898_v5 = vcombine.high %v579_v63, %v583_v0  ;;  %v7900_v6 = vcombine.high %v580_v1, %v584_v2  ;;  %v587_v7 = vld [vmem:[%s9149_s25 + $0x440] sm:$0xff]  ;;  %v588_v10 = vld [vmem:[%s9149_s25 + $0x448] sm:$0xff] }
  0x38   : > { %v591_v8 = vld [vmem:[%s9149_s25 + $0x460] sm:$0xff]  ;;  %v8894_v16 = vld [vmem:[%s9183_s29 + $0x4c] ss:$36 sps:$4 sm:$0xff]  }
  0x39   : > { %4292 = vmatpush1.bf16.msra.mxu0 %v7833_v11  ;;  %4857 = vmatpush1.bf16.msra.mxu1 %v7835_v12  ;;  %v8893_v9 = vld [vmem:[%s9183_s29] ss:$36 sps:$4 sm:$0xff]   ;;  %v592_v11 = vld [vmem:[%s9149_s25 + $0x468] sm:$0xff]  ;;  %v7897_v12 = vcombine.low %v579_v63, %v583_v0  ;;  %v8902_v63 = vld [vmem:[%s9183_s29 + $0xd8] ss:$36 sps:$4 sm:$0xff]  }
  0x3a   : > { %4293 = vmatprep.subr.bf16.mxu0 %v7842_v13  ;;  %4858 = vmatprep.subr.bf16.mxu1 %v7844_v14  ;;  %v7899_v13 = vcombine.low %v580_v1, %v584_v2  ;;  %v7906_v14 = vcombine.high %v587_v7, %v591_v8  ;;  %v7908_v15 = vcombine.high %v588_v10, %v592_v11  ;;  %v595_v17 = vld [vmem:[%s9149_s25 + $0x480] sm:$0xff]  ;;  %v624_v47 = vld [vmem:[%s9149_s25 + $0x568] sm:$0xff] }
  0x3b   : > { %v599_v18 = vld [vmem:[%s9149_s25 + $0x4a0] sm:$0xff]  ;;  %v628_v55 = vld [vmem:[%s9149_s25 + $0x588] sm:$0xff] }
  0x3c   : > { %v7914_v23 = vcombine.high %v595_v17, %v599_v18  ;;  %v603_v25 = vld [vmem:[%s9149_s25 + $0x4c0] sm:$0xff]  ;;  %v632_v56 = vld [vmem:[%s9149_s25 + $0x5a8] sm:$0xff] }
  0x3d   : > { %4294 = vmatpush1.bf16.msra.mxu0 %v7841_v19  ;;  %4859 = vmatpush1.bf16.msra.mxu1 %v7843_v20  ;;  %v596_v19 = vld [vmem:[%s9149_s25 + $0x488] sm:$0xff]  ;;  %v607_v26 = vld [vmem:[%s9149_s25 + $0x4e0] sm:$0xff] }
  0x3e   : > { %4295 = vmatprep.subr.bf16.mxu0 %v7850_v21  ;;  %4860 = vmatprep.subr.bf16.mxu1 %v7852_v22  ;;  %v600_v20 = vld [vmem:[%s9149_s25 + $0x4a8] sm:$0xff]  ;;  %v7905_v21 = vcombine.low %v587_v7, %v591_v8  ;;  %v7907_v22 = vcombine.low %v588_v10, %v592_v11  ;;  %v7922_v32 = vcombine.high %v603_v25, %v607_v26  ;;  %v643_v7 = vld [vmem:[%s9149_s25 + $0x600] sm:$0xff] }
  0x3f   : > { %v7916_v24 = vcombine.high %v596_v19, %v600_v20  ;;  %v7915_v31 = vcombine.low %v596_v19, %v600_v20  ;;  %v7921_v39 = vcombine.low %v603_v25, %v607_v26  ;;  %v636_v0 = vld [vmem:[%s9149_s25 + $0x5c8] sm:$0xff]  ;;  %v647_v8 = vld [vmem:[%s9149_s25 + $0x620] sm:$0xff] }
  0x40   : > { %v640_v1 = vld [vmem:[%s9149_s25 + $0x5e8] sm:$0xff]  ;;  %v7961_v20 = vcombine.low %v643_v7, %v647_v8  ;;  %v659_v25 = vld [vmem:[%s9149_s25 + $0x680] sm:$0xff] }
  0x41   : > { %4296 = vmatpush1.bf16.msra.mxu0 %v7849_v27  ;;  %4861 = vmatpush1.bf16.msra.mxu1 %v7851_v28  ;;  %v8896_v27 = vld [vmem:[%s9183_s29 + $0x48] ss:$36 sps:$4 sm:$0xff]   ;;  %v663_v26 = vld [vmem:[%s9149_s25 + $0x6a0] sm:$0xff] }
  0x42   : > { %4297 = vmatprep.subr.bf16.mxu0 %v7858_v29  ;;  %4862 = vmatprep.subr.bf16.mxu1 %v7860_v30  ;;  %v604_v28 = vld [vmem:[%s9149_s25 + $0x4c8] sm:$0xff]  ;;  %v7913_v30 = vcombine.low %v595_v17, %v599_v18  ;;  %v8905_v17 = vld [vmem:[%s9183_s29 + $0x120] ss:$36 sps:$4 sm:$0xff]  }
  0x43   : > { %v608_v29 = vld [vmem:[%s9149_s25 + $0x4e8] sm:$0xff] }
  0x44   : > { %v7924_v33 = vcombine.high %v604_v28, %v608_v29  ;;  %v7923_v40 = vcombine.low %v604_v28, %v608_v29  ;;  %v648_v10 = vld [vmem:[%s9149_s25 + $0x628] sm:$0xff] }
  0x45   : > { %4298 = vmatpush1.bf16.msra.mxu0 %v7857_v35  ;;  %4863 = vmatpush1.bf16.msra.mxu1 %v7859_v36  ;;  %v611_v35 = vld [vmem:[%s9149_s25 + $0x500] sm:$0xff]  ;;  %v652_v18 = vld [vmem:[%s9149_s25 + $0x648] sm:$0xff] }
  0x46   : > { %4299 = vmatprep.subr.bf16.mxu0 %v7866_v37  ;;  %4864 = vmatprep.subr.bf16.mxu1 %v7868_v38  ;;  %v615_v36 = vld [vmem:[%s9149_s25 + $0x520] sm:$0xff]  ;;  %v612_v37 = vld [vmem:[%s9149_s25 + $0x508] sm:$0xff] }
  0x47   : > { %v616_v38 = vld [vmem:[%s9149_s25 + $0x528] sm:$0xff]  ;;  %v7930_v41 = vcombine.high %v611_v35, %v615_v36  ;;  %v7929_v48 = vcombine.low %v611_v35, %v615_v36 }
  0x48   : > { %v7932_v42 = vcombine.high %v612_v37, %v616_v38  ;;  %v7931_v49 = vcombine.low %v612_v37, %v616_v38  ;;  %v656_v19 = vld [vmem:[%s9149_s25 + $0x668] sm:$0xff]  ;;  %v7977_v38 = vcombine.low %v659_v25, %v663_v26 }
  0x49   : > { %4300 = vmatpush1.bf16.msra.mxu0 %v7865_v43  ;;  %4865 = vmatpush1.bf16.msra.mxu1 %v7867_v44  ;;  %v619_v43 = vld [vmem:[%s9149_s25 + $0x540] sm:$0xff]  ;;  %v664_v28 = vld [vmem:[%s9149_s25 + $0x6a8] sm:$0xff] }
  0x4a   : > { %4301 = vmatprep.subr.bf16.mxu0 %v7874_v45  ;;  %4866 = vmatprep.subr.bf16.mxu1 %v7876_v46  ;;  %v623_v44 = vld [vmem:[%s9149_s25 + $0x560] sm:$0xff]  ;;  %v8899_v45 = vld [vmem:[%s9183_s29 + $0x90] ss:$36 sps:$4 sm:$0xff]   ;;  %v620_v46 = vld [vmem:[%s9149_s25 + $0x548] sm:$0xff] }
  0x4b   : > { %v7938_v50 = vcombine.high %v619_v43, %v623_v44  ;;  %v7937_v57 = vcombine.low %v619_v43, %v623_v44  ;;  %v7939_v58 = vcombine.low %v620_v46, %v624_v47  ;;  %v8908_v35 = vld [vmem:[%s9183_s29 + $0x168] ss:$36 sps:$4 sm:$0xff]   ;;  %v675_v43 = vld [vmem:[%s9149_s25 + $0x700] sm:$0xff] }
  0x4c   : > { %v668_v36 = vld [vmem:[%s9149_s25 + $0x6c8] sm:$0xff]  ;;  %v679_v44 = vld [vmem:[%s9149_s25 + $0x720] sm:$0xff] }
  0x4d   : > { %4302 = vmatpush1.bf16.msra.mxu0 %v7873_v51  ;;  %4867 = vmatpush1.bf16.msra.mxu1 %v7875_v52  ;;  %v7940_v51 = vcombine.high %v620_v46, %v624_v47  ;;  %v8900_v52 = vld [vmem:[%s9183_s29 + $0xdc] ss:$36 sps:$4 sm:$0xff]   ;;  %v672_v37 = vld [vmem:[%s9149_s25 + $0x6e8] sm:$0xff] }
  0x4e   : > { %4303 = vmatprep.subr.bf16.mxu0 %v7882_v53  ;;  %4868 = vmatprep.subr.bf16.mxu1 %v7884_v54  ;;  %v627_v53 = vld [vmem:[%s9149_s25 + $0x580] sm:$0xff]  ;;  %v680_v46 = vld [vmem:[%s9149_s25 + $0x728] sm:$0xff] }
  0x4f   : > { %v631_v54 = vld [vmem:[%s9149_s25 + $0x5a0] sm:$0xff] }
  0x50   : > { %v7945_v2 = vcombine.low %v627_v53, %v631_v54 }
  0x51   : > { %4304 = vmatpush1.bf16.msra.mxu0 %v7881_v59  ;;  %4869 = vmatpush1.bf16.msra.mxu1 %v7883_v60  ;;  %v7946_v59 = vcombine.high %v627_v53, %v631_v54  ;;  %v7948_v60 = vcombine.high %v628_v55, %v632_v56  ;;  %v684_v53 = vld [vmem:[%s9149_s25 + $0x748] sm:$0xff] }
  0x52   : > { %4305 = vmatprep.subr.bf16.mxu0 %v7890_v61  ;;  %4870 = vmatprep.subr.bf16.mxu1 %v7892_v62  ;;  %v635_v61 = vld [vmem:[%s9149_s25 + $0x5c0] sm:$0xff] }
  0x53   : > { %v639_v62 = vld [vmem:[%s9149_s25 + $0x5e0] sm:$0xff] }
  0x54   : > { %v7953_v11 = vcombine.low %v635_v61, %v639_v62 }
  0x55   : > { %4306 = vmatpush1.bf16.msra.mxu0 %v7889_v3  ;;  %4871 = vmatpush1.bf16.msra.mxu1 %v7891_v4  ;;  %v7947_v3 = vcombine.low %v628_v55, %v632_v56  ;;  %v7954_v4 = vcombine.high %v635_v61, %v639_v62  ;;  %v688_v55 = vld [vmem:[%s9149_s25 + $0x768] sm:$0xff]  ;;  %v7993_v56 = vcombine.low %v675_v43, %v679_v44  ;;  %v695_v62 = vld [vmem:[%s9149_s25 + $0x7a0] sm:$0xff] }
  0x56   : > { %4388 = vmatprep.subr.bf16.mxu0 %v7898_v5  ;;  %4953 = vmatprep.subr.bf16.mxu1 %v7900_v6  ;;  %v7956_v5 = vcombine.high %v636_v0, %v640_v1  ;;  %v8903_v6 = vld [vmem:[%s9183_s29 + $0x124] ss:$36 sps:$4 sm:$0xff]   ;;  %v8004_v61 = vcombine.high %v684_v53, %v688_v55 }
  0x58   : > { %4308 = vmatmul.mubr.bf16.vlgmr.msra.gmra.mrb[0].mxu0 %v8893_v9  ;;  %4873 = vmatmul.mubr.bf16.vlgmr.msra.gmra.mrb[0].mxu1 %v8893_v9  ;;  %v644_v9 = vld [vmem:[%s9149_s25 + $0x608] sm:$0xff] }
  0x59   : > { %4389 = vmatpush1.bf16.msra.mxu0 %v7897_v12  ;;  %4954 = vmatpush1.bf16.msra.mxu1 %v7899_v13  ;;  %v7955_v12 = vcombine.low %v636_v0, %v640_v1  ;;  %v7962_v13 = vcombine.high %v643_v7, %v647_v8  ;;  %v696_v0 = vld [vmem:[%s9149_s25 + $0x7a8] sm:$0xff] }
  0x5a   : > { %4390 = vmatprep.subr.bf16.mxu0 %v7906_v14  ;;  %4955 = vmatprep.subr.bf16.mxu1 %v7908_v15  ;;  %v7964_v14 = vcombine.high %v644_v9, %v648_v10  ;;  %v651_v15 = vld [vmem:[%s9149_s25 + $0x640] sm:$0xff]  ;;  %v700_v7 = vld [vmem:[%s9149_s25 + $0x7c8] sm:$0xff] }
  0x5b   : > { %4317 = vmatprep.mubr.bf16.mxu0 %v8894_v16  ;;  %4882 = vmatprep.mubr.bf16.mxu1 %v8894_v16  ;;  %v655_v16 = vld [vmem:[%s9149_s25 + $0x660] sm:$0xff] }
  0x5c   : > { %v7969_v29 = vcombine.low %v651_v15, %v655_v16 }
  0x5d   : > { %4391 = vmatpush1.bf16.msra.mxu0 %v7905_v21  ;;  %4956 = vmatpush1.bf16.msra.mxu1 %v7907_v22  ;;  %v7963_v21 = vcombine.low %v644_v9, %v648_v10  ;;  %v7970_v22 = vcombine.high %v651_v15, %v655_v16  ;;  %v704_v9 = vld [vmem:[%s9149_s25 + $0x7e8] sm:$0xff]  ;;  %v711_v16 = vld [vmem:[%s9149_s25 + $0x820] sm:$0xff] }
  0x5e   : > { %4392 = vmatprep.subr.bf16.mxu0 %v7914_v23  ;;  %4957 = vmatprep.subr.bf16.mxu1 %v7916_v24  ;;  %v7972_v23 = vcombine.high %v652_v18, %v656_v19  ;;  %v8906_v24 = vld [vmem:[%s9183_s29 + $0x16c] ss:$36 sps:$4 sm:$0xff]   ;;  %v8020_v15 = vcombine.high %v700_v7, %v704_v9 }
  0x60   : > { %4318 = vmatmul.mubr.bf16.gmra.mrb[4].mxu0 %v8896_v27  ;;  %4883 = vmatmul.mubr.bf16.gmra.mrb[4].mxu1 %v8896_v27  ;;  %v660_v27 = vld [vmem:[%s9149_s25 + $0x688] sm:$0xff] }
  0x61   : > { %4393 = vmatpush1.bf16.msra.mxu0 %v7913_v30  ;;  %4958 = vmatpush1.bf16.msra.mxu1 %v7915_v31  ;;  %v7971_v30 = vcombine.low %v652_v18, %v656_v19  ;;  %v7978_v31 = vcombine.high %v659_v25, %v663_v26  ;;  %v712_v18 = vld [vmem:[%s9149_s25 + $0x828] sm:$0xff] }
  0x62   : > { %4394 = vmatprep.subr.bf16.mxu0 %v7922_v32  ;;  %4959 = vmatprep.subr.bf16.mxu1 %v7924_v33  ;;  %v7980_v32 = vcombine.high %v660_v27, %v664_v28  ;;  %v667_v33 = vld [vmem:[%s9149_s25 + $0x6c0] sm:$0xff]  ;;  %v716_v25 = vld [vmem:[%s9149_s25 + $0x848] sm:$0xff] }
  0x63   : > { %4327 = vmatprep.mubr.bf16.mxu0 %v8897_v34  ;;  %4892 = vmatprep.mubr.bf16.mxu1 %v8897_v34  ;;  %v671_v34 = vld [vmem:[%s9149_s25 + $0x6e0] sm:$0xff] }
  0x64   : > { %v7985_v47 = vcombine.low %v667_v33, %v671_v34 }
  0x65   : > { %4395 = vmatpush1.bf16.msra.mxu0 %v7921_v39  ;;  %4960 = vmatpush1.bf16.msra.mxu1 %v7923_v40  ;;  %v7979_v39 = vcombine.low %v660_v27, %v664_v28  ;;  %v7986_v40 = vcombine.high %v667_v33, %v671_v34  ;;  %v720_v27 = vld [vmem:[%s9149_s25 + $0x868] sm:$0xff]  ;;  %v723_v33 = vld [vmem:[%s9149_s25 + $0x880] sm:$0xff] }
  0x66   : > { %4396 = vmatprep.subr.bf16.mxu0 %v7930_v41  ;;  %4961 = vmatprep.subr.bf16.mxu1 %v7932_v42  ;;  %v7988_v41 = vcombine.high %v668_v36, %v672_v37  ;;  %v8909_v42 = vld [vmem:[%s9183_s29 + $0x1b4] ss:$36 sps:$4 sm:$0xff]   ;;  %v727_v34 = vld [vmem:[%s9149_s25 + $0x8a0] sm:$0xff] }
  0x68   : > { %4328 = vmatmul.mubr.bf16.gmra.mrb[8].mxu0 %v8899_v45  ;;  %4893 = vmatmul.mubr.bf16.gmra.mrb[8].mxu1 %v8899_v45  ;;  %v676_v45 = vld [vmem:[%s9149_s25 + $0x708] sm:$0xff] }
  0x69   : > { %4397 = vmatpush1.bf16.msra.mxu0 %v7929_v48  ;;  %4962 = vmatpush1.bf16.msra.mxu1 %v7931_v49  ;;  %v7987_v48 = vcombine.low %v668_v36, %v672_v37  ;;  %v8911_v49 = vld [vmem:[%s9183_s29 + $0x1b0] ss:$36 sps:$4 sm:$0xff]   ;;  %v7996_v54 = vcombine.high %v676_v45, %v680_v46  ;;  %v728_v36 = vld [vmem:[%s9149_s25 + $0x8a8] sm:$0xff] }
  0x6a   : > { %4398 = vmatprep.subr.bf16.mxu0 %v7938_v50  ;;  %4963 = vmatprep.subr.bf16.mxu1 %v7940_v51  ;;  %v7994_v50 = vcombine.high %v675_v43, %v679_v44  ;;  %v683_v51 = vld [vmem:[%s9149_s25 + $0x740] sm:$0xff]  ;;  %v8920_v43 = vld [vmem:[%s9183_s29 + $0x50] ss:$36 sps:$4 sm:$0xff]   ;;  %v732_v44 = vld [vmem:[%s9149_s25 + $0x8c8] sm:$0xff] }
  0x6b   : > { %4337 = vmatprep.mubr.bf16.mxu0 %v8900_v52  ;;  %4902 = vmatprep.mubr.bf16.mxu1 %v8900_v52  ;;  %v687_v52 = vld [vmem:[%s9149_s25 + $0x760] sm:$0xff] }
  0x6c   : > { %v8001_v1 = vcombine.low %v683_v51, %v687_v52 }
  0x6d   : > { %4399 = vmatpush1.bf16.msra.mxu0 %v7937_v57  ;;  %4964 = vmatpush1.bf16.msra.mxu1 %v7939_v58  ;;  %v7995_v57 = vcombine.low %v676_v45, %v680_v46  ;;  %v8002_v58 = vcombine.high %v683_v51, %v687_v52  ;;  %v736_v45 = vld [vmem:[%s9149_s25 + $0x8e8] sm:$0xff]  ;;  %v8041_v46 = vcombine.low %v723_v33, %v727_v34  ;;  %v739_v51 = vld [vmem:[%s9149_s25 + $0x900] sm:$0xff] }
  0x6e   : > { %4400 = vmatprep.subr.bf16.mxu0 %v7946_v59  ;;  %4965 = vmatprep.subr.bf16.mxu1 %v7948_v60  ;;  %v8912_v59 = vld [vmem:[%s9183_s29 + $0x1fc] ss:$36 sps:$4 sm:$0xff]  }
  0x6f   : > { %v691_v60 = vld [vmem:[%s9149_s25 + $0x780] sm:$0xff] }
  0x70   : > { %4338 = vmatmul.mubr.bf16.gmra.mrb[12].mxu0 %v8902_v63  ;;  %4903 = vmatmul.mubr.bf16.gmra.mrb[12].mxu1 %v8902_v63  ;;  %v692_v63 = vld [vmem:[%s9149_s25 + $0x788] sm:$0xff]  ;;  %v8009_v10 = vcombine.low %v691_v60, %v695_v62  ;;  %v743_v52 = vld [vmem:[%s9149_s25 + $0x920] sm:$0xff] }
  0x71   : > { %4401 = vmatpush1.bf16.msra.mxu0 %v7945_v2  ;;  %4966 = vmatpush1.bf16.msra.mxu1 %v7947_v3  ;;  %v8003_v2 = vcombine.low %v684_v53, %v688_v55  ;;  %v8914_v3 = vld [vmem:[%s9183_s29 + $0x1f8] ss:$36 sps:$4 sm:$0xff]   ;;  %v8012_v8 = vcombine.high %v692_v63, %v696_v0  ;;  %v740_v53 = vld [vmem:[%s9149_s25 + $0x908] sm:$0xff] }
  0x72   : > { %4402 = vmatprep.subr.bf16.mxu0 %v7954_v4  ;;  %4967 = vmatprep.subr.bf16.mxu1 %v7956_v5  ;;  %v8010_v4 = vcombine.high %v691_v60, %v695_v62  ;;  %v699_v5 = vld [vmem:[%s9149_s25 + $0x7c0] sm:$0xff]  ;;  %v748_v62 = vld [vmem:[%s9149_s25 + $0x948] sm:$0xff] }
  0x73   : > { %4347 = vmatprep.mubr.bf16.mxu0 %v8903_v6  ;;  %4912 = vmatprep.mubr.bf16.mxu1 %v8903_v6  ;;  %v703_v6 = vld [vmem:[%s9149_s25 + $0x7e0] sm:$0xff] }
  0x74   : > { %v8017_v19 = vcombine.low %v699_v5, %v703_v6  ;;  %v751_v60 = vld [vmem:[%s9149_s25 + $0x960] sm:$0xff] }
  0x75   : > { %4403 = vmatpush1.bf16.msra.mxu0 %v7953_v11  ;;  %4968 = vmatpush1.bf16.msra.mxu1 %v7955_v12  ;;  %v8011_v11 = vcombine.low %v692_v63, %v696_v0  ;;  %v8018_v12 = vcombine.high %v699_v5, %v703_v6  ;;  %v752_v63 = vld [vmem:[%s9149_s25 + $0x968] sm:$0xff]  ;;  %v8057_v0 = vcombine.low %v739_v51, %v743_v52  ;;  %v755_v5 = vld [vmem:[%s9149_s25 + $0x980] sm:$0xff] }
  0x76   : > { %4404 = vmatprep.subr.bf16.mxu0 %v7962_v13  ;;  %4969 = vmatprep.subr.bf16.mxu1 %v7964_v14  ;;  %v8917_v13 = vld [vmem:[%s9183_s29 + $0xc] ss:$36 sps:$4 sm:$0xff]   ;;  %v707_v14 = vld [vmem:[%s9149_s25 + $0x800] sm:$0xff] }
  0x77   : > { %v8025_v28 = vcombine.low %v707_v14, %v711_v16  ;;  %v759_v6 = vld [vmem:[%s9149_s25 + $0x9a0] sm:$0xff] }
  0x78   : > { %4348 = vmatmul.mubr.bf16.gmra.mrb[16].mxu0 %v8905_v17  ;;  %4913 = vmatmul.mubr.bf16.gmra.mrb[16].mxu1 %v8905_v17  ;;  %v708_v17 = vld [vmem:[%s9149_s25 + $0x808] sm:$0xff] }
  0x79   : > { %4405 = vmatpush1.bf16.msra.mxu0 %v7961_v20  ;;  %4970 = vmatpush1.bf16.msra.mxu1 %v7963_v21  ;;  %v8019_v20 = vcombine.low %v700_v7, %v704_v9  ;;  %v8915_v21 = vld [vmem:[%s9183_s29 + $0x8] ss:$36 sps:$4 sm:$0xff]   ;;  %v8028_v26 = vcombine.high %v708_v17, %v712_v18 }
  0x7a   : > { %4406 = vmatprep.subr.bf16.mxu0 %v7970_v22  ;;  %4971 = vmatprep.subr.bf16.mxu1 %v7972_v23  ;;  %v8026_v22 = vcombine.high %v707_v14, %v711_v16  ;;  %v715_v23 = vld [vmem:[%s9149_s25 + $0x840] sm:$0xff]  ;;  %v756_v7 = vld [vmem:[%s9149_s25 + $0x988] sm:$0xff] }
  0x7b   : > { %4357 = vmatprep.mubr.bf16.mxu0 %v8906_v24  ;;  %4922 = vmatprep.mubr.bf16.mxu1 %v8906_v24  ;;  %v719_v24 = vld [vmem:[%s9149_s25 + $0x860] sm:$0xff]  ;;  %v764_v16 = vld [vmem:[%s9149_s25 + $0x9c8] sm:$0xff] }
  0x7c   : > { %v8033_v37 = vcombine.low %v715_v23, %v719_v24  ;;  %v767_v14 = vld [vmem:[%s9149_s25 + $0x9e0] sm:$0xff] }
  0x7d   : > { %4407 = vmatpush1.bf16.msra.mxu0 %v7969_v29  ;;  %4972 = vmatpush1.bf16.msra.mxu1 %v7971_v30  ;;  %v8027_v29 = vcombine.low %v708_v17, %v712_v18  ;;  %v8034_v30 = vcombine.high %v715_v23, %v719_v24  ;;  %v768_v17 = vld [vmem:[%s9149_s25 + $0x9e8] sm:$0xff]  ;;  %v8073_v18 = vcombine.low %v755_v5, %v759_v6  ;;  %v771_v23 = vld [vmem:[%s9149_s25 + $0xa00] sm:$0xff] }
  0x7e   : > { %4408 = vmatprep.subr.bf16.mxu0 %v7978_v31  ;;  %4973 = vmatprep.subr.bf16.mxu1 %v7980_v32  ;;  %v8036_v31 = vcombine.high %v716_v25, %v720_v27  ;;  %v8918_v32 = vld [vmem:[%s9183_s29 + $0x54] ss:$36 sps:$4 sm:$0xff]   ;;  %v775_v24 = vld [vmem:[%s9149_s25 + $0xa20] sm:$0xff] }
  0x80   : > { %4358 = vmatmul.mubr.bf16.gmra.mrb[20].mxu0 %v8908_v35  ;;  %4923 = vmatmul.mubr.bf16.gmra.mrb[20].mxu1 %v8908_v35  ;;  %v724_v35 = vld [vmem:[%s9149_s25 + $0x888] sm:$0xff] }
  0x81   : > { %4409 = vmatpush1.bf16.msra.mxu0 %v7977_v38  ;;  %4974 = vmatpush1.bf16.msra.mxu1 %v7979_v39  ;;  %v8035_v38 = vcombine.low %v716_v25, %v720_v27  ;;  %v8042_v39 = vcombine.high %v723_v33, %v727_v34  ;;  %v772_v25 = vld [vmem:[%s9149_s25 + $0xa08] sm:$0xff] }
  0x82   : > { %4410 = vmatprep.subr.bf16.mxu0 %v7986_v40  ;;  %4975 = vmatprep.subr.bf16.mxu1 %v7988_v41  ;;  %v8044_v40 = vcombine.high %v724_v35, %v728_v36  ;;  %v731_v41 = vld [vmem:[%s9149_s25 + $0x8c0] sm:$0xff]  ;;  %v8929_v33 = vld [vmem:[%s9183_s29 + $0x128] ss:$36 sps:$4 sm:$0xff]  }
  0x83   : > { %4367 = vmatprep.mubr.bf16.mxu0 %v8909_v42  ;;  %4932 = vmatprep.mubr.bf16.mxu1 %v8909_v42  ;;  %v735_v42 = vld [vmem:[%s9149_s25 + $0x8e0] sm:$0xff]  ;;  %v780_v34 = vld [vmem:[%s9149_s25 + $0xa48] sm:$0xff] }
  0x84   : > { %v8049_v55 = vcombine.low %v731_v41, %v735_v42 }
  0x85   : > { %4411 = vmatpush1.bf16.msra.mxu0 %v7985_v47  ;;  %4976 = vmatpush1.bf16.msra.mxu1 %v7987_v48  ;;  %v8043_v47 = vcombine.low %v724_v35, %v728_v36  ;;  %v8050_v48 = vcombine.high %v731_v41, %v735_v42  ;;  %v784_v35 = vld [vmem:[%s9149_s25 + $0xa68] sm:$0xff]  ;;  %v8089_v36 = vcombine.low %v771_v23, %v775_v24  ;;  %v787_v41 = vld [vmem:[%s9149_s25 + $0xa80] sm:$0xff] }
  0x86   : > { %4412 = vmatprep.subr.bf16.mxu0 %v7994_v50  ;;  %4977 = vmatprep.subr.bf16.mxu1 %v7996_v54  ;;  %v8921_v50 = vld [vmem:[%s9183_s29 + $0x9c] ss:$36 sps:$4 sm:$0xff]   ;;  %v744_v54 = vld [vmem:[%s9149_s25 + $0x928] sm:$0xff] }
  0x87   : > { %v791_v42 = vld [vmem:[%s9149_s25 + $0xaa0] sm:$0xff] }
  0x88   : > { %4368 = vmatmul.mubr.bf16.gmra.mrb[24].mxu0 %v8911_v49  ;;  %4933 = vmatmul.mubr.bf16.gmra.mrb[24].mxu1 %v8911_v49  ;;  %v8052_v49 = vcombine.high %v732_v44, %v736_v45 }
  0x89   : > { %4413 = vmatpush1.bf16.msra.mxu0 %v7993_v56  ;;  %4978 = vmatpush1.bf16.msra.mxu1 %v7995_v57  ;;  %v8051_v56 = vcombine.low %v732_v44, %v736_v45  ;;  %v8058_v57 = vcombine.high %v739_v51, %v743_v52  ;;  %v792_v44 = vld [vmem:[%s9149_s25 + $0xaa8] sm:$0xff]  ;;  %v8932_v51 = vld [vmem:[%s9183_s29 + $0x170] ss:$36 sps:$4 sm:$0xff]  }
  0x8a   : > { %4414 = vmatprep.subr.bf16.mxu0 %v8002_v58  ;;  %4979 = vmatprep.subr.bf16.mxu1 %v8004_v61  ;;  %v8060_v58 = vcombine.high %v740_v53, %v744_v54  ;;  %v8923_v61 = vld [vmem:[%s9183_s29 + $0x98] ss:$36 sps:$4 sm:$0xff]   ;;  %v796_v52 = vld [vmem:[%s9149_s25 + $0xac8] sm:$0xff] }
  0x8b   : > { %4377 = vmatprep.mubr.bf16.mxu0 %v8912_v59  ;;  %4942 = vmatprep.mubr.bf16.mxu1 %v8912_v59  ;;  %v747_v59 = vld [vmem:[%s9149_s25 + $0x940] sm:$0xff] }
  0x8c   : > { %v8065_v9 = vcombine.low %v747_v59, %v751_v60 }
  0x8d   : > { %4415 = vmatpush1.bf16.msra.mxu0 %v8001_v1  ;;  %4980 = vmatpush1.bf16.msra.mxu1 %v8003_v2  ;;  %v8059_v1 = vcombine.low %v740_v53, %v744_v54  ;;  %v8066_v2 = vcombine.high %v747_v59, %v751_v60  ;;  %v800_v53 = vld [vmem:[%s9149_s25 + $0xae8] sm:$0xff]  ;;  %v8105_v54 = vcombine.low %v787_v41, %v791_v42  ;;  %v803_v59 = vld [vmem:[%s9149_s25 + $0xb00] sm:$0xff] }
  0x8e   : > { %4416 = vmatprep.subr.bf16.mxu0 %v8010_v4  ;;  %4981 = vmatprep.subr.bf16.mxu1 %v8012_v8  ;;  %v8924_v4 = vld [vmem:[%s9183_s29 + $0xe4] ss:$36 sps:$4 sm:$0xff]  }
  0x8f   : > { %v760_v8 = vld [vmem:[%s9149_s25 + $0x9a8] sm:$0xff]  ;;  %v807_v60 = vld [vmem:[%s9149_s25 + $0xb20] sm:$0xff] }
  0x90   : > { %4378 = vmatmul.mubr.bf16.gmra.mrb[28].mxu0 %v8914_v3  ;;  %4943 = vmatmul.mubr.bf16.gmra.mrb[28].mxu1 %v8914_v3  ;;  %v8068_v3 = vcombine.high %v748_v62, %v752_v63 }
  0x91   : > { %4417 = vmatpush1.bf16.msra.mxu0 %v8009_v10  ;;  %4982 = vmatpush1.bf16.msra.mxu1 %v8011_v11  ;;  %v8067_v10 = vcombine.low %v748_v62, %v752_v63  ;;  %v8074_v11 = vcombine.high %v755_v5, %v759_v6  ;;  %v808_v62 = vld [vmem:[%s9149_s25 + $0xb28] sm:$0xff]  ;;  %v8935_v5 = vld [vmem:[%s9183_s29 + $0x1b8] ss:$36 sps:$4 sm:$0xff]  }
  0x92   : > { %4418 = vmatprep.subr.bf16.mxu0 %v8018_v12  ;;  %4983 = vmatprep.subr.bf16.mxu1 %v8020_v15  ;;  %v8076_v12 = vcombine.high %v756_v7, %v760_v8  ;;  %v8926_v15 = vld [vmem:[%s9183_s29 + $0xe0] ss:$36 sps:$4 sm:$0xff]   ;;  %v812_v6 = vld [vmem:[%s9149_s25 + $0xb48] sm:$0xff] }
  0x93   : > { %4420 = vmatprep.mubr.bf16.mxu0 %v8917_v13  ;;  %4985 = vmatprep.mubr.bf16.mxu1 %v8917_v13  ;;  %v763_v13 = vld [vmem:[%s9149_s25 + $0x9c0] sm:$0xff] }
  0x94   : > { %v8081_v27 = vcombine.low %v763_v13, %v767_v14 }
  0x95   : > { %4419 = vmatpush1.bf16.msra.mxu0 %v8017_v19  ;;  %4984 = vmatpush1.bf16.msra.mxu1 %v8019_v20  ;;  %v8075_v19 = vcombine.low %v756_v7, %v760_v8  ;;  %v8082_v20 = vcombine.high %v763_v13, %v767_v14  ;;  %v816_v7 = vld [vmem:[%s9149_s25 + $0xb68] sm:$0xff]  ;;  %v8121_v8 = vcombine.low %v803_v59, %v807_v60  ;;  %v819_v13 = vld [vmem:[%s9149_s25 + $0xb80] sm:$0xff] }
  0x96   : > { %4501 = vmatprep.subr.bf16.mxu0 %v8026_v22  ;;  %5066 = vmatprep.subr.bf16.mxu1 %v8028_v26  ;;  %v8927_v22 = vld [vmem:[%s9183_s29 + $0x12c] ss:$36 sps:$4 sm:$0xff]   ;;  %v823_v14 = vld [vmem:[%s9149_s25 + $0xba0] sm:$0xff] }
  0x97   : > { %v776_v26 = vld [vmem:[%s9149_s25 + $0xa28] sm:$0xff] }
  0x98   : > { %4421 = vmatmul.mubr.bf16.vlgmr.msra.gmra.mrb[0].mxu0 %v8915_v21  ;;  %4986 = vmatmul.mubr.bf16.vlgmr.msra.gmra.mrb[0].mxu1 %v8915_v21  ;;  %v8084_v21 = vcombine.high %v764_v16, %v768_v17 }
  0x99   : > { %4502 = vmatpush1.bf16.msra.mxu0 %v8025_v28  ;;  %5067 = vmatpush1.bf16.msra.mxu1 %v8027_v29  ;;  %v8083_v28 = vcombine.low %v764_v16, %v768_v17  ;;  %v8090_v29 = vcombine.high %v771_v23, %v775_v24  ;;  %v824_v16 = vld [vmem:[%s9149_s25 + $0xba8] sm:$0xff]  ;;  %v8938_v23 = vld [vmem:[%s9183_s29 + $0x200] ss:$36 sps:$4 sm:$0xff]  }
  0x9a   : > { %4503 = vmatprep.subr.bf16.mxu0 %v8034_v30  ;;  %5068 = vmatprep.subr.bf16.mxu1 %v8036_v31  ;;  %v8092_v30 = vcombine.high %v772_v25, %v776_v26  ;;  %v779_v31 = vld [vmem:[%s9149_s25 + $0xa40] sm:$0xff]  ;;  %v828_v24 = vld [vmem:[%s9149_s25 + $0xbc8] sm:$0xff] }
  0x9b   : > { %4430 = vmatprep.mubr.bf16.mxu0 %v8918_v32  ;;  %4995 = vmatprep.mubr.bf16.mxu1 %v8918_v32  ;;  %v783_v32 = vld [vmem:[%s9149_s25 + $0xa60] sm:$0xff] }
  0x9c   : > { %v8097_v45 = vcombine.low %v779_v31, %v783_v32 }
  0x9d   : > { %4504 = vmatpush1.bf16.msra.mxu0 %v8033_v37  ;;  %5069 = vmatpush1.bf16.msra.mxu1 %v8035_v38  ;;  %v8091_v37 = vcombine.low %v772_v25, %v776_v26  ;;  %v8098_v38 = vcombine.high %v779_v31, %v783_v32  ;;  %v832_v25 = vld [vmem:[%s9149_s25 + $0xbe8] sm:$0xff]  ;;  %v8137_v26 = vcombine.low %v819_v13, %v823_v14  ;;  %v835_v31 = vld [vmem:[%s9149_s25 + $0xc00] sm:$0xff] }
  0x9e   : > { %4505 = vmatprep.subr.bf16.mxu0 %v8042_v39  ;;  %5070 = vmatprep.subr.bf16.mxu1 %v8044_v40  ;;  %v8100_v39 = vcombine.high %v780_v34, %v784_v35  ;;  %v8930_v40 = vld [vmem:[%s9183_s29 + $0x174] ss:$36 sps:$4 sm:$0xff]   ;;  %v839_v32 = vld [vmem:[%s9149_s25 + $0xc20] sm:$0xff] }
  0xa0   : > { %4431 = vmatmul.mubr.bf16.gmra.mrb[4].mxu0 %v8920_v43  ;;  %4996 = vmatmul.mubr.bf16.gmra.mrb[4].mxu1 %v8920_v43  ;;  %v788_v43 = vld [vmem:[%s9149_s25 + $0xa88] sm:$0xff] }
  0xa1   : > { %4506 = vmatpush1.bf16.msra.mxu0 %v8041_v46  ;;  %5071 = vmatpush1.bf16.msra.mxu1 %v8043_v47  ;;  %v8099_v46 = vcombine.low %v780_v34, %v784_v35  ;;  %v8106_v47 = vcombine.high %v787_v41, %v791_v42  ;;  %v840_v34 = vld [vmem:[%s9149_s25 + $0xc28] sm:$0xff]  ;;  %v8939_v41 = vld [vmem:[%s9183_s29 + $0x10] ss:$36 sps:$4 sm:$0xff]  }
  0xa2   : > { %4507 = vmatprep.subr.bf16.mxu0 %v8050_v48  ;;  %5072 = vmatprep.subr.bf16.mxu1 %v8052_v49  ;;  %v8108_v48 = vcombine.high %v788_v43, %v792_v44  ;;  %v795_v49 = vld [vmem:[%s9149_s25 + $0xac0] sm:$0xff]  ;;  %v844_v42 = vld [vmem:[%s9149_s25 + $0xc48] sm:$0xff] }
  0xa3   : > { %4440 = vmatprep.mubr.bf16.mxu0 %v8921_v50  ;;  %5005 = vmatprep.mubr.bf16.mxu1 %v8921_v50  ;;  %v799_v50 = vld [vmem:[%s9149_s25 + $0xae0] sm:$0xff] }
  0xa4   : > { %v8113_v63 = vcombine.low %v795_v49, %v799_v50 }
  0xa5   : > { %4508 = vmatpush1.bf16.msra.mxu0 %v8049_v55  ;;  %5073 = vmatpush1.bf16.msra.mxu1 %v8051_v56  ;;  %v8107_v55 = vcombine.low %v788_v43, %v792_v44  ;;  %v8114_v56 = vcombine.high %v795_v49, %v799_v50  ;;  %v848_v43 = vld [vmem:[%s9149_s25 + $0xc68] sm:$0xff]  ;;  %v11454_v44 = vmov 0   ;;  %v8942_v49 = vld [vmem:[%s9183_s29 + $0x5c] ss:$36 sps:$4 sm:$0xff]  }
  0xa6   : > { %4509 = vmatprep.subr.bf16.mxu0 %v8058_v57  ;;  %5074 = vmatprep.subr.bf16.mxu1 %v8060_v58  ;;  %v8116_v57 = vcombine.high %v796_v52, %v800_v53  ;;  %v8933_v58 = vld [vmem:[%s9183_s29 + $0x1bc] ss:$36 sps:$4 sm:$0xff]  }
  0xa7   : > { %8890 = vset.pattern.permute.xlu1 %v11454_v44  ;;  %8889 = vset.pattern.permute.xlu0 %v11454_v44  ;;  %v851_v50 = vld [vmem:[%s9149_s25 + $0xc80] sm:$0xff] }
  0xa8   : > { %4441 = vmatmul.mubr.bf16.gmra.mrb[8].mxu0 %v8923_v61  ;;  %5006 = vmatmul.mubr.bf16.gmra.mrb[8].mxu1 %v8923_v61  ;;  %v804_v61 = vld [vmem:[%s9149_s25 + $0xb08] sm:$0xff] }
  0xa9   : > { %4510 = vmatpush1.bf16.msra.mxu0 %v8057_v0  ;;  %5075 = vmatpush1.bf16.msra.mxu1 %v8059_v1  ;;  %v8115_v0 = vcombine.low %v796_v52, %v800_v53  ;;  %v8122_v1 = vcombine.high %v803_v59, %v807_v60  ;;  %v852_v52 = vld [vmem:[%s9149_s25 + $0xc88] sm:$0xff]  ;;  %v863_v59 = vld [vmem:[%s9149_s25 + $0xce0] sm:$0xff]  ;;  %v8944_v60 = vld [vmem:[%s9183_s29 + $0x58] ss:$36 sps:$4 sm:$0xff]  }
  0xaa   : > { %4511 = vmatprep.subr.bf16.mxu0 %v8066_v2  ;;  %5076 = vmatprep.subr.bf16.mxu1 %v8068_v3  ;;  %v8124_v2 = vcombine.high %v804_v61, %v808_v62  ;;  %v811_v3 = vld [vmem:[%s9149_s25 + $0xb40] sm:$0xff]  ;;  %v856_v53 = vld [vmem:[%s9149_s25 + $0xca8] sm:$0xff] }
  0xab   : > { %4450 = vmatprep.mubr.bf16.mxu0 %v8924_v4  ;;  %5015 = vmatprep.mubr.bf16.mxu1 %v8924_v4  ;;  %v815_v4 = vld [vmem:[%s9149_s25 + $0xb60] sm:$0xff] }
  0xac   : > { %v8129_v17 = vcombine.low %v811_v3, %v815_v4 }
  0xad   : > { %4512 = vmatpush1.bf16.msra.mxu0 %v8065_v9  ;;  %5077 = vmatpush1.bf16.msra.mxu1 %v8067_v10  ;;  %v8123_v9 = vcombine.low %v804_v61, %v808_v62  ;;  %v8130_v10 = vcombine.high %v811_v3, %v815_v4  ;;  %v860_v61 = vld [vmem:[%s9149_s25 + $0xcc8] sm:$0xff]  ;;  %v867_v4 = vld [vmem:[%s9149_s25 + $0xd00] sm:$0xff] }
  0xae   : > { %4513 = vmatprep.subr.bf16.mxu0 %v8074_v11  ;;  %5078 = vmatprep.subr.bf16.mxu1 %v8076_v12  ;;  %v8132_v11 = vcombine.high %v812_v6, %v816_v7  ;;  %v8936_v12 = vld [vmem:[%s9183_s29 + $0x204] ss:$36 sps:$4 sm:$0xff]  }
  0xaf   : > { %v864_v62 = vld [vmem:[%s9149_s25 + $0xce8] sm:$0xff] }
  0xb0   : > { %4451 = vmatmul.mubr.bf16.gmra.mrb[12].mxu0 %v8926_v15  ;;  %5016 = vmatmul.mubr.bf16.gmra.mrb[12].mxu1 %v8926_v15  ;;  %v820_v15 = vld [vmem:[%s9149_s25 + $0xb88] sm:$0xff] }
  0xb1   : > { %4514 = vmatpush1.bf16.msra.mxu0 %v8073_v18  ;;  %5079 = vmatpush1.bf16.msra.mxu1 %v8075_v19  ;;  %v8131_v18 = vcombine.low %v812_v6, %v816_v7  ;;  %v8138_v19 = vcombine.high %v819_v13, %v823_v14  ;;  %v8945_v3 = vld [vmem:[%s9183_s29 + $0xa4] ss:$36 sps:$4 sm:$0xff]  }
  0xb2   : > { %4515 = vmatprep.subr.bf16.mxu0 %v8082_v20  ;;  %5080 = vmatprep.subr.bf16.mxu1 %v8084_v21  ;;  %v8140_v20 = vcombine.high %v820_v15, %v824_v16  ;;  %v827_v21 = vld [vmem:[%s9149_s25 + $0xbc0] sm:$0xff]  ;;  %v868_v6 = vld [vmem:[%s9149_s25 + $0xd08] sm:$0xff] }
  0xb3   : > { %4460 = vmatprep.mubr.bf16.mxu0 %v8927_v22  ;;  %5025 = vmatprep.mubr.bf16.mxu1 %v8927_v22  ;;  %v831_v22 = vld [vmem:[%s9149_s25 + $0xbe0] sm:$0xff]  ;;  %v872_v7 = vld [vmem:[%s9149_s25 + $0xd28] sm:$0xff] }
  0xb4   : > { %v8145_v35 = vcombine.low %v827_v21, %v831_v22  ;;  %v879_v13 = vld [vmem:[%s9149_s25 + $0xd60] sm:$0xff] }
  0xb5   : > { %4516 = vmatpush1.bf16.msra.mxu0 %v8081_v27  ;;  %5081 = vmatpush1.bf16.msra.mxu1 %v8083_v28  ;;  %v8139_v27 = vcombine.low %v820_v15, %v824_v16  ;;  %v8146_v28 = vcombine.high %v827_v21, %v831_v22  ;;  %v8947_v14 = vld [vmem:[%s9183_s29 + $0xa0] ss:$36 sps:$4 sm:$0xff]   ;;  %v876_v15 = vld [vmem:[%s9149_s25 + $0xd48] sm:$0xff] }
  0xb6   : > { %4517 = vmatprep.subr.bf16.mxu0 %v8090_v29  ;;  %5082 = vmatprep.subr.bf16.mxu1 %v8092_v30  ;;  %v8148_v29 = vcombine.high %v828_v24, %v832_v25  ;;  %v8941_v30 = vld [vmem:[%s9183_s29 + $0x14] ss:$36 sps:$4 sm:$0xff]   ;;  %v880_v16 = vld [vmem:[%s9149_s25 + $0xd68] sm:$0xff]  ;;  %v883_v22 = vld [vmem:[%s9149_s25 + $0xd80] sm:$0xff] }
  0xb7   : > { %v8948_v21 = vld [vmem:[%s9183_s29 + $0xec] ss:$36 sps:$4 sm:$0xff]  }
  0xb8   : > { %4461 = vmatmul.mubr.bf16.gmra.mrb[16].mxu0 %v8929_v33  ;;  %5026 = vmatmul.mubr.bf16.gmra.mrb[16].mxu1 %v8929_v33  ;;  %v836_v33 = vld [vmem:[%s9149_s25 + $0xc08] sm:$0xff] }
  0xb9   : > { %4518 = vmatpush1.bf16.msra.mxu0 %v8089_v36  ;;  %5083 = vmatpush1.bf16.msra.mxu1 %v8091_v37  ;;  %v8147_v36 = vcombine.low %v828_v24, %v832_v25  ;;  %v8154_v37 = vcombine.high %v835_v31, %v839_v32  ;;  %v884_v24 = vld [vmem:[%s9149_s25 + $0xd88] sm:$0xff] }
  0xba   : > { %4519 = vmatprep.subr.bf16.mxu0 %v8098_v38  ;;  %5084 = vmatprep.subr.bf16.mxu1 %v8100_v39  ;;  %v8156_v38 = vcombine.high %v836_v33, %v840_v34  ;;  %v843_v39 = vld [vmem:[%s9149_s25 + $0xc40] sm:$0xff]  ;;  %v888_v25 = vld [vmem:[%s9149_s25 + $0xda8] sm:$0xff] }
  0xbb   : > { %4470 = vmatprep.mubr.bf16.mxu0 %v8930_v40  ;;  %5035 = vmatprep.mubr.bf16.mxu1 %v8930_v40  ;;  %v847_v40 = vld [vmem:[%s9149_s25 + $0xc60] sm:$0xff] }
  0xbd   : > { %4520 = vmatpush1.bf16.msra.mxu0 %v8097_v45  ;;  %5085 = vmatpush1.bf16.msra.mxu1 %v8099_v46  ;;  %v8153_v45 = vcombine.low %v835_v31, %v839_v32  ;;  %v8155_v46 = vcombine.low %v836_v33, %v840_v34  ;;  %v895_v31 = vld [vmem:[%s9149_s25 + $0xde0] sm:$0xff]  ;;  %v8950_v32 = vld [vmem:[%s9183_s29 + $0xe8] ss:$36 sps:$4 sm:$0xff]  }
  0xbe   : > { %4521 = vmatprep.subr.bf16.mxu0 %v8106_v47  ;;  %5086 = vmatprep.subr.bf16.mxu1 %v8108_v48  ;;  %v8162_v47 = vcombine.high %v843_v39, %v847_v40  ;;  %v8164_v48 = vcombine.high %v844_v42, %v848_v43  ;;  %v892_v33 = vld [vmem:[%s9149_s25 + $0xdc8] sm:$0xff] }
  0xbf   : > { %v896_v34 = vld [vmem:[%s9149_s25 + $0xde8] sm:$0xff] }
  0xc0   : > { %4471 = vmatmul.mubr.bf16.gmra.mrb[20].mxu0 %v8932_v51  ;;  %5036 = vmatmul.mubr.bf16.gmra.mrb[20].mxu1 %v8932_v51  ;;  %v855_v51 = vld [vmem:[%s9149_s25 + $0xca0] sm:$0xff] }
  0xc1   : > { %4522 = vmatpush1.bf16.msra.mxu0 %v8105_v54  ;;  %5087 = vmatpush1.bf16.msra.mxu1 %v8107_v55  ;;  %v8161_v54 = vcombine.low %v843_v39, %v847_v40  ;;  %v8163_v55 = vcombine.low %v844_v42, %v848_v43  ;;  %v8951_v39 = vld [vmem:[%s9183_s29 + $0x134] ss:$36 sps:$4 sm:$0xff]   ;;  %v899_v40 = vld [vmem:[%s9149_s25 + $0xe00] sm:$0xff]  ;;  %v900_v42 = vld [vmem:[%s9149_s25 + $0xe08] sm:$0xff] }
  0xc2   : > { %4523 = vmatprep.subr.bf16.mxu0 %v8114_v56  ;;  %5088 = vmatprep.subr.bf16.mxu1 %v8116_v57  ;;  %v8170_v56 = vcombine.high %v851_v50, %v855_v51  ;;  %v8172_v57 = vcombine.high %v852_v52, %v856_v53  ;;  %v904_v43 = vld [vmem:[%s9149_s25 + $0xe28] sm:$0xff] }
  0xc3   : > { %4480 = vmatprep.mubr.bf16.mxu0 %v8933_v58  ;;  %5045 = vmatprep.mubr.bf16.mxu1 %v8933_v58  ;;  %v859_v58 = vld [vmem:[%s9149_s25 + $0xcc0] sm:$0xff] }
  0xc5   : > { %4524 = vmatpush1.bf16.msra.mxu0 %v8113_v63  ;;  %5089 = vmatpush1.bf16.msra.mxu1 %v8115_v0  ;;  %v8169_v63 = vcombine.low %v851_v50, %v855_v51  ;;  %v8171_v0 = vcombine.low %v852_v52, %v856_v53  ;;  %v911_v50 = vld [vmem:[%s9149_s25 + $0xe60] sm:$0xff]  ;;  %v8953_v51 = vld [vmem:[%s9183_s29 + $0x130] ss:$36 sps:$4 sm:$0xff]   ;;  %v908_v52 = vld [vmem:[%s9149_s25 + $0xe48] sm:$0xff] }
  0xc6   : > { %4525 = vmatprep.subr.bf16.mxu0 %v8122_v1  ;;  %5090 = vmatprep.subr.bf16.mxu1 %v8124_v2  ;;  %v8178_v1 = vcombine.high %v859_v58, %v863_v59  ;;  %v8180_v2 = vcombine.high %v860_v61, %v864_v62  ;;  %v912_v53 = vld [vmem:[%s9149_s25 + $0xe68] sm:$0xff] }
  0xc8   : > { %4481 = vmatmul.mubr.bf16.gmra.mrb[24].mxu0 %v8935_v5  ;;  %5046 = vmatmul.mubr.bf16.gmra.mrb[24].mxu1 %v8935_v5  ;;  %v871_v5 = vld [vmem:[%s9149_s25 + $0xd20] sm:$0xff] }
  0xc9   : > { %4526 = vmatpush1.bf16.msra.mxu0 %v8121_v8  ;;  %5091 = vmatpush1.bf16.msra.mxu1 %v8123_v9  ;;  %v8177_v8 = vcombine.low %v859_v58, %v863_v59  ;;  %v8179_v9 = vcombine.low %v860_v61, %v864_v62  ;;  %v8954_v58 = vld [vmem:[%s9183_s29 + $0x17c] ss:$36 sps:$4 sm:$0xff]   ;;  %v916_v61 = vld [vmem:[%s9149_s25 + $0xe88] sm:$0xff] }
  0xca   : > { %4527 = vmatprep.subr.bf16.mxu0 %v8130_v10  ;;  %5092 = vmatprep.subr.bf16.mxu1 %v8132_v11  ;;  %v8186_v10 = vcombine.high %v867_v4, %v871_v5  ;;  %v8188_v11 = vcombine.high %v868_v6, %v872_v7  ;;  %v915_v59 = vld [vmem:[%s9149_s25 + $0xe80] sm:$0xff]  ;;  %v920_v62 = vld [vmem:[%s9149_s25 + $0xea8] sm:$0xff] }
  0xcb   : > { %4490 = vmatprep.mubr.bf16.mxu0 %v8936_v12  ;;  %5055 = vmatprep.mubr.bf16.mxu1 %v8936_v12  ;;  %v875_v12 = vld [vmem:[%s9149_s25 + $0xd40] sm:$0xff] }
  0xcd   : > { %4528 = vmatpush1.bf16.msra.mxu0 %v8129_v17  ;;  %5093 = vmatpush1.bf16.msra.mxu1 %v8131_v18  ;;  %v8185_v17 = vcombine.low %v867_v4, %v871_v5  ;;  %v8187_v18 = vcombine.low %v868_v6, %v872_v7  ;;  %v927_v4 = vld [vmem:[%s9149_s25 + $0xee0] sm:$0xff]  ;;  %v8956_v5 = vld [vmem:[%s9183_s29 + $0x178] ss:$36 sps:$4 sm:$0xff]   ;;  %v924_v6 = vld [vmem:[%s9149_s25 + $0xec8] sm:$0xff] }
  0xce   : > { %4529 = vmatprep.subr.bf16.mxu0 %v8138_v19  ;;  %5094 = vmatprep.subr.bf16.mxu1 %v8140_v20  ;;  %v8194_v19 = vcombine.high %v875_v12, %v879_v13  ;;  %v8196_v20 = vcombine.high %v876_v15, %v880_v16  ;;  %v928_v7 = vld [vmem:[%s9149_s25 + $0xee8] sm:$0xff] }
  0xd0   : > { %4491 = vmatmul.mubr.bf16.gmra.mrb[28].mxu0 %v8938_v23  ;;  %5056 = vmatmul.mubr.bf16.gmra.mrb[28].mxu1 %v8938_v23  ;;  %v887_v23 = vld [vmem:[%s9149_s25 + $0xda0] sm:$0xff] }
  0xd1   : > { %4530 = vmatpush1.bf16.msra.mxu0 %v8137_v26  ;;  %5095 = vmatpush1.bf16.msra.mxu1 %v8139_v27  ;;  %v8193_v26 = vcombine.low %v875_v12, %v879_v13  ;;  %v8195_v27 = vcombine.low %v876_v15, %v880_v16  ;;  %v8957_v12 = vld [vmem:[%s9183_s29 + $0x1c4] ss:$36 sps:$4 sm:$0xff]  }
  0xd2   : > { %4531 = vmatprep.subr.bf16.mxu0 %v8146_v28  ;;  %5096 = vmatprep.subr.bf16.mxu1 %v8148_v29  ;;  %v8202_v28 = vcombine.high %v883_v22, %v887_v23  ;;  %v8204_v29 = vcombine.high %v884_v24, %v888_v25  ;;  %v931_v13 = vld [vmem:[%s9149_s25 + $0xf00] sm:$0xff]  ;;  %v932_v15 = vld [vmem:[%s9149_s25 + $0xf08] sm:$0xff] }
  0xd3   : > { %4533 = vmatprep.mubr.bf16.mxu0 %v8941_v30  ;;  %5098 = vmatprep.mubr.bf16.mxu1 %v8941_v30  ;;  %v891_v30 = vld [vmem:[%s9149_s25 + $0xdc0] sm:$0xff]  ;;  %v936_v16 = vld [vmem:[%s9149_s25 + $0xf28] sm:$0xff] }
  0xd5   : > { %4532 = vmatpush1.bf16.msra.mxu0 %v8145_v35  ;;  %5097 = vmatpush1.bf16.msra.mxu1 %v8147_v36  ;;  %v8201_v35 = vcombine.low %v883_v22, %v887_v23  ;;  %v8203_v36 = vcombine.low %v884_v24, %v888_v25  ;;  %v943_v22 = vld [vmem:[%s9149_s25 + $0xf60] sm:$0xff]  ;;  %v940_v24 = vld [vmem:[%s9149_s25 + $0xf48] sm:$0xff] }
  0xd6   : > { %4614 = vmatprep.subr.bf16.mxu0 %v8154_v37  ;;  %5179 = vmatprep.subr.bf16.mxu1 %v8156_v38  ;;  %v8210_v37 = vcombine.high %v891_v30, %v895_v31  ;;  %v8212_v38 = vcombine.high %v892_v33, %v896_v34  ;;  %v8959_v23 = vld [vmem:[%s9183_s29 + $0x1c0] ss:$36 sps:$4 sm:$0xff]   ;;  %v944_v25 = vld [vmem:[%s9149_s25 + $0xf68] sm:$0xff] }
  0xd8   : > { %4534 = vmatmul.mubr.bf16.vlgmr.msra.gmra.mrb[0].mxu0 %v8939_v41  ;;  %5099 = vmatmul.mubr.bf16.vlgmr.msra.gmra.mrb[0].mxu1 %v8939_v41  ;;  %v903_v41 = vld [vmem:[%s9149_s25 + $0xe20] sm:$0xff] }
  0xd9   : > { %4615 = vmatpush1.bf16.msra.mxu0 %v8153_v45  ;;  %5180 = vmatpush1.bf16.msra.mxu1 %v8155_v46  ;;  %v8209_v45 = vcombine.low %v891_v30, %v895_v31  ;;  %v8211_v46 = vcombine.low %v892_v33, %v896_v34  ;;  %v8960_v30 = vld [vmem:[%s9183_s29 + $0x20c] ss:$36 sps:$4 sm:$0xff]   ;;  %v947_v31 = vld [vmem:[%s9149_s25 + $0xf80] sm:$0xff] }
  0xda   : > { %4616 = vmatprep.subr.bf16.mxu0 %v8162_v47  ;;  %5181 = vmatprep.subr.bf16.mxu1 %v8164_v48  ;;  %v8218_v47 = vcombine.high %v899_v40, %v903_v41  ;;  %v8220_v48 = vcombine.high %v900_v42, %v904_v43  ;;  %v948_v33 = vld [vmem:[%s9149_s25 + $0xf88] sm:$0xff] }
  0xdb   : > { %4543 = vmatprep.mubr.bf16.mxu0 %v8942_v49  ;;  %5108 = vmatprep.mubr.bf16.mxu1 %v8942_v49  ;;  %v907_v49 = vld [vmem:[%s9149_s25 + $0xe40] sm:$0xff]  ;;  %v952_v34 = vld [vmem:[%s9149_s25 + $0xfa8] sm:$0xff] }
  0xdd   : > { %4617 = vmatpush1.bf16.msra.mxu0 %v8161_v54  ;;  %5182 = vmatpush1.bf16.msra.mxu1 %v8163_v55  ;;  %v8217_v54 = vcombine.low %v899_v40, %v903_v41  ;;  %v8219_v55 = vcombine.low %v900_v42, %v904_v43  ;;  %v959_v40 = vld [vmem:[%s9149_s25 + $0xfe0] sm:$0xff]  ;;  %v8962_v41 = vld [vmem:[%s9183_s29 + $0x208] ss:$36 sps:$4 sm:$0xff]  }
  0xde   : > { %4618 = vmatprep.subr.bf16.mxu0 %v8170_v56  ;;  %5183 = vmatprep.subr.bf16.mxu1 %v8172_v57  ;;  %v8226_v56 = vcombine.high %v907_v49, %v911_v50  ;;  %v8228_v57 = vcombine.high %v908_v52, %v912_v53  ;;  %v956_v42 = vld [vmem:[%s9149_s25 + $0xfc8] sm:$0xff] }
  0xdf   : > { %v960_v43 = vld [vmem:[%s9149_s25 + $0xfe8] sm:$0xff] }
  0xe0   : > { %4544 = vmatmul.mubr.bf16.gmra.mrb[4].mxu0 %v8944_v60  ;;  %5109 = vmatmul.mubr.bf16.gmra.mrb[4].mxu1 %v8944_v60  ;;  %v919_v60 = vld [vmem:[%s9149_s25 + $0xea0] sm:$0xff] }
  0xe1   : > { %4619 = vmatpush1.bf16.msra.mxu0 %v8169_v63  ;;  %5184 = vmatpush1.bf16.msra.mxu1 %v8171_v0  ;;  %v8225_v63 = vcombine.low %v907_v49, %v911_v50  ;;  %v8227_v0 = vcombine.low %v908_v52, %v912_v53  ;;  %v8965_v49 = vld [vmem:[%s9183_s29 + $0x1c] ss:$36 sps:$4 sm:$0xff]   ;;  %v964_v52 = vld [vmem:[%s9149_s25 + $0x1008] sm:$0xff] }
  0xe2   : > { %4620 = vmatprep.subr.bf16.mxu0 %v8178_v1  ;;  %5185 = vmatprep.subr.bf16.mxu1 %v8180_v2  ;;  %v8234_v1 = vcombine.high %v915_v59, %v919_v60  ;;  %v8236_v2 = vcombine.high %v916_v61, %v920_v62  ;;  %v963_v50 = vld [vmem:[%s9149_s25 + $0x1000] sm:$0xff]  ;;  %v968_v53 = vld [vmem:[%s9149_s25 + $0x1028] sm:$0xff] }
  0xe3   : > { %4553 = vmatprep.mubr.bf16.mxu0 %v8945_v3  ;;  %5118 = vmatprep.mubr.bf16.mxu1 %v8945_v3  ;;  %v923_v3 = vld [vmem:[%s9149_s25 + $0xec0] sm:$0xff] }
  0xe5   : > { %4621 = vmatpush1.bf16.msra.mxu0 %v8177_v8  ;;  %5186 = vmatpush1.bf16.msra.mxu1 %v8179_v9  ;;  %v8233_v8 = vcombine.low %v915_v59, %v919_v60  ;;  %v8235_v9 = vcombine.low %v916_v61, %v920_v62  ;;  %v971_v59 = vld [vmem:[%s9149_s25 + $0x1040] sm:$0xff]  ;;  %v972_v62 = vld [vmem:[%s9149_s25 + $0x1048] sm:$0xff] }
  0xe6   : > { %4622 = vmatprep.subr.bf16.mxu0 %v8186_v10  ;;  %5187 = vmatprep.subr.bf16.mxu1 %v8188_v11  ;;  %v8242_v10 = vcombine.high %v923_v3, %v927_v4  ;;  %v8244_v11 = vcombine.high %v924_v6, %v928_v7  ;;  %v975_v60 = vld [vmem:[%s9149_s25 + $0x1060] sm:$0xff] }
  0xe8   : > { %4554 = vmatmul.mubr.bf16.gmra.mrb[8].mxu0 %v8947_v14  ;;  %5119 = vmatmul.mubr.bf16.gmra.mrb[8].mxu1 %v8947_v14  ;;  %v935_v14 = vld [vmem:[%s9149_s25 + $0xf20] sm:$0xff] }
  0xe9   : > { %4623 = vmatpush1.bf16.msra.mxu0 %v8185_v17  ;;  %5188 = vmatpush1.bf16.msra.mxu1 %v8187_v18  ;;  %v8241_v17 = vcombine.low %v923_v3, %v927_v4  ;;  %v8243_v18 = vcombine.low %v924_v6, %v928_v7  ;;  %v979_v3 = vld [vmem:[%s9149_s25 + $0x1080] sm:$0xff]  ;;  %v980_v6 = vld [vmem:[%s9149_s25 + $0x1088] sm:$0xff] }
  0xea   : > { %4624 = vmatprep.subr.bf16.mxu0 %v8194_v19  ;;  %5189 = vmatprep.subr.bf16.mxu1 %v8196_v20  ;;  %v8250_v19 = vcombine.high %v931_v13, %v935_v14  ;;  %v8252_v20 = vcombine.high %v932_v15, %v936_v16  ;;  %v983_v4 = vld [vmem:[%s9149_s25 + $0x10a0] sm:$0xff]  ;;  %v984_v7 = vld [vmem:[%s9149_s25 + $0x10a8] sm:$0xff] }
  0xeb   : > { %4563 = vmatprep.mubr.bf16.mxu0 %v8948_v21  ;;  %5128 = vmatprep.mubr.bf16.mxu1 %v8948_v21  ;;  %v939_v21 = vld [vmem:[%s9149_s25 + $0xf40] sm:$0xff] }
  0xed   : > { %4625 = vmatpush1.bf16.msra.mxu0 %v8193_v26  ;;  %5190 = vmatpush1.bf16.msra.mxu1 %v8195_v27  ;;  %v8249_v26 = vcombine.low %v931_v13, %v935_v14  ;;  %v8251_v27 = vcombine.low %v932_v15, %v936_v16  ;;  %v987_v13 = vld [vmem:[%s9149_s25 + $0x10c0] sm:$0xff]  ;;  %v8969_v15 = vld [vmem:[%s9183_s29 + $0xac] ss:$36 sps:$4 sm:$0xff]  }
  0xee   : > { %4626 = vmatprep.subr.bf16.mxu0 %v8202_v28  ;;  %5191 = vmatprep.subr.bf16.mxu1 %v8204_v29  ;;  %v8258_v28 = vcombine.high %v939_v21, %v943_v22  ;;  %v8260_v29 = vcombine.high %v940_v24, %v944_v25  ;;  %v991_v14 = vld [vmem:[%s9149_s25 + $0x10e0] sm:$0xff]  ;;  %v988_v16 = vld [vmem:[%s9149_s25 + $0x10c8] sm:$0xff] }
  0xf0   : > { %4564 = vmatmul.mubr.bf16.gmra.mrb[12].mxu0 %v8950_v32  ;;  %5129 = vmatmul.mubr.bf16.gmra.mrb[12].mxu1 %v8950_v32  ;;  %v951_v32 = vld [vmem:[%s9149_s25 + $0xfa0] sm:$0xff] }
  0xf1   : > { %4627 = vmatpush1.bf16.msra.mxu0 %v8201_v35  ;;  %5192 = vmatpush1.bf16.msra.mxu1 %v8203_v36  ;;  %v8257_v35 = vcombine.low %v939_v21, %v943_v22  ;;  %v8259_v36 = vcombine.low %v940_v24, %v944_v25  ;;  %v995_v22 = vld [vmem:[%s9149_s25 + $0x1100] sm:$0xff]  ;;  %v996_v24 = vld [vmem:[%s9149_s25 + $0x1108] sm:$0xff] }
  0xf2   : > { %4628 = vmatprep.subr.bf16.mxu0 %v8210_v37  ;;  %5193 = vmatprep.subr.bf16.mxu1 %v8212_v38  ;;  %v8266_v37 = vcombine.high %v947_v31, %v951_v32  ;;  %v8268_v38 = vcombine.high %v948_v33, %v952_v34  ;;  %v1000_v25 = vld [vmem:[%s9149_s25 + $0x1128] sm:$0xff] }
  0xf3   : > { %4573 = vmatprep.mubr.bf16.mxu0 %v8951_v39  ;;  %5138 = vmatprep.mubr.bf16.mxu1 %v8951_v39  ;;  %v955_v39 = vld [vmem:[%s9149_s25 + $0xfc0] sm:$0xff] }
  0xf5   : > { %4629 = vmatpush1.bf16.msra.mxu0 %v8209_v45  ;;  %5194 = vmatpush1.bf16.msra.mxu1 %v8211_v46  ;;  %v8265_v45 = vcombine.low %v947_v31, %v951_v32  ;;  %v8267_v46 = vcombine.low %v948_v33, %v952_v34  ;;  %v1003_v31 = vld [vmem:[%s9149_s25 + $0x1140] sm:$0xff]  ;;  %v8972_v33 = vld [vmem:[%s9183_s29 + $0xf4] ss:$36 sps:$4 sm:$0xff]   ;;  %v1004_v34 = vld [vmem:[%s9149_s25 + $0x1148] sm:$0xff] }
  0xf6   : > { %4630 = vmatprep.subr.bf16.mxu0 %v8218_v47  ;;  %5195 = vmatprep.subr.bf16.mxu1 %v8220_v48  ;;  %v8274_v47 = vcombine.high %v955_v39, %v959_v40  ;;  %v8276_v48 = vcombine.high %v956_v42, %v960_v43  ;;  %v1007_v32 = vld [vmem:[%s9149_s25 + $0x1160] sm:$0xff] }
  0xf8   : > { %4574 = vmatmul.mubr.bf16.gmra.mrb[16].mxu0 %v8953_v51  ;;  %5139 = vmatmul.mubr.bf16.gmra.mrb[16].mxu1 %v8953_v51  ;;  %v967_v51 = vld [vmem:[%s9149_s25 + $0x1020] sm:$0xff] }
  0xf9   : > { %4631 = vmatpush1.bf16.msra.mxu0 %v8217_v54  ;;  %5196 = vmatpush1.bf16.msra.mxu1 %v8219_v55  ;;  %v8273_v54 = vcombine.low %v955_v39, %v959_v40  ;;  %v8275_v55 = vcombine.low %v956_v42, %v960_v43  ;;  %v8281_v61 = vcombine.low %v963_v50, %v967_v51  ;;  %v1011_v40 = vld [vmem:[%s9149_s25 + $0x1180] sm:$0xff]  ;;  %v1012_v42 = vld [vmem:[%s9149_s25 + $0x1188] sm:$0xff] }
  0xfa   : > { %4632 = vmatprep.subr.bf16.mxu0 %v8226_v56  ;;  %5197 = vmatprep.subr.bf16.mxu1 %v8228_v57  ;;  %v8282_v56 = vcombine.high %v963_v50, %v967_v51  ;;  %v8284_v57 = vcombine.high %v964_v52, %v968_v53  ;;  %v1016_v43 = vld [vmem:[%s9149_s25 + $0x11a8] sm:$0xff]  ;;  %v1019_v50 = vld [vmem:[%s9149_s25 + $0x11c0] sm:$0xff] }
  0xfb   : > { %4583 = vmatprep.mubr.bf16.mxu0 %v8954_v58  ;;  %5148 = vmatprep.mubr.bf16.mxu1 %v8954_v58  ;;  %v8963_v58 = vld [vmem:[%s9183_s29 + $0x18] ss:$36 sps:$4 sm:$0xff]   ;;  %v1023_v51 = vld [vmem:[%s9149_s25 + $0x11e0] sm:$0xff] }
  0xfd   : > { %4633 = vmatpush1.bf16.msra.mxu0 %v8225_v63  ;;  %5198 = vmatpush1.bf16.msra.mxu1 %v8227_v0  ;;  %v976_v63 = vld [vmem:[%s9149_s25 + $0x1068] sm:$0xff]  ;;  %v8283_v0 = vcombine.low %v964_v52, %v968_v53  ;;  %v8975_v52 = vld [vmem:[%s9183_s29 + $0x13c] ss:$36 sps:$4 sm:$0xff]  }
  0xfe   : > { %4634 = vmatprep.subr.bf16.mxu0 %v8234_v1  ;;  %5199 = vmatprep.subr.bf16.mxu1 %v8236_v2  ;;  %v8966_v1 = vld [vmem:[%s9183_s29 + $0x64] ss:$36 sps:$4 sm:$0xff]   ;;  %v8290_v2 = vcombine.high %v971_v59, %v975_v60 }
  0xff   : > { %v1020_v53 = vld [vmem:[%s9149_s25 + $0x11c8] sm:$0xff] }
 0x100   : > { %4584 = vmatmul.mubr.bf16.gmra.mrb[20].mxu0 %v8956_v5  ;;  %5149 = vmatmul.mubr.bf16.gmra.mrb[20].mxu1 %v8956_v5  ;;  %v8292_v5 = vcombine.high %v972_v62, %v976_v63 }
 0x101   : > { %4635 = vmatpush1.bf16.msra.mxu0 %v8233_v8  ;;  %5200 = vmatpush1.bf16.msra.mxu1 %v8235_v9  ;;  %v8289_v8 = vcombine.low %v971_v59, %v975_v60  ;;  %v8291_v9 = vcombine.low %v972_v62, %v976_v63  ;;  %v9511_v59 = vld [vmem:[%s9149_s25 + $0x10] sm:$0xff]  ;;  %v9520_v62 = vld [vmem:[%s9149_s25 + $0x38] sm:$0xff]  ;;  %v7003_v63 = vld [vmem:[%s9508_s8] sm:$0xff] }
 0x102   : > { %4636 = vmatprep.subr.bf16.mxu0 %v8242_v10  ;;  %5201 = vmatprep.subr.bf16.mxu1 %v8244_v11  ;;  %v8298_v10 = vcombine.high %v979_v3, %v983_v4  ;;  %v8300_v11 = vcombine.high %v980_v6, %v984_v7  ;;  %v9514_v60 = vld [vmem:[%s9149_s25 + $0x30] sm:$0xff] }
 0x103   : > { %4593 = vmatprep.mubr.bf16.mxu0 %v8957_v12  ;;  %5158 = vmatprep.mubr.bf16.mxu1 %v8957_v12  ;;  %v8968_v12 = vld [vmem:[%s9183_s29 + $0x60] ss:$36 sps:$4 sm:$0xff]  }
 0x104   : > { %7021 = vperm.xlu1 %8890, %v7003_v63   ;;  %v498_v63 = vld [vmem:[%s9149_s25 + $0x178] sm:$0xff] }
 0x105   : > { %4637 = vmatpush1.bf16.msra.mxu0 %v8241_v17  ;;  %5202 = vmatpush1.bf16.msra.mxu1 %v8243_v18  ;;  %v992_v17 = vld [vmem:[%s9149_s25 + $0x10e8] sm:$0xff]  ;;  %v8297_v18 = vcombine.low %v979_v3, %v983_v4  ;;  %v8977_v3 = vld [vmem:[%s9183_s29 + $0x138] ss:$36 sps:$4 sm:$0xff]  }
 0x106   : > { %4638 = vmatprep.subr.bf16.mxu0 %v8250_v19  ;;  %5203 = vmatprep.subr.bf16.mxu1 %v8252_v20  ;;  %v8299_v19 = vcombine.low %v980_v6, %v984_v7  ;;  %v8306_v20 = vcombine.high %v987_v13, %v991_v14  ;;  %v8308_v21 = vcombine.high %v988_v16, %v992_v17  ;;  %v7004_v6 = vld [vmem:[%s9508_s8 + $0x8] sm:$0xff]  ;;  %v7005_v7 = vld [vmem:[%s9508_s8 + $0x10] sm:$0xff] }
 0x108   : > { %4594 = vmatmul.mubr.bf16.gmra.mrb[24].mxu0 %v8959_v23  ;;  %5159 = vmatmul.mubr.bf16.gmra.mrb[24].mxu1 %v8959_v23  ;;  %v999_v23 = vld [vmem:[%s9149_s25 + $0x1120] sm:$0xff] }
 0x109   : > { %4639 = vmatpush1.bf16.msra.mxu0 %v8249_v26  ;;  %5204 = vmatpush1.bf16.msra.mxu1 %v8251_v27  ;;  %v8305_v26 = vcombine.low %v987_v13, %v991_v14  ;;  %v8307_v27 = vcombine.low %v988_v16, %v992_v17  ;;  %v8984_v13 = vld [vmem:[%s9183_s29 + $0x214] ss:$36 sps:$4 sm:$0xff]   ;;  %v7008_v14 = vld [vmem:[%s9508_s8 + $0x28] sm:$0xff]  ;;  %v7011_v17 = vld [vmem:[%s9508_s8 + $0x40] sm:$0xff] }
 0x10a   : > { %4640 = vmatprep.subr.bf16.mxu0 %v8258_v28  ;;  %5205 = vmatprep.subr.bf16.mxu1 %v8260_v29  ;;  %v8314_v28 = vcombine.high %v995_v22, %v999_v23  ;;  %v8971_v29 = vld [vmem:[%s9183_s29 + $0xa8] ss:$36 sps:$4 sm:$0xff]   ;;  %v8986_v16 = vld [vmem:[%s9183_s29 + $0x210] ss:$36 sps:$4 sm:$0xff]  }
 0x10b   : > { %4603 = vmatprep.mubr.bf16.mxu0 %v8960_v30  ;;  %5168 = vmatprep.mubr.bf16.mxu1 %v8960_v30  ;;  %v8316_v30 = vcombine.high %v996_v24, %v1000_v25 }
 0x10c   : > { %7026 = vperm.xlu1 %8890, %v7004_v6   ;;  %7061 = vperm.xlu0 %8889, %v7011_v17   ;;  %v505_v6 = vld [vmem:[%s9149_s25 + $0x1b0] sm:$0xff]  ;;  %v510_v17 = vld [vmem:[%s9149_s25 + $0x1d8] sm:$0xff] }
 0x10d   : > { %4641 = vmatpush1.bf16.msra.mxu0 %v8257_v35  ;;  %5206 = vmatpush1.bf16.msra.mxu1 %v8259_v36  ;;  %v1008_v35 = vld [vmem:[%s9149_s25 + $0x1168] sm:$0xff]  ;;  %v8313_v36 = vcombine.low %v995_v22, %v999_v23  ;;  %v8987_v22 = vld [vmem:[%s9183_s29 + $0x20] ss:$36 sps:$4 sm:$0xff]   ;;  %v462_v23 = vld [vmem:[%s9149_s25 + $0x58] sm:$0xff] }
 0x10e   : > { %4642 = vmatprep.subr.bf16.mxu0 %v8266_v37  ;;  %5207 = vmatprep.subr.bf16.mxu1 %v8268_v38  ;;  %v8315_v37 = vcombine.low %v996_v24, %v1000_v25  ;;  %v8322_v38 = vcombine.high %v1003_v31, %v1007_v32  ;;  %v8324_v39 = vcombine.high %v1004_v34, %v1008_v35  ;;  %v466_v24 = vld [vmem:[%s9149_s25 + $0x78] sm:$0xff] }
 0x10f   : > { %v7773_v25 = vcombine.low %v9511_v59, %v9514_v60 }
 0x110   : > { %4604 = vmatmul.mubr.bf16.gmra.mrb[28].mxu0 %v8962_v41  ;;  %5169 = vmatmul.mubr.bf16.gmra.mrb[28].mxu1 %v8962_v41  ;;  %v1015_v41 = vld [vmem:[%s9149_s25 + $0x11a0] sm:$0xff] }
 0x111   : > { %4643 = vmatpush1.bf16.msra.mxu0 %v8265_v45  ;;  %5208 = vmatpush1.bf16.msra.mxu1 %v8267_v46  ;;  %v8321_v45 = vcombine.low %v1003_v31, %v1007_v32  ;;  %v8323_v46 = vcombine.low %v1004_v34, %v1008_v35  ;;  %v473_v31 = vld [vmem:[%s9149_s25 + $0xb0] sm:$0xff]  ;;  %v470_v32 = vld [vmem:[%s9149_s25 + $0x98] sm:$0xff]  ;;  %v7783_v35 = vcombine.low %v462_v23, %v466_v24 }
 0x112   : > { %4644 = vmatprep.subr.bf16.mxu0 %v8274_v47  ;;  %5209 = vmatprep.subr.bf16.mxu1 %v8276_v48  ;;  %v8330_v47 = vcombine.high %v1011_v40, %v1015_v41  ;;  %v8974_v48 = vld [vmem:[%s9183_s29 + $0xf0] ss:$36 sps:$4 sm:$0xff]  }
 0x113   : > { %4646 = vmatprep.mubr.bf16.mxu0 %v8965_v49  ;;  %5211 = vmatprep.mubr.bf16.mxu1 %v8965_v49  ;;  %v8332_v49 = vcombine.high %v1012_v42, %v1016_v43 }
 0x114   : > { %7031 = vperm.xlu1 %8890, %v7005_v7   ;;  %v502_v7 = vld [vmem:[%s9149_s25 + $0x198] sm:$0xff] }
 0x115   : > { %4645 = vmatpush1.bf16.msra.mxu0 %v8273_v54  ;;  %5210 = vmatpush1.bf16.msra.mxu1 %v8275_v55  ;;  %v1024_v54 = vld [vmem:[%s9149_s25 + $0x11e8] sm:$0xff]  ;;  %v8329_v55 = vcombine.low %v1011_v40, %v1015_v41  ;;  %v481_v40 = vld [vmem:[%s9149_s25 + $0xf0] sm:$0xff] }
 0x116   : > { %4727 = vmatprep.subr.bf16.mxu0 %v8282_v56  ;;  %5292 = vmatprep.subr.bf16.mxu1 %v8284_v57  ;;  %v8331_v56 = vcombine.low %v1012_v42, %v1016_v43  ;;  %v8338_v57 = vcombine.high %v1019_v50, %v1023_v51  ;;  %v8988_v41 = vld [vmem:[%s9183_s29 + $0x68] ss:$36 sps:$4 sm:$0xff]   ;;  %v478_v42 = vld [vmem:[%s9149_s25 + $0xd8] sm:$0xff] }
 0x117   : > { %v482_v43 = vld [vmem:[%s9149_s25 + $0xf8] sm:$0xff] }
 0x118   : > { %4647 = vmatmul.mubr.bf16.vlgmr.msra.gmra.mrb[0].mxu0 %v8963_v58  ;;  %5212 = vmatmul.mubr.bf16.vlgmr.msra.gmra.mrb[0].mxu1 %v8963_v58  ;;  %v8340_v58 = vcombine.high %v1020_v53, %v1024_v54 }
 0x119   : > { %4728 = vmatpush1.bf16.msra.mxu0 %v8281_v61  ;;  %5293 = vmatpush1.bf16.msra.mxu1 %v8283_v0  ;;  %v9517_v61 = vld [vmem:[%s9149_s25 + $0x18] sm:$0xff]  ;;  %v8337_v0 = vcombine.low %v1019_v50, %v1023_v51  ;;  %v485_v50 = vld [vmem:[%s9149_s25 + $0x110] sm:$0xff] }
 0x11a   : > { %4656 = vmatprep.mubr.bf16.mxu0 %v8966_v1  ;;  %5221 = vmatprep.mubr.bf16.mxu1 %v8966_v1  ;;  %v8339_v1 = vcombine.low %v1020_v53, %v1024_v54  ;;  %v7776_v4 = vcombine.high %v9517_v61, %v9520_v62  ;;  %v489_v51 = vld [vmem:[%s9149_s25 + $0x130] sm:$0xff]  ;;  %v490_v53 = vld [vmem:[%s9149_s25 + $0x138] sm:$0xff] }
 0x11b   : > { %4729 = vmatprep.subr.bf16.mxu0 %v8290_v2  ;;  %5294 = vmatprep.subr.bf16.mxu1 %v8292_v5  ;;  %v7774_v2 = vcombine.high %v9511_v59, %v9514_v60  ;;  %v8978_v5 = vld [vmem:[%s9183_s29 + $0x184] ss:$36 sps:$4 sm:$0xff]   ;;  %v493_v59 = vld [vmem:[%s9149_s25 + $0x150] sm:$0xff] }
 0x11c   : > { %v497_v60 = vld [vmem:[%s9149_s25 + $0x170] sm:$0xff] }
 0x11d   : > { %4730 = vmatpush1.bf16.msra.mxu0 %v8289_v8  ;;  %5295 = vmatpush1.bf16.msra.mxu1 %v8291_v9  ;;  %v8980_v8 = vld [vmem:[%s9183_s29 + $0x180] ss:$36 sps:$4 sm:$0xff]   ;;  %v8981_v9 = vld [vmem:[%s9183_s29 + $0x1cc] ss:$36 sps:$4 sm:$0xff]  }
 0x11e   : > { %4731 = vmatprep.subr.bf16.mxu0 %v8298_v10  ;;  %5296 = vmatprep.subr.bf16.mxu1 %v8300_v11  ;;  %v7006_v10 = vld [vmem:[%s9508_s8 + $0x18] sm:$0xff]  ;;  %v7007_v11 = vld [vmem:[%s9508_s8 + $0x20] sm:$0xff] }
 0x11f   : > { %7036 = vperm.xlu1 %8890, %v7006_v10  }
 0x120   : > { %4657 = vmatmul.mubr.bf16.gmra.mrb[4].mxu0 %v8968_v12  ;;  %5222 = vmatmul.mubr.bf16.gmra.mrb[4].mxu1 %v8968_v12  ;;  %v8983_v12 = vld [vmem:[%s9183_s29 + $0x1c8] ss:$36 sps:$4 sm:$0xff]  }
 0x121   : > { %4666 = vmatprep.mubr.bf16.mxu0 %v8969_v15  ;;  %5231 = vmatprep.mubr.bf16.mxu1 %v8969_v15  ;;  %v7009_v15 = vld [vmem:[%s9508_s8 + $0x30] sm:$0xff] }
 0x122   : > { %4732 = vmatpush1.bf16.msra.mxu0 %v8297_v18  ;;  %5297 = vmatpush1.bf16.msra.mxu1 %v8299_v19  ;;  %v7010_v18 = vld [vmem:[%s9508_s8 + $0x38] sm:$0xff]  ;;  %v7012_v19 = vld [vmem:[%s9508_s8 + $0x48] sm:$0xff] }
 0x123   : > { %4733 = vmatprep.subr.bf16.mxu0 %v8306_v20  ;;  %5298 = vmatprep.subr.bf16.mxu1 %v8308_v21  ;;  %v461_v20 = vld [vmem:[%s9149_s25 + $0x50] sm:$0xff] }
 0x124   : > { %7041 = vperm.xlu1 %8890, %v7007_v11   ;;  %v465_v21 = vld [vmem:[%s9149_s25 + $0x70] sm:$0xff]  ;;  %7066 = vperm.xlu0 %8889, %v7012_v19  }
 0x125   : > { %v7781_v34 = vcombine.low %v461_v20, %v465_v21 }
 0x126   : > { %4734 = vmatpush1.bf16.msra.mxu0 %v8305_v26  ;;  %5299 = vmatpush1.bf16.msra.mxu1 %v8307_v27  ;;  %v7775_v26 = vcombine.low %v9517_v61, %v9520_v62  ;;  %v7782_v27 = vcombine.high %v461_v20, %v465_v21  ;;  %v8989_v61 = vld [vmem:[%s9183_s29 + $0xb0] ss:$36 sps:$4 sm:$0xff]   ;;  %v494_v62 = vld [vmem:[%s9149_s25 + $0x158] sm:$0xff] }
 0x127   : > { %4735 = vmatprep.subr.bf16.mxu0 %v8314_v28  ;;  %5300 = vmatprep.subr.bf16.mxu1 %v8316_v30  ;;  %v7013_v28 = vld [vmem:[%s9508_s8 + $0x50] sm:$0xff]  ;;  %v7815_v10 = vcombine.low %v494_v62, %v498_v63 }
 0x128   : > { %4667 = vmatmul.mubr.bf16.gmra.mrb[8].mxu0 %v8971_v29  ;;  %5232 = vmatmul.mubr.bf16.gmra.mrb[8].mxu1 %v8971_v29  ;;  %v7784_v29 = vcombine.high %v462_v23, %v466_v24  ;;  %v469_v30 = vld [vmem:[%s9149_s25 + $0x90] sm:$0xff] }
 0x129   : > { %4676 = vmatprep.mubr.bf16.mxu0 %v8972_v33  ;;  %5241 = vmatprep.mubr.bf16.mxu1 %v8972_v33  ;;  %v474_v33 = vld [vmem:[%s9149_s25 + $0xb8] sm:$0xff]  ;;  %v517_v23 = vld [vmem:[%s9149_s25 + $0x210] sm:$0xff] }
 0x12a   : > { %4736 = vmatpush1.bf16.msra.mxu0 %v8313_v36  ;;  %5301 = vmatpush1.bf16.msra.mxu1 %v8315_v37  ;;  %v7790_v36 = vcombine.high %v469_v30, %v473_v31  ;;  %v7014_v37 = vld [vmem:[%s9508_s8 + $0x58] sm:$0xff]  ;;  %v521_v24 = vld [vmem:[%s9149_s25 + $0x230] sm:$0xff] }
 0x12b   : > { %4737 = vmatprep.subr.bf16.mxu0 %v8322_v38  ;;  %5302 = vmatprep.subr.bf16.mxu1 %v8324_v39  ;;  %v7792_v38 = vcombine.high %v470_v32, %v474_v33  ;;  %v477_v39 = vld [vmem:[%s9149_s25 + $0xd0] sm:$0xff] }
 0x12c   : > { %7046 = vperm.xlu1 %8890, %v7008_v14   ;;  %7071 = vperm.xlu0 %8889, %v7013_v28   ;;  %v7797_v54 = vcombine.low %v477_v39, %v481_v40  ;;  %v509_v14 = vld [vmem:[%s9149_s25 + $0x1d0] sm:$0xff] }
 0x12e   : > { %4738 = vmatpush1.bf16.msra.mxu0 %v8321_v45  ;;  %5303 = vmatpush1.bf16.msra.mxu1 %v8323_v46  ;;  %v7789_v45 = vcombine.low %v469_v30, %v473_v31  ;;  %v7791_v46 = vcombine.low %v470_v32, %v474_v33  ;;  %v525_v31 = vld [vmem:[%s9149_s25 + $0x250] sm:$0xff]  ;;  %v8991_v33 = vld [vmem:[%s9183_s29 + $0x140] ss:$36 sps:$4 sm:$0xff]  }
 0x12f   : > { %4739 = vmatprep.subr.bf16.mxu0 %v8330_v47  ;;  %5304 = vmatprep.subr.bf16.mxu1 %v8332_v49  ;;  %v7798_v47 = vcombine.high %v477_v39, %v481_v40  ;;  %v7800_v49 = vcombine.high %v478_v42, %v482_v43  ;;  %v529_v32 = vld [vmem:[%s9149_s25 + $0x270] sm:$0xff] }
 0x130   : > { %4677 = vmatmul.mubr.bf16.gmra.mrb[12].mxu0 %v8974_v48  ;;  %5242 = vmatmul.mubr.bf16.gmra.mrb[12].mxu1 %v8974_v48  ;;  %v7015_v48 = vld [vmem:[%s9508_s8 + $0x60] sm:$0xff]  ;;  %v533_v40 = vld [vmem:[%s9149_s25 + $0x290] sm:$0xff] }
 0x131   : > { %4686 = vmatprep.mubr.bf16.mxu0 %v8975_v52  ;;  %5251 = vmatprep.mubr.bf16.mxu1 %v8975_v52  ;;  %v486_v52 = vld [vmem:[%s9149_s25 + $0x118] sm:$0xff] }
 0x132   : > { %4740 = vmatpush1.bf16.msra.mxu0 %v8329_v55  ;;  %5305 = vmatpush1.bf16.msra.mxu1 %v8331_v56  ;;  %v7799_v55 = vcombine.low %v478_v42, %v482_v43  ;;  %v7806_v56 = vcombine.high %v485_v50, %v489_v51  ;;  %v534_v42 = vld [vmem:[%s9149_s25 + $0x298] sm:$0xff] }
 0x133   : > { %4741 = vmatprep.subr.bf16.mxu0 %v8338_v57  ;;  %5306 = vmatprep.subr.bf16.mxu1 %v8340_v58  ;;  %v7016_v57 = vld [vmem:[%s9508_s8 + $0x68] sm:$0xff]  ;;  %v7808_v58 = vcombine.high %v486_v52, %v490_v53  ;;  %v538_v43 = vld [vmem:[%s9149_s25 + $0x2b8] sm:$0xff] }
 0x134   : > { %7051 = vperm.xlu1 %8890, %v7009_v15   ;;  %7076 = vperm.xlu0 %8889, %v7014_v37   ;;  %v513_v15 = vld [vmem:[%s9149_s25 + $0x1f0] sm:$0xff] }
 0x135   : > { %v7830_v21 = vcombine.high %v509_v14, %v513_v15 }
 0x136   : > { %4742 = vmatpush1.bf16.msra.mxu0 %v8337_v0  ;;  %5307 = vmatpush1.bf16.msra.mxu1 %v8339_v1  ;;  %v7805_v0 = vcombine.low %v485_v50, %v489_v51  ;;  %v7807_v1 = vcombine.low %v486_v52, %v490_v53  ;;  %v545_v50 = vld [vmem:[%s9149_s25 + $0x2f0] sm:$0xff]  ;;  %v8992_v51 = vld [vmem:[%s9183_s29 + $0x188] ss:$36 sps:$4 sm:$0xff]   ;;  %v542_v52 = vld [vmem:[%s9149_s25 + $0x2d8] sm:$0xff] }
 0x137   : > { %5405 = vmatprep.subr.bf16.mxu0 %v7774_v2  ;;  %5970 = vmatprep.subr.bf16.mxu1 %v7776_v4  ;;  %v7814_v2 = vcombine.high %v493_v59, %v497_v60  ;;  %v7816_v4 = vcombine.high %v494_v62, %v498_v63  ;;  %v546_v53 = vld [vmem:[%s9149_s25 + $0x2f8] sm:$0xff] }
 0x138   : > { %4687 = vmatmul.mubr.bf16.gmra.mrb[16].mxu0 %v8977_v3  ;;  %5252 = vmatmul.mubr.bf16.gmra.mrb[16].mxu1 %v8977_v3  ;;  %v7017_v3 = vld [vmem:[%s9508_s8 + $0x70] sm:$0xff]  ;;  %v7863_v63 = vcombine.low %v542_v52, %v546_v53 }
 0x139   : > { %4696 = vmatprep.mubr.bf16.mxu0 %v8978_v5  ;;  %5261 = vmatprep.mubr.bf16.mxu1 %v8978_v5  ;;  %v501_v5 = vld [vmem:[%s9149_s25 + $0x190] sm:$0xff] }
 0x13a   : > { %7056 = vperm.xlu1 %8890, %v7010_v18   ;;  %7081 = vperm.xlu0 %8889, %v7015_v48   ;;  %v7822_v11 = vcombine.high %v501_v5, %v505_v6  ;;  %v514_v18 = vld [vmem:[%s9149_s25 + $0x1f8] sm:$0xff]  ;;  %v7821_v19 = vcombine.low %v501_v5, %v505_v6  ;;  %v7856_v48 = vcombine.high %v534_v42, %v538_v43 }
 0x13b   : > { %v7831_v28 = vcombine.low %v510_v17, %v514_v18  ;;  %v558_v5 = vld [vmem:[%s9149_s25 + $0x358] sm:$0xff] }
 0x13c   : > { %v562_v6 = vld [vmem:[%s9149_s25 + $0x378] sm:$0xff] }
 0x13e   : > { %7086 = vperm.xlu0 %8889, %v7016_v57   ;;  %v7864_v57 = vcombine.high %v542_v52, %v546_v53 }
 0x140   : > { %4697 = vmatmul.mubr.bf16.gmra.mrb[20].mxu0 %v8980_v8  ;;  %5262 = vmatmul.mubr.bf16.gmra.mrb[20].mxu1 %v8980_v8  ;;  %v506_v8 = vld [vmem:[%s9149_s25 + $0x1b8] sm:$0xff] }
 0x141   : > { %4706 = vmatprep.mubr.bf16.mxu0 %v8981_v9  ;;  %5271 = vmatprep.mubr.bf16.mxu1 %v8981_v9  ;;  %v7813_v9 = vcombine.low %v493_v59, %v497_v60  ;;  %v7823_v20 = vcombine.low %v502_v7, %v506_v8  ;;  %v553_v59 = vld [vmem:[%s9149_s25 + $0x330] sm:$0xff]  ;;  %v550_v60 = vld [vmem:[%s9149_s25 + $0x318] sm:$0xff] }
 0x142   : > { %7091 = vperm.xlu0 %8889, %v7017_v3   ;;  %v561_v3 = vld [vmem:[%s9149_s25 + $0x370] sm:$0xff] }
 0x148   : > { %4707 = vmatmul.mubr.bf16.gmra.mrb[24].mxu0 %v8983_v12  ;;  %5272 = vmatmul.mubr.bf16.gmra.mrb[24].mxu1 %v8983_v12  ;;  %v7018_v12 = vld [vmem:[%s9508_s8 + $0x78] sm:$0xff] }
 0x149   : > { %4716 = vmatprep.mubr.bf16.mxu0 %v8984_v13  ;;  %5281 = vmatprep.mubr.bf16.mxu1 %v8984_v13  ;;  %v7824_v13 = vcombine.high %v502_v7, %v506_v8 }
 0x14a   : > { %7096 = vperm.xlu0 %8889, %v7018_v12   ;;  %v569_v12 = vld [vmem:[%s9149_s25 + $0x3b0] sm:$0xff] }
 0x150   : > { %4717 = vmatmul.mubr.bf16.gmra.mrb[28].mxu0 %v8986_v16  ;;  %5282 = vmatmul.mubr.bf16.gmra.mrb[28].mxu1 %v8986_v16  ;;  %v8990_v16 = vld [vmem:[%s9183_s29 + $0xf8] ss:$36 sps:$4 sm:$0xff]  }
 0x151   : > { %4759 = vmatprep.mubr.bf16.mxu0 %v11454_v44  ;;  %5324 = vmatprep.mubr.bf16.mxu1 %v11454_v44 }
 0x158   : > { %4760 = vmatmul.mubr.bf16.vlgmr.msra.gmra.mrb[0].mxu0 %v8987_v22  ;;  %5325 = vmatmul.mubr.bf16.vlgmr.msra.gmra.mrb[0].mxu1 %v8987_v22  ;;  %v7832_v22 = vcombine.high %v510_v17, %v514_v18 }
 0x159   : > { %5406 = vmatpush1.bf16.msra.mxu0 %v7773_v25  ;;  %5971 = vmatpush1.bf16.msra.mxu1 %v7775_v26  ;;  %v518_v25 = vld [vmem:[%s9149_s25 + $0x218] sm:$0xff] }
 0x15a   : > { %5407 = vmatprep.subr.bf16.mxu0 %v7782_v27  ;;  %5972 = vmatprep.subr.bf16.mxu1 %v7784_v29  ;;  %v522_v26 = vld [vmem:[%s9149_s25 + $0x238] sm:$0xff]  ;;  %v7829_v27 = vcombine.low %v509_v14, %v513_v15  ;;  %v7838_v29 = vcombine.high %v517_v23, %v521_v24 }
 0x15b   : > { %4769 = vmatprep.mubr.bf16.mxu0 %v11454_v44  ;;  %5334 = vmatprep.mubr.bf16.mxu1 %v11454_v44  ;;  %v7840_v30 = vcombine.high %v518_v25, %v522_v26  ;;  %v7839_v37 = vcombine.low %v518_v25, %v522_v26  ;;  %v570_v14 = vld [vmem:[%s9149_s25 + $0x3b8] sm:$0xff] }
 0x15d   : > { %5408 = vmatpush1.bf16.msra.mxu0 %v7781_v34  ;;  %5973 = vmatpush1.bf16.msra.mxu1 %v7783_v35  ;;  %v526_v34 = vld [vmem:[%s9149_s25 + $0x258] sm:$0xff] }
 0x15e   : > { %5409 = vmatprep.subr.bf16.mxu0 %v7790_v36  ;;  %5974 = vmatprep.subr.bf16.mxu1 %v7792_v38  ;;  %v530_v35 = vld [vmem:[%s9149_s25 + $0x278] sm:$0xff]  ;;  %v7837_v36 = vcombine.low %v517_v23, %v521_v24  ;;  %v7846_v38 = vcombine.high %v525_v31, %v529_v32 }
 0x15f   : > { %v7848_v39 = vcombine.high %v526_v34, %v530_v35  ;;  %v578_v23 = vld [vmem:[%s9149_s25 + $0x3f8] sm:$0xff] }
 0x160   : > { %4770 = vmatmul.mubr.bf16.gmra.mrb[4].mxu0 %v8988_v41  ;;  %5335 = vmatmul.mubr.bf16.gmra.mrb[4].mxu1 %v8988_v41  ;;  %v537_v41 = vld [vmem:[%s9149_s25 + $0x2b0] sm:$0xff] }
 0x161   : > { %5410 = vmatpush1.bf16.msra.mxu0 %v7789_v45  ;;  %5975 = vmatpush1.bf16.msra.mxu1 %v7791_v46  ;;  %v7845_v45 = vcombine.low %v525_v31, %v529_v32  ;;  %v7847_v46 = vcombine.low %v526_v34, %v530_v35  ;;  %v586_v31 = vld [vmem:[%s9149_s25 + $0x438] sm:$0xff]  ;;  %v8995_v35 = vld [vmem:[%s9183_s29 + $0x4] ss:$36 sps:$4 sm:$0xff]  }
 0x162   : > { %5411 = vmatprep.subr.bf16.mxu0 %v7798_v47  ;;  %5976 = vmatprep.subr.bf16.mxu1 %v7800_v49  ;;  %v7854_v47 = vcombine.high %v533_v40, %v537_v41  ;;  %v541_v49 = vld [vmem:[%s9149_s25 + $0x2d0] sm:$0xff] }
 0x163   : > { %4779 = vmatprep.mubr.bf16.mxu0 %v11454_v44  ;;  %5344 = vmatprep.mubr.bf16.mxu1 %v11454_v44  ;;  %v7861_v62 = vcombine.low %v541_v49, %v545_v50 }
 0x165   : > { %5412 = vmatpush1.bf16.msra.mxu0 %v7797_v54  ;;  %5977 = vmatpush1.bf16.msra.mxu1 %v7799_v55  ;;  %v7853_v54 = vcombine.low %v533_v40, %v537_v41  ;;  %v7855_v55 = vcombine.low %v534_v42, %v538_v43  ;;  %v594_v40 = vld [vmem:[%s9149_s25 + $0x478] sm:$0xff] }
 0x166   : > { %5413 = vmatprep.subr.bf16.mxu0 %v7806_v56  ;;  %5978 = vmatprep.subr.bf16.mxu1 %v7808_v58  ;;  %v7862_v56 = vcombine.high %v541_v49, %v545_v50  ;;  %v549_v58 = vld [vmem:[%s9149_s25 + $0x310] sm:$0xff]  ;;  %v598_v49 = vld [vmem:[%s9149_s25 + $0x498] sm:$0xff] }
 0x167   : > { %v7869_v7 = vcombine.low %v549_v58, %v553_v59  ;;  %v602_v50 = vld [vmem:[%s9149_s25 + $0x4b8] sm:$0xff] }
 0x168   : > { %4780 = vmatmul.mubr.bf16.gmra.mrb[8].mxu0 %v8989_v61  ;;  %5345 = vmatmul.mubr.bf16.gmra.mrb[8].mxu1 %v8989_v61  ;;  %v554_v61 = vld [vmem:[%s9149_s25 + $0x338] sm:$0xff] }
 0x169   : > { %5414 = vmatpush1.bf16.msra.mxu0 %v7805_v0  ;;  %5979 = vmatpush1.bf16.msra.mxu1 %v7807_v1  ;;  %v7870_v0 = vcombine.high %v549_v58, %v553_v59  ;;  %v7872_v1 = vcombine.high %v550_v60, %v554_v61  ;;  %v7871_v8 = vcombine.low %v550_v60, %v554_v61  ;;  %v606_v58 = vld [vmem:[%s9149_s25 + $0x4d8] sm:$0xff] }
 0x16a   : > { %5415 = vmatprep.subr.bf16.mxu0 %v7814_v2  ;;  %5980 = vmatprep.subr.bf16.mxu1 %v7816_v4  ;;  %v557_v2 = vld [vmem:[%s9149_s25 + $0x350] sm:$0xff]  ;;  %v610_v59 = vld [vmem:[%s9149_s25 + $0x4f8] sm:$0xff]  ;;  %v7919_v61 = vcombine.low %v598_v49, %v602_v50 }
 0x16b   : > { %4789 = vmatprep.mubr.bf16.mxu0 %v11454_v44  ;;  %5354 = vmatprep.mubr.bf16.mxu1 %v11454_v44  ;;  %v8993_v4 = vld [vmem:[%s9183_s29 + $0x1d0] ss:$36 sps:$4 sm:$0xff]   ;;  %v7877_v15 = vcombine.low %v557_v2, %v561_v3 }
 0x16d   : > { %5416 = vmatpush1.bf16.msra.mxu0 %v7813_v9  ;;  %5981 = vmatpush1.bf16.msra.mxu1 %v7815_v10  ;;  %v7878_v9 = vcombine.high %v557_v2, %v561_v3  ;;  %v7880_v10 = vcombine.high %v558_v5, %v562_v6  ;;  %v8998_v2 = vld [vmem:[%s9183_s29 + $0x48] ss:$36 sps:$4 sm:$0xff]   ;;  %v614_v3 = vld [vmem:[%s9149_s25 + $0x518] sm:$0xff] }
 0x16e   : > { %5417 = vmatprep.subr.bf16.mxu0 %v7822_v11  ;;  %5982 = vmatprep.subr.bf16.mxu1 %v7824_v13  ;;  %v565_v11 = vld [vmem:[%s9149_s25 + $0x390] sm:$0xff]  ;;  %v566_v13 = vld [vmem:[%s9149_s25 + $0x398] sm:$0xff] }
 0x16f   : > { %v7886_v17 = vcombine.high %v565_v11, %v569_v12  ;;  %v7888_v18 = vcombine.high %v566_v13, %v570_v14  ;;  %v7885_v24 = vcombine.low %v565_v11, %v569_v12  ;;  %v7887_v25 = vcombine.low %v566_v13, %v570_v14  ;;  %v625_v11 = vld [vmem:[%s9149_s25 + $0x570] sm:$0xff]  ;;  %v622_v12 = vld [vmem:[%s9149_s25 + $0x558] sm:$0xff] }
 0x170   : > { %4790 = vmatmul.mubr.bf16.gmra.mrb[12].mxu0 %v8990_v16  ;;  %5355 = vmatmul.mubr.bf16.gmra.mrb[12].mxu1 %v8990_v16  ;;  %v7879_v16 = vcombine.low %v558_v5, %v562_v6  ;;  %v7927_v6 = vcombine.low %v606_v58, %v610_v59  ;;  %v626_v13 = vld [vmem:[%s9149_s25 + $0x578] sm:$0xff] }
 0x171   : > { %5418 = vmatpush1.bf16.msra.mxu0 %v7821_v19  ;;  %5983 = vmatpush1.bf16.msra.mxu1 %v7823_v20  ;;  %v573_v19 = vld [vmem:[%s9149_s25 + $0x3d0] sm:$0xff] }
 0x172   : > { %5419 = vmatprep.subr.bf16.mxu0 %v7830_v21  ;;  %5984 = vmatprep.subr.bf16.mxu1 %v7832_v22  ;;  %v577_v20 = vld [vmem:[%s9149_s25 + $0x3f0] sm:$0xff]  ;;  %v8994_v21 = vld [vmem:[%s9183_s29 + $0x218] ss:$36 sps:$4 sm:$0xff]  }
 0x173   : > { %4799 = vmatprep.mubr.bf16.mxu0 %v11454_v44  ;;  %5364 = vmatprep.mubr.bf16.mxu1 %v11454_v44  ;;  %v574_v22 = vld [vmem:[%s9149_s25 + $0x3d8] sm:$0xff]  ;;  %v7894_v26 = vcombine.high %v573_v19, %v577_v20  ;;  %v7893_v32 = vcombine.low %v573_v19, %v577_v20  ;;  %v633_v19 = vld [vmem:[%s9149_s25 + $0x5b0] sm:$0xff] }
 0x174   : > { %v9000_v20 = vld [vmem:[%s9183_s29 + $0x90] ss:$36 sps:$4 sm:$0xff]  }
 0x175   : > { %5420 = vmatpush1.bf16.msra.mxu0 %v7829_v27  ;;  %5985 = vmatpush1.bf16.msra.mxu1 %v7831_v28  ;;  %v7896_v27 = vcombine.high %v574_v22, %v578_v23  ;;  %v581_v28 = vld [vmem:[%s9149_s25 + $0x410] sm:$0xff] }
 0x176   : > { %5421 = vmatprep.subr.bf16.mxu0 %v7838_v29  ;;  %5986 = vmatprep.subr.bf16.mxu1 %v7840_v30  ;;  %v585_v29 = vld [vmem:[%s9149_s25 + $0x430] sm:$0xff]  ;;  %v582_v30 = vld [vmem:[%s9149_s25 + $0x418] sm:$0xff] }
 0x177   : > { %v7902_v34 = vcombine.high %v581_v28, %v585_v29  ;;  %v7901_v41 = vcombine.low %v581_v28, %v585_v29  ;;  %v7903_v42 = vcombine.low %v582_v30, %v586_v31  ;;  %v637_v28 = vld [vmem:[%s9149_s25 + $0x5d0] sm:$0xff] }
 0x178   : > { %4800 = vmatmul.mubr.bf16.gmra.mrb[16].mxu0 %v8991_v33  ;;  %5365 = vmatmul.mubr.bf16.gmra.mrb[16].mxu1 %v8991_v33  ;;  %v7895_v33 = vcombine.low %v574_v22, %v578_v23  ;;  %v634_v22 = vld [vmem:[%s9149_s25 + $0x5b8] sm:$0xff]  ;;  %v641_v29 = vld [vmem:[%s9149_s25 + $0x5f0] sm:$0xff] }
 0x179   : > { %5422 = vmatpush1.bf16.msra.mxu0 %v7837_v36  ;;  %5987 = vmatpush1.bf16.msra.mxu1 %v7839_v37  ;;  %v7904_v36 = vcombine.high %v582_v30, %v586_v31  ;;  %v589_v37 = vld [vmem:[%s9149_s25 + $0x450] sm:$0xff]  ;;  %v638_v30 = vld [vmem:[%s9149_s25 + $0x5d8] sm:$0xff] }
 0x17a   : > { %5423 = vmatprep.subr.bf16.mxu0 %v7846_v38  ;;  %5988 = vmatprep.subr.bf16.mxu1 %v7848_v39  ;;  %v593_v38 = vld [vmem:[%s9149_s25 + $0x470] sm:$0xff]  ;;  %v590_v39 = vld [vmem:[%s9149_s25 + $0x458] sm:$0xff] }
 0x17b   : > { %4809 = vmatprep.mubr.bf16.mxu0 %v11454_v44  ;;  %5374 = vmatprep.mubr.bf16.mxu1 %v11454_v44  ;;  %v7910_v43 = vcombine.high %v589_v37, %v593_v38  ;;  %v7911_v52 = vcombine.low %v590_v39, %v594_v40  ;;  %v642_v31 = vld [vmem:[%s9149_s25 + $0x5f8] sm:$0xff] }
 0x17d   : > { %5424 = vmatpush1.bf16.msra.mxu0 %v7845_v45  ;;  %5989 = vmatpush1.bf16.msra.mxu1 %v7847_v46  ;;  %v7912_v45 = vcombine.high %v590_v39, %v594_v40  ;;  %v597_v46 = vld [vmem:[%s9149_s25 + $0x490] sm:$0xff]  ;;  %v646_v39 = vld [vmem:[%s9149_s25 + $0x618] sm:$0xff] }
 0x17e   : > { %5425 = vmatprep.subr.bf16.mxu0 %v7854_v47  ;;  %5990 = vmatprep.subr.bf16.mxu1 %v7856_v48  ;;  %v601_v47 = vld [vmem:[%s9149_s25 + $0x4b0] sm:$0xff]  ;;  %v8996_v48 = vld [vmem:[%s9183_s29] ss:$36 sps:$4 sm:$0xff]   ;;  %v650_v40 = vld [vmem:[%s9149_s25 + $0x638] sm:$0xff] }
 0x17f   : > { %v7918_v53 = vcombine.high %v597_v46, %v601_v47  ;;  %v7917_v60 = vcombine.low %v597_v46, %v601_v47  ;;  %v7968_v46 = vcombine.high %v646_v39, %v650_v40  ;;  %v653_v47 = vld [vmem:[%s9149_s25 + $0x650] sm:$0xff] }
 0x180   : > { %4810 = vmatmul.mubr.bf16.gmra.mrb[20].mxu0 %v8992_v51  ;;  %5375 = vmatmul.mubr.bf16.gmra.mrb[20].mxu1 %v8992_v51  ;;  %v7909_v51 = vcombine.low %v589_v37, %v593_v38  ;;  %v649_v37 = vld [vmem:[%s9149_s25 + $0x630] sm:$0xff]  ;;  %v9002_v38 = vld [vmem:[%s9183_s29 + $0xd8] ss:$36 sps:$4 sm:$0xff]  }
 0x181   : > { %5426 = vmatpush1.bf16.msra.mxu0 %v7853_v54  ;;  %5991 = vmatpush1.bf16.msra.mxu1 %v7855_v55  ;;  %v8997_v54 = vld [vmem:[%s9183_s29 + $0x4c] ss:$36 sps:$4 sm:$0xff]   ;;  %v7920_v55 = vcombine.high %v598_v49, %v602_v50  ;;  %v654_v49 = vld [vmem:[%s9149_s25 + $0x658] sm:$0xff] }
 0x182   : > { %5427 = vmatprep.subr.bf16.mxu0 %v7862_v56  ;;  %5992 = vmatprep.subr.bf16.mxu1 %v7864_v57  ;;  %v605_v56 = vld [vmem:[%s9149_s25 + $0x4d0] sm:$0xff]  ;;  %v658_v50 = vld [vmem:[%s9149_s25 + $0x678] sm:$0xff] }
 0x183   : > { %4819 = vmatprep.mubr.bf16.mxu0 %v11454_v44  ;;  %5384 = vmatprep.mubr.bf16.mxu1 %v11454_v44  ;;  %v609_v57 = vld [vmem:[%s9149_s25 + $0x4f0] sm:$0xff] }
 0x184   : > { %v7925_v5 = vcombine.low %v605_v56, %v609_v57 }
 0x185   : > { %5428 = vmatpush1.bf16.msra.mxu0 %v7861_v62  ;;  %5993 = vmatpush1.bf16.msra.mxu1 %v7863_v63  ;;  %v7926_v62 = vcombine.high %v605_v56, %v609_v57  ;;  %v7928_v63 = vcombine.high %v606_v58, %v610_v59  ;;  %v665_v56 = vld [vmem:[%s9149_s25 + $0x6b0] sm:$0xff]  ;;  %v9004_v57 = vld [vmem:[%s9183_s29 + $0x120] ss:$36 sps:$4 sm:$0xff]   ;;  %v662_v58 = vld [vmem:[%s9149_s25 + $0x698] sm:$0xff] }
 0x186   : > { %5429 = vmatprep.subr.bf16.mxu0 %v7870_v0  ;;  %5994 = vmatprep.subr.bf16.mxu1 %v7872_v1  ;;  %v613_v0 = vld [vmem:[%s9149_s25 + $0x510] sm:$0xff]  ;;  %v666_v59 = vld [vmem:[%s9149_s25 + $0x6b8] sm:$0xff] }
 0x187   : > { %v617_v1 = vld [vmem:[%s9149_s25 + $0x530] sm:$0xff] }
 0x188   : > { %4820 = vmatmul.mubr.bf16.gmra.mrb[24].mxu0 %v8993_v4  ;;  %5385 = vmatmul.mubr.bf16.gmra.mrb[24].mxu1 %v8993_v4  ;;  %v618_v4 = vld [vmem:[%s9149_s25 + $0x538] sm:$0xff]  ;;  %v7933_v14 = vcombine.low %v613_v0, %v617_v1 }
 0x189   : > { %5430 = vmatpush1.bf16.msra.mxu0 %v7869_v7  ;;  %5995 = vmatpush1.bf16.msra.mxu1 %v7871_v8  ;;  %v7934_v7 = vcombine.high %v613_v0, %v617_v1  ;;  %v8999_v8 = vld [vmem:[%s9183_s29 + $0x94] ss:$36 sps:$4 sm:$0xff]   ;;  %v7984_v0 = vcombine.high %v662_v58, %v666_v59 }
 0x18a   : > { %5431 = vmatprep.subr.bf16.mxu0 %v7878_v9  ;;  %5996 = vmatprep.subr.bf16.mxu1 %v7880_v10  ;;  %v7936_v9 = vcombine.high %v614_v3, %v618_v4  ;;  %v621_v10 = vld [vmem:[%s9149_s25 + $0x550] sm:$0xff] }
 0x18b   : > { %4829 = vmatprep.mubr.bf16.mxu0 %v11454_v44  ;;  %5394 = vmatprep.mubr.bf16.mxu1 %v11454_v44  ;;  %v7941_v23 = vcombine.low %v621_v10, %v625_v11  ;;  %v669_v1 = vld [vmem:[%s9149_s25 + $0x6d0] sm:$0xff] }
 0x18d   : > { %5432 = vmatpush1.bf16.msra.mxu0 %v7877_v15  ;;  %5997 = vmatpush1.bf16.msra.mxu1 %v7879_v16  ;;  %v7935_v15 = vcombine.low %v614_v3, %v618_v4  ;;  %v7942_v16 = vcombine.high %v621_v10, %v625_v11  ;;  %v670_v3 = vld [vmem:[%s9149_s25 + $0x6d8] sm:$0xff]  ;;  %v681_v10 = vld [vmem:[%s9149_s25 + $0x730] sm:$0xff]  ;;  %v9006_v11 = vld [vmem:[%s9183_s29 + $0x168] ss:$36 sps:$4 sm:$0xff]  }
 0x18e   : > { %5433 = vmatprep.subr.bf16.mxu0 %v7886_v17  ;;  %5998 = vmatprep.subr.bf16.mxu1 %v7888_v18  ;;  %v7944_v17 = vcombine.high %v622_v12, %v626_v13  ;;  %v629_v18 = vld [vmem:[%s9149_s25 + $0x590] sm:$0xff]  ;;  %v674_v4 = vld [vmem:[%s9149_s25 + $0x6f8] sm:$0xff] }
 0x190   : > { %4830 = vmatmul.mubr.bf16.gmra.mrb[28].mxu0 %v8994_v21  ;;  %5395 = vmatmul.mubr.bf16.gmra.mrb[28].mxu1 %v8994_v21  ;;  %v630_v21 = vld [vmem:[%s9149_s25 + $0x598] sm:$0xff] }
 0x191   : > { %5434 = vmatpush1.bf16.msra.mxu0 %v7885_v24  ;;  %5999 = vmatpush1.bf16.msra.mxu1 %v7887_v25  ;;  %v7943_v24 = vcombine.low %v622_v12, %v626_v13  ;;  %v7950_v25 = vcombine.high %v629_v18, %v633_v19  ;;  %v678_v12 = vld [vmem:[%s9149_s25 + $0x718] sm:$0xff] }
 0x192   : > { %5435 = vmatprep.subr.bf16.mxu0 %v7894_v26  ;;  %6000 = vmatprep.subr.bf16.mxu1 %v7896_v27  ;;  %v9001_v26 = vld [vmem:[%s9183_s29 + $0xdc] ss:$36 sps:$4 sm:$0xff]   ;;  %v7952_v27 = vcombine.high %v630_v21, %v634_v22 }
 0x193   : > { %5437 = vmatprep.mubr.bf16.mxu0 %v8995_v35  ;;  %6002 = vmatprep.mubr.bf16.mxu1 %v8995_v35  ;;  %v7960_v35 = vcombine.high %v638_v30, %v642_v31  ;;  %v682_v13 = vld [vmem:[%s9149_s25 + $0x738] sm:$0xff] }
 0x195   : > { %5436 = vmatpush1.bf16.msra.mxu0 %v7893_v32  ;;  %6001 = vmatpush1.bf16.msra.mxu1 %v7895_v33  ;;  %v7949_v32 = vcombine.low %v629_v18, %v633_v19  ;;  %v7951_v33 = vcombine.low %v630_v21, %v634_v22  ;;  %v8000_v18 = vcombine.high %v678_v12, %v682_v13  ;;  %v685_v19 = vld [vmem:[%s9149_s25 + $0x750] sm:$0xff]  ;;  %v686_v21 = vld [vmem:[%s9149_s25 + $0x758] sm:$0xff] }
 0x196   : > { %5518 = vmatprep.subr.bf16.mxu0 %v7902_v34  ;;  %6083 = vmatprep.subr.bf16.mxu1 %v7904_v36  ;;  %v7958_v34 = vcombine.high %v637_v28, %v641_v29  ;;  %v645_v36 = vld [vmem:[%s9149_s25 + $0x610] sm:$0xff]  ;;  %v690_v22 = vld [vmem:[%s9149_s25 + $0x778] sm:$0xff] }
 0x198   : > { %5438 = vmatmul.mubr.bf16.vlgmr.msra.gmra.mrb[32].mxu0 %v8996_v48  ;;  %6003 = vmatmul.mubr.bf16.vlgmr.msra.gmra.mrb[32].mxu1 %v8996_v48  ;;  %v657_v48 = vld [vmem:[%s9149_s25 + $0x670] sm:$0xff] }
 0x199   : > { %5519 = vmatpush1.bf16.msra.mxu0 %v7901_v41  ;;  %6084 = vmatpush1.bf16.msra.mxu1 %v7903_v42  ;;  %v7957_v41 = vcombine.low %v637_v28, %v641_v29  ;;  %v7959_v42 = vcombine.low %v638_v30, %v642_v31  ;;  %v697_v28 = vld [vmem:[%s9149_s25 + $0x7b0] sm:$0xff]  ;;  %v694_v30 = vld [vmem:[%s9149_s25 + $0x798] sm:$0xff] }
 0x19a   : > { %5520 = vmatprep.subr.bf16.mxu0 %v7910_v43  ;;  %6085 = vmatprep.subr.bf16.mxu1 %v7912_v45  ;;  %v7966_v43 = vcombine.high %v645_v36, %v649_v37  ;;  %v9003_v45 = vld [vmem:[%s9183_s29 + $0x124] ss:$36 sps:$4 sm:$0xff]   ;;  %v9008_v29 = vld [vmem:[%s9183_s29 + $0x1b0] ss:$36 sps:$4 sm:$0xff]   ;;  %v698_v31 = vld [vmem:[%s9149_s25 + $0x7b8] sm:$0xff] }
 0x19b   : > { %5447 = vmatprep.mubr.bf16.mxu0 %v8997_v54  ;;  %6012 = vmatprep.mubr.bf16.mxu1 %v8997_v54  ;;  %v7976_v54 = vcombine.high %v654_v49, %v658_v50 }
 0x19d   : > { %5521 = vmatpush1.bf16.msra.mxu0 %v7909_v51  ;;  %6086 = vmatpush1.bf16.msra.mxu1 %v7911_v52  ;;  %v7965_v51 = vcombine.low %v645_v36, %v649_v37  ;;  %v7967_v52 = vcombine.low %v646_v39, %v650_v40  ;;  %v8016_v36 = vcombine.high %v694_v30, %v698_v31  ;;  %v701_v37 = vld [vmem:[%s9149_s25 + $0x7d0] sm:$0xff]  ;;  %v702_v39 = vld [vmem:[%s9149_s25 + $0x7d8] sm:$0xff] }
 0x19e   : > { %5522 = vmatprep.subr.bf16.mxu0 %v7918_v53  ;;  %6087 = vmatprep.subr.bf16.mxu1 %v7920_v55  ;;  %v7974_v53 = vcombine.high %v653_v47, %v657_v48  ;;  %v661_v55 = vld [vmem:[%s9149_s25 + $0x690] sm:$0xff]  ;;  %v706_v40 = vld [vmem:[%s9149_s25 + $0x7f8] sm:$0xff] }
 0x1a0   : > { %5448 = vmatmul.mubr.bf16.gmra.mrb[36].mxu0 %v8998_v2  ;;  %6013 = vmatmul.mubr.bf16.gmra.mrb[36].mxu1 %v8998_v2  ;;  %v673_v2 = vld [vmem:[%s9149_s25 + $0x6f0] sm:$0xff] }
 0x1a1   : > { %5523 = vmatpush1.bf16.msra.mxu0 %v7917_v60  ;;  %6088 = vmatpush1.bf16.msra.mxu1 %v7919_v61  ;;  %v7973_v60 = vcombine.low %v653_v47, %v657_v48  ;;  %v7975_v61 = vcombine.low %v654_v49, %v658_v50  ;;  %v713_v47 = vld [vmem:[%s9149_s25 + $0x830] sm:$0xff]  ;;  %v9010_v48 = vld [vmem:[%s9183_s29 + $0x1f8] ss:$36 sps:$4 sm:$0xff]  }
 0x1a2   : > { %5524 = vmatprep.subr.bf16.mxu0 %v7926_v62  ;;  %6089 = vmatprep.subr.bf16.mxu1 %v7928_v63  ;;  %v7982_v62 = vcombine.high %v661_v55, %v665_v56  ;;  %v9005_v63 = vld [vmem:[%s9183_s29 + $0x16c] ss:$36 sps:$4 sm:$0xff]   ;;  %v710_v49 = vld [vmem:[%s9149_s25 + $0x818] sm:$0xff] }
 0x1a3   : > { %5457 = vmatprep.mubr.bf16.mxu0 %v8999_v8  ;;  %6022 = vmatprep.mubr.bf16.mxu1 %v8999_v8  ;;  %v7992_v8 = vcombine.high %v670_v3, %v674_v4  ;;  %v714_v50 = vld [vmem:[%s9149_s25 + $0x838] sm:$0xff] }
 0x1a5   : > { %5525 = vmatpush1.bf16.msra.mxu0 %v7925_v5  ;;  %6090 = vmatpush1.bf16.msra.mxu1 %v7927_v6  ;;  %v7981_v5 = vcombine.low %v661_v55, %v665_v56  ;;  %v7983_v6 = vcombine.low %v662_v58, %v666_v59  ;;  %v8032_v55 = vcombine.high %v710_v49, %v714_v50  ;;  %v717_v56 = vld [vmem:[%s9149_s25 + $0x850] sm:$0xff]  ;;  %v718_v58 = vld [vmem:[%s9149_s25 + $0x858] sm:$0xff] }
 0x1a6   : > { %5526 = vmatprep.subr.bf16.mxu0 %v7934_v7  ;;  %6091 = vmatprep.subr.bf16.mxu1 %v7936_v9  ;;  %v7990_v7 = vcombine.high %v669_v1, %v673_v2  ;;  %v677_v9 = vld [vmem:[%s9149_s25 + $0x710] sm:$0xff]  ;;  %v722_v59 = vld [vmem:[%s9149_s25 + $0x878] sm:$0xff] }
 0x1a8   : > { %5458 = vmatmul.mubr.bf16.gmra.mrb[40].mxu0 %v9000_v20  ;;  %6023 = vmatmul.mubr.bf16.gmra.mrb[40].mxu1 %v9000_v20  ;;  %v689_v20 = vld [vmem:[%s9149_s25 + $0x770] sm:$0xff] }
 0x1a9   : > { %5527 = vmatpush1.bf16.msra.mxu0 %v7933_v14  ;;  %6092 = vmatpush1.bf16.msra.mxu1 %v7935_v15  ;;  %v7989_v14 = vcombine.low %v669_v1, %v673_v2  ;;  %v7991_v15 = vcombine.low %v670_v3, %v674_v4  ;;  %v729_v1 = vld [vmem:[%s9149_s25 + $0x8b0] sm:$0xff]  ;;  %v9012_v2 = vld [vmem:[%s9183_s29 + $0x8] ss:$36 sps:$4 sm:$0xff]   ;;  %v726_v3 = vld [vmem:[%s9149_s25 + $0x898] sm:$0xff] }
 0x1aa   : > { %5528 = vmatprep.subr.bf16.mxu0 %v7942_v16  ;;  %6093 = vmatprep.subr.bf16.mxu1 %v7944_v17  ;;  %v7998_v16 = vcombine.high %v677_v9, %v681_v10  ;;  %v9007_v17 = vld [vmem:[%s9183_s29 + $0x1b4] ss:$36 sps:$4 sm:$0xff]  }
 0x1ab   : > { %5467 = vmatprep.mubr.bf16.mxu0 %v9001_v26  ;;  %6032 = vmatprep.mubr.bf16.mxu1 %v9001_v26  ;;  %v8008_v26 = vcombine.high %v686_v21, %v690_v22  ;;  %v730_v4 = vld [vmem:[%s9149_s25 + $0x8b8] sm:$0xff] }
 0x1ad   : > { %5529 = vmatpush1.bf16.msra.mxu0 %v7941_v23  ;;  %6094 = vmatpush1.bf16.msra.mxu1 %v7943_v24  ;;  %v7997_v23 = vcombine.low %v677_v9, %v681_v10  ;;  %v7999_v24 = vcombine.low %v678_v12, %v682_v13  ;;  %v8048_v9 = vcombine.high %v726_v3, %v730_v4  ;;  %v733_v10 = vld [vmem:[%s9149_s25 + $0x8d0] sm:$0xff]  ;;  %v734_v12 = vld [vmem:[%s9149_s25 + $0x8d8] sm:$0xff] }
 0x1ae   : > { %5530 = vmatprep.subr.bf16.mxu0 %v7950_v25  ;;  %6095 = vmatprep.subr.bf16.mxu1 %v7952_v27  ;;  %v8006_v25 = vcombine.high %v685_v19, %v689_v20  ;;  %v693_v27 = vld [vmem:[%s9149_s25 + $0x790] sm:$0xff]  ;;  %v738_v13 = vld [vmem:[%s9149_s25 + $0x8f8] sm:$0xff] }
 0x1b0   : > { %5468 = vmatmul.mubr.bf16.gmra.mrb[44].mxu0 %v9002_v38  ;;  %6033 = vmatmul.mubr.bf16.gmra.mrb[44].mxu1 %v9002_v38  ;;  %v705_v38 = vld [vmem:[%s9149_s25 + $0x7f0] sm:$0xff] }
 0x1b1   : > { %5531 = vmatpush1.bf16.msra.mxu0 %v7949_v32  ;;  %6096 = vmatpush1.bf16.msra.mxu1 %v7951_v33  ;;  %v8005_v32 = vcombine.low %v685_v19, %v689_v20  ;;  %v8007_v33 = vcombine.low %v686_v21, %v690_v22  ;;  %v745_v19 = vld [vmem:[%s9149_s25 + $0x930] sm:$0xff]  ;;  %v742_v21 = vld [vmem:[%s9149_s25 + $0x918] sm:$0xff] }
 0x1b2   : > { %5532 = vmatprep.subr.bf16.mxu0 %v7958_v34  ;;  %6097 = vmatprep.subr.bf16.mxu1 %v7960_v35  ;;  %v8014_v34 = vcombine.high %v693_v27, %v697_v28  ;;  %v9009_v35 = vld [vmem:[%s9183_s29 + $0x1fc] ss:$36 sps:$4 sm:$0xff]   ;;  %v9014_v20 = vld [vmem:[%s9183_s29 + $0x50] ss:$36 sps:$4 sm:$0xff]  }
 0x1b3   : > { %5477 = vmatprep.mubr.bf16.mxu0 %v9003_v45  ;;  %6042 = vmatprep.mubr.bf16.mxu1 %v9003_v45  ;;  %v8024_v45 = vcombine.high %v702_v39, %v706_v40  ;;  %v746_v22 = vld [vmem:[%s9149_s25 + $0x938] sm:$0xff] }
 0x1b5   : > { %5533 = vmatpush1.bf16.msra.mxu0 %v7957_v41  ;;  %6098 = vmatpush1.bf16.msra.mxu1 %v7959_v42  ;;  %v8013_v41 = vcombine.low %v693_v27, %v697_v28  ;;  %v8015_v42 = vcombine.low %v694_v30, %v698_v31  ;;  %v8064_v27 = vcombine.high %v742_v21, %v746_v22  ;;  %v749_v28 = vld [vmem:[%s9149_s25 + $0x950] sm:$0xff]  ;;  %v750_v30 = vld [vmem:[%s9149_s25 + $0x958] sm:$0xff] }
 0x1b6   : > { %5534 = vmatprep.subr.bf16.mxu0 %v7966_v43  ;;  %6099 = vmatprep.subr.bf16.mxu1 %v7968_v46  ;;  %v8022_v43 = vcombine.high %v701_v37, %v705_v38  ;;  %v709_v46 = vld [vmem:[%s9149_s25 + $0x810] sm:$0xff]  ;;  %v754_v31 = vld [vmem:[%s9149_s25 + $0x978] sm:$0xff] }
 0x1b8   : > { %5478 = vmatmul.mubr.bf16.gmra.mrb[48].mxu0 %v9004_v57  ;;  %6043 = vmatmul.mubr.bf16.gmra.mrb[48].mxu1 %v9004_v57  ;;  %v721_v57 = vld [vmem:[%s9149_s25 + $0x870] sm:$0xff] }
 0x1b9   : > { %5535 = vmatpush1.bf16.msra.mxu0 %v7965_v51  ;;  %6100 = vmatpush1.bf16.msra.mxu1 %v7967_v52  ;;  %v8021_v51 = vcombine.low %v701_v37, %v705_v38  ;;  %v8023_v52 = vcombine.low %v702_v39, %v706_v40  ;;  %v761_v37 = vld [vmem:[%s9149_s25 + $0x9b0] sm:$0xff]  ;;  %v9016_v38 = vld [vmem:[%s9183_s29 + $0x98] ss:$36 sps:$4 sm:$0xff]  }
 0x1ba   : > { %5536 = vmatprep.subr.bf16.mxu0 %v7974_v53  ;;  %6101 = vmatprep.subr.bf16.mxu1 %v7976_v54  ;;  %v8030_v53 = vcombine.high %v709_v46, %v713_v47  ;;  %v9011_v54 = vld [vmem:[%s9183_s29 + $0xc] ss:$36 sps:$4 sm:$0xff]   ;;  %v758_v39 = vld [vmem:[%s9149_s25 + $0x998] sm:$0xff] }
 0x1bb   : > { %5487 = vmatprep.mubr.bf16.mxu0 %v9005_v63  ;;  %6052 = vmatprep.mubr.bf16.mxu1 %v9005_v63  ;;  %v8040_v63 = vcombine.high %v718_v58, %v722_v59  ;;  %v762_v40 = vld [vmem:[%s9149_s25 + $0x9b8] sm:$0xff] }
 0x1bd   : > { %5537 = vmatpush1.bf16.msra.mxu0 %v7973_v60  ;;  %6102 = vmatpush1.bf16.msra.mxu1 %v7975_v61  ;;  %v8029_v60 = vcombine.low %v709_v46, %v713_v47  ;;  %v8031_v61 = vcombine.low %v710_v49, %v714_v50  ;;  %v8080_v46 = vcombine.high %v758_v39, %v762_v40  ;;  %v765_v47 = vld [vmem:[%s9149_s25 + $0x9d0] sm:$0xff]  ;;  %v766_v49 = vld [vmem:[%s9149_s25 + $0x9d8] sm:$0xff] }
 0x1be   : > { %5538 = vmatprep.subr.bf16.mxu0 %v7982_v62  ;;  %6103 = vmatprep.subr.bf16.mxu1 %v7984_v0  ;;  %v8038_v62 = vcombine.high %v717_v56, %v721_v57  ;;  %v725_v0 = vld [vmem:[%s9149_s25 + $0x890] sm:$0xff]  ;;  %v770_v50 = vld [vmem:[%s9149_s25 + $0x9f8] sm:$0xff] }
 0x1c0   : > { %5488 = vmatmul.mubr.bf16.gmra.mrb[52].mxu0 %v9006_v11  ;;  %6053 = vmatmul.mubr.bf16.gmra.mrb[52].mxu1 %v9006_v11  ;;  %v737_v11 = vld [vmem:[%s9149_s25 + $0x8f0] sm:$0xff] }
 0x1c1   : > { %5539 = vmatpush1.bf16.msra.mxu0 %v7981_v5  ;;  %6104 = vmatpush1.bf16.msra.mxu1 %v7983_v6  ;;  %v8037_v5 = vcombine.low %v717_v56, %v721_v57  ;;  %v8039_v6 = vcombine.low %v718_v58, %v722_v59  ;;  %v777_v56 = vld [vmem:[%s9149_s25 + $0xa30] sm:$0xff]  ;;  %v9018_v57 = vld [vmem:[%s9183_s29 + $0xe0] ss:$36 sps:$4 sm:$0xff]   ;;  %v774_v58 = vld [vmem:[%s9149_s25 + $0xa18] sm:$0xff] }
 0x1c2   : > { %5540 = vmatprep.subr.bf16.mxu0 %v7990_v7  ;;  %6105 = vmatprep.subr.bf16.mxu1 %v7992_v8  ;;  %v8046_v7 = vcombine.high %v725_v0, %v729_v1  ;;  %v9013_v8 = vld [vmem:[%s9183_s29 + $0x54] ss:$36 sps:$4 sm:$0xff]  }
 0x1c3   : > { %5497 = vmatprep.mubr.bf16.mxu0 %v9007_v17  ;;  %6062 = vmatprep.mubr.bf16.mxu1 %v9007_v17  ;;  %v8056_v17 = vcombine.high %v734_v12, %v738_v13  ;;  %v778_v59 = vld [vmem:[%s9149_s25 + $0xa38] sm:$0xff] }
 0x1c5   : > { %5541 = vmatpush1.bf16.msra.mxu0 %v7989_v14  ;;  %6106 = vmatpush1.bf16.msra.mxu1 %v7991_v15  ;;  %v8045_v14 = vcombine.low %v725_v0, %v729_v1  ;;  %v8047_v15 = vcombine.low %v726_v3, %v730_v4  ;;  %v8096_v0 = vcombine.high %v774_v58, %v778_v59  ;;  %v781_v1 = vld [vmem:[%s9149_s25 + $0xa50] sm:$0xff]  ;;  %v782_v3 = vld [vmem:[%s9149_s25 + $0xa58] sm:$0xff] }
 0x1c6   : > { %5542 = vmatprep.subr.bf16.mxu0 %v7998_v16  ;;  %6107 = vmatprep.subr.bf16.mxu1 %v8000_v18  ;;  %v8054_v16 = vcombine.high %v733_v10, %v737_v11  ;;  %v741_v18 = vld [vmem:[%s9149_s25 + $0x910] sm:$0xff]  ;;  %v786_v4 = vld [vmem:[%s9149_s25 + $0xa78] sm:$0xff] }
 0x1c8   : > { %5498 = vmatmul.mubr.bf16.gmra.mrb[56].mxu0 %v9008_v29  ;;  %6063 = vmatmul.mubr.bf16.gmra.mrb[56].mxu1 %v9008_v29  ;;  %v753_v29 = vld [vmem:[%s9149_s25 + $0x970] sm:$0xff] }
 0x1c9   : > { %5543 = vmatpush1.bf16.msra.mxu0 %v7997_v23  ;;  %6108 = vmatpush1.bf16.msra.mxu1 %v7999_v24  ;;  %v8053_v23 = vcombine.low %v733_v10, %v737_v11  ;;  %v8055_v24 = vcombine.low %v734_v12, %v738_v13  ;;  %v793_v10 = vld [vmem:[%s9149_s25 + $0xab0] sm:$0xff]  ;;  %v9020_v11 = vld [vmem:[%s9183_s29 + $0x128] ss:$36 sps:$4 sm:$0xff]   ;;  %v790_v12 = vld [vmem:[%s9149_s25 + $0xa98] sm:$0xff] }
 0x1ca   : > { %5544 = vmatprep.subr.bf16.mxu0 %v8006_v25  ;;  %6109 = vmatprep.subr.bf16.mxu1 %v8008_v26  ;;  %v8062_v25 = vcombine.high %v741_v18, %v745_v19  ;;  %v9015_v26 = vld [vmem:[%s9183_s29 + $0x9c] ss:$36 sps:$4 sm:$0xff]  }
 0x1cb   : > { %5507 = vmatprep.mubr.bf16.mxu0 %v9009_v35  ;;  %6072 = vmatprep.mubr.bf16.mxu1 %v9009_v35  ;;  %v8072_v35 = vcombine.high %v750_v30, %v754_v31  ;;  %v794_v13 = vld [vmem:[%s9149_s25 + $0xab8] sm:$0xff] }
 0x1cd   : > { %5545 = vmatpush1.bf16.msra.mxu0 %v8005_v32  ;;  %6110 = vmatpush1.bf16.msra.mxu1 %v8007_v33  ;;  %v8061_v32 = vcombine.low %v741_v18, %v745_v19  ;;  %v8063_v33 = vcombine.low %v742_v21, %v746_v22  ;;  %v8112_v18 = vcombine.high %v790_v12, %v794_v13  ;;  %v797_v19 = vld [vmem:[%s9149_s25 + $0xad0] sm:$0xff]  ;;  %v798_v21 = vld [vmem:[%s9149_s25 + $0xad8] sm:$0xff] }
 0x1ce   : > { %5546 = vmatprep.subr.bf16.mxu0 %v8014_v34  ;;  %6111 = vmatprep.subr.bf16.mxu1 %v8016_v36  ;;  %v8070_v34 = vcombine.high %v749_v28, %v753_v29  ;;  %v757_v36 = vld [vmem:[%s9149_s25 + $0x990] sm:$0xff]  ;;  %v802_v22 = vld [vmem:[%s9149_s25 + $0xaf8] sm:$0xff] }
 0x1d0   : > { %5508 = vmatmul.mubr.bf16.gmra.mrb[60].mxu0 %v9010_v48  ;;  %6073 = vmatmul.mubr.bf16.gmra.mrb[60].mxu1 %v9010_v48  ;;  %v769_v48 = vld [vmem:[%s9149_s25 + $0x9f0] sm:$0xff] }
 0x1d1   : > { %5547 = vmatpush1.bf16.msra.mxu0 %v8013_v41  ;;  %6112 = vmatpush1.bf16.msra.mxu1 %v8015_v42  ;;  %v8069_v41 = vcombine.low %v749_v28, %v753_v29  ;;  %v8071_v42 = vcombine.low %v750_v30, %v754_v31  ;;  %v809_v28 = vld [vmem:[%s9149_s25 + $0xb30] sm:$0xff]  ;;  %v806_v30 = vld [vmem:[%s9149_s25 + $0xb18] sm:$0xff] }
 0x1d2   : > { %5548 = vmatprep.subr.bf16.mxu0 %v8022_v43  ;;  %6113 = vmatprep.subr.bf16.mxu1 %v8024_v45  ;;  %v8078_v43 = vcombine.high %v757_v36, %v761_v37  ;;  %v9017_v45 = vld [vmem:[%s9183_s29 + $0xe4] ss:$36 sps:$4 sm:$0xff]   ;;  %v9022_v29 = vld [vmem:[%s9183_s29 + $0x170] ss:$36 sps:$4 sm:$0xff]   ;;  %v810_v31 = vld [vmem:[%s9149_s25 + $0xb38] sm:$0xff] }
 0x1d3   : > { %5550 = vmatprep.mubr.bf16.mxu0 %v9011_v54  ;;  %6115 = vmatprep.mubr.bf16.mxu1 %v9011_v54  ;;  %v8088_v54 = vcombine.high %v766_v49, %v770_v50 }
 0x1d5   : > { %5549 = vmatpush1.bf16.msra.mxu0 %v8021_v51  ;;  %6114 = vmatpush1.bf16.msra.mxu1 %v8023_v52  ;;  %v8077_v51 = vcombine.low %v757_v36, %v761_v37  ;;  %v8079_v52 = vcombine.low %v758_v39, %v762_v40  ;;  %v8128_v36 = vcombine.high %v806_v30, %v810_v31  ;;  %v813_v37 = vld [vmem:[%s9149_s25 + $0xb50] sm:$0xff]  ;;  %v814_v39 = vld [vmem:[%s9149_s25 + $0xb58] sm:$0xff] }
 0x1d6   : > { %5631 = vmatprep.subr.bf16.mxu0 %v8030_v53  ;;  %6196 = vmatprep.subr.bf16.mxu1 %v8032_v55  ;;  %v8086_v53 = vcombine.high %v765_v47, %v769_v48  ;;  %v773_v55 = vld [vmem:[%s9149_s25 + $0xa10] sm:$0xff]  ;;  %v818_v40 = vld [vmem:[%s9149_s25 + $0xb78] sm:$0xff] }
 0x1d8   : > { %5551 = vmatmul.mubr.bf16.vlgmr.msra.gmra.mrb[32].mxu0 %v9012_v2  ;;  %6116 = vmatmul.mubr.bf16.vlgmr.msra.gmra.mrb[32].mxu1 %v9012_v2  ;;  %v785_v2 = vld [vmem:[%s9149_s25 + $0xa70] sm:$0xff] }
 0x1d9   : > { %5632 = vmatpush1.bf16.msra.mxu0 %v8029_v60  ;;  %6197 = vmatpush1.bf16.msra.mxu1 %v8031_v61  ;;  %v8085_v60 = vcombine.low %v765_v47, %v769_v48  ;;  %v8087_v61 = vcombine.low %v766_v49, %v770_v50  ;;  %v9790_v47 = vld [vmem:[%s9149_s25 + $0xbb0] sm:$0xff]  ;;  %v9793_v48 = vld [vmem:[%s9149_s25 + $0xb98] sm:$0xff] }
 0x1da   : > { %5633 = vmatprep.subr.bf16.mxu0 %v8038_v62  ;;  %6198 = vmatprep.subr.bf16.mxu1 %v8040_v63  ;;  %v8094_v62 = vcombine.high %v773_v55, %v777_v56  ;;  %v9019_v63 = vld [vmem:[%s9183_s29 + $0x12c] ss:$36 sps:$4 sm:$0xff]   ;;  %v9024_v49 = vld [vmem:[%s9183_s29 + $0x1b8] ss:$36 sps:$4 sm:$0xff]  }
 0x1db   : > { %5560 = vmatprep.mubr.bf16.mxu0 %v9013_v8  ;;  %6125 = vmatprep.mubr.bf16.mxu1 %v9013_v8  ;;  %v8104_v8 = vcombine.high %v782_v3, %v786_v4  ;;  %v9797_v50 = vld [vmem:[%s9149_s25 + $0xbb8] sm:$0xff] }
 0x1dd   : > { %5634 = vmatpush1.bf16.msra.mxu0 %v8037_v5  ;;  %6199 = vmatpush1.bf16.msra.mxu1 %v8039_v6  ;;  %v8093_v5 = vcombine.low %v773_v55, %v777_v56  ;;  %v8095_v6 = vcombine.low %v774_v58, %v778_v59  ;;  %v9806_v55 = vld [vmem:[%s9149_s25 + $0xbd8] sm:$0xff]  ;;  %v8135_v58 = vcombine.low %v814_v39, %v818_v40 }
 0x1de   : > { %5635 = vmatprep.subr.bf16.mxu0 %v8046_v7  ;;  %6200 = vmatprep.subr.bf16.mxu1 %v8048_v9  ;;  %v8102_v7 = vcombine.high %v781_v1, %v785_v2  ;;  %v789_v9 = vld [vmem:[%s9149_s25 + $0xa90] sm:$0xff]  ;;  %v9809_v56 = vld [vmem:[%s9149_s25 + $0xbf8] sm:$0xff] }
 0x1e0   : > { %5561 = vmatmul.mubr.bf16.gmra.mrb[36].mxu0 %v9014_v20  ;;  %6126 = vmatmul.mubr.bf16.gmra.mrb[36].mxu1 %v9014_v20  ;;  %v801_v20 = vld [vmem:[%s9149_s25 + $0xaf0] sm:$0xff] }
 0x1e1   : > { %5636 = vmatpush1.bf16.msra.mxu0 %v8045_v14  ;;  %6201 = vmatpush1.bf16.msra.mxu1 %v8047_v15  ;;  %v8101_v14 = vcombine.low %v781_v1, %v785_v2  ;;  %v8103_v15 = vcombine.low %v782_v3, %v786_v4  ;;  %v8144_v1 = vcombine.high %v9793_v48, %v9797_v50  ;;  %v9832_v2 = vld [vmem:[%s9149_s25 + $0xc50] sm:$0xff]  ;;  %v9838_v4 = vld [vmem:[%s9149_s25 + $0xc58] sm:$0xff] }
 0x1e2   : > { %5637 = vmatprep.subr.bf16.mxu0 %v8054_v16  ;;  %6202 = vmatprep.subr.bf16.mxu1 %v8056_v17  ;;  %v8110_v16 = vcombine.high %v789_v9, %v793_v10  ;;  %v9021_v17 = vld [vmem:[%s9183_s29 + $0x174] ss:$36 sps:$4 sm:$0xff]  }
 0x1e3   : > { %5570 = vmatprep.mubr.bf16.mxu0 %v9015_v26  ;;  %6135 = vmatprep.mubr.bf16.mxu1 %v9015_v26  ;;  %v8120_v26 = vcombine.high %v798_v21, %v802_v22  ;;  %v9835_v3 = vld [vmem:[%s9149_s25 + $0xc70] sm:$0xff] }
 0x1e5   : > { %5638 = vmatpush1.bf16.msra.mxu0 %v8053_v23  ;;  %6203 = vmatpush1.bf16.msra.mxu1 %v8055_v24  ;;  %v8109_v23 = vcombine.low %v789_v9, %v793_v10  ;;  %v8111_v24 = vcombine.low %v790_v12, %v794_v13  ;;  %v9850_v9 = vld [vmem:[%s9149_s25 + $0xc90] sm:$0xff]  ;;  %v8151_v12 = vcombine.low %v9806_v55, %v9809_v56 }
 0x1e6   : > { %5639 = vmatprep.subr.bf16.mxu0 %v8062_v25  ;;  %6204 = vmatprep.subr.bf16.mxu1 %v8064_v27  ;;  %v8118_v25 = vcombine.high %v797_v19, %v801_v20  ;;  %v805_v27 = vld [vmem:[%s9149_s25 + $0xb10] sm:$0xff]  ;;  %v8152_v13 = vcombine.high %v9806_v55, %v9809_v56 }
 0x1e7   : > { %v9853_v10 = vld [vmem:[%s9149_s25 + $0xcb0] sm:$0xff] }
 0x1e8   : > { %5571 = vmatmul.mubr.bf16.gmra.mrb[40].mxu0 %v9016_v38  ;;  %6136 = vmatmul.mubr.bf16.gmra.mrb[40].mxu1 %v9016_v38  ;;  %v817_v38 = vld [vmem:[%s9149_s25 + $0xb70] sm:$0xff] }
 0x1e9   : > { %5640 = vmatpush1.bf16.msra.mxu0 %v8061_v32  ;;  %6205 = vmatpush1.bf16.msra.mxu1 %v8063_v33  ;;  %v8117_v32 = vcombine.low %v797_v19, %v801_v20  ;;  %v8119_v33 = vcombine.low %v798_v21, %v802_v22  ;;  %v9885_v21 = vld [vmem:[%s9149_s25 + $0xcd0] sm:$0xff] }
 0x1ea   : > { %5641 = vmatprep.subr.bf16.mxu0 %v8070_v34  ;;  %6206 = vmatprep.subr.bf16.mxu1 %v8072_v35  ;;  %v8126_v34 = vcombine.high %v805_v27, %v809_v28  ;;  %v9023_v35 = vld [vmem:[%s9183_s29 + $0x1bc] ss:$36 sps:$4 sm:$0xff]   ;;  %v9888_v22 = vld [vmem:[%s9149_s25 + $0xcf0] sm:$0xff] }
 0x1eb   : > { %5580 = vmatprep.mubr.bf16.mxu0 %v9017_v45  ;;  %6145 = vmatprep.mubr.bf16.mxu1 %v9017_v45  ;;  %v8136_v45 = vcombine.high %v814_v39, %v818_v40  ;;  %v10002_v40 = vld [vmem:[%s9149_s25 + $0xdf8] sm:$0xff]  ;;  %v10029_v55 = vld [vmem:[%s9149_s25 + $0xe50] sm:$0xff] }
 0x1ec   : > { %v10068_v39 = vld [vmem:[%s9149_s25 + $0xeb8] sm:$0xff]  ;;  %v10084_v20 = vld [vmem:[%s9149_s25 + $0xed0] sm:$0xff] }
 0x1ed   : > { %5642 = vmatpush1.bf16.msra.mxu0 %v8069_v41  ;;  %6207 = vmatpush1.bf16.msra.mxu1 %v8071_v42  ;;  %v8125_v41 = vcombine.low %v805_v27, %v809_v28  ;;  %v8127_v42 = vcombine.low %v806_v30, %v810_v31  ;;  %v9902_v28 = vld [vmem:[%s9149_s25 + $0xcf8] sm:$0xff]  ;;  %v9908_v30 = vld [vmem:[%s9149_s25 + $0xd30] sm:$0xff]  ;;  %v9026_v31 = vld [vmem:[%s9183_s29 + $0x200] ss:$36 sps:$4 sm:$0xff]   ;;  %11563 = vst [vmem:[#allocation10_spill] sm:$0xff] %v10068_v39 }
 0x1ee   : > { %5643 = vmatprep.subr.bf16.mxu0 %v8078_v43  ;;  %6208 = vmatprep.subr.bf16.mxu1 %v8080_v46  ;;  %v8134_v43 = vcombine.high %v813_v37, %v817_v38  ;;  %v9787_v46 = vld [vmem:[%s9149_s25 + $0xb90] sm:$0xff]  ;;  %v9094_v27 = vmov 1983009808   ;;  %11565 = vst [vmem:[#allocation12_spill] sm:$0xff] %v10084_v20  ;;  %v10203_v20 = vld [vmem:[%s9149_s25 + $0xfd8] sm:$0xff] }
 0x1ef   : > { %v8142_v59 = vcombine.high %v9787_v46, %v9790_v47  ;;  %v10206_v39 = vld [vmem:[%s9149_s25 + $0xff8] sm:$0xff] }
 0x1f0   : > { %5581 = vmatmul.mubr.bf16.gmra.mrb[44].mxu0 %v9018_v57  ;;  %6146 = vmatmul.mubr.bf16.gmra.mrb[44].mxu1 %v9018_v57  ;;  %v9812_v57 = vld [vmem:[%s9149_s25 + $0xc10] sm:$0xff] }
 0x1f1   : > { %5644 = vmatpush1.bf16.msra.mxu0 %v8077_v51  ;;  %6209 = vmatpush1.bf16.msra.mxu1 %v8079_v52  ;;  %v9800_v51 = vld [vmem:[%s9149_s25 + $0xbd0] sm:$0xff] }
 0x1f2   : > { %5645 = vmatprep.subr.bf16.mxu0 %v8086_v53  ;;  %6210 = vmatprep.subr.bf16.mxu1 %v8088_v54  ;;  %v9803_v52 = vld [vmem:[%s9149_s25 + $0xbf0] sm:$0xff]  ;;  %v6537_v53 = vlaneseq  ;;  %v8133_v54 = vcombine.low %v813_v37, %v817_v38 }
 0x1f3   : > { %5590 = vmatprep.mubr.bf16.mxu0 %v9019_v63  ;;  %6155 = vmatprep.mubr.bf16.mxu1 %v9019_v63  ;;  %v9025_v63 = vld [vmem:[%s9183_s29 + $0x204] ss:$36 sps:$4 sm:$0xff]  }
 0x1f5   : > { %5646 = vmatpush1.bf16.msra.mxu0 %v8085_v60  ;;  %6211 = vmatpush1.bf16.msra.mxu1 %v8087_v61  ;;  %v9817_v60 = vld [vmem:[%s9149_s25 + $0xc30] sm:$0xff]  ;;  %v9820_v61 = vld [vmem:[%s9149_s25 + $0xc18] sm:$0xff] }
 0x1f6   : > { %5647 = vmatprep.subr.bf16.mxu0 %v8094_v62  ;;  %6212 = vmatprep.subr.bf16.mxu1 %v8096_v0  ;;  %v9823_v62 = vld [vmem:[%s9149_s25 + $0xc38] sm:$0xff]  ;;  %v8141_v0 = vcombine.low %v9787_v46, %v9790_v47  ;;  %v10008_v47 = vld [vmem:[%s9149_s25 + $0xe30] sm:$0xff] }
 0x1f7   : > { %v8160_v19 = vcombine.high %v9820_v61, %v9823_v62  ;;  %v9944_v46 = vld [vmem:[%s9149_s25 + $0xd58] sm:$0xff]  ;;  %11557 = vst [vmem:[#allocation4_spill] sm:$0xff] %v10008_v47  ;;  %v10130_v47 = vld [vmem:[%s9149_s25 + $0xf50] sm:$0xff] }
 0x1f8   : > { %5591 = vmatmul.mubr.bf16.gmra.mrb[48].mxu0 %v9020_v11  ;;  %6156 = vmatmul.mubr.bf16.gmra.mrb[48].mxu1 %v9020_v11  ;;  %v9855_v11 = vshrl.u32 %v6537_v53, 7  ;;  %v9954_v53 = vld [vmem:[%s9149_s25 + $0xd78] sm:$0xff] }
 0x1f9   : > { %5648 = vmatpush1.bf16.msra.mxu0 %v8093_v5  ;;  %6213 = vmatpush1.bf16.msra.mxu1 %v8095_v6  ;;  %v8143_v5 = vcombine.low %v9793_v48, %v9797_v50  ;;  %v8149_v6 = vcombine.low %v9800_v51, %v9803_v52  ;;  %v6705_v50 = vld [vmem:[%s9915_s15] sm:$0xff]  ;;  %v9990_v48 = vld [vmem:[%s9149_s25 + $0xdd8] sm:$0xff] }
 0x1fa   : > { %5649 = vmatprep.subr.bf16.mxu0 %v8102_v7  ;;  %6214 = vmatprep.subr.bf16.mxu1 %v8104_v8  ;;  %v8150_v7 = vcombine.high %v9800_v51, %v9803_v52  ;;  %v9847_v8 = vld [vmem:[%s9149_s25 + $0xc78] sm:$0xff]  ;;  %11555 = vst [vmem:[#allocation2_spill] sm:$0xff] %v9855_v11  ;;  %v6539_v37 = vsub.s32 0, %v9855_v11  ;;  %v6547_v38 = vsub.s32 2, %v9855_v11 }
 0x1fb   : > { %5600 = vmatprep.mubr.bf16.mxu0 %v9021_v17  ;;  %6165 = vmatprep.mubr.bf16.mxu1 %v9021_v17  ;;  %v9869_v17 = vld [vmem:[%s9149_s25 + $0xcb8] sm:$0xff] }
 0x1fc   : > { %v10016_v51 = vrot.slane %v6705_v50, %v6539_v37  ;;  %v10018_v52 = vrot.slane %v6705_v50, %v6547_v38 }
 0x1fd   : > { %5650 = vmatpush1.bf16.msra.mxu0 %v8101_v14  ;;  %6215 = vmatpush1.bf16.msra.mxu1 %v8103_v15  ;;  %v8157_v14 = vcombine.low %v9812_v57, %v9817_v60  ;;  %v8158_v15 = vcombine.high %v9812_v57, %v9817_v60  ;;  %v10090_v57 = vld [vmem:[%s9149_s25 + $0xed8] sm:$0xff] }
 0x1fe   : > { %5651 = vmatprep.subr.bf16.mxu0 %v8110_v16  ;;  %6216 = vmatprep.subr.bf16.mxu1 %v8112_v18  ;;  %v9866_v16 = vld [vmem:[%s9149_s25 + $0xc98] sm:$0xff]  ;;  %v8159_v18 = vcombine.low %v9820_v61, %v9823_v62  ;;  %v10111_v61 = vld [vmem:[%s9149_s25 + $0xf30] sm:$0xff] }
 0x1ff   : > { %11569 = vst [vmem:[#allocation16_spill] sm:$0xff] %v10111_v61  ;;  %v9029_v62 = vld [vmem:[%s9183_s29 + $0x5c] ss:$36 sps:$4 sm:$0xff]   ;;  %v10222_v61 = vld [vmem:[%s9149_s25 + $0x1030] sm:$0xff] }
 0x200   : > { %5601 = vmatmul.mubr.bf16.gmra.mrb[52].mxu0 %v9022_v29  ;;  %6166 = vmatmul.mubr.bf16.gmra.mrb[52].mxu1 %v9022_v29  ;;  %v9905_v29 = vld [vmem:[%s9149_s25 + $0xd10] sm:$0xff]  ;;  %v10127_v60 = vld [vmem:[%s9149_s25 + $0xf38] sm:$0xff]  ;;  %11583 = vst [vmem:[#allocation26_spill] sm:$0xff] %v10222_v61 }
 0x201   : > { %5652 = vmatpush1.bf16.msra.mxu0 %v8109_v23  ;;  %6217 = vmatpush1.bf16.msra.mxu1 %v8111_v24  ;;  %v9891_v23 = vld [vmem:[%s9149_s25 + $0xcd8] sm:$0xff]  ;;  %v8166_v24 = vcombine.high %v9832_v2, %v9835_v3 }
 0x202   : > { %5653 = vmatprep.subr.bf16.mxu0 %v8118_v25  ;;  %6218 = vmatprep.subr.bf16.mxu1 %v8120_v26  ;;  %v8168_v26 = vcombine.high %v9838_v4, %v9847_v8  ;;  %v10070_v25 = vunpack.c.l.s4 %v9094_v27  ;;  %v10124_v27 = vld [vmem:[%s9149_s25 + $0xf18] sm:$0xff] }
 0x203   : > { %5610 = vmatprep.mubr.bf16.mxu0 %v9023_v35  ;;  %6175 = vmatprep.mubr.bf16.mxu1 %v9023_v35  ;;  %v9926_v35 = vld [vmem:[%s9149_s25 + $0xd38] sm:$0xff] }
 0x204   : > { %v10360_v61 = vld [vmem:[%s9149_s25 + $0x1158] sm:$0xff] }
 0x205   : > { %5654 = vmatpush1.bf16.msra.mxu0 %v8117_v32  ;;  %6219 = vmatpush1.bf16.msra.mxu1 %v8119_v33  ;;  %v10049_v33 = vld [vmem:[%s9149_s25 + $0xe78] sm:$0xff]  ;;  %v9028_v32 = vld [vmem:[%s9183_s29 + $0x10] ss:$36 sps:$4 sm:$0xff]   ;;  %11604 = vst [vmem:[#allocation39_spill] sm:$0xff] %v10360_v61 }
 0x206   : > { %5655 = vmatprep.subr.bf16.mxu0 %v8126_v34  ;;  %6220 = vmatprep.subr.bf16.mxu1 %v8128_v36  ;;  %v9923_v34 = vld [vmem:[%s9149_s25 + $0xd18] sm:$0xff]  ;;  %v6535_v36 = vld [vmem:[%s9876_s12] sm:$0xff]  ;;  %11561 = vst [vmem:[#allocation8_spill] sm:$0xff] %v10049_v33  ;;  %v10160_v33 = vld [vmem:[%s9149_s25 + $0xf90] sm:$0xff] }
 0x207   : > { %v9979_v44 = vrot.slane %v6535_v36, %v6547_v38  ;;  %v10043_v38 = vld [vmem:[%s9149_s25 + $0xe70] sm:$0xff] }
 0x208   : > { %5611 = vmatmul.mubr.bf16.gmra.mrb[56].mxu0 %v9024_v49  ;;  %6176 = vmatmul.mubr.bf16.gmra.mrb[56].mxu1 %v9024_v49  ;;  %v10005_v49 = vld [vmem:[%s9149_s25 + $0xe10] sm:$0xff] }
 0x209   : > { %5656 = vmatpush1.bf16.msra.mxu0 %v8125_v41  ;;  %6221 = vmatpush1.bf16.msra.mxu1 %v8127_v42  ;;  %v6543_v41 = vsub.s32 1, %v9855_v11  ;;  %v6551_v42 = vsub.s32 3, %v9855_v11  ;;  %11556 = vst [vmem:[#allocation3_spill] sm:$0xff] %v10005_v49  ;;  %v10146_v49 = vld [vmem:[%s9149_s25 + $0xf78] sm:$0xff] }
 0x20a   : > { %5657 = vmatprep.subr.bf16.mxu0 %v8134_v43  ;;  %6222 = vmatprep.subr.bf16.mxu1 %v8136_v45  ;;  %v9938_v43 = vld [vmem:[%s9149_s25 + $0xd50] sm:$0xff]  ;;  %11570 = vst [vmem:[#allocation17_spill] sm:$0xff] %v10146_v49 }
 0x20b   : > { %5620 = vmatprep.mubr.bf16.mxu0 %v9025_v63  ;;  %6185 = vmatprep.mubr.bf16.mxu1 %v9025_v63  ;;  %v9941_v45 = vld [vmem:[%s9149_s25 + $0xd70] sm:$0xff]  ;;  %v10034_v56 = vrot.slane %v6705_v50, %v6543_v41 }
 0x20c   : > { %v9987_v63 = vld [vmem:[%s9149_s25 + $0xdf0] sm:$0xff] }
 0x20d   : > { %5658 = vmatpush1.bf16.msra.mxu0 %v8133_v54  ;;  %6223 = vmatpush1.bf16.msra.mxu1 %v8135_v58  ;;  %v9957_v54 = vld [vmem:[%s9149_s25 + $0xd90] sm:$0xff] }
 0x20e   : > { %5659 = vmatprep.subr.bf16.mxu0 %v8142_v59  ;;  %6224 = vmatprep.subr.bf16.mxu1 %v8144_v1  ;;  %v9027_v58 = vld [vmem:[%s9183_s29 + $0x14] ss:$36 sps:$4 sm:$0xff]  }
 0x20f   : > { %v9967_v1 = vld [vmem:[%s9149_s25 + $0xdb0] sm:$0xff] }
 0x210   : > { %5621 = vmatmul.mubr.bf16.gmra.mrb[60].mxu0 %v9026_v31  ;;  %6186 = vmatmul.mubr.bf16.gmra.mrb[60].mxu1 %v9026_v31  ;;  %v9977_v31 = vrot.slane %v6535_v36, %v6539_v37  ;;  %v9984_v59 = vld [vmem:[%s9149_s25 + $0xdd0] sm:$0xff] }
 0x211   : > { %5660 = vmatpush1.bf16.msra.mxu0 %v8141_v0  ;;  %6225 = vmatpush1.bf16.msra.mxu1 %v8143_v5  ;;  %v9970_v5 = vld [vmem:[%s9149_s25 + $0xd98] sm:$0xff]  ;;  %v10062_v37 = vld [vmem:[%s9149_s25 + $0xeb0] sm:$0xff] }
 0x212   : > { %5661 = vmatprep.subr.bf16.mxu0 %v8150_v7  ;;  %6226 = vmatprep.subr.bf16.mxu1 %v8152_v13  ;;  %v9973_v7 = vld [vmem:[%s9149_s25 + $0xdb8] sm:$0xff]  ;;  %v9997_v13 = vrot.slane %v6535_v36, %v6551_v42  ;;  %v10264_v49 = vld [vmem:[%s9149_s25 + $0x1090] sm:$0xff] }
 0x213   : > { %5663 = vmatprep.mubr.bf16.mxu0 %v9027_v58  ;;  %6228 = vmatprep.mubr.bf16.mxu1 %v9027_v58  ;;  %v9995_v58 = vrot.slane %v6535_v36, %v6543_v41  ;;  %v10023_v36 = vld [vmem:[%s9149_s25 + $0xe18] sm:$0xff]  ;;  %v10075_v41 = vpop.permute.xlu1 %7021  ;;  %11589 = vst [vmem:[#allocation29_spill] sm:$0xff] %v10264_v49  ;;  %v10366_v49 = vld [vmem:[%s9149_s25 + $0x1190] sm:$0xff] }
 0x214   : > { %11558 = vst [vmem:[#allocation5_spill] sm:$0xff] %v10023_v36  ;;  %v10026_v0 = vld [vmem:[%s9149_s25 + $0xe38] sm:$0xff]  ;;  %11564 = vst [vmem:[#allocation11_spill] sm:$0xff] %v10075_v41 }
 0x215   : > { %5662 = vmatpush1.bf16.msra.mxu0 %v8149_v6  ;;  %6227 = vmatpush1.bf16.msra.mxu1 %v8151_v12  ;;  %11559 = vst [vmem:[#allocation6_spill] sm:$0xff] %v10026_v0  ;;  %v10036_v12 = vrot.slane %v6705_v50, %v6551_v42  ;;  %v10046_v6 = vld [vmem:[%s9149_s25 + $0xe58] sm:$0xff]  ;;  %v10059_v50 = vld [vmem:[%s9149_s25 + $0xe90] sm:$0xff] }
 0x216   : > { %5744 = vmatprep.subr.bf16.mxu0 %v8158_v15  ;;  %6309 = vmatprep.subr.bf16.mxu1 %v8160_v19  ;;  %11560 = vst [vmem:[#allocation7_spill] sm:$0xff] %v10046_v6  ;;  %v10065_v15 = vld [vmem:[%s9149_s25 + $0xe98] sm:$0xff]  ;;  %v10108_v42 = vld [vmem:[%s9149_s25 + $0xf10] sm:$0xff] }
 0x217   : > { %11562 = vst [vmem:[#allocation9_spill] sm:$0xff] %v10065_v15  ;;  %v10105_v19 = vld [vmem:[%s9149_s25 + $0xef8] sm:$0xff]  ;;  %11568 = vst [vmem:[#allocation15_spill] sm:$0xff] %v10108_v42  ;;  %v10140_v0 = vld [vmem:[%s9149_s25 + $0xf70] sm:$0xff] }
 0x218   : > { %5664 = vmatmul.mubr.bf16.vlgmr.msra.gmra.mrb[32].mxu0 %v9028_v32  ;;  %6229 = vmatmul.mubr.bf16.vlgmr.msra.gmra.mrb[32].mxu1 %v9028_v32  ;;  %v10087_v32 = vld [vmem:[%s9149_s25 + $0xef0] sm:$0xff]  ;;  %11567 = vst [vmem:[#allocation14_spill] sm:$0xff] %v10105_v19  ;;  %v10143_v36 = vld [vmem:[%s9149_s25 + $0xf58] sm:$0xff] }
 0x219   : > { %5745 = vmatpush1.bf16.msra.mxu0 %v8157_v14  ;;  %11566 = vst [vmem:[#allocation13_spill] sm:$0xff] %v10087_v32  ;;  %6310 = vmatpush1.bf16.msra.mxu1 %v8159_v18  ;;  %v7455_v14 = vunpack.c.0.s8 %v10070_v25  ;;  %v10163_v6 = vld [vmem:[%s9149_s25 + $0xfb0] sm:$0xff]  ;;  %v9030_v15 = vld [vmem:[%s9183_s29 + $0x58] ss:$36 sps:$4 sm:$0xff]  }
 0x21a   : > { %5746 = vmatprep.subr.bf16.mxu0 %v8166_v24  ;;  %6311 = vmatprep.subr.bf16.mxu1 %v8168_v26  ;;  %11572 = vst [vmem:[#allocation18_spill] sm:$0xff] %v10163_v6  ;;  %v10181_v26 = vld [vmem:[%s9149_s25 + $0xfb8] sm:$0xff] }
 0x21b   : > { %5673 = vmatprep.mubr.bf16.mxu0 %v9029_v62  ;;  %6238 = vmatprep.mubr.bf16.mxu1 %v9029_v62  ;;  %v11571_v62 = vcombine.low %v9832_v2, %v9835_v3  ;;  %v10166_v2 = vld [vmem:[%s9149_s25 + $0xf98] sm:$0xff]  ;;  %v11574_v3 = vcombine.low %v9838_v4, %v9847_v8  ;;  %11576 = vst [vmem:[#allocation20_spill] sm:$0xff] %v10181_v26  ;;  %v10184_v4 = vld [vmem:[%s9149_s25 + $0xfd0] sm:$0xff] }
 0x21c   : > { %11573 = vst [vmem:[#allocation19_spill] sm:$0xff] %v10166_v2  ;;  %11577 = vst [vmem:[#allocation21_spill] sm:$0xff] %v10184_v4  ;;  %v10187_v8 = vld [vmem:[%s9149_s25 + $0xff0] sm:$0xff]  ;;  %v10215_v25 = vsub.s32 %v7455_v14, %v9855_v11  ;;  %v10225_v42 = vld [vmem:[%s9149_s25 + $0x1018] sm:$0xff]  ;;  %v11584_v14 = vcombine.low %v9850_v9, %v9853_v10 }
 0x21d   : > { %5747 = vmatpush1.bf16.msra.mxu0 %v11571_v62  ;;  %6312 = vmatpush1.bf16.msra.mxu1 %v11574_v3  ;;  %v11575_v62 = vcombine.high %v9850_v9, %v9853_v10  ;;  %11578 = vst [vmem:[#allocation22_spill] sm:$0xff] %v10187_v8  ;;  %v11579_v3 = vcombine.high %v9866_v16, %v9869_v17  ;;  %v10228_v19 = vld [vmem:[%s9149_s25 + $0x1038] sm:$0xff]  ;;  %v10240_v11 = vld [vmem:[%s9149_s25 + $0x1050] sm:$0xff] }
 0x21e   : > { %11582 = vst [vmem:[#allocation25_spill] sm:$0xff] %v10215_v25  ;;  %11585 = vst [vmem:[#allocation27_spill] sm:$0xff] %v10240_v11  ;;  %v10243_v25 = vld [vmem:[%s9149_s25 + $0x1070] sm:$0xff]  ;;  %v11587_v9 = vcombine.low %v9866_v16, %v9869_v17  ;;  %v11588_v10 = vcombine.high %v9885_v21, %v9888_v22  ;;  %v10261_v18 = vld [vmem:[%s9149_s25 + $0x1078] sm:$0xff]  ;;  %v11591_v17 = vcombine.high %v9891_v23, %v9902_v28 }
 0x21f   : > { %5748 = vmatprep.subr.bf16.mxu0 %v11575_v62  ;;  %6313 = vmatprep.subr.bf16.mxu1 %v11579_v3  ;;  %v10192_v62 = vpop.permute.xlu1 %7026  ;;  %v10209_v3 = vld [vmem:[%s9149_s25 + $0x1010] sm:$0xff]  ;;  %11586 = vst [vmem:[#allocation28_spill] sm:$0xff] %v10243_v25  ;;  %v10280_v32 = vld [vmem:[%s9149_s25 + $0x1098] sm:$0xff] }
 0x220   : > { %11580 = vst [vmem:[#allocation23_spill] sm:$0xff] %v10192_v62  ;;  %11581 = vst [vmem:[#allocation24_spill] sm:$0xff] %v10209_v3  ;;  %5674 = vmatmul.mubr.bf16.gmra.mrb[36].mxu0 %v9030_v15  ;;  %6239 = vmatmul.mubr.bf16.gmra.mrb[36].mxu1 %v9030_v15  ;;  %v10246_v15 = vld [vmem:[%s9149_s25 + $0x1058] sm:$0xff]  ;;  %v10267_v16 = vld [vmem:[%s9149_s25 + $0x10b0] sm:$0xff] }
 0x221   : > { %5749 = vmatpush1.bf16.msra.mxu0 %v11584_v14  ;;  %6314 = vmatpush1.bf16.msra.mxu1 %v11587_v9  ;;  %11590 = vst [vmem:[#allocation30_spill] sm:$0xff] %v10267_v16  ;;  %v9031_v9 = vld [vmem:[%s9183_s29 + $0xa4] ss:$36 sps:$4 sm:$0xff]   ;;  %v10283_v26 = vld [vmem:[%s9149_s25 + $0x10b8] sm:$0xff]  ;;  %v10286_v2 = vld [vmem:[%s9149_s25 + $0x10d0] sm:$0xff]  ;;  %v11599_v14 = vcombine.high %v9905_v29, %v9908_v30 }
 0x222   : > { %5750 = vmatprep.subr.bf16.mxu0 %v11588_v10  ;;  %6315 = vmatprep.subr.bf16.mxu1 %v11591_v17  ;;  %11592 = vst [vmem:[#allocation31_spill] sm:$0xff] %v10283_v26  ;;  %11593 = vst [vmem:[#allocation32_spill] sm:$0xff] %v10286_v2  ;;  %v10297_v8 = vld [vmem:[%s9149_s25 + $0x10f0] sm:$0xff]  ;;  %v10300_v4 = vld [vmem:[%s9149_s25 + $0x10d8] sm:$0xff] }
 0x223   : > { %5683 = vmatprep.mubr.bf16.mxu0 %v9031_v9  ;;  %6248 = vmatprep.mubr.bf16.mxu1 %v9031_v9  ;;  %11594 = vst [vmem:[#allocation33_spill] sm:$0xff] %v10297_v8  ;;  %v10303_v6 = vld [vmem:[%s9149_s25 + $0x10f8] sm:$0xff]  ;;  %v11595_v9 = vcombine.low %v9885_v21, %v9888_v22  ;;  %v10308_v10 = vpop.permute.xlu1 %7031  ;;  %v10319_v3 = vld [vmem:[%s9149_s25 + $0x1110] sm:$0xff] }
 0x224   : > { %11596 = vst [vmem:[#allocation34_spill] sm:$0xff] %v10319_v3  ;;  %v10322_v21 = vld [vmem:[%s9149_s25 + $0x1130] sm:$0xff]  ;;  %v10325_v22 = vld [vmem:[%s9149_s25 + $0x1118] sm:$0xff] }
 0x225   : > { %5751 = vmatpush1.bf16.msra.mxu0 %v11595_v9  ;;  %11597 = vst [vmem:[#allocation35_spill] sm:$0xff] %v10322_v21  ;;  %v11598_v9 = vcombine.low %v9891_v23, %v9902_v28  ;;  %v10340_v25 = vld [vmem:[%s9149_s25 + $0x1138] sm:$0xff]  ;;  %v10343_v11 = vld [vmem:[%s9149_s25 + $0x1150] sm:$0xff]  ;;  %v11603_v28 = vcombine.high %v9923_v34, %v9926_v35 }
 0x226   : > { %5752 = vmatprep.subr.bf16.mxu0 %v11599_v14  ;;  %11600 = vst [vmem:[#allocation36_spill] sm:$0xff] %v10340_v25  ;;  %11601 = vst [vmem:[#allocation37_spill] sm:$0xff] %v10343_v11  ;;  %v10346_v23 = vld [vmem:[%s9149_s25 + $0x1170] sm:$0xff]  ;;  %v10363_v16 = vld [vmem:[%s9149_s25 + $0x1178] sm:$0xff]  ;;  %v11607_v14 = vcombine.low %v9905_v29, %v9908_v30  ;;  %v11611_v29 = vcombine.high %v9938_v43, %v9941_v45 }
 0x227   : > { %6316 = vmatpush1.bf16.msra.mxu1 %v11598_v9  ;;  %11602 = vst [vmem:[#allocation38_spill] sm:$0xff] %v10346_v23  ;;  %11605 = vst [vmem:[#allocation40_spill] sm:$0xff] %v10363_v16  ;;  %v10378_v8 = vld [vmem:[%s9149_s25 + $0x11b0] sm:$0xff]  ;;  %v10381_v2 = vld [vmem:[%s9149_s25 + $0x1198] sm:$0xff] }
 0x228   : > { %6317 = vmatprep.subr.bf16.mxu1 %v11603_v28  ;;  %v9032_v28 = vld [vmem:[%s9183_s29 + $0xa0] ss:$36 sps:$4 sm:$0xff]   ;;  %11606 = vst [vmem:[#allocation41_spill] sm:$0xff] %v10378_v8  ;;  %v10384_v26 = vld [vmem:[%s9149_s25 + $0x11b8] sm:$0xff]  ;;  %v10396_v21 = vld [vmem:[%s9149_s25 + $0x11d0] sm:$0xff] }
 0x229   : > { %5684 = vmatmul.mubr.bf16.gmra.mrb[40].mxu0 %v9032_v28  ;;  %6249 = vmatmul.mubr.bf16.gmra.mrb[40].mxu1 %v9032_v28  ;;  %11608 = vst [vmem:[#allocation42_spill] sm:$0xff] %v10396_v21  ;;  %v10399_v3 = vld [vmem:[%s9149_s25 + $0x11f0] sm:$0xff]  ;;  %v11610_v28 = vcombine.low %v9923_v34, %v9926_v35  ;;  %v10414_v17 = vld [vmem:[%s9149_s25 + $0x11d8] sm:$0xff]  ;;  %v11614_v34 = vcombine.high %v9944_v46, %v9954_v53 }
 0x22a   : > { %5753 = vmatpush1.bf16.msra.mxu0 %v11607_v14  ;;  %11609 = vst [vmem:[#allocation43_spill] sm:$0xff] %v10399_v3  ;;  %11612 = vst [vmem:[#allocation44_spill] sm:$0xff] %v10414_v17  ;;  %v10417_v24 = vld [vmem:[%s9149_s25 + $0x11f8] sm:$0xff]  ;;  %v9033_v35 = vld [vmem:[%s9183_s29 + $0xec] ss:$36 sps:$4 sm:$0xff]   ;;  %v11617_v3 = vcombine.low %v9944_v46, %v9954_v53 }
 0x22b   : > { %6318 = vmatpush1.bf16.msra.mxu1 %v11610_v28  ;;  %5754 = vmatprep.subr.bf16.mxu0 %v11611_v29  ;;  %11613 = vst [vmem:[#allocation45_spill] sm:$0xff] %v10417_v24  ;;  %v4761_v25 = vpop.f32.mrb[0].mxu0  ;;  %v10423_v28 = vpop.permute.xlu1 %7036  ;;  %v9034_v24 = vld [vmem:[%s9183_s29 + $0xe8] ss:$36 sps:$4 sm:$0xff]  }
 0x22c   : > { %6319 = vmatprep.subr.bf16.mxu1 %v11614_v34  ;;  %5693 = vmatprep.mubr.bf16.mxu0 %v9033_v35  ;;  %11615 = vst [vmem:[#allocation46_spill] sm:$0xff] %v10423_v28  ;;  %v6577_v30 = vmul.f32 %v9977_v31, %v4761_v25  ;;  %v5326_v16 = vpop.f32.mrb[0].mxu1  ;;  %v4763_v61 = vpop.f32.mrb[1].mxu0  ;;  %v11616_v25 = vcombine.low %v9938_v43, %v9941_v45 }
 0x22d   : > { %6258 = vmatprep.mubr.bf16.mxu1 %v9033_v35  ;;  %v6579_v11 = vmul.f32 %v9979_v44, %v5326_v16  ;;  %v6578_v14 = vmul.f32 %v9995_v58, %v4763_v61  ;;  %v5328_v8 = vpop.f32.mrb[1].mxu1  ;;  %v4765_v9 = vpop.f32.mrb[2].mxu0  ;;  %v11618_v45 = vcombine.high %v9957_v54, %v9967_v1 }
 0x22e   : > { %5755 = vmatpush1.bf16.msra.mxu0 %v11616_v25  ;;  %v6747_v23 = vadd.f32 %v10016_v51, %v6577_v30  ;;  %v6580_v29 = vmul.f32 %v9997_v13, %v5328_v8  ;;  %v6585_v16 = vmul.f32 %v9977_v31, %v4765_v9  ;;  %v5330_v61 = vpop.f32.mrb[2].mxu1  ;;  %v4767_v43 = vpop.f32.mrb[3].mxu0  ;;  %v11619_v9 = vcombine.high %v9970_v5, %v9973_v7 }
 0x22f   : > { %6320 = vmatpush1.bf16.msra.mxu1 %v11617_v3  ;;  %5756 = vmatprep.subr.bf16.mxu0 %v11618_v45  ;;  %v6749_v25 = vadd.f32 %v10018_v52, %v6579_v11  ;;  %v6748_v35 = vadd.f32 %v10034_v56, %v6578_v14  ;;  %v6587_v30 = vmul.f32 %v9979_v44, %v5330_v61  ;;  %v5332_v34 = vpop.f32.mrb[3].mxu1 }
 0x230   : > { %v6586_v8 = vmul.f32 %v9995_v58, %v4767_v43  ;;  %6321 = vmatprep.subr.bf16.mxu1 %v11619_v9  ;;  %v6875_v46 = vmax.f32 %v6747_v23, 0.0  ;;  %v6750_v53 = vadd.f32 %v10036_v12, %v6580_v29  ;;  %v6755_v3 = vadd.f32 %v10016_v51, %v6585_v16 }
 0x231   : > { %v6588_v45 = vmul.f32 %v9997_v13, %v5332_v34  ;;  %5694 = vmatmul.mubr.bf16.gmra.mrb[44].mxu0 %v9034_v24  ;;  %v6877_v11 = vmax.f32 %v6749_v25, 0.0  ;;  %v6876_v14 = vmax.f32 %v6748_v35, 0.0  ;;  %v6757_v61 = vadd.f32 %v10018_v52, %v6587_v30  ;;  %6259 = vmatmul.mubr.bf16.gmra.mrb[44].mxu1 %v9034_v24 }
 0x232   : > { %v6756_v43 = vadd.f32 %v10034_v56, %v6586_v8  ;;  %v11620_v9 = vcombine.low %v9957_v54, %v9967_v1  ;;  %v6878_v23 = vmax.f32 %v6750_v53, 0.0  ;;  %v6883_v29 = vmax.f32 %v6755_v3, 0.0  ;;  %v9035_v53 = vld [vmem:[%s9183_s29 + $0x134] ss:$36 sps:$4 sm:$0xff]  }
 0x233   : > { %v6758_v16 = vadd.f32 %v10036_v12, %v6588_v45  ;;  %v10474_v34 = vmul.f32 %v10075_v41, %v6875_v46  ;;  %v11621_v35 = vcombine.low %v9970_v5, %v9973_v7  ;;  %v11622_v25 = vcombine.high %v9984_v59, %v9987_v63  ;;  %v4771_v8 = vpop.f32.mrb[4].mxu0  ;;  %5703 = vmatprep.mubr.bf16.mxu0 %v9035_v53  ;;  %v10492_v5 = vpop.permute.xlu1 %7041 }
 0x234   : > { %5757 = vmatpush1.bf16.msra.mxu0 %v11620_v9  ;;  %v6885_v24 = vmax.f32 %v6757_v61, 0.0  ;;  %v6884_v30 = vmax.f32 %v6756_v43, 0.0  ;;  %v10483_v54 = vmul.f32 %v10075_v41, %v6876_v14  ;;  %v10486_v1 = vmul.f32 %v10075_v41, %v6877_v11  ;;  %11624 = vst [vmem:[#allocation47_spill] sm:$0xff] %v10492_v5  ;;  %v5336_v61 = vpop.f32.mrb[4].mxu1  ;;  %v4773_v11 = vpop.f32.mrb[5].mxu0  ;;  %6268 = vmatprep.mubr.bf16.mxu1 %v9035_v53 }
 0x235   : > { %6322 = vmatpush1.bf16.msra.mxu1 %v11621_v35  ;;  %5758 = vmatprep.subr.bf16.mxu0 %v11622_v25  ;;  %v11623_v46 = vcombine.high %v9990_v48, %v10002_v40  ;;  %v6886_v7 = vmax.f32 %v6758_v16, 0.0  ;;  %v10495_v3 = vmul.f32 %v10075_v41, %v6878_v23  ;;  %v7107_v45 = vmul.f32 %v10192_v62, %v6883_v29  ;;  %v4775_v16 = vpop.f32.mrb[6].mxu0 }
 0x236   : > { %v6593_v14 = vmul.f32 %v9977_v31, %v4771_v8  ;;  %v7108_v43 = vmul.f32 %v10192_v62, %v6884_v30  ;;  %v7109_v9 = vmul.f32 %v10192_v62, %v6885_v24  ;;  %v6595_v35 = vmul.f32 %v9979_v44, %v5336_v61 }
 0x237   : > { %6323 = vmatprep.subr.bf16.mxu1 %v11623_v46  ;;  %v6594_v25 = vmul.f32 %v9995_v58, %v4773_v11  ;;  %v5338_v46 = vpop.f32.mrb[5].mxu1  ;;  %v11625_v23 = vcombine.low %v9984_v59, %v9987_v63  ;;  %v7110_v29 = vmul.f32 %v10192_v62, %v6886_v7  ;;  %v7227_v8 = vmax.f32 %v10474_v34, %v7107_v45  ;;  %v4777_v11 = vpop.f32.mrb[7].mxu0  ;;  %v11627_v45 = vld [vmem:[#allocation3_spill] sm:$0xff] }
 0x238   : > { %v6763_v53 = vadd.f32 %v10016_v51, %v6593_v14  ;;  %v6596_v30 = vmul.f32 %v9997_v13, %v5338_v46  ;;  %v5340_v24 = vpop.f32.mrb[6].mxu1  ;;  %v11626_v61 = vcombine.low %v9990_v48, %v10002_v40  ;;  %v7240_v41 = vmax.f32 %v10483_v54, %v7108_v43  ;;  %v11630_v54 = vld [vmem:[#allocation5_spill] sm:$0xff] }
 0x239   : > { %5759 = vmatpush1.bf16.msra.mxu0 %v11625_v23  ;;  %v7253_v59 = vmax.f32 %v10486_v1, %v7109_v9  ;;  %v6765_v63 = vadd.f32 %v10018_v52, %v6595_v35  ;;  %v6764_v7 = vadd.f32 %v10034_v56, %v6594_v25  ;;  %v5342_v34 = vpop.f32.mrb[7].mxu1  ;;  %v11628_v23 = vld [vmem:[#allocation4_spill] sm:$0xff]  ;;  %v7266_v46 = vmax.f32 %v10495_v3, %v7110_v29  ;;  %v11631_v1 = vld [vmem:[#allocation6_spill] sm:$0xff] }
 0x23a   : > { %6324 = vmatpush1.bf16.msra.mxu1 %v11626_v61  ;;  %v11629_v14 = vcombine.high %v11627_v45, %v11628_v23  ;;  %v6891_v62 = vmax.f32 %v6763_v53, 0.0  ;;  %v6766_v40 = vadd.f32 %v10036_v12, %v6596_v30  ;;  %v6601_v48 = vmul.f32 %v9977_v31, %v4775_v16  ;;  %v9036_v61 = vld [vmem:[%s9183_s29 + $0x130] ss:$36 sps:$4 sm:$0xff]  }
 0x23b   : > { %5704 = vmatmul.mubr.bf16.gmra.mrb[48].mxu0 %v9036_v61  ;;  %v11632_v43 = vcombine.high %v11630_v54, %v11631_v1  ;;  %v6893_v9 = vmax.f32 %v6765_v63, 0.0  ;;  %v6892_v35 = vmax.f32 %v6764_v7, 0.0  ;;  %v6603_v25 = vmul.f32 %v9979_v44, %v5340_v24  ;;  %6269 = vmatmul.mubr.bf16.gmra.mrb[48].mxu1 %v9036_v61 }
 0x23c   : > { %5760 = vmatprep.subr.bf16.mxu0 %v11629_v14  ;;  %v6602_v17 = vmul.f32 %v9995_v58, %v4777_v11  ;;  %v11633_v3 = vcombine.low %v11627_v45, %v11628_v23  ;;  %v6894_v29 = vmax.f32 %v6766_v40, 0.0  ;;  %v6771_v16 = vadd.f32 %v10016_v51, %v6601_v48  ;;  %v11636_v14 = vld [vmem:[#allocation7_spill] sm:$0xff]  ;;  %v10548_v48 = vpop.permute.xlu1 %7046 }
 0x23d   : > { %6325 = vmatprep.subr.bf16.mxu1 %v11632_v43  ;;  %v6604_v53 = vmul.f32 %v9997_v13, %v5342_v34  ;;  %v7115_v30 = vmul.f32 %v10308_v10, %v6891_v62  ;;  %v11634_v63 = vcombine.low %v11630_v54, %v11631_v1  ;;  %v11635_v24 = vcombine.high %v10029_v55, %v10043_v38  ;;  %v4781_v34 = vpop.f32.mrb[8].mxu0  ;;  %v11637_v62 = vld [vmem:[#allocation8_spill] sm:$0xff] }
 0x23e   : > { %5761 = vmatpush1.bf16.msra.mxu0 %v11633_v3  ;;  %v6773_v11 = vadd.f32 %v10018_v52, %v6603_v25  ;;  %v6772_v7 = vadd.f32 %v10034_v56, %v6602_v17  ;;  %v7116_v45 = vmul.f32 %v10308_v10, %v6892_v35  ;;  %v7117_v23 = vmul.f32 %v10308_v10, %v6893_v9  ;;  %v5346_v25 = vpop.f32.mrb[8].mxu1  ;;  %v4783_v17 = vpop.f32.mrb[9].mxu0  ;;  %v9037_v3 = vld [vmem:[%s9183_s29 + $0x17c] ss:$36 sps:$4 sm:$0xff]  }
 0x23f   : > { %6326 = vmatpush1.bf16.msra.mxu1 %v11634_v63  ;;  %5762 = vmatprep.subr.bf16.mxu0 %v11635_v24  ;;  %v11638_v40 = vcombine.high %v11636_v14, %v11637_v62  ;;  %11639 = vst [vmem:[#allocation3_spill] sm:$0xff] %v10548_v48  ;;  %v6899_v61 = vmax.f32 %v6771_v16, 0.0  ;;  %v6774_v54 = vadd.f32 %v10036_v12, %v6604_v53  ;;  %v4785_v21 = vpop.f32.mrb[10].mxu0 }
 0x240   : > { %v7118_v1 = vmul.f32 %v10308_v10, %v6894_v29  ;;  %v10552_v43 = vmax.f32 %v7227_v8, %v7115_v30  ;;  %5713 = vmatprep.mubr.bf16.mxu0 %v9037_v3  ;;  %6278 = vmatprep.mubr.bf16.mxu1 %v9037_v3  ;;  %v6901_v9 = vmax.f32 %v6773_v11, 0.0  ;;  %v6900_v35 = vmax.f32 %v6772_v7, 0.0 }
 0x241   : > { %6327 = vmatprep.subr.bf16.mxu1 %v11638_v40  ;;  %v10555_v63 = vmax.f32 %v7240_v41, %v7116_v45  ;;  %v10557_v24 = vmax.f32 %v7253_v59, %v7117_v23  ;;  %v5348_v40 = vpop.f32.mrb[9].mxu1  ;;  %v11640_v16 = vcombine.low %v10029_v55, %v10043_v38  ;;  %v6902_v29 = vmax.f32 %v6774_v54, 0.0  ;;  %v4787_v59 = vpop.f32.mrb[11].mxu0 }
 0x242   : > { %v10562_v8 = vmax.f32 %v7266_v46, %v7118_v1  ;;  %v7123_v53 = vmul.f32 %v10423_v28, %v6899_v61  ;;  %v6609_v30 = vmul.f32 %v9977_v31, %v4781_v34  ;;  %v5350_v11 = vpop.f32.mrb[10].mxu1  ;;  %v11641_v41 = vcombine.low %v11636_v14, %v11637_v62  ;;  %v11643_v34 = vld [vmem:[#allocation9_spill] sm:$0xff]  ;;  %v11644_v61 = vld [vmem:[#allocation10_spill] sm:$0xff] }
 0x243   : > { %5763 = vmatpush1.bf16.msra.mxu0 %v11640_v16  ;;  %v11642_v7 = vcombine.high %v10059_v50, %v10062_v37  ;;  %v7124_v55 = vmul.f32 %v10423_v28, %v6900_v35  ;;  %v7125_v38 = vmul.f32 %v10423_v28, %v6901_v9  ;;  %v6611_v46 = vmul.f32 %v9979_v44, %v5346_v25  ;;  %v5352_v23 = vpop.f32.mrb[11].mxu1  ;;  %v9038_v35 = vld [vmem:[%s9183_s29 + $0x178] ss:$36 sps:$4 sm:$0xff]  }
 0x244   : > { %6328 = vmatpush1.bf16.msra.mxu1 %v11641_v41  ;;  %v6610_v45 = vmul.f32 %v9995_v58, %v4783_v17  ;;  %v11645_v54 = vcombine.high %v11643_v34, %v11644_v61  ;;  %v7126_v14 = vmul.f32 %v10423_v28, %v6902_v29  ;;  %v7229_v62 = vmax.f32 %v10552_v43, %v7123_v53 }
 0x245   : > { %5764 = vmatprep.subr.bf16.mxu0 %v11642_v7  ;;  %v6779_v1 = vadd.f32 %v10016_v51, %v6609_v30  ;;  %v6612_v3 = vmul.f32 %v9997_v13, %v5348_v40  ;;  %5714 = vmatmul.mubr.bf16.gmra.mrb[52].mxu0 %v9038_v35  ;;  %v7242_v9 = vmax.f32 %v10555_v63, %v7124_v55  ;;  %v4791_v55 = vpop.f32.mrb[12].mxu0 }
 0x246   : > { %6329 = vmatprep.subr.bf16.mxu1 %v11645_v54  ;;  %v7255_v25 = vmax.f32 %v10557_v24, %v7125_v38  ;;  %v6781_v17 = vadd.f32 %v10018_v52, %v6611_v46  ;;  %v6780_v16 = vadd.f32 %v10034_v56, %v6610_v45  ;;  %6279 = vmatmul.mubr.bf16.gmra.mrb[52].mxu1 %v9038_v35  ;;  %v11648_v38 = vld [vmem:[#allocation12_spill] sm:$0xff]  ;;  %v11649_v46 = vld [vmem:[#allocation13_spill] sm:$0xff] }
 0x247   : > { %v7268_v41 = vmax.f32 %v10562_v8, %v7126_v14  ;;  %v6907_v29 = vmax.f32 %v6779_v1, 0.0  ;;  %v6782_v43 = vadd.f32 %v10036_v12, %v6612_v3  ;;  %v6617_v53 = vmul.f32 %v9977_v31, %v4785_v21  ;;  %v11651_v21 = vld [vmem:[#allocation14_spill] sm:$0xff]  ;;  %v5356_v14 = vpop.f32.mrb[12].mxu1 }
 0x248   : > { %v11646_v40 = vcombine.low %v10059_v50, %v10062_v37  ;;  %v11647_v63 = vcombine.low %v11643_v34, %v11644_v61  ;;  %v6909_v24 = vmax.f32 %v6781_v17, 0.0  ;;  %v6908_v30 = vmax.f32 %v6780_v16, 0.0  ;;  %v10605_v50 = vpop.permute.xlu1 %7051  ;;  %v9039_v1 = vld [vmem:[%s9183_s29 + $0x1c4] ss:$36 sps:$4 sm:$0xff]  }
 0x249   : > { %v6619_v7 = vmul.f32 %v9979_v44, %v5350_v11  ;;  %v6618_v8 = vmul.f32 %v9995_v58, %v4787_v59  ;;  %v11650_v45 = vcombine.high %v11648_v38, %v11649_v46  ;;  %v11652_v37 = vcombine.high %v10090_v57, %v11651_v21  ;;  %11653 = vst [vmem:[#allocation4_spill] sm:$0xff] %v10605_v50  ;;  %v4793_v59 = vpop.f32.mrb[13].mxu0 }
 0x24a   : > { %5765 = vmatpush1.bf16.msra.mxu0 %v11646_v40  ;;  %6330 = vmatpush1.bf16.msra.mxu1 %v11647_v63  ;;  %v6910_v34 = vmax.f32 %v6782_v43, 0.0  ;;  %v6787_v61 = vadd.f32 %v10016_v51, %v6617_v53  ;;  %v6620_v54 = vmul.f32 %v9997_v13, %v5352_v23  ;;  %v7131_v11 = vmul.f32 %v10492_v5, %v6907_v29  ;;  %v5358_v43 = vpop.f32.mrb[13].mxu1  ;;  %v4795_v40 = vpop.f32.mrb[14].mxu0 }
 0x24b   : > { %5766 = vmatprep.subr.bf16.mxu0 %v11650_v45  ;;  %6331 = vmatprep.subr.bf16.mxu1 %v11652_v37  ;;  %v6789_v3 = vadd.f32 %v10018_v52, %v6619_v7  ;;  %v6788_v35 = vadd.f32 %v10034_v56, %v6618_v8  ;;  %v7132_v17 = vmul.f32 %v10492_v5, %v6908_v30  ;;  %v5360_v45 = vpop.f32.mrb[14].mxu1 }
 0x24c   : > { %5723 = vmatprep.mubr.bf16.mxu0 %v9039_v1  ;;  %6288 = vmatprep.mubr.bf16.mxu1 %v9039_v1  ;;  %v7133_v16 = vmul.f32 %v10492_v5, %v6909_v24  ;;  %v6915_v53 = vmax.f32 %v6787_v61, 0.0  ;;  %v6790_v23 = vadd.f32 %v10036_v12, %v6620_v54  ;;  %v7134_v29 = vmul.f32 %v10492_v5, %v6910_v34  ;;  %v4797_v24 = vpop.f32.mrb[15].mxu0  ;;  %v5362_v34 = vpop.f32.mrb[15].mxu1 }
 0x24d   : > { %v10617_v63 = vmax.f32 %v7229_v62, %v7131_v11  ;;  %v11654_v7 = vcombine.low %v11648_v38, %v11649_v46  ;;  %v11655_v30 = vcombine.low %v10090_v57, %v11651_v21  ;;  %v6917_v8 = vmax.f32 %v6789_v3, 0.0  ;;  %v11656_v62 = vld [vmem:[#allocation15_spill] sm:$0xff]  ;;  %v11657_v11 = vld [vmem:[#allocation16_spill] sm:$0xff]  ;;  %v9040_v21 = vld [vmem:[%s9183_s29 + $0x1c0] ss:$36 sps:$4 sm:$0xff]  }
 0x24e   : > { %v6916_v37 = vmax.f32 %v6788_v35, 0.0  ;;  %v10625_v61 = vmax.f32 %v7242_v9, %v7132_v17  ;;  %v10627_v54 = vmax.f32 %v7255_v25, %v7133_v16  ;;  %v11658_v1 = vcombine.high %v11656_v62, %v11657_v11  ;;  %5724 = vmatmul.mubr.bf16.gmra.mrb[56].mxu0 %v9040_v21  ;;  %6289 = vmatmul.mubr.bf16.gmra.mrb[56].mxu1 %v9040_v21 }
 0x24f   : > { %5767 = vmatpush1.bf16.msra.mxu0 %v11654_v7  ;;  %6332 = vmatpush1.bf16.msra.mxu1 %v11655_v30  ;;  %v11659_v38 = vcombine.high %v10124_v27, %v10127_v60  ;;  %v6918_v46 = vmax.f32 %v6790_v23, 0.0  ;;  %v10635_v7 = vmax.f32 %v7268_v41, %v7134_v29  ;;  %v10638_v57 = vmul.f32 %v10548_v48, %v6915_v53  ;;  %v10659_v29 = vpop.permute.xlu1 %7056 }
 0x250   : > { %5768 = vmatprep.subr.bf16.mxu0 %v11658_v1  ;;  %v6625_v9 = vmul.f32 %v9977_v31, %v4791_v55  ;;  %v10643_v25 = vmul.f32 %v10548_v48, %v6916_v37  ;;  %v10646_v3 = vmul.f32 %v10548_v48, %v6917_v8  ;;  %v6627_v35 = vmul.f32 %v9979_v44, %v5356_v14 }
 0x251   : > { %6333 = vmatprep.subr.bf16.mxu1 %v11659_v38  ;;  %v6626_v17 = vmul.f32 %v9995_v58, %v4793_v59  ;;  %v10651_v41 = vmul.f32 %v10548_v48, %v6918_v46  ;;  %v6628_v55 = vmul.f32 %v9997_v13, %v5358_v43  ;;  %v6633_v53 = vmul.f32 %v9977_v31, %v4795_v40  ;;  %v4801_v43 = vpop.f32.mrb[16].mxu0  ;;  %v10668_v40 = vpop.permute.xlu0 %7061 }
 0x252   : > { %v6795_v16 = vadd.f32 %v10016_v51, %v6625_v9  ;;  %v11660_v23 = vcombine.low %v11656_v62, %v11657_v11  ;;  %11661 = vst [vmem:[#allocation5_spill] sm:$0xff] %v10659_v29  ;;  %v6797_v14 = vadd.f32 %v10018_v52, %v6627_v35  ;;  %v6635_v30 = vmul.f32 %v9979_v44, %v5360_v45  ;;  %v5366_v46 = vpop.f32.mrb[16].mxu1  ;;  %v4803_v9 = vpop.f32.mrb[17].mxu0 }
 0x253   : > { %v6796_v59 = vadd.f32 %v10034_v56, %v6626_v17  ;;  %v6634_v8 = vmul.f32 %v9995_v58, %v4797_v24  ;;  %v11662_v37 = vcombine.low %v10124_v27, %v10127_v60  ;;  %v6798_v11 = vadd.f32 %v10036_v12, %v6628_v55  ;;  %v11664_v27 = vld [vmem:[#allocation17_spill] sm:$0xff]  ;;  %v10681_v55 = vpop.f32.mrb[18].mxu0 }
 0x254   : > { %5769 = vmatpush1.bf16.msra.mxu0 %v11660_v23  ;;  %v6923_v62 = vmax.f32 %v6795_v16, 0.0  ;;  %v6803_v1 = vadd.f32 %v10016_v51, %v6633_v53  ;;  %v6636_v38 = vmul.f32 %v9997_v13, %v5362_v34  ;;  %v11663_v45 = vcombine.high %v10130_v47, %v10140_v0  ;;  %v5368_v16 = vpop.f32.mrb[17].mxu1  ;;  %v9041_v34 = vld [vmem:[%s9183_s29 + $0x20c] ss:$36 sps:$4 sm:$0xff]  }
 0x255   : > { %6334 = vmatpush1.bf16.msra.mxu1 %v11662_v37  ;;  %v11665_v60 = vcombine.high %v10143_v36, %v11664_v27  ;;  %v6925_v24 = vmax.f32 %v6797_v14, 0.0  ;;  %v6924_v21 = vmax.f32 %v6796_v59, 0.0  ;;  %v6805_v35 = vadd.f32 %v10018_v52, %v6635_v30  ;;  %5733 = vmatprep.mubr.bf16.mxu0 %v9041_v34  ;;  %v10691_v59 = vpop.f32.mrb[19].mxu0 }
 0x256   : > { %5770 = vmatprep.subr.bf16.mxu0 %v11663_v45  ;;  %v6804_v17 = vadd.f32 %v10034_v56, %v6634_v8  ;;  %6298 = vmatprep.mubr.bf16.mxu1 %v9041_v34  ;;  %v6926_v53 = vmax.f32 %v6798_v11, 0.0  ;;  %v6931_v23 = vmax.f32 %v6803_v1, 0.0  ;;  %v6806_v37 = vadd.f32 %v10036_v12, %v6636_v38 }
 0x257   : > { %6335 = vmatprep.subr.bf16.mxu1 %v11665_v60  ;;  %v7147_v45 = vmul.f32 %v10605_v50, %v6923_v62  ;;  %v10686_v60 = vpop.f32.mrb[18].mxu1  ;;  %v11666_v14 = vcombine.low %v10130_v47, %v10140_v0  ;;  %v6933_v30 = vmax.f32 %v6805_v35, 0.0  ;;  %v7148_v48 = vmul.f32 %v10605_v50, %v6924_v21  ;;  %v11668_v62 = vld [vmem:[#allocation18_spill] sm:$0xff] }
 0x258   : > { %v6932_v8 = vmax.f32 %v6804_v17, 0.0  ;;  %v7149_v11 = vmul.f32 %v10605_v50, %v6925_v24  ;;  %v11667_v1 = vcombine.low %v10143_v36, %v11664_v27  ;;  %v10698_v38 = vpop.f32.mrb[19].mxu1  ;;  %v11669_v34 = vcombine.high %v10160_v33, %v11668_v62  ;;  %v9042_v17 = vld [vmem:[%s9183_s29 + $0x208] ss:$36 sps:$4 sm:$0xff]  }
 0x259   : > { %5771 = vmatpush1.bf16.msra.mxu0 %v11666_v14  ;;  %v6934_v47 = vmax.f32 %v6806_v37, 0.0  ;;  %v7150_v0 = vmul.f32 %v10605_v50, %v6926_v53  ;;  %v7155_v35 = vmul.f32 %v10659_v29, %v6931_v23  ;;  %v7231_v21 = vmax.f32 %v10617_v63, %v10638_v57  ;;  %v11670_v24 = vld [vmem:[#allocation19_spill] sm:$0xff]  ;;  %v11671_v14 = vld [vmem:[#allocation20_spill] sm:$0xff]  ;;  %6299 = vmatmul.mubr.bf16.gmra.mrb[60].mxu1 %v9042_v17 }
 0x25a   : > { %6336 = vmatpush1.bf16.msra.mxu1 %v11667_v1  ;;  %5772 = vmatprep.subr.bf16.mxu0 %v11669_v34  ;;  %v11672_v36 = vcombine.high %v11670_v24, %v11671_v14  ;;  %v7156_v27 = vmul.f32 %v10659_v29, %v6932_v8  ;;  %v7157_v1 = vmul.f32 %v10659_v29, %v6933_v30 }
 0x25b   : > { %5734 = vmatmul.mubr.bf16.gmra.mrb[60].mxu0 %v9042_v17  ;;  %v7244_v37 = vmax.f32 %v10625_v61, %v10643_v25  ;;  %v7257_v53 = vmax.f32 %v10627_v54, %v10646_v3  ;;  %v7158_v23 = vmul.f32 %v10659_v29, %v6934_v47  ;;  %v7232_v63 = vmax.f32 %v7231_v21, %v7147_v45  ;;  %v10729_v3 = vpop.permute.xlu0 %7066  ;;  %v10731_v45 = vpop.f32.mrb[20].mxu0 }
 0x25c   : > { %6337 = vmatprep.subr.bf16.mxu1 %v11672_v36  ;;  %v7270_v57 = vmax.f32 %v10635_v7, %v10651_v41  ;;  %v6641_v34 = vmul.f32 %v9977_v31, %v4801_v43  ;;  %v11673_v8 = vcombine.low %v10160_v33, %v11668_v62  ;;  %v6643_v61 = vmul.f32 %v9979_v44, %v5366_v46  ;;  %v10739_v46 = vpop.f32.mrb[21].mxu0 }
 0x25d   : > { %v7245_v30 = vmax.f32 %v7244_v37, %v7148_v48  ;;  %v7258_v36 = vmax.f32 %v7257_v53, %v7149_v11  ;;  %v6642_v25 = vmul.f32 %v9995_v58, %v4803_v9  ;;  %v11674_v54 = vcombine.low %v11670_v24, %v11671_v14  ;;  %11675 = vst [vmem:[#allocation6_spill] sm:$0xff] %v10729_v3  ;;  %v10737_v48 = vpop.f32.mrb[20].mxu1  ;;  %v11676_v9 = vld [vmem:[#allocation21_spill] sm:$0xff]  ;;  %v11677_v11 = vld [vmem:[#allocation22_spill] sm:$0xff]  ;;  %v10755_v24 = vpop.f32.mrb[22].mxu0 }
 0x25e   : > { %5773 = vmatpush1.bf16.msra.mxu0 %v11673_v8  ;;  %v7233_v7 = vmax.f32 %v7232_v63, %v7155_v35  ;;  %v7271_v41 = vmax.f32 %v7270_v57, %v7150_v0  ;;  %v10734_v43 = vadd.f32 %v10016_v51, %v6641_v34  ;;  %v6644_v33 = vmul.f32 %v9997_v13, %v5368_v16  ;;  %v10750_v35 = vpop.f32.mrb[21].mxu1  ;;  %v10766_v57 = vpop.f32.mrb[23].mxu0  ;;  %v9043_v34 = vld [vmem:[%s9183_s29 + $0x1c] ss:$36 sps:$4 sm:$0xff]  }
 0x25f   : > { %6338 = vmatpush1.bf16.msra.mxu1 %v11674_v54  ;;  %v11678_v62 = vcombine.high %v11676_v9, %v11677_v11  ;;  %v7246_v47 = vmax.f32 %v7245_v30, %v7156_v27  ;;  %v7259_v21 = vmax.f32 %v7258_v36, %v7157_v1  ;;  %v10745_v17 = vadd.f32 %v10018_v52, %v6643_v61  ;;  %v10761_v1 = vpop.f32.mrb[22].mxu1 }
 0x260   : > { %v10748_v0 = vadd.f32 %v10034_v56, %v6642_v25  ;;  %v11679_v16 = vcombine.high %v10203_v20, %v10206_v39  ;;  %v7234_v14 = vrot.slane %v7233_v7, 4  ;;  %v7272_v37 = vmax.f32 %v7271_v41, %v7158_v23  ;;  %5776 = vmatprep.mubr.bf16.mxu0 %v9043_v34  ;;  %v10774_v25 = vpop.f32.mrb[23].mxu1  ;;  %6341 = vmatprep.mubr.bf16.mxu1 %v9043_v34 }
 0x261   : > { %5774 = vmatprep.subr.bf16.mxu0 %v11678_v62  ;;  %v6939_v53 = vmax.f32 %v10734_v43, 0.0  ;;  %v10759_v27 = vadd.f32 %v10036_v12, %v6644_v33  ;;  %v11680_v63 = vcombine.low %v11676_v9, %v11677_v11  ;;  %v7247_v8 = vrot.slane %v7246_v47, 4  ;;  %v11682_v9 = vld [vmem:[#allocation24_spill] sm:$0xff]  ;;  %v11683_v11 = vld [vmem:[#allocation26_spill] sm:$0xff] }
 0x262   : > { %6339 = vmatprep.subr.bf16.mxu1 %v11679_v16  ;;  %v7260_v30 = vrot.slane %v7259_v21, 4  ;;  %v6941_v23 = vmax.f32 %v10745_v17, 0.0  ;;  %v6940_v36 = vmax.f32 %v10748_v0, 0.0  ;;  %v11681_v61 = vcombine.low %v10203_v20, %v10206_v39  ;;  %v9044_v16 = vld [vmem:[%s9183_s29 + $0x18] ss:$36 sps:$4 sm:$0xff]  }
 0x263   : > { %5775 = vmatpush1.bf16.msra.mxu0 %v11680_v63  ;;  %v7235_v54 = vmax.f32 %v7233_v7, %v7234_v14  ;;  %v7273_v41 = vrot.slane %v7272_v37, 4  ;;  %v6942_v43 = vmax.f32 %v10759_v27, 0.0  ;;  %v6649_v33 = vmul.f32 %v9977_v31, %v10681_v55 }
 0x264   : > { %6340 = vmatpush1.bf16.msra.mxu1 %v11681_v61  ;;  %v11684_v62 = vcombine.high %v11682_v9, %v11683_v11  ;;  %v11685_v17 = vcombine.high %v10225_v42, %v10228_v19  ;;  %v7248_v20 = vmax.f32 %v7246_v47, %v7247_v8  ;;  %v7261_v39 = vmax.f32 %v7259_v21, %v7260_v30  ;;  %v10798_v8 = vpop.permute.xlu0 %7071  ;;  %v10803_v30 = vpop.f32.mrb[24].mxu0 }
 0x265   : > { %v6651_v0 = vmul.f32 %v9979_v44, %v10686_v60  ;;  %v6650_v7 = vmul.f32 %v9995_v58, %v10691_v59  ;;  %v7236_v55 = vrot.slane %v7235_v54, 2  ;;  %v7274_v14 = vmax.f32 %v7272_v37, %v7273_v41 }
 0x266   : > { %5857 = vmatprep.subr.bf16.mxu0 %v11684_v62  ;;  %6422 = vmatprep.subr.bf16.mxu1 %v11685_v17  ;;  %v6819_v27 = vadd.f32 %v10016_v51, %v6649_v33  ;;  %v6652_v63 = vmul.f32 %v9997_v13, %v10698_v38  ;;  %v11686_v47 = vcombine.low %v11682_v9, %v11683_v11  ;;  %v7249_v21 = vrot.slane %v7248_v20, 2  ;;  %v9045_v38 = vld [vmem:[%s9183_s29 + $0x64] ss:$36 sps:$4 sm:$0xff]   ;;  %v10807_v11 = vpop.f32.mrb[24].mxu1  ;;  %v10809_v62 = vpop.f32.mrb[25].mxu0 }
 0x267   : > { %5777 = vmatmul.mubr.bf16.vlgmr.msra.gmra.mrb[32].mxu0 %v9044_v16  ;;  %6342 = vmatmul.mubr.bf16.vlgmr.msra.gmra.mrb[32].mxu1 %v9044_v16  ;;  %v7262_v60 = vrot.slane %v7261_v39, 2  ;;  %v6821_v34 = vadd.f32 %v10018_v52, %v6651_v0  ;;  %v6820_v59 = vadd.f32 %v10034_v56, %v6650_v7  ;;  %v11687_v37 = vcombine.low %v10225_v42, %v10228_v19  ;;  %v11688_v17 = vld [vmem:[#allocation27_spill] sm:$0xff]  ;;  %v11689_v0 = vld [vmem:[#allocation28_spill] sm:$0xff] }
 0x268   : > { %5858 = vmatpush1.bf16.msra.mxu0 %v11686_v47  ;;  %5786 = vmatprep.mubr.bf16.mxu0 %v9045_v38  ;;  %v7237_v61 = vmax.f32 %v7235_v54, %v7236_v55  ;;  %v7275_v41 = vrot.slane %v7274_v14, 2  ;;  %v6947_v33 = vmax.f32 %v6819_v27, 0.0  ;;  %v6822_v9 = vadd.f32 %v10036_v12, %v6652_v63  ;;  %v10816_v54 = vpop.f32.mrb[26].mxu0 }
 0x269   : > { %6423 = vmatpush1.bf16.msra.mxu1 %v11687_v37  ;;  %6351 = vmatprep.mubr.bf16.mxu1 %v9045_v38  ;;  %v11690_v7 = vcombine.high %v11688_v17, %v11689_v0  ;;  %v7250_v19 = vmax.f32 %v7248_v20, %v7249_v21  ;;  %v7263_v42 = vmax.f32 %v7261_v39, %v7262_v60  ;;  %v6949_v16 = vmax.f32 %v6821_v34, 0.0  ;;  %v10814_v37 = vpop.f32.mrb[25].mxu1  ;;  %v10826_v20 = vpop.f32.mrb[27].mxu0 }
 0x26a   : > { %v6948_v47 = vmax.f32 %v6820_v59, 0.0  ;;  %v11691_v55 = vcombine.high %v10246_v15, %v10261_v18  ;;  %v7238_v27 = vrot.slane %v7237_v61, 1  ;;  %v7276_v63 = vmax.f32 %v7274_v14, %v7275_v41  ;;  %v10824_v50 = vpop.f32.mrb[26].mxu1  ;;  %v11694_v41 = vld [vmem:[#allocation29_spill] sm:$0xff] }
 0x26b   : > { %5859 = vmatprep.subr.bf16.mxu0 %v11690_v7  ;;  %v6950_v29 = vmax.f32 %v6822_v9, 0.0  ;;  %v10822_v38 = vmul.f32 %v10668_v40, %v6939_v53  ;;  %v11692_v39 = vcombine.low %v11688_v17, %v11689_v0  ;;  %v7251_v21 = vrot.slane %v7250_v19, 1  ;;  %v10837_v59 = vpop.f32.mrb[27].mxu1  ;;  %v11695_v9 = vld [vmem:[#allocation30_spill] sm:$0xff] }
 0x26c   : > { %6424 = vmatprep.subr.bf16.mxu1 %v11691_v55  ;;  %v7264_v60 = vrot.slane %v7263_v42, 1  ;;  %v10832_v34 = vmul.f32 %v10668_v40, %v6940_v36  ;;  %v10835_v14 = vmul.f32 %v10668_v40, %v6941_v23  ;;  %v11693_v53 = vcombine.low %v10246_v15, %v10261_v18  ;;  %v11697_v23 = vld [vmem:[#allocation31_spill] sm:$0xff] }
 0x26d   : > { %5860 = vmatpush1.bf16.msra.mxu0 %v11692_v39  ;;  %v11696_v7 = vcombine.high %v11694_v41, %v11695_v9  ;;  %v7239_v17 = vmax.f32 %v7237_v61, %v7238_v27  ;;  %v7277_v0 = vrot.slane %v7276_v63, 1  ;;  %v10846_v55 = vmul.f32 %v10668_v40, %v6942_v43  ;;  %v9046_v61 = vld [vmem:[%s9183_s29 + $0x60] ss:$36 sps:$4 sm:$0xff]  }
 0x26e   : > { %6425 = vmatpush1.bf16.msra.mxu1 %v11693_v53  ;;  %v10849_v36 = vmul.f32 %v10729_v3, %v6947_v33  ;;  %v11698_v39 = vcombine.high %v10280_v32, %v11697_v23  ;;  %v7252_v5 = vmax.f32 %v7250_v19, %v7251_v21  ;;  %v7265_v28 = vmax.f32 %v7263_v42, %v7264_v60  ;;  %v10874_v21 = vpop.permute.xlu0 %7076  ;;  %v9047_v60 = vld [vmem:[%s9183_s29 + $0xac] ss:$36 sps:$4 sm:$0xff]   ;;  %v10884_v53 = vpop.f32.mrb[28].mxu1 }
 0x26f   : > { %5861 = vmatprep.subr.bf16.mxu0 %v11696_v7  ;;  %v10855_v18 = vmul.f32 %v10729_v3, %v6948_v47  ;;  %v10858_v15 = vmul.f32 %v10729_v3, %v6949_v16  ;;  %5787 = vmatmul.mubr.bf16.gmra.mrb[36].mxu0 %v9046_v61  ;;  %v7278_v43 = vmax.f32 %v7276_v63, %v7277_v0 }
 0x270   : > { %6426 = vmatprep.subr.bf16.mxu1 %v11698_v39  ;;  %v10862_v27 = vmul.f32 %v10729_v3, %v6950_v29  ;;  %v7331_v33 = vmax.f32 %v10822_v38, %v10849_v36  ;;  %v6657_v19 = vmul.f32 %v9977_v31, %v10731_v45  ;;  %6352 = vmatmul.mubr.bf16.gmra.mrb[36].mxu1 %v9046_v61  ;;  %v10876_v29 = vpop.f32.mrb[28].mxu0  ;;  %v11709_v3 = vld [vmem:[#allocation35_spill] sm:$0xff] }
 0x271   : > { %v7451_v42 = vcombine.low %v7239_v17, %v7252_v5  ;;  %v7344_v47 = vmax.f32 %v10832_v34, %v10855_v18  ;;  %v7357_v16 = vmax.f32 %v10835_v14, %v10858_v15  ;;  %v6659_v63 = vmul.f32 %v9979_v44, %v10737_v48  ;;  %5796 = vmatprep.mubr.bf16.mxu0 %v9047_v60  ;;  %v10886_v14 = vpop.f32.mrb[29].mxu0  ;;  %v11699_v48 = vld [vmem:[#allocation25_spill] sm:$0xff] }
 0x272   : > { %v7452_v38 = vcombine.low %v7265_v28, %v7278_v43  ;;  %v7370_v45 = vmax.f32 %v10846_v55, %v10862_v27  ;;  %v6827_v5 = vadd.f32 %v10016_v51, %v6657_v19  ;;  %v6658_v34 = vmul.f32 %v9995_v58, %v10739_v46  ;;  %6361 = vmatprep.mubr.bf16.mxu1 %v9047_v60  ;;  %v10896_v55 = vpop.f32.mrb[29].mxu1  ;;  %v10898_v36 = vpop.f32.mrb[30].mxu0  ;;  %v11702_v27 = vld [vmem:[#allocation32_spill] sm:$0xff] }
 0x273   : > { %v10889_v7 = vrot.slane %v7451_v42, %v11699_v48  ;;  %v6829_v17 = vadd.f32 %v10018_v52, %v6659_v63  ;;  %v6660_v28 = vmul.f32 %v9997_v13, %v10750_v35  ;;  %v6665_v0 = vmul.f32 %v9977_v31, %v10755_v24  ;;  %v10909_v61 = vpop.f32.mrb[30].mxu1  ;;  %v10911_v24 = vpop.f32.mrb[31].mxu0 }
 0x274   : > { %v11700_v46 = vcombine.low %v11694_v41, %v11695_v9  ;;  %v10904_v39 = vrot.slane %v7452_v38, %v11699_v48  ;;  %v6955_v18 = vmax.f32 %v6827_v5, 0.0  ;;  %v6828_v15 = vadd.f32 %v10034_v56, %v6658_v34  ;;  %v11703_v41 = vld [vmem:[#allocation33_spill] sm:$0xff]  ;;  %v10923_v60 = vpop.f32.mrb[31].mxu1 }
 0x275   : > { %v6667_v35 = vmul.f32 %v9979_v44, %v10761_v1  ;;  %v11701_v43 = vcombine.low %v10280_v32, %v11697_v23  ;;  %v11704_v9 = vcombine.high %v11702_v27, %v11703_v41  ;;  %v6957_v19 = vmax.f32 %v6829_v17, 0.0  ;;  %v10939_v32 = vpop.permute.xlu0 %7081 }
 0x276   : > { %5862 = vmatpush1.bf16.msra.mxu0 %v11700_v46  ;;  %v6830_v42 = vadd.f32 %v10036_v12, %v6660_v28  ;;  %v6835_v63 = vadd.f32 %v10016_v51, %v6665_v0  ;;  %v6666_v1 = vmul.f32 %v9995_v58, %v10766_v57  ;;  %v11705_v38 = vcombine.high %v10300_v4, %v10303_v6  ;;  %v9048_v46 = vld [vmem:[%s9183_s29 + $0xa8] ss:$36 sps:$4 sm:$0xff]  }
 0x277   : > { %6427 = vmatpush1.bf16.msra.mxu1 %v11701_v43  ;;  %5863 = vmatprep.subr.bf16.mxu0 %v11704_v9  ;;  %v6956_v23 = vmax.f32 %v6828_v15, 0.0  ;;  %v6837_v5 = vadd.f32 %v10018_v52, %v6667_v35  ;;  %v6668_v34 = vmul.f32 %v9997_v13, %v10774_v25  ;;  %v7179_v0 = vmul.f32 %v10798_v8, %v6955_v18  ;;  %v9049_v35 = vld [vmem:[%s9183_s29 + $0xf4] ss:$36 sps:$4 sm:$0xff]  }
 0x278   : > { %6428 = vmatprep.subr.bf16.mxu1 %v11705_v38  ;;  %v6958_v17 = vmax.f32 %v6830_v42, 0.0  ;;  %v6963_v28 = vmax.f32 %v6835_v63, 0.0  ;;  %v6836_v57 = vadd.f32 %v10034_v56, %v6666_v1  ;;  %5797 = vmatmul.mubr.bf16.gmra.mrb[40].mxu0 %v9048_v46  ;;  %v7181_v15 = vmul.f32 %v10798_v8, %v6957_v19 }
 0x279   : > { %v6965_v43 = vmax.f32 %v6837_v5, 0.0  ;;  %v6838_v9 = vadd.f32 %v10036_v12, %v6668_v34  ;;  %v7180_v38 = vmul.f32 %v10798_v8, %v6956_v23  ;;  %6362 = vmatmul.mubr.bf16.gmra.mrb[40].mxu1 %v9048_v46  ;;  %5806 = vmatprep.mubr.bf16.mxu0 %v9049_v35  ;;  %v7332_v63 = vmax.f32 %v7331_v33, %v7179_v0 }
 0x27a   : > { %v6964_v25 = vmax.f32 %v6836_v57, 0.0  ;;  %v7182_v42 = vmul.f32 %v10798_v8, %v6958_v17  ;;  %v7187_v18 = vmul.f32 %v10874_v21, %v6963_v28  ;;  %6371 = vmatprep.mubr.bf16.mxu1 %v9049_v35  ;;  %v11706_v1 = vcombine.low %v11702_v27, %v11703_v41  ;;  %v11708_v57 = vld [vmem:[#allocation34_spill] sm:$0xff] }
 0x27b   : > { %v6966_v5 = vmax.f32 %v6838_v9, 0.0  ;;  %v7345_v23 = vmax.f32 %v7344_v47, %v7180_v38  ;;  %v7358_v34 = vmax.f32 %v7357_v16, %v7181_v15  ;;  %v7189_v19 = vmul.f32 %v10874_v21, %v6965_v43  ;;  %v11711_v47 = vld [vmem:[#allocation36_spill] sm:$0xff] }
 0x27c   : > { %5864 = vmatpush1.bf16.msra.mxu0 %v11706_v1  ;;  %v11707_v46 = vcombine.low %v10300_v4, %v10303_v6  ;;  %v11710_v17 = vcombine.high %v11708_v57, %v11709_v3  ;;  %v7371_v33 = vmax.f32 %v7370_v45, %v7182_v42  ;;  %v7188_v28 = vmul.f32 %v10874_v21, %v6964_v25  ;;  %v10977_v42 = vpop.permute.xlu0 %7086  ;;  %v9050_v1 = vld [vmem:[%s9183_s29 + $0xf0] ss:$36 sps:$4 sm:$0xff]  }
 0x27d   : > { %v7333_v0 = vmax.f32 %v7332_v63, %v7187_v18  ;;  %v6673_v27 = vmul.f32 %v9977_v31, %v10803_v30  ;;  %v11712_v16 = vcombine.high %v10325_v22, %v11711_v47  ;;  %v7190_v41 = vmul.f32 %v10874_v21, %v6966_v5  ;;  %v11715_v5 = vld [vmem:[#allocation37_spill] sm:$0xff] }
 0x27e   : > { %6429 = vmatpush1.bf16.msra.mxu1 %v11707_v46  ;;  %5865 = vmatprep.subr.bf16.mxu0 %v11710_v17  ;;  %v7359_v43 = vmax.f32 %v7358_v34, %v7189_v19  ;;  %v6675_v6 = vmul.f32 %v9979_v44, %v10807_v11  ;;  %v6674_v4 = vmul.f32 %v9995_v58, %v10809_v62 }
 0x27f   : > { %6430 = vmatprep.subr.bf16.mxu1 %v11712_v16  ;;  %v7346_v45 = vmax.f32 %v7345_v23, %v7188_v28  ;;  %v6843_v9 = vadd.f32 %v10016_v51, %v6673_v27  ;;  %v6676_v30 = vmul.f32 %v9997_v13, %v10814_v37  ;;  %v6681_v38 = vmul.f32 %v9977_v31, %v10816_v54  ;;  %v11716_v23 = vld [vmem:[#allocation38_spill] sm:$0xff]  ;;  %v11718_v27 = vld [vmem:[#allocation39_spill] sm:$0xff] }
 0x280   : > { %v11713_v15 = vcombine.low %v11708_v57, %v11709_v3  ;;  %v7372_v35 = vmax.f32 %v7371_v33, %v7190_v41  ;;  %v6845_v11 = vadd.f32 %v10018_v52, %v6675_v6  ;;  %v6844_v25 = vadd.f32 %v10034_v56, %v6674_v4  ;;  %5807 = vmatmul.mubr.bf16.gmra.mrb[44].mxu0 %v9050_v1  ;;  %v9051_v57 = vld [vmem:[%s9183_s29 + $0x13c] ss:$36 sps:$4 sm:$0xff]  }
 0x281   : > { %v6683_v62 = vmul.f32 %v9979_v44, %v10824_v50  ;;  %v11714_v37 = vcombine.low %v10325_v22, %v11711_v47  ;;  %v6971_v54 = vmax.f32 %v6843_v9, 0.0  ;;  %v6846_v63 = vadd.f32 %v10036_v12, %v6676_v30  ;;  %6372 = vmatmul.mubr.bf16.gmra.mrb[44].mxu1 %v9050_v1  ;;  %5816 = vmatprep.mubr.bf16.mxu0 %v9051_v57  ;;  %v11719_v47 = vld [vmem:[#allocation40_spill] sm:$0xff] }
 0x282   : > { %5866 = vmatpush1.bf16.msra.mxu0 %v11713_v15  ;;  %v6851_v3 = vadd.f32 %v10016_v51, %v6681_v38  ;;  %v6682_v18 = vmul.f32 %v9995_v58, %v10826_v20  ;;  %v11717_v34 = vcombine.high %v11715_v5, %v11716_v23  ;;  %v6973_v50 = vmax.f32 %v6845_v11, 0.0  ;;  %6381 = vmatprep.mubr.bf16.mxu1 %v9051_v57  ;;  %v9052_v57 = vld [vmem:[%s9183_s29 + $0x138] ss:$36 sps:$4 sm:$0xff]  }
 0x283   : > { %6431 = vmatpush1.bf16.msra.mxu1 %v11714_v37  ;;  %v6972_v19 = vmax.f32 %v6844_v25, 0.0  ;;  %v6853_v46 = vadd.f32 %v10018_v52, %v6683_v62  ;;  %v6684_v22 = vmul.f32 %v9997_v13, %v10837_v59  ;;  %v6974_v17 = vmax.f32 %v6846_v63, 0.0  ;;  %v11723_v62 = vld [vmem:[#allocation41_spill] sm:$0xff] }
 0x284   : > { %5867 = vmatprep.subr.bf16.mxu0 %v11717_v34  ;;  %v6979_v33 = vmax.f32 %v6851_v3, 0.0  ;;  %v6852_v20 = vadd.f32 %v10034_v56, %v6682_v18  ;;  %v7195_v28 = vmul.f32 %v10939_v32, %v6971_v54  ;;  %v11720_v16 = vcombine.high %v11718_v27, %v11719_v47 }
 0x285   : > { %v6981_v41 = vmax.f32 %v6853_v46, 0.0  ;;  %v6854_v6 = vadd.f32 %v10036_v12, %v6684_v22  ;;  %v7196_v4 = vmul.f32 %v10939_v32, %v6972_v19  ;;  %v7197_v59 = vmul.f32 %v10939_v32, %v6973_v50 }
 0x286   : > { %6432 = vmatprep.subr.bf16.mxu1 %v11720_v16  ;;  %v11721_v9 = vcombine.low %v11715_v5, %v11716_v23  ;;  %v11722_v30 = vcombine.low %v11718_v27, %v11719_v47  ;;  %v6980_v38 = vmax.f32 %v6852_v20, 0.0  ;;  %v7198_v15 = vmul.f32 %v10939_v32, %v6974_v17  ;;  %v11017_v5 = vpop.permute.xlu0 %7091 }
 0x287   : > { %v7334_v11 = vmax.f32 %v7333_v0, %v7195_v28  ;;  %v7203_v25 = vmul.f32 %v10977_v42, %v6979_v33  ;;  %v11724_v37 = vcombine.high %v10366_v49, %v11723_v62  ;;  %v11725_v54 = vcombine.high %v10381_v2, %v10384_v26 }
 0x288   : > { %5868 = vmatpush1.bf16.msra.mxu0 %v11721_v9  ;;  %6433 = vmatpush1.bf16.msra.mxu1 %v11722_v30  ;;  %v6982_v63 = vmax.f32 %v6854_v6, 0.0  ;;  %v7347_v3 = vmax.f32 %v7346_v45, %v7196_v4  ;;  %v7360_v18 = vmax.f32 %v7359_v43, %v7197_v59  ;;  %v7205_v1 = vmul.f32 %v10977_v42, %v6981_v41  ;;  %v11731_v6 = vld [vmem:[#allocation44_spill] sm:$0xff]  ;;  %v11732_v4 = vld [vmem:[#allocation45_spill] sm:$0xff] }
 0x289   : > { %5869 = vmatprep.subr.bf16.mxu0 %v11724_v37  ;;  %6434 = vmatprep.subr.bf16.mxu1 %v11725_v54  ;;  %v7373_v23 = vmax.f32 %v7372_v35, %v7198_v15  ;;  %v7204_v0 = vmul.f32 %v10977_v42, %v6980_v38  ;;  %v6689_v34 = vmul.f32 %v9977_v31, %v10876_v29 }
 0x28a   : > { %v6691_v50 = vmul.f32 %v9979_v44, %v10884_v53  ;;  %v7206_v19 = vmul.f32 %v10977_v42, %v6982_v63  ;;  %v6690_v45 = vmul.f32 %v9995_v58, %v10886_v14  ;;  %v6692_v43 = vmul.f32 %v9997_v13, %v10896_v55  ;;  %5817 = vmatmul.mubr.bf16.gmra.mrb[48].mxu0 %v9052_v57  ;;  %v11050_v47 = vpop.permute.xlu0 %7096 }
 0x28b   : > { %v6697_v46 = vmul.f32 %v9977_v31, %v10898_v36  ;;  %v11726_v35 = vcombine.low %v10366_v49, %v11723_v62  ;;  %v6859_v29 = vadd.f32 %v10016_v51, %v6689_v34  ;;  %v6699_v22 = vmul.f32 %v9979_v44, %v10909_v61  ;;  %6382 = vmatmul.mubr.bf16.gmra.mrb[48].mxu1 %v9052_v57  ;;  %v9053_v61 = vld [vmem:[%s9183_s29 + $0x184] ss:$36 sps:$4 sm:$0xff]  }
 0x28c   : > { %v6861_v53 = vadd.f32 %v10018_v52, %v6691_v50  ;;  %v6698_v14 = vmul.f32 %v9995_v58, %v10911_v24  ;;  %v6860_v55 = vadd.f32 %v10034_v56, %v6690_v45  ;;  %v6862_v31 = vadd.f32 %v10036_v12, %v6692_v43  ;;  %5826 = vmatprep.mubr.bf16.mxu0 %v9053_v61 }
 0x28d   : > { %5870 = vmatpush1.bf16.msra.mxu0 %v11726_v35  ;;  %v6867_v49 = vadd.f32 %v10016_v51, %v6697_v46  ;;  %v6700_v36 = vmul.f32 %v9997_v13, %v10923_v60  ;;  %v6987_v17 = vmax.f32 %v6859_v29, 0.0  ;;  %v6869_v20 = vadd.f32 %v10018_v52, %v6699_v22  ;;  %6391 = vmatprep.mubr.bf16.mxu1 %v9053_v61  ;;  %v11728_v51 = vld [vmem:[#allocation42_spill] sm:$0xff]  ;;  %v11729_v60 = vld [vmem:[#allocation43_spill] sm:$0xff] }
 0x28e   : > { %v6989_v33 = vmax.f32 %v6861_v53, 0.0  ;;  %v6868_v44 = vadd.f32 %v10034_v56, %v6698_v14  ;;  %v6988_v58 = vmax.f32 %v6860_v55, 0.0  ;;  %v6990_v24 = vmax.f32 %v6862_v31, 0.0  ;;  %v9054_v35 = vld [vmem:[%s9183_s29 + $0x180] ss:$36 sps:$4 sm:$0xff]  }
 0x28f   : > { %v6995_v28 = vmax.f32 %v6867_v49, 0.0  ;;  %v6870_v27 = vadd.f32 %v10036_v12, %v6700_v36  ;;  %v11727_v13 = vcombine.low %v10381_v2, %v10384_v26  ;;  %v11730_v16 = vcombine.high %v11728_v51, %v11729_v60  ;;  %v9055_v22 = vld [vmem:[%s9183_s29 + $0x1cc] ss:$36 sps:$4 sm:$0xff]  }
 0x290   : > { %v6997_v52 = vmax.f32 %v6869_v20, 0.0  ;;  %v6996_v56 = vmax.f32 %v6868_v44, 0.0  ;;  %v7211_v41 = vmul.f32 %v11017_v5, %v6987_v17  ;;  %v11733_v59 = vcombine.high %v11731_v6, %v11732_v4  ;;  %v9056_v17 = vld [vmem:[%s9183_s29 + $0x1c8] ss:$36 sps:$4 sm:$0xff]   ;;  %v9057_v44 = vld [vmem:[%s9183_s29 + $0x214] ss:$36 sps:$4 sm:$0xff]  }
 0x291   : > { %6435 = vmatpush1.bf16.msra.mxu1 %v11727_v13  ;;  %5871 = vmatprep.subr.bf16.mxu0 %v11730_v16  ;;  %v11734_v12 = vcombine.low %v11728_v51, %v11729_v60  ;;  %v6998_v9 = vmax.f32 %v6870_v27, 0.0  ;;  %v7212_v26 = vmul.f32 %v11017_v5, %v6988_v58  ;;  %v7213_v2 = vmul.f32 %v11017_v5, %v6989_v33 }
 0x292   : > { %6436 = vmatprep.subr.bf16.mxu1 %v11733_v59  ;;  %v7214_v30 = vmul.f32 %v11017_v5, %v6990_v24  ;;  %v7219_v38 = vmul.f32 %v11050_v47, %v6995_v28  ;;  %v7220_v15 = vmul.f32 %v11050_v47, %v6996_v56  ;;  %v7335_v62 = vmax.f32 %v7334_v11, %v7203_v25 }
 0x293   : > { %5872 = vmatpush1.bf16.msra.mxu0 %v11734_v12  ;;  %v7348_v37 = vmax.f32 %v7347_v3, %v7204_v0  ;;  %v7221_v54 = vmul.f32 %v11050_v47, %v6997_v52  ;;  %v7222_v63 = vmul.f32 %v11050_v47, %v6998_v9  ;;  %v7361_v34 = vmax.f32 %v7360_v18, %v7205_v1 }
 0x294   : > { %v7374_v50 = vmax.f32 %v7373_v23, %v7206_v19  ;;  %v11735_v45 = vcombine.low %v11731_v6, %v11732_v4  ;;  %v7336_v43 = vmax.f32 %v7335_v62, %v7211_v41  ;;  %5827 = vmatmul.mubr.bf16.gmra.mrb[52].mxu0 %v9054_v35  ;;  %6392 = vmatmul.mubr.bf16.gmra.mrb[52].mxu1 %v9054_v35  ;;  %v9058_v4 = vld [vmem:[%s9183_s29 + $0x210] ss:$36 sps:$4 sm:$0xff]   ;;  %v11736_v12 = vmov 0   ;;  %v11738_v35 = vld [vmem:[#allocation2_spill] sm:$0xff] }
 0x295   : > { %v7349_v46 = vmax.f32 %v7348_v37, %v7212_v26  ;;  %v7362_v29 = vmax.f32 %v7361_v34, %v7213_v2  ;;  %5836 = vmatprep.mubr.bf16.mxu0 %v9055_v22  ;;  %6401 = vmatprep.mubr.bf16.mxu1 %v9055_v22  ;;  %v9062_v34 = vld [vmem:[%s9183_s29 + $0xf8] ss:$36 sps:$4 sm:$0xff]   ;;  %v6559_v22 = vsub.s32 5, %v11738_v35 }
 0x296   : > { %6437 = vmatpush1.bf16.msra.mxu1 %v11735_v45  ;;  %v7375_v53 = vmax.f32 %v7374_v50, %v7214_v30  ;;  %v7337_v11 = vmax.f32 %v7336_v43, %v7219_v38  ;;  %v9059_v38 = vld [vmem:[%s9183_s29 + $0x20] ss:$36 sps:$4 sm:$0xff]   ;;  %v9064_v45 = vld [vmem:[%s9183_s29 + $0x188] ss:$36 sps:$4 sm:$0xff]   ;;  %v9065_v43 = vld [vmem:[%s9183_s29 + $0x1d0] ss:$36 sps:$4 sm:$0xff]  }
 0x297   : > { %v7350_v25 = vmax.f32 %v7349_v46, %v7220_v15  ;;  %v7363_v3 = vmax.f32 %v7362_v29, %v7221_v54  ;;  %v11737_v15 = vcombine.low %v10889_v7, %v10904_v39  ;;  %v9060_v7 = vld [vmem:[%s9183_s29 + $0x68] ss:$36 sps:$4 sm:$0xff]   ;;  %v9061_v39 = vld [vmem:[%s9183_s29 + $0xb0] ss:$36 sps:$4 sm:$0xff]   ;;  %v9063_v50 = vld [vmem:[%s9183_s29 + $0x140] ss:$36 sps:$4 sm:$0xff]  }
 0x298   : > { %v7376_v18 = vmax.f32 %v7375_v53, %v7222_v63  ;;  %v7338_v1 = vrot.slane %v7337_v11, 4  ;;  %v9066_v46 = vld [vmem:[%s9183_s29 + $0x218] ss:$36 sps:$4 sm:$0xff]   ;;  %v6555_v29 = vsub.s32 4, %v11738_v35  ;;  %v6563_v53 = vsub.s32 6, %v11738_v35 }
 0x299   : > { %v7351_v23 = vrot.slane %v7350_v25, 4  ;;  %v7364_v0 = vrot.slane %v7363_v3, 4 }
 0x29a   : > { %v7377_v19 = vrot.slane %v7376_v18, 4  ;;  %v7339_v14 = vmax.f32 %v7337_v11, %v7338_v1  ;;  %v6567_v11 = vsub.s32 7, %v11738_v35 }
 0x29b   : > { %v7352_v57 = vmax.f32 %v7350_v25, %v7351_v23  ;;  %v7365_v55 = vmax.f32 %v7363_v3, %v7364_v0  ;;  %v9067_v25 = vld [vmem:[%s9876_s12] sm:$0xff] }
 0x29c   : > { %v7378_v31 = vmax.f32 %v7376_v18, %v7377_v19  ;;  %v7340_v49 = vrot.slane %v7339_v14, 2  ;;  %5837 = vmatmul.mubr.bf16.gmra.mrb[56].mxu0 %v9056_v17  ;;  %6402 = vmatmul.mubr.bf16.gmra.mrb[56].mxu1 %v9056_v17  ;;  %v11125_v3 = vrot.slane %v9067_v25, %v6555_v29  ;;  %v11127_v18 = vrot.slane %v9067_v25, %v6563_v53  ;;  %v9068_v23 = vld [vmem:[%s9915_s15] sm:$0xff] }
 0x29d   : > { %v7353_v36 = vrot.slane %v7352_v57, 2  ;;  %v7366_v33 = vrot.slane %v7365_v55, 2  ;;  %5846 = vmatprep.mubr.bf16.mxu0 %v9057_v44  ;;  %6411 = vmatprep.mubr.bf16.mxu1 %v9057_v44  ;;  %v11129_v1 = vrot.slane %v9067_v25, %v6559_v22  ;;  %v11132_v0 = vrot.slane %v9068_v23, %v6555_v29 }
 0x29e   : > { %v7379_v20 = vrot.slane %v7378_v31, 2  ;;  %v7341_v61 = vmax.f32 %v7339_v14, %v7340_v49  ;;  %v11134_v19 = vrot.slane %v9067_v25, %v6567_v11  ;;  %v11141_v17 = vrot.slane %v9068_v23, %v6567_v11 }
 0x29f   : > { %v7354_v58 = vmax.f32 %v7352_v57, %v7353_v36  ;;  %v7367_v24 = vmax.f32 %v7365_v55, %v7366_v33  ;;  %v11136_v57 = vrot.slane %v9068_v23, %v6563_v53  ;;  %v11138_v55 = vrot.slane %v9068_v23, %v6559_v22 }
 0x2a0   : > { %v7380_v28 = vmax.f32 %v7378_v31, %v7379_v20  ;;  %v7342_v27 = vrot.slane %v7341_v61, 1 }
 0x2a1   : > { %v7355_v13 = vrot.slane %v7354_v58, 1  ;;  %v7368_v51 = vrot.slane %v7367_v24, 1 }
 0x2a2   : > { %v7381_v60 = vrot.slane %v7380_v28, 1  ;;  %v7343_v16 = vmax.f32 %v7341_v61, %v7342_v27 }
 0x2a3   : > { %v7356_v52 = vmax.f32 %v7354_v58, %v7355_v13  ;;  %v7369_v56 = vmax.f32 %v7367_v24, %v7368_v51 }
 0x2a4   : > { %v7382_v41 = vmax.f32 %v7380_v28, %v7381_v60  ;;  %5847 = vmatmul.mubr.bf16.gmra.mrb[60].mxu0 %v9058_v4  ;;  %6412 = vmatmul.mubr.bf16.gmra.mrb[60].mxu1 %v9058_v4 }
 0x2a5   : > { %v7485_v6 = vcombine.low %v7343_v16, %v7356_v52  ;;  %5889 = vmatprep.mubr.bf16.mxu0 %v11736_v12  ;;  %6454 = vmatprep.mubr.bf16.mxu1 %v11736_v12 }
 0x2a6   : > { %v7486_v59 = vcombine.low %v7369_v56, %v7382_v41 }
 0x2a7   : > { %v7493_v9 = vrot.slane %v7485_v6, %v11699_v48 }
 0x2a8   : > { %v7500_v26 = vrot.slane %v7486_v59, %v11699_v48 }
 0x2aa   : > { %v7501_v2 = vcombine.low %v7493_v9, %v7500_v26 }
 0x2ac   : > { %v7523_v30 = vrot.slane %v7501_v2, 7  ;;  %5890 = vmatmul.mubr.bf16.vlgmr.msra.gmra.mrb[32].mxu0 %v9059_v38  ;;  %6455 = vmatmul.mubr.bf16.vlgmr.msra.gmra.mrb[32].mxu1 %v9059_v38 }
 0x2ad   : > { %5899 = vmatprep.mubr.bf16.mxu0 %v11736_v12  ;;  %6464 = vmatprep.mubr.bf16.mxu1 %v11736_v12 }
 0x2ae   : > { %v7525_v62 = vsel %vm7524_vm0, %v7523_v30, %v11737_v15 }
 0x2af   : > { %v7527_v37 = vsel %vm7526_vm1, %v7523_v30, %v7525_v62 }
 0x2b0   : > { %v7529_v54 = vsel %vm7528_vm2, %v7523_v30, %v7527_v37 }
 0x2b1   : > { %v7531_v63 = vsel %vm7530_vm3, %v7523_v30, %v7529_v54  ;;  %v11739_v30 = vld [vmem:[#allocation11_spill] sm:$0xff] }
 0x2b2   : > { %7541 = vst [vmem:[%s11095_s18] sm:$0xff] %v7531_v63 }
 0x2b4   : > { %5900 = vmatmul.mubr.bf16.gmra.mrb[36].mxu0 %v9060_v7  ;;  %6465 = vmatmul.mubr.bf16.gmra.mrb[36].mxu1 %v9060_v7 }
 0x2b5   : > { %5909 = vmatprep.mubr.bf16.mxu0 %v11736_v12  ;;  %6474 = vmatprep.mubr.bf16.mxu1 %v11736_v12 }
 0x2bc   : > { %5910 = vmatmul.mubr.bf16.gmra.mrb[40].mxu0 %v9061_v39  ;;  %6475 = vmatmul.mubr.bf16.gmra.mrb[40].mxu1 %v9061_v39 }
 0x2bd   : > { %5919 = vmatprep.mubr.bf16.mxu0 %v11736_v12  ;;  %6484 = vmatprep.mubr.bf16.mxu1 %v11736_v12 }
 0x2c4   : > { %5920 = vmatmul.mubr.bf16.gmra.mrb[44].mxu0 %v9062_v34  ;;  %6485 = vmatmul.mubr.bf16.gmra.mrb[44].mxu1 %v9062_v34 }
 0x2c5   : > { %5929 = vmatprep.mubr.bf16.mxu0 %v11736_v12  ;;  %6494 = vmatprep.mubr.bf16.mxu1 %v11736_v12 }
 0x2cc   : > { %5930 = vmatmul.mubr.bf16.gmra.mrb[48].mxu0 %v9063_v50  ;;  %6495 = vmatmul.mubr.bf16.gmra.mrb[48].mxu1 %v9063_v50 }
 0x2cd   : > { %5939 = vmatprep.mubr.bf16.mxu0 %v11736_v12  ;;  %6504 = vmatprep.mubr.bf16.mxu1 %v11736_v12 }
 0x2d4   : > { %5940 = vmatmul.mubr.bf16.gmra.mrb[52].mxu0 %v9064_v45  ;;  %6505 = vmatmul.mubr.bf16.gmra.mrb[52].mxu1 %v9064_v45  ;;  %v11740_v45 = vld [vmem:[#allocation23_spill] sm:$0xff] }
 0x2d5   : > { %5949 = vmatprep.mubr.bf16.mxu0 %v11736_v12  ;;  %6514 = vmatprep.mubr.bf16.mxu1 %v11736_v12 }
 0x2dc   : > { %5950 = vmatmul.mubr.bf16.gmra.mrb[56].mxu0 %v9065_v43  ;;  %6515 = vmatmul.mubr.bf16.gmra.mrb[56].mxu1 %v9065_v43 }
 0x2dd   : > { %5959 = vmatprep.mubr.bf16.mxu0 %v11736_v12  ;;  %6524 = vmatprep.mubr.bf16.mxu1 %v11736_v12 }
 0x2e4   : > { %5960 = vmatmul.mubr.bf16.gmra.mrb[60].mxu0 %v9066_v46  ;;  %6525 = vmatmul.mubr.bf16.gmra.mrb[60].mxu1 %v9066_v46 }
 0x37f   : > { %v5891_v14 = vpop.f32.mrb[32].mxu0  ;;  %v6456_v49 = vpop.f32.mrb[32].mxu1 }
 0x380   : > { %v6581_v31 = vmul.f32 %v11125_v3, %v5891_v14  ;;  %v5893_v36 = vpop.f32.mrb[33].mxu0  ;;  %v6583_v33 = vmul.f32 %v11127_v18, %v6456_v49  ;;  %v6458_v44 = vpop.f32.mrb[33].mxu1 }
 0x381   : > { %v6582_v20 = vmul.f32 %v11129_v1, %v5893_v36  ;;  %v5895_v61 = vpop.f32.mrb[34].mxu0  ;;  %v6584_v24 = vmul.f32 %v11134_v19, %v6458_v44  ;;  %v6460_v27 = vpop.f32.mrb[34].mxu1 }
 0x382   : > { %v6751_v58 = vadd.f32 %v11132_v0, %v6581_v31  ;;  %v6589_v28 = vmul.f32 %v11125_v3, %v5895_v61  ;;  %v5897_v13 = vpop.f32.mrb[35].mxu0  ;;  %v6753_v51 = vadd.f32 %v11136_v57, %v6583_v33  ;;  %v6591_v16 = vmul.f32 %v11127_v18, %v6460_v27  ;;  %v6462_v56 = vpop.f32.mrb[35].mxu1 }
 0x383   : > { %v6752_v60 = vadd.f32 %v11138_v55, %v6582_v20  ;;  %v6590_v52 = vmul.f32 %v11129_v1, %v5897_v13  ;;  %v6754_v6 = vadd.f32 %v11141_v17, %v6584_v24  ;;  %v6592_v59 = vmul.f32 %v11134_v19, %v6462_v56 }
 0x384   : > { %v6879_v41 = vmax.f32 %v6751_v58, 0.0  ;;  %v6759_v4 = vadd.f32 %v11132_v0, %v6589_v28  ;;  %v6881_v12 = vmax.f32 %v6753_v51, 0.0  ;;  %v6761_v26 = vadd.f32 %v11136_v57, %v6591_v16 }
 0x385   : > { %v6880_v9 = vmax.f32 %v6752_v60, 0.0  ;;  %v6760_v2 = vadd.f32 %v11138_v55, %v6590_v52  ;;  %v6882_v15 = vmax.f32 %v6754_v6, 0.0  ;;  %v6762_v37 = vadd.f32 %v11141_v17, %v6592_v59 }
 0x386   : > { %v7103_v38 = vmul.f32 %v11739_v30, %v6879_v41  ;;  %v6887_v62 = vmax.f32 %v6759_v4, 0.0  ;;  %v7105_v54 = vmul.f32 %v11739_v30, %v6881_v12  ;;  %v6889_v7 = vmax.f32 %v6761_v26, 0.0 }
 0x387   : > { %v7104_v63 = vmul.f32 %v11739_v30, %v6880_v9  ;;  %v6888_v39 = vmax.f32 %v6760_v2, 0.0  ;;  %v5901_v34 = vpop.f32.mrb[36].mxu0  ;;  %v7106_v50 = vmul.f32 %v11739_v30, %v6882_v15  ;;  %v6890_v46 = vmax.f32 %v6762_v37, 0.0  ;;  %v6466_v29 = vpop.f32.mrb[36].mxu1 }
 0x388   : > { %v7111_v43 = vmul.f32 %v11740_v45, %v6887_v62  ;;  %v6597_v35 = vmul.f32 %v11125_v3, %v5901_v34  ;;  %v5903_v53 = vpop.f32.mrb[37].mxu0  ;;  %v7113_v22 = vmul.f32 %v11740_v45, %v6889_v7  ;;  %v6599_v25 = vmul.f32 %v11127_v18, %v6466_v29  ;;  %v6468_v14 = vpop.f32.mrb[37].mxu1 }
 0x389   : > { %v7112_v11 = vmul.f32 %v11740_v45, %v6888_v39  ;;  %v6598_v23 = vmul.f32 %v11129_v1, %v5903_v53  ;;  %v5905_v31 = vpop.f32.mrb[38].mxu0  ;;  %v7114_v36 = vmul.f32 %v11740_v45, %v6890_v46  ;;  %v6600_v20 = vmul.f32 %v11134_v19, %v6468_v14  ;;  %v6470_v44 = vpop.f32.mrb[38].mxu1 }
 0x38a   : > { %v7279_v49 = vmax.f32 %v7103_v38, %v7111_v43  ;;  %v6767_v33 = vadd.f32 %v11132_v0, %v6597_v35  ;;  %v5907_v61 = vpop.f32.mrb[39].mxu0  ;;  %v7305_v58 = vmax.f32 %v7105_v54, %v7113_v22  ;;  %v6769_v28 = vadd.f32 %v11136_v57, %v6599_v25  ;;  %v6472_v13 = vpop.f32.mrb[39].mxu1  ;;  %v11741_v22 = vld [vmem:[#allocation46_spill] sm:$0xff] }
 0x38b   : > { %v7292_v24 = vmax.f32 %v7104_v63, %v7112_v11  ;;  %v6768_v27 = vadd.f32 %v11138_v55, %v6598_v23  ;;  %v7318_v51 = vmax.f32 %v7106_v50, %v7114_v36  ;;  %v6770_v16 = vadd.f32 %v11141_v17, %v6600_v20 }
 0x38c   : > { %v6895_v60 = vmax.f32 %v6767_v33, 0.0  ;;  %v6605_v52 = vmul.f32 %v11125_v3, %v5905_v31  ;;  %v6897_v56 = vmax.f32 %v6769_v28, 0.0  ;;  %v6607_v6 = vmul.f32 %v11127_v18, %v6470_v44 }
 0x38d   : > { %v6896_v41 = vmax.f32 %v6768_v27, 0.0  ;;  %v6606_v4 = vmul.f32 %v11129_v1, %v5907_v61  ;;  %v6898_v12 = vmax.f32 %v6770_v16, 0.0  ;;  %v6608_v26 = vmul.f32 %v11134_v19, %v6472_v13 }
 0x38e   : > { %v7119_v59 = vmul.f32 %v10308_v10, %v6895_v60  ;;  %v6775_v9 = vadd.f32 %v11132_v0, %v6605_v52  ;;  %v7121_v2 = vmul.f32 %v10308_v10, %v6897_v56  ;;  %v6777_v38 = vadd.f32 %v11136_v57, %v6607_v6 }
 0x38f   : > { %v7120_v30 = vmul.f32 %v10308_v10, %v6896_v41  ;;  %v6776_v15 = vadd.f32 %v11138_v55, %v6606_v4  ;;  %v5911_v62 = vpop.f32.mrb[40].mxu0  ;;  %v7122_v54 = vmul.f32 %v10308_v10, %v6898_v12  ;;  %v6778_v7 = vadd.f32 %v11141_v17, %v6608_v26  ;;  %v6476_v39 = vpop.f32.mrb[40].mxu1 }
 0x390   : > { %v7280_v37 = vmax.f32 %v7279_v49, %v7119_v59  ;;  %v6903_v63 = vmax.f32 %v6775_v9, 0.0  ;;  %v5913_v34 = vpop.f32.mrb[41].mxu0  ;;  %v7306_v50 = vmax.f32 %v7305_v58, %v7121_v2  ;;  %v6905_v43 = vmax.f32 %v6777_v38, 0.0  ;;  %v6478_v35 = vpop.f32.mrb[41].mxu1  ;;  %v11742_v9 = vld [vmem:[#allocation47_spill] sm:$0xff] }
 0x391   : > { %v7293_v45 = vmax.f32 %v7292_v24, %v7120_v30  ;;  %v6904_v46 = vmax.f32 %v6776_v15, 0.0  ;;  %v5915_v29 = vpop.f32.mrb[42].mxu0  ;;  %v7319_v53 = vmax.f32 %v7318_v51, %v7122_v54  ;;  %v6906_v25 = vmax.f32 %v6778_v7, 0.0  ;;  %v6480_v14 = vpop.f32.mrb[42].mxu1 }
 0x392   : > { %v7127_v11 = vmul.f32 %v11741_v22, %v6903_v63  ;;  %v6613_v23 = vmul.f32 %v11125_v3, %v5911_v62  ;;  %v5917_v31 = vpop.f32.mrb[43].mxu0  ;;  %v7129_v10 = vmul.f32 %v11741_v22, %v6905_v43  ;;  %v6615_v36 = vmul.f32 %v11127_v18, %v6476_v39  ;;  %v6482_v20 = vpop.f32.mrb[43].mxu1 }
 0x393   : > { %v7128_v49 = vmul.f32 %v11741_v22, %v6904_v46  ;;  %v6614_v33 = vmul.f32 %v11129_v1, %v5913_v34  ;;  %v7130_v61 = vmul.f32 %v11741_v22, %v6906_v25  ;;  %v6616_v24 = vmul.f32 %v11134_v19, %v6478_v35 }
 0x394   : > { %v7281_v44 = vmax.f32 %v7280_v37, %v7127_v11  ;;  %v6783_v58 = vadd.f32 %v11132_v0, %v6613_v23  ;;  %v7307_v28 = vmax.f32 %v7306_v50, %v7129_v10  ;;  %v6785_v13 = vadd.f32 %v11136_v57, %v6615_v36 }
 0x395   : > { %v7294_v27 = vmax.f32 %v7293_v45, %v7128_v49  ;;  %v6784_v51 = vadd.f32 %v11138_v55, %v6614_v33  ;;  %v7320_v60 = vmax.f32 %v7319_v53, %v7130_v61  ;;  %v6786_v52 = vadd.f32 %v11141_v17, %v6616_v24 }
 0x396   : > { %v6911_v16 = vmax.f32 %v6783_v58, 0.0  ;;  %v6621_v56 = vmul.f32 %v11125_v3, %v5915_v29  ;;  %v6913_v41 = vmax.f32 %v6785_v13, 0.0  ;;  %v6623_v4 = vmul.f32 %v11127_v18, %v6480_v14 }
 0x397   : > { %v6912_v6 = vmax.f32 %v6784_v51, 0.0  ;;  %v6622_v59 = vmul.f32 %v11129_v1, %v5917_v31  ;;  %v5921_v12 = vpop.f32.mrb[44].mxu0  ;;  %v6914_v2 = vmax.f32 %v6786_v52, 0.0  ;;  %v6624_v38 = vmul.f32 %v11134_v19, %v6482_v20  ;;  %v6486_v15 = vpop.f32.mrb[44].mxu1  ;;  %v11743_v31 = vld [vmem:[#allocation3_spill] sm:$0xff] }
 0x398   : > { %v7135_v26 = vmul.f32 %v11742_v9, %v6911_v16  ;;  %v6791_v30 = vadd.f32 %v11132_v0, %v6621_v56  ;;  %v5923_v62 = vpop.f32.mrb[45].mxu0  ;;  %v7137_v37 = vmul.f32 %v11742_v9, %v6913_v41  ;;  %v6793_v63 = vadd.f32 %v11136_v57, %v6623_v4  ;;  %v6488_v39 = vpop.f32.mrb[45].mxu1 }
 0x399   : > { %v7136_v54 = vmul.f32 %v11742_v9, %v6912_v6  ;;  %v6792_v7 = vadd.f32 %v11138_v55, %v6622_v59  ;;  %v5925_v34 = vpop.f32.mrb[46].mxu0  ;;  %v7138_v45 = vmul.f32 %v11742_v9, %v6914_v2  ;;  %v6794_v46 = vadd.f32 %v11141_v17, %v6624_v38  ;;  %v6490_v35 = vpop.f32.mrb[46].mxu1 }
 0x39a   : > { %v7282_v50 = vmax.f32 %v7281_v44, %v7135_v26  ;;  %v6919_v43 = vmax.f32 %v6791_v30, 0.0  ;;  %v5927_v29 = vpop.f32.mrb[47].mxu0  ;;  %v7308_v53 = vmax.f32 %v7307_v28, %v7137_v37  ;;  %v6921_v11 = vmax.f32 %v6793_v63, 0.0  ;;  %v6492_v23 = vpop.f32.mrb[47].mxu1 }
 0x39b   : > { %v7295_v22 = vmax.f32 %v7294_v27, %v7136_v54  ;;  %v6920_v25 = vmax.f32 %v6792_v7, 0.0  ;;  %v7321_v14 = vmax.f32 %v7320_v60, %v7138_v45  ;;  %v6922_v49 = vmax.f32 %v6794_v46, 0.0 }
 0x39c   : > { %v7143_v10 = vmul.f32 %v11743_v31, %v6919_v43  ;;  %v6629_v36 = vmul.f32 %v11125_v3, %v5921_v12  ;;  %v7145_v33 = vmul.f32 %v11743_v31, %v6921_v11  ;;  %v6631_v44 = vmul.f32 %v11127_v18, %v6486_v15 }
 0x39d   : > { %v7144_v20 = vmul.f32 %v11743_v31, %v6920_v25  ;;  %v6630_v61 = vmul.f32 %v11129_v1, %v5923_v62  ;;  %v7146_v24 = vmul.f32 %v11743_v31, %v6922_v49  ;;  %v6632_v27 = vmul.f32 %v11134_v19, %v6488_v39  ;;  %v11744_v62 = vld [vmem:[#allocation4_spill] sm:$0xff]  ;;  %v11745_v49 = vld [vmem:[#allocation5_spill] sm:$0xff] }
 0x39e   : > { %v7283_v58 = vmax.f32 %v7282_v50, %v7143_v10  ;;  %v6799_v28 = vadd.f32 %v11132_v0, %v6629_v36  ;;  %v7309_v13 = vmax.f32 %v7308_v53, %v7145_v33  ;;  %v6801_v60 = vadd.f32 %v11136_v57, %v6631_v44 }
 0x39f   : > { %v7296_v51 = vmax.f32 %v7295_v22, %v7144_v20  ;;  %v6800_v16 = vadd.f32 %v11138_v55, %v6630_v61  ;;  %v5931_v52 = vpop.f32.mrb[48].mxu0  ;;  %v7322_v56 = vmax.f32 %v7321_v14, %v7146_v24  ;;  %v6802_v6 = vadd.f32 %v11141_v17, %v6632_v27  ;;  %v6496_v59 = vpop.f32.mrb[48].mxu1 }
 0x3a0   : > { %v6927_v41 = vmax.f32 %v6799_v28, 0.0  ;;  %v6637_v4 = vmul.f32 %v11125_v3, %v5925_v34  ;;  %v5933_v12 = vpop.f32.mrb[49].mxu0  ;;  %v6929_v9 = vmax.f32 %v6801_v60, 0.0  ;;  %v6639_v2 = vmul.f32 %v11127_v18, %v6490_v35  ;;  %v6498_v38 = vpop.f32.mrb[49].mxu1 }
 0x3a1   : > { %v6928_v26 = vmax.f32 %v6800_v16, 0.0  ;;  %v6638_v30 = vmul.f32 %v11129_v1, %v5927_v29  ;;  %v11225_v15 = vpop.f32.mrb[50].mxu0  ;;  %v6930_v54 = vmax.f32 %v6802_v6, 0.0  ;;  %v6640_v7 = vmul.f32 %v11134_v19, %v6492_v23  ;;  %v6500_v39 = vpop.f32.mrb[50].mxu1 }
 0x3a2   : > { %v7151_v37 = vmul.f32 %v11744_v62, %v6927_v41  ;;  %v6807_v63 = vadd.f32 %v11132_v0, %v6637_v4  ;;  %v5937_v34 = vpop.f32.mrb[51].mxu0  ;;  %v7153_v50 = vmul.f32 %v11744_v62, %v6929_v9  ;;  %v6809_v43 = vadd.f32 %v11136_v57, %v6639_v2  ;;  %v6502_v35 = vpop.f32.mrb[51].mxu1 }
 0x3a3   : > { %v7152_v45 = vmul.f32 %v11744_v62, %v6928_v26  ;;  %v6808_v46 = vadd.f32 %v11138_v55, %v6638_v30  ;;  %v7154_v53 = vmul.f32 %v11744_v62, %v6930_v54  ;;  %v6810_v11 = vadd.f32 %v11141_v17, %v6640_v7 }
 0x3a4   : > { %v7284_v29 = vmax.f32 %v7283_v58, %v7151_v37  ;;  %v6935_v22 = vmax.f32 %v6807_v63, 0.0  ;;  %v7310_v25 = vmax.f32 %v7309_v13, %v7153_v50  ;;  %v6937_v23 = vmax.f32 %v6809_v43, 0.0 }
 0x3a5   : > { %v7297_v14 = vmax.f32 %v7296_v51, %v7152_v45  ;;  %v6936_v31 = vmax.f32 %v6808_v46, 0.0  ;;  %v7323_v10 = vmax.f32 %v7322_v56, %v7154_v53  ;;  %v6938_v33 = vmax.f32 %v6810_v11, 0.0 }
 0x3a6   : > { %v7159_v36 = vmul.f32 %v11745_v49, %v6935_v22  ;;  %v6645_v20 = vmul.f32 %v11125_v3, %v5931_v52  ;;  %v7161_v44 = vmul.f32 %v11745_v49, %v6937_v23  ;;  %v6647_v58 = vmul.f32 %v11127_v18, %v6496_v59 }
 0x3a7   : > { %v7160_v61 = vmul.f32 %v11745_v49, %v6936_v31  ;;  %v6646_v24 = vmul.f32 %v11129_v1, %v5933_v12  ;;  %v11242_v28 = vpop.f32.mrb[52].mxu0  ;;  %v7162_v13 = vmul.f32 %v11745_v49, %v6938_v33  ;;  %v6648_v60 = vmul.f32 %v11134_v19, %v6498_v38  ;;  %v11247_v16 = vpop.f32.mrb[52].mxu1 }
 0x3a8   : > { %v7285_v27 = vmax.f32 %v7284_v29, %v7159_v36  ;;  %v6815_v51 = vadd.f32 %v11132_v0, %v6645_v20  ;;  %v11249_v52 = vpop.f32.mrb[53].mxu0  ;;  %v7311_v56 = vmax.f32 %v7310_v25, %v7161_v44  ;;  %v6817_v6 = vadd.f32 %v11136_v57, %v6647_v58  ;;  %v11253_v59 = vpop.f32.mrb[53].mxu1 }
 0x3a9   : > { %v7298_v41 = vmax.f32 %v7297_v14, %v7160_v61  ;;  %v6816_v4 = vadd.f32 %v11138_v55, %v6646_v24  ;;  %v11255_v12 = vpop.f32.mrb[54].mxu0  ;;  %v7324_v26 = vmax.f32 %v7323_v10, %v7162_v13  ;;  %v6818_v30 = vadd.f32 %v11141_v17, %v6648_v60  ;;  %v11258_v38 = vpop.f32.mrb[54].mxu1 }
 0x3aa   : > { %v7286_v9 = vrot.slane %v7285_v27, 4  ;;  %v6943_v2 = vmax.f32 %v6815_v51, 0.0  ;;  %v11260_v62 = vpop.f32.mrb[55].mxu0  ;;  %v7312_v37 = vrot.slane %v7311_v56, 4  ;;  %v6945_v63 = vmax.f32 %v6817_v6, 0.0  ;;  %v11262_v50 = vpop.f32.mrb[55].mxu1 }
 0x3ab   : > { %v7299_v54 = vrot.slane %v7298_v41, 4  ;;  %v6944_v7 = vmax.f32 %v6816_v4, 0.0  ;;  %v7325_v43 = vrot.slane %v7324_v26, 4  ;;  %v6946_v29 = vmax.f32 %v6818_v30, 0.0 }
 0x3ac   : > { %v7287_v45 = vmax.f32 %v7285_v27, %v7286_v9  ;;  %v11265_v46 = vmul.f32 %v10668_v40, %v6943_v2  ;;  %v7313_v53 = vmax.f32 %v7311_v56, %v7312_v37  ;;  %v11268_v11 = vmul.f32 %v10668_v40, %v6945_v63 }
 0x3ad   : > { %v7300_v22 = vmax.f32 %v7298_v41, %v7299_v54  ;;  %v11271_v25 = vmul.f32 %v10668_v40, %v6944_v7  ;;  %v7326_v23 = vmax.f32 %v7324_v26, %v7325_v43  ;;  %v11274_v31 = vmul.f32 %v10668_v40, %v6946_v29  ;;  %v11746_v43 = vld [vmem:[#allocation6_spill] sm:$0xff] }
 0x3ae   : > { %v7288_v14 = vrot.slane %v7287_v45, 2  ;;  %v6653_v10 = vmul.f32 %v11125_v3, %v11225_v15  ;;  %v7314_v49 = vrot.slane %v7313_v53, 2  ;;  %v6655_v33 = vmul.f32 %v11127_v18, %v6500_v39 }
 0x3af   : > { %v7301_v36 = vrot.slane %v7300_v22, 2  ;;  %v6654_v20 = vmul.f32 %v11129_v1, %v5937_v34  ;;  %v11280_v44 = vpop.f32.mrb[56].mxu0  ;;  %v7327_v58 = vrot.slane %v7326_v23, 2  ;;  %v6656_v27 = vmul.f32 %v11134_v19, %v6502_v35  ;;  %v11284_v13 = vpop.f32.mrb[56].mxu1 }
 0x3b0   : > { %v7289_v61 = vmax.f32 %v7287_v45, %v7288_v14  ;;  %v6823_v24 = vadd.f32 %v11132_v0, %v6653_v10  ;;  %v11286_v40 = vpop.f32.mrb[57].mxu0  ;;  %v7315_v51 = vmax.f32 %v7313_v53, %v7314_v49  ;;  %v6825_v60 = vadd.f32 %v11136_v57, %v6655_v33  ;;  %v11290_v56 = vpop.f32.mrb[57].mxu1 }
 0x3b1   : > { %v7302_v15 = vmax.f32 %v7300_v22, %v7301_v36  ;;  %v6824_v39 = vadd.f32 %v11138_v55, %v6654_v20  ;;  %v11292_v34 = vpop.f32.mrb[58].mxu0  ;;  %v7328_v6 = vmax.f32 %v7326_v23, %v7327_v58  ;;  %v6826_v9 = vadd.f32 %v11141_v17, %v6656_v27  ;;  %v11295_v35 = vpop.f32.mrb[58].mxu1 }
 0x3b2   : > { %v7290_v41 = vrot.slane %v7289_v61, 1  ;;  %v6951_v4 = vmax.f32 %v6823_v24, 0.0  ;;  %v11297_v26 = vpop.f32.mrb[59].mxu0  ;;  %v7316_v2 = vrot.slane %v7315_v51, 1  ;;  %v6953_v37 = vmax.f32 %v6825_v60, 0.0  ;;  %v11299_v63 = vpop.f32.mrb[59].mxu1 }
 0x3b3   : > { %v7303_v30 = vrot.slane %v7302_v15, 1  ;;  %v6952_v54 = vmax.f32 %v6824_v39, 0.0  ;;  %v7329_v45 = vrot.slane %v7328_v6, 1  ;;  %v6954_v53 = vmax.f32 %v6826_v9, 0.0 }
 0x3b4   : > { %v7291_v7 = vmax.f32 %v7289_v61, %v7290_v41  ;;  %v7175_v29 = vmul.f32 %v11746_v43, %v6951_v4  ;;  %v7317_v22 = vmax.f32 %v7315_v51, %v7316_v2  ;;  %v7177_v23 = vmul.f32 %v11746_v43, %v6953_v37 }
 0x3b5   : > { %v7304_v14 = vmax.f32 %v7302_v15, %v7303_v30  ;;  %v7176_v10 = vmul.f32 %v11746_v43, %v6952_v54  ;;  %v7330_v49 = vmax.f32 %v7328_v6, %v7329_v45  ;;  %v7178_v33 = vmul.f32 %v11746_v43, %v6954_v53 }
 0x3b6   : > { %v7383_v36 = vmax.f32 %v11265_v46, %v7175_v29  ;;  %v6661_v20 = vmul.f32 %v11125_v3, %v11242_v28  ;;  %v7409_v61 = vmax.f32 %v11268_v11, %v7177_v23  ;;  %v6663_v27 = vmul.f32 %v11127_v18, %v11247_v16 }
 0x3b7   : > { %v7468_v58 = vcombine.low %v7291_v7, %v7304_v14  ;;  %v7396_v24 = vmax.f32 %v11271_v25, %v7176_v10  ;;  %v11312_v51 = vpop.f32.mrb[60].mxu0  ;;  %v7469_v15 = vcombine.low %v7317_v22, %v7330_v49  ;;  %v7422_v60 = vmax.f32 %v11274_v31, %v7178_v33  ;;  %v11318_v41 = vpop.f32.mrb[60].mxu1 }
 0x3b8   : > { %v6831_v46 = vadd.f32 %v11132_v0, %v6661_v20  ;;  %v6662_v39 = vmul.f32 %v11129_v1, %v11249_v52  ;;  %v11320_v28 = vpop.f32.mrb[61].mxu0  ;;  %v6833_v25 = vadd.f32 %v11136_v57, %v6663_v27  ;;  %v6664_v16 = vmul.f32 %v11134_v19, %v11253_v59  ;;  %v11330_v6 = vpop.f32.mrb[61].mxu1 }
 0x3b9   : > { %v11323_v11 = vrot.slane %v7468_v58, %v11699_v48  ;;  %v6669_v31 = vmul.f32 %v11125_v3, %v11255_v12  ;;  %v11332_v4 = vpop.f32.mrb[62].mxu0  ;;  %v11335_v52 = vrot.slane %v7469_v15, %v11699_v48  ;;  %v6671_v30 = vmul.f32 %v11127_v18, %v11258_v38  ;;  %v11340_v37 = vpop.f32.mrb[62].mxu1 }
 0x3ba   : > { %v6959_v9 = vmax.f32 %v6831_v46, 0.0  ;;  %v6832_v2 = vadd.f32 %v11138_v55, %v6662_v39  ;;  %v11342_v54 = vpop.f32.mrb[63].mxu0  ;;  %v6961_v59 = vmax.f32 %v6833_v25, 0.0  ;;  %v6834_v12 = vadd.f32 %v11141_v17, %v6664_v16  ;;  %v11348_v43 = vpop.f32.mrb[63].mxu1 }
 0x3bb   : > { %v6839_v7 = vadd.f32 %v11132_v0, %v6669_v31  ;;  %v6670_v45 = vmul.f32 %v11129_v1, %v11260_v62  ;;  %v7484_v29 = vcombine.low %v11323_v11, %v11335_v52  ;;  %v6841_v22 = vadd.f32 %v11136_v57, %v6671_v30 }
 0x3bc   : > { %v7183_v53 = vmul.f32 %v10798_v8, %v6959_v9  ;;  %v6960_v38 = vmax.f32 %v6832_v2, 0.0  ;;  %v7185_v14 = vmul.f32 %v10798_v8, %v6961_v59  ;;  %v6962_v23 = vmax.f32 %v6834_v12, 0.0 }
 0x3bd   : > { %v6967_v10 = vmax.f32 %v6839_v7, 0.0  ;;  %v6840_v49 = vadd.f32 %v11138_v55, %v6670_v45  ;;  %v6969_v62 = vmax.f32 %v6841_v22, 0.0  ;;  %v6672_v58 = vmul.f32 %v11134_v19, %v11262_v50 }
 0x3be   : > { %v7384_v33 = vmax.f32 %v7383_v36, %v7183_v53  ;;  %v7184_v20 = vmul.f32 %v10798_v8, %v6960_v38  ;;  %v7410_v27 = vmax.f32 %v7409_v61, %v7185_v14  ;;  %v7186_v15 = vmul.f32 %v10798_v8, %v6962_v23 }
 0x3bf   : > { %v7191_v46 = vmul.f32 %v10874_v21, %v6967_v10  ;;  %v6968_v39 = vmax.f32 %v6840_v49, 0.0  ;;  %v7193_v16 = vmul.f32 %v10874_v21, %v6969_v62  ;;  %v6842_v31 = vadd.f32 %v11141_v17, %v6672_v58 }
 0x3c0   : > { %v7397_v25 = vmax.f32 %v7396_v24, %v7184_v20  ;;  %v6677_v36 = vmul.f32 %v11125_v3, %v11280_v44  ;;  %v7423_v9 = vmax.f32 %v7422_v60, %v7186_v15  ;;  %v6679_v50 = vmul.f32 %v11127_v18, %v11284_v13 }
 0x3c1   : > { %v7385_v2 = vmax.f32 %v7384_v33, %v7191_v46  ;;  %v7192_v30 = vmul.f32 %v10874_v21, %v6968_v39  ;;  %v7411_v61 = vmax.f32 %v7410_v27, %v7193_v16  ;;  %v6970_v8 = vmax.f32 %v6842_v31, 0.0 }
 0x3c2   : > { %v6847_v59 = vadd.f32 %v11132_v0, %v6677_v36  ;;  %v6678_v24 = vmul.f32 %v11129_v1, %v11286_v40  ;;  %v6849_v7 = vadd.f32 %v11136_v57, %v6679_v50  ;;  %v6680_v44 = vmul.f32 %v11134_v19, %v11290_v56 }
 0x3c3   : > { %v7398_v12 = vmax.f32 %v7397_v25, %v7192_v30  ;;  %v6685_v60 = vmul.f32 %v11125_v3, %v11292_v34  ;;  %v7194_v45 = vmul.f32 %v10874_v21, %v6970_v8  ;;  %v6687_v38 = vmul.f32 %v11127_v18, %v11295_v35 }
 0x3c4   : > { %v6975_v53 = vmax.f32 %v6847_v59, 0.0  ;;  %v6848_v13 = vadd.f32 %v11138_v55, %v6678_v24  ;;  %v6977_v22 = vmax.f32 %v6849_v7, 0.0  ;;  %v6850_v40 = vadd.f32 %v11141_v17, %v6680_v44 }
 0x3c5   : > { %v6855_v14 = vadd.f32 %v11132_v0, %v6685_v60  ;;  %v6686_v23 = vmul.f32 %v11129_v1, %v11297_v26  ;;  %v7424_v56 = vmax.f32 %v7423_v9, %v7194_v45  ;;  %v6857_v21 = vadd.f32 %v11136_v57, %v6687_v38 }
 0x3c6   : > { %v7199_v10 = vmul.f32 %v10939_v32, %v6975_v53  ;;  %v6976_v34 = vmax.f32 %v6848_v13, 0.0  ;;  %v7201_v49 = vmul.f32 %v10939_v32, %v6977_v22  ;;  %v6978_v33 = vmax.f32 %v6850_v40, 0.0 }
 0x3c7   : > { %v6983_v20 = vmax.f32 %v6855_v14, 0.0  ;;  %v6856_v35 = vadd.f32 %v11138_v55, %v6686_v23  ;;  %v6985_v27 = vmax.f32 %v6857_v21, 0.0  ;;  %v6688_v15 = vmul.f32 %v11134_v19, %v11299_v63 }
 0x3c8   : > { %v7386_v62 = vmax.f32 %v7385_v2, %v7199_v10  ;;  %v7200_v58 = vmul.f32 %v10939_v32, %v6976_v34  ;;  %v7412_v26 = vmax.f32 %v7411_v61, %v7201_v49  ;;  %v7202_v46 = vmul.f32 %v10939_v32, %v6978_v33 }
 0x3c9   : > { %v7207_v39 = vmul.f32 %v10977_v42, %v6983_v20  ;;  %v6984_v25 = vmax.f32 %v6856_v35, 0.0  ;;  %v7209_v31 = vmul.f32 %v10977_v42, %v6985_v27  ;;  %v6858_v36 = vadd.f32 %v11141_v17, %v6688_v15 }
 0x3ca   : > { %v7399_v16 = vmax.f32 %v7398_v12, %v7200_v58  ;;  %v6693_v9 = vmul.f32 %v11125_v3, %v11312_v51  ;;  %v7425_v2 = vmax.f32 %v7424_v56, %v7202_v46  ;;  %v6695_v63 = vmul.f32 %v11127_v18, %v11318_v41 }
 0x3cb   : > { %v7387_v30 = vmax.f32 %v7386_v62, %v7207_v39  ;;  %v7208_v50 = vmul.f32 %v10977_v42, %v6984_v25  ;;  %v7413_v61 = vmax.f32 %v7412_v26, %v7209_v31  ;;  %v6986_v32 = vmax.f32 %v6858_v36, 0.0 }
 0x3cc   : > { %v6863_v8 = vadd.f32 %v11132_v0, %v6693_v9  ;;  %v6694_v59 = vmul.f32 %v11129_v1, %v11320_v28  ;;  %v6865_v12 = vadd.f32 %v11136_v57, %v6695_v63  ;;  %v6696_v51 = vmul.f32 %v11134_v19, %v11330_v6 }
 0x3cd   : > { %v7400_v24 = vmax.f32 %v7399_v16, %v7208_v50  ;;  %v6701_v7 = vmul.f32 %v11125_v3, %v11332_v4  ;;  %v7210_v44 = vmul.f32 %v10977_v42, %v6986_v32  ;;  %v6703_v45 = vmul.f32 %v11127_v18, %v11340_v37 }
 0x3ce   : > { %v6991_v60 = vmax.f32 %v6863_v8, 0.0  ;;  %v6864_v41 = vadd.f32 %v11138_v55, %v6694_v59  ;;  %v6993_v53 = vmax.f32 %v6865_v12, 0.0  ;;  %v6866_v28 = vadd.f32 %v11141_v17, %v6696_v51 }
 0x3cf   : > { %v6871_v13 = vadd.f32 %v11132_v0, %v6701_v7  ;;  %v6702_v38 = vmul.f32 %v11129_v1, %v11342_v54  ;;  %v7426_v6 = vmax.f32 %v7425_v2, %v7210_v44  ;;  %v6873_v42 = vadd.f32 %v11136_v57, %v6703_v45 }
 0x3d0   : > { %v7215_v22 = vmul.f32 %v11017_v5, %v6991_v60  ;;  %v6992_v3 = vmax.f32 %v6864_v41, 0.0  ;;  %v7217_v4 = vmul.f32 %v11017_v5, %v6993_v53  ;;  %v6994_v40 = vmax.f32 %v6866_v28, 0.0 }
 0x3d1   : > { %v6999_v14 = vmax.f32 %v6871_v13, 0.0  ;;  %v6872_v18 = vadd.f32 %v11138_v55, %v6702_v38  ;;  %v7001_v56 = vmax.f32 %v6873_v42, 0.0  ;;  %v6704_v0 = vmul.f32 %v11134_v19, %v11348_v43 }
 0x3d2   : > { %v7388_v37 = vmax.f32 %v7387_v30, %v7215_v22  ;;  %v7216_v23 = vmul.f32 %v11017_v5, %v6992_v3  ;;  %v7414_v1 = vmax.f32 %v7413_v61, %v7217_v4  ;;  %v7218_v54 = vmul.f32 %v11017_v5, %v6994_v40 }
 0x3d3   : > { %v7223_v10 = vmul.f32 %v11050_v47, %v6999_v14  ;;  %v7000_v34 = vmax.f32 %v6872_v18, 0.0  ;;  %v7225_v21 = vmul.f32 %v11050_v47, %v7001_v56  ;;  %v6874_v49 = vadd.f32 %v11141_v17, %v6704_v0 }
 0x3d4   : > { %v7401_v57 = vmax.f32 %v7400_v24, %v7216_v23  ;;  %v7427_v33 = vmax.f32 %v7426_v6, %v7218_v54 }
 0x3d5   : > { %v7389_v55 = vmax.f32 %v7388_v37, %v7223_v10  ;;  %v7224_v20 = vmul.f32 %v11050_v47, %v7000_v34  ;;  %v7415_v35 = vmax.f32 %v7414_v1, %v7225_v21  ;;  %v7002_v62 = vmax.f32 %v6874_v49, 0.0 }
 0x3d7   : > { %v7390_v58 = vrot.slane %v7389_v55, 4  ;;  %v7402_v27 = vmax.f32 %v7401_v57, %v7224_v20  ;;  %v7416_v19 = vrot.slane %v7415_v35, 4  ;;  %v7226_v43 = vmul.f32 %v11050_v47, %v7002_v62 }
 0x3d9   : > { %v7391_v5 = vmax.f32 %v7389_v55, %v7390_v58  ;;  %v7403_v15 = vrot.slane %v7402_v27, 4  ;;  %v7417_v26 = vmax.f32 %v7415_v35, %v7416_v19  ;;  %v7428_v46 = vmax.f32 %v7427_v33, %v7226_v43 }
 0x3db   : > { %v7392_v39 = vrot.slane %v7391_v5, 2  ;;  %v7404_v25 = vmax.f32 %v7402_v27, %v7403_v15  ;;  %v7418_v16 = vrot.slane %v7417_v26, 2  ;;  %v7429_v31 = vrot.slane %v7428_v46, 4 }
 0x3dd   : > { %v7393_v17 = vmax.f32 %v7391_v5, %v7392_v39  ;;  %v7405_v36 = vrot.slane %v7404_v25, 2  ;;  %v7419_v9 = vmax.f32 %v7417_v26, %v7418_v16  ;;  %v7430_v2 = vmax.f32 %v7428_v46, %v7429_v31 }
 0x3df   : > { %v7394_v30 = vrot.slane %v7393_v17, 1  ;;  %v7406_v50 = vmax.f32 %v7404_v25, %v7405_v36  ;;  %v7420_v63 = vrot.slane %v7419_v9, 1  ;;  %v7431_v61 = vrot.slane %v7430_v2, 2 }
 0x3e1   : > { %v7395_v32 = vmax.f32 %v7393_v17, %v7394_v30  ;;  %v7407_v8 = vrot.slane %v7406_v50, 1  ;;  %v7432_v47 = vmax.f32 %v7430_v2, %v7431_v61  ;;  %v7421_v24 = vmax.f32 %v7419_v9, %v7420_v63 }
 0x3e3   : > { %v7408_v59 = vmax.f32 %v7406_v50, %v7407_v8  ;;  %v7433_v12 = vrot.slane %v7432_v47, 1 }
 0x3e5   : > { %v7502_v51 = vcombine.low %v7395_v32, %v7408_v59  ;;  %v7434_v7 = vmax.f32 %v7432_v47, %v7433_v12 }
 0x3e7   : > { %v7510_v44 = vrot.slane %v7502_v51, %v11699_v48  ;;  %v7503_v60 = vcombine.low %v7421_v24, %v7434_v7 }
 0x3e9   : > { %v7517_v41 = vrot.slane %v7503_v60, %v11699_v48 }
 0x3eb   : > { %v7518_v45 = vcombine.low %v7510_v44, %v7517_v41 }
 0x3ed   : > { %v7534_v53 = vrot.slane %v7518_v45, 7 }
 0x3ef   : > { %v7535_v28 = vsel %vm7524_vm0, %v7534_v53, %v7484_v29 }
 0x3f0   : > { %v7536_v13 = vsel %vm7526_vm1, %v7534_v53, %v7535_v28 }
 0x3f1   : > { %v7537_v38 = vsel %vm7528_vm2, %v7534_v53, %v7536_v13 }
 0x3f2   : > { %v7538_v6 = vsel %vm7530_vm3, %v7534_v53, %v7537_v38 }
 0x3f3   : > { %7542 = vst [vmem:[%s11095_s18 + $0x8] sm:$0xff] %v7538_v6 }
 0x3f4 PF: > { %s15_s20 = sadd.s32 1, %s9091_s20   ;;  %s11747_s18 = smov %s9087_s19 }
 0x3f5   : > { %p12_p5 = scmp.ge.s32.totalorder %s15_s20, 5   ;;  %s11748_s19 = smov %s11750_s21 }
 0x3f7   :  { %14 = sbr.rel (!%p12_p5) target bundleno = 2 (0x2), region = 82 }

// kernel: pmgi_v3_forward.5
= control target key start
LH: loop header
LB: loop body
LE: loop exit
PB: predicated region body
PF: predicated region fallthrough
CT: control target
= control target key end

     0   :  { %v10922_v22 = vmov 1983009808   ;;  %v60_v24 = vlaneseq  ;;  %vm10925_vm0 = vmmov 0   ;;  %s13582_s1 = inlined_call_operand.vmem [shape: bf16[3,1024,128], index: 1, kind: input, shape index: {}]   ;;  %s13583_s0 = inlined_call_operand.vmem [shape: f32[3,2,1024], index: 0, kind: input, shape index: {}]   ;;  %s13584_s3 = inlined_call_operand.vmem [shape: bf16[128,1024], index: 3, kind: input, shape index: {}]   ;;  %s13585_s2 = inlined_call_operand.vmem [shape: f32[1,128], index: 2, kind: input, shape index: {}]   ;;  %s13586_s5 = inlined_call_operand.vmem [shape: bf16[3,1024,128], index: 5, kind: input, shape index: {}]   ;;  %s13587_s4 = inlined_call_operand.vmem [shape: f32[1,1024], index: 4, kind: input, shape index: {}]   ;;  %s13588_s8 = inlined_call_operand.vmem [shape: bf16[3,128,128], index: 8, kind: input, shape index: {}]   ;;  %s13589_s10 = inlined_call_operand.vmem [shape: bf16[3,1024,128], index: 10, kind: input, shape index: {}]   ;;  %s13590_s6 = inlined_call_operand.vmem [shape: f32[3,1,128], index: 6, kind: input, shape index: {}]   ;;  %s13591_s7 = inlined_call_operand.vmem [shape: f32[3,1,128], index: 7, kind: input, shape index: {}]   ;;  %s13592_s9 = inlined_call_operand.vmem [shape: f32[3,1,128], index: 9, kind: input, shape index: {}]   ;;  %s13593_s15 = inlined_call_operand.vmem [shape: f32[4,2,128], index: 15, kind: output, shape index: {}]   ;;  %s13594_s13 = inlined_call_operand.vmem [shape: bf16[128,128], index: 13, kind: input, shape index: {}]   ;;  %s13595_s11 = inlined_call_operand.vmem [shape: f32[1,128], index: 11, kind: input, shape index: {}]   ;;  %s13596_s12 = inlined_call_operand.vmem [shape: f32[1,128], index: 12, kind: input, shape index: {}]   ;;  %s13597_s14 = inlined_call_operand.vmem [shape: f32[1,128], index: 14, kind: input, shape index: {}]  }
   0x1   :  { %v10200_v0 = vld [vmem:[%s13582_s1 + $0x40] sm:$0xff]   ;;  %v10204_v4 = vld [vmem:[%s13582_s1 + $0x48] sm:$0xff]   ;;  %v10208_v8 = vld [vmem:[%s13582_s1 + $0x50] sm:$0xff]   ;;  %v58_v23 = vunpack.c.l.s4 %v10922_v22 }
   0x2   :  { %v10201_v1 = vld [vmem:[%s13582_s1 + $0xc0] sm:$0xff]   ;;  %9288 = vmatprep.subr.bf16.mxu0 %v10200_v0  ;;  %v10205_v5 = vld [vmem:[%s13582_s1 + $0xc8] sm:$0xff]   ;;  %v10209_v9 = vld [vmem:[%s13582_s1 + $0xd0] sm:$0xff]   ;;  %v11084_v30 = vshrl.u32 %v60_v24, 7 }
   0x3   :  { %v10202_v2 = vld [vmem:[%s13582_s1] sm:$0xff]   ;;  %9310 = vmatprep.subr.bf16.mxu1 %v10201_v1  ;;  %v10206_v6 = vld [vmem:[%s13582_s1 + $0x8] sm:$0xff]   ;;  %v10210_v10 = vld [vmem:[%s13582_s1 + $0x10] sm:$0xff]   ;;  %v59_v29 = vunpack.c.0.s8 %v58_v23 }
   0x4   :  { %v10203_v3 = vld [vmem:[%s13582_s1 + $0x80] sm:$0xff]   ;;  %9289 = vmatpush3.bf16.msra.mxu0 %v10202_v2  ;;  %v10207_v7 = vld [vmem:[%s13582_s1 + $0x88] sm:$0xff]   ;;  %v10211_v11 = vld [vmem:[%s13582_s1 + $0x90] sm:$0xff]  }
   0x5   :  { %9311 = vmatpush3.bf16.msra.mxu1 %v10203_v3  ;;  %9290 = vmatprep.subr.bf16.mxu0 %v10204_v4  ;;  %v10212_v12 = vld [vmem:[%s13582_s1 + $0x58] sm:$0xff]   ;;  %v10216_v16 = vld [vmem:[%s13582_s1 + $0x60] sm:$0xff]   ;;  %v10220_v20 = vld [vmem:[%s13582_s1 + $0x68] sm:$0xff]   ;;  %v11099_v35 = vsub.s32 %v59_v29, %v11084_v30 }
   0x6   :  { %9312 = vmatprep.subr.bf16.mxu1 %v10205_v5  ;;  %v10213_v13 = vld [vmem:[%s13582_s1 + $0xd8] sm:$0xff]   ;;  %v10217_v17 = vld [vmem:[%s13582_s1 + $0xe0] sm:$0xff]   ;;  %v10221_v21 = vld [vmem:[%s13582_s1 + $0xe8] sm:$0xff]  }
   0x7   :  { %v10214_v14 = vld [vmem:[%s13582_s1 + $0x18] sm:$0xff]   ;;  %v10218_v18 = vld [vmem:[%s13582_s1 + $0x20] sm:$0xff]   ;;  %v10222_v25 = vld [vmem:[%s13582_s1 + $0x28] sm:$0xff]  }
   0x8   :  { %9291 = vmatpush3.bf16.msra.mxu0 %v10206_v6  ;;  %v10215_v15 = vld [vmem:[%s13582_s1 + $0x98] sm:$0xff]   ;;  %v10219_v19 = vld [vmem:[%s13582_s1 + $0xa0] sm:$0xff]   ;;  %v10223_v26 = vld [vmem:[%s13582_s1 + $0xa8] sm:$0xff]  }
   0x9   :  { %9313 = vmatpush3.bf16.msra.mxu1 %v10207_v7  ;;  %9292 = vmatprep.subr.bf16.mxu0 %v10208_v8  ;;  %v10224_v27 = vld [vmem:[%s13582_s1 + $0x70] sm:$0xff]   ;;  %v10228_v33 = vld [vmem:[%s13582_s1 + $0x78] sm:$0xff]   ;;  %v52_v38 = vld [vmem:[%s13583_s0] sm:$0xff] }
   0xa   :  { %9314 = vmatprep.subr.bf16.mxu1 %v10209_v9  ;;  %v10225_v28 = vld [vmem:[%s13582_s1 + $0xf0] sm:$0xff]   ;;  %v10229_v34 = vld [vmem:[%s13582_s1 + $0xf8] sm:$0xff]   ;;  %v11111_v39 = vrot.slane %v52_v38, %v11099_v35  ;;  %v56_v40 = vcombine.high %v52_v38, %v52_v38  ;;  %v10233_v41 = vld [vmem:[%s13582_s1 + $0x140] sm:$0xff]  }
   0xb   :  { %v10226_v31 = vld [vmem:[%s13582_s1 + $0x30] sm:$0xff]   ;;  %v10230_v36 = vld [vmem:[%s13582_s1 + $0x38] sm:$0xff]   ;;  %v10234_v42 = vld [vmem:[%s13582_s1 + $0x1c0] sm:$0xff]  }
   0xc   :  { %9293 = vmatpush3.bf16.msra.mxu0 %v10210_v10  ;;  %v10227_v32 = vld [vmem:[%s13582_s1 + $0xb0] sm:$0xff]   ;;  %v10231_v37 = vld [vmem:[%s13582_s1 + $0xb8] sm:$0xff]   ;;  %v11121_v43 = vcombine.high %v11111_v39, %v11111_v39  ;;  %v11124_v44 = vrot.slane %v56_v40, %v11099_v35  ;;  %v98_v45 = vpack.c.bf16 %v11111_v39, %v11111_v39  ;;  %v10235_v46 = vld [vmem:[%s13582_s1 + $0x100] sm:$0xff]  }
   0xd   :  { %9315 = vmatpush3.bf16.msra.mxu1 %v10211_v11  ;;  %9294 = vmatprep.subr.bf16.mxu0 %v10212_v12  ;;  %v10236_v49 = vld [vmem:[%s13582_s1 + $0x180] sm:$0xff]   ;;  %v10237_v51 = vld [vmem:[%s13582_s1 + $0x148] sm:$0xff]   ;;  %v10241_v56 = vld [vmem:[%s13582_s1 + $0x150] sm:$0xff]  }
   0xe   :  { %9316 = vmatprep.subr.bf16.mxu1 %v10213_v13  ;;  %v99_v47 = vpack.c.bf16 %v11121_v43, %v11121_v43  ;;  %v11135_v48 = vcombine.high %v11124_v44, %v11124_v44  ;;  %v100_v50 = vpack.c.bf16 %v11124_v44, %v11124_v44  ;;  %v10238_v53 = vld [vmem:[%s13582_s1 + $0x1c8] sm:$0xff]   ;;  %v10242_v57 = vld [vmem:[%s13582_s1 + $0x1d0] sm:$0xff]   ;;  %v10245_v60 = vld [vmem:[%s13582_s1 + $0x158] sm:$0xff]  }
   0xf   :  { %v10239_v54 = vld [vmem:[%s13582_s1 + $0x108] sm:$0xff]   ;;  %v10243_v58 = vld [vmem:[%s13582_s1 + $0x110] sm:$0xff]   ;;  %v10246_v61 = vld [vmem:[%s13582_s1 + $0x1d8] sm:$0xff]  }
  0x10   :  { %9295 = vmatpush3.bf16.msra.mxu0 %v10214_v14  ;;  %650 = vmatprep.mubr.bf16.mxu0 %v99_v47  ;;  %v101_v52 = vpack.c.bf16 %v11135_v48, %v11135_v48  ;;  %v10240_v55 = vld [vmem:[%s13582_s1 + $0x188] sm:$0xff]   ;;  %v10244_v59 = vld [vmem:[%s13582_s1 + $0x190] sm:$0xff]   ;;  %v10247_v62 = vld [vmem:[%s13582_s1 + $0x118] sm:$0xff]  }
  0x11   :  { %9317 = vmatpush3.bf16.msra.mxu1 %v10215_v15  ;;  %9296 = vmatprep.subr.bf16.mxu0 %v10216_v16  ;;  %v10248_v63 = vld [vmem:[%s13582_s1 + $0x198] sm:$0xff]   ;;  %v10249_v0 = vld [vmem:[%s13582_s1 + $0x160] sm:$0xff]   ;;  %v10253_v4 = vld [vmem:[%s13582_s1 + $0x168] sm:$0xff]  }
  0x12   :  { %9318 = vmatprep.subr.bf16.mxu1 %v10217_v17  ;;  %690 = vmatprep.mubr.bf16.mxu1 %v101_v52  ;;  %v10250_v1 = vld [vmem:[%s13582_s1 + $0x1e0] sm:$0xff]   ;;  %v10254_v5 = vld [vmem:[%s13582_s1 + $0x1e8] sm:$0xff]   ;;  %v10257_v8 = vld [vmem:[%s13582_s1 + $0x170] sm:$0xff]  }
  0x13   :  { %v10251_v2 = vld [vmem:[%s13582_s1 + $0x120] sm:$0xff]   ;;  %v10255_v6 = vld [vmem:[%s13582_s1 + $0x128] sm:$0xff]   ;;  %v10258_v9 = vld [vmem:[%s13582_s1 + $0x1f0] sm:$0xff]  }
  0x14   :  { %9297 = vmatpush3.bf16.msra.mxu0 %v10218_v18  ;;  %v10252_v3 = vld [vmem:[%s13582_s1 + $0x1a0] sm:$0xff]   ;;  %v10256_v7 = vld [vmem:[%s13582_s1 + $0x1a8] sm:$0xff]   ;;  %v10259_v10 = vld [vmem:[%s13582_s1 + $0x130] sm:$0xff]  }
  0x15   :  { %9319 = vmatpush3.bf16.msra.mxu1 %v10219_v19  ;;  %9298 = vmatprep.subr.bf16.mxu0 %v10220_v20  ;;  %v10260_v11 = vld [vmem:[%s13582_s1 + $0x1b0] sm:$0xff]   ;;  %v10261_v12 = vld [vmem:[%s13582_s1 + $0x178] sm:$0xff]   ;;  %v53_v15 = vld [vmem:[%s13583_s0 + $0x8] sm:$0xff] }
  0x16   :  { %9320 = vmatprep.subr.bf16.mxu1 %v10221_v21  ;;  %v10262_v13 = vld [vmem:[%s13582_s1 + $0x1f8] sm:$0xff]   ;;  %v11232_v17 = vrot.slane %v53_v15, %v11099_v35  ;;  %v73_v18 = vcombine.high %v53_v15, %v53_v15  ;;  %v10266_v19 = vld [vmem:[%s13582_s1 + $0x240] sm:$0xff]   ;;  %v10270_v29 = vld [vmem:[%s13582_s1 + $0x248] sm:$0xff]  }
  0x17   :  { %v10263_v14 = vld [vmem:[%s13582_s1 + $0x138] sm:$0xff]   ;;  %v10267_v22 = vld [vmem:[%s13582_s1 + $0x2c0] sm:$0xff]   ;;  %v10276_v38 = vld [vmem:[%s13582_s1 + $0x210] sm:$0xff]  }
  0x18   :  { %9299 = vmatpush3.bf16.msra.mxu0 %v10222_v25  ;;  %v10264_v16 = vld [vmem:[%s13582_s1 + $0x1b8] sm:$0xff]   ;;  %v11239_v20 = vcombine.high %v11232_v17, %v11232_v17  ;;  %v11242_v21 = vrot.slane %v73_v18, %v11099_v35  ;;  %v102_v23 = vpack.c.bf16 %v11232_v17, %v11232_v17  ;;  %v10268_v24 = vld [vmem:[%s13582_s1 + $0x200] sm:$0xff]   ;;  %v10277_v40 = vld [vmem:[%s13582_s1 + $0x290] sm:$0xff]  }
  0x19   :  { %9321 = vmatpush3.bf16.msra.mxu1 %v10223_v26  ;;  %9300 = vmatprep.subr.bf16.mxu0 %v10224_v27  ;;  %v10269_v27 = vld [vmem:[%s13582_s1 + $0x280] sm:$0xff]   ;;  %v10286_v52 = vld [vmem:[%s13582_s1 + $0x268] sm:$0xff]  }
  0x1a   :  { %9322 = vmatprep.subr.bf16.mxu1 %v10225_v28  ;;  %v103_v25 = vpack.c.bf16 %v11239_v20, %v11239_v20  ;;  %v11256_v26 = vcombine.high %v11242_v21, %v11242_v21  ;;  %v104_v28 = vpack.c.bf16 %v11242_v21, %v11242_v21  ;;  %v10282_v47 = vld [vmem:[%s13582_s1 + $0x260] sm:$0xff]   ;;  %v10304_v15 = vld [vmem:[%s13582_s1 + $0x3c8] sm:$0xff]  }
  0x1b   :  { %v10306_v18 = vld [vmem:[%s13582_s1 + $0x388] sm:$0xff]  }
  0x1c   :  { %9301 = vmatpush3.bf16.msra.mxu0 %v10226_v31  ;;  %v105_v31 = vpack.c.bf16 %v11256_v26, %v11256_v26 }
  0x1d   :  { %9323 = vmatpush3.bf16.msra.mxu1 %v10227_v32  ;;  %9302 = vmatprep.subr.bf16.mxu0 %v10228_v33  ;;  %v10271_v32 = vld [vmem:[%s13582_s1 + $0x2c8] sm:$0xff]  }
  0x1e   :  { %9324 = vmatprep.subr.bf16.mxu1 %v10229_v34  ;;  %v10272_v33 = vld [vmem:[%s13582_s1 + $0x208] sm:$0xff]  }
  0x1f   :  { %v10273_v34 = vld [vmem:[%s13582_s1 + $0x288] sm:$0xff]  }
  0x20   :  { %9303 = vmatpush3.bf16.msra.mxu0 %v10230_v36  ;;  %v10274_v36 = vld [vmem:[%s13582_s1 + $0x250] sm:$0xff]  }
  0x21   :  { %9325 = vmatpush3.bf16.msra.mxu1 %v10231_v37  ;;  %9332 = vmatprep.subr.bf16.mxu0 %v10233_v41  ;;  %v10275_v37 = vld [vmem:[%s13582_s1 + $0x2d0] sm:$0xff]   ;;  %v10278_v41 = vld [vmem:[%s13582_s1 + $0x258] sm:$0xff]  }
  0x22   :  { %9354 = vmatprep.subr.bf16.mxu1 %v10234_v42  ;;  %v10279_v42 = vld [vmem:[%s13582_s1 + $0x2d8] sm:$0xff]  }
  0x23   :  { %651 = vmatmul.mubr.bf16.vlgmr.msra.gmra.mrb[0].mxu0 %v98_v45  ;;  %v10280_v45 = vld [vmem:[%s13582_s1 + $0x218] sm:$0xff]  }
  0x24   :  { %9333 = vmatpush3.bf16.msra.mxu0 %v10235_v46  ;;  %691 = vmatmul.mubr.bf16.vlgmr.msra.gmra.mrb[0].mxu1 %v100_v50  ;;  %v10281_v46 = vld [vmem:[%s13582_s1 + $0x298] sm:$0xff]   ;;  %v10284_v50 = vld [vmem:[%s13582_s1 + $0x220] sm:$0xff]  }
  0x25   :  { %9334 = vmatprep.subr.bf16.mxu0 %v10237_v51  ;;  %9355 = vmatpush3.bf16.msra.mxu1 %v10236_v49  ;;  %v10283_v49 = vld [vmem:[%s13582_s1 + $0x2e0] sm:$0xff]  }
  0x26   :  { %9356 = vmatprep.subr.bf16.mxu1 %v10238_v53  ;;  %730 = vmatprep.mubr.bf16.mxu0 %v103_v25  ;;  %v10285_v51 = vld [vmem:[%s13582_s1 + $0x2a0] sm:$0xff]   ;;  %v10287_v53 = vld [vmem:[%s13582_s1 + $0x2e8] sm:$0xff]   ;;  %v10311_v25 = vld [vmem:[%s13582_s1 + $0x358] sm:$0xff]  }
  0x27   :  { %770 = vmatprep.mubr.bf16.mxu1 %v105_v31  ;;  %v10315_v31 = vld [vmem:[%s13582_s1 + $0x360] sm:$0xff]  }
  0x28   :  { %9335 = vmatpush3.bf16.msra.mxu0 %v10239_v54  ;;  %v10288_v54 = vld [vmem:[%s13582_s1 + $0x228] sm:$0xff]  }
  0x29   :  { %9336 = vmatprep.subr.bf16.mxu0 %v10241_v56  ;;  %9357 = vmatpush3.bf16.msra.mxu1 %v10240_v55  ;;  %v10289_v55 = vld [vmem:[%s13582_s1 + $0x2a8] sm:$0xff]   ;;  %v10290_v56 = vld [vmem:[%s13582_s1 + $0x270] sm:$0xff]  }
  0x2a   :  { %9358 = vmatprep.subr.bf16.mxu1 %v10242_v57  ;;  %v10291_v57 = vld [vmem:[%s13582_s1 + $0x2f0] sm:$0xff]  }
  0x2c   :  { %9337 = vmatpush3.bf16.msra.mxu0 %v10243_v58  ;;  %v10292_v58 = vld [vmem:[%s13582_s1 + $0x230] sm:$0xff]  }
  0x2d   :  { %9338 = vmatprep.subr.bf16.mxu0 %v10245_v60  ;;  %9359 = vmatpush3.bf16.msra.mxu1 %v10244_v59  ;;  %v10293_v59 = vld [vmem:[%s13582_s1 + $0x2b0] sm:$0xff]   ;;  %v10294_v60 = vld [vmem:[%s13582_s1 + $0x278] sm:$0xff]  }
  0x2e   :  { %9360 = vmatprep.subr.bf16.mxu1 %v10246_v61  ;;  %v10295_v61 = vld [vmem:[%s13582_s1 + $0x2f8] sm:$0xff]  }
  0x30   :  { %9339 = vmatpush3.bf16.msra.mxu0 %v10247_v62  ;;  %v10296_v62 = vld [vmem:[%s13582_s1 + $0x238] sm:$0xff]  }
  0x31   :  { %9340 = vmatprep.subr.bf16.mxu0 %v10249_v0  ;;  %9361 = vmatpush3.bf16.msra.mxu1 %v10248_v63  ;;  %v7823_v63 = vld [vmem:[%s13583_s0 + $0x10] sm:$0xff]  ;;  %v10297_v0 = vld [vmem:[%s13582_s1 + $0x2b8] sm:$0xff]  }
  0x32   :  { %9362 = vmatprep.subr.bf16.mxu1 %v10250_v1  ;;  %v797_v1 = vrot.slane %v7823_v63, %v11099_v35 }
  0x34   :  { %9341 = vmatpush3.bf16.msra.mxu0 %v10251_v2  ;;  %v790_v2 = vcombine.high %v7823_v63, %v7823_v63 }
  0x35   :  { %9342 = vmatprep.subr.bf16.mxu0 %v10253_v4  ;;  %9363 = vmatpush3.bf16.msra.mxu1 %v10252_v3  ;;  %v10299_v3 = vld [vmem:[%s13582_s1 + $0x340] sm:$0xff]   ;;  %v805_v4 = vcombine.high %v797_v1, %v797_v1 }
  0x36   :  { %9364 = vmatprep.subr.bf16.mxu1 %v10254_v5  ;;  %v804_v5 = vrot.slane %v790_v2, %v11099_v35  ;;  %v10335_v2 = vld [vmem:[%s13582_s1 + $0x480] sm:$0xff]  }
  0x38   :  { %9343 = vmatpush3.bf16.msra.mxu0 %v10255_v6  ;;  %v10300_v6 = vld [vmem:[%s13582_s1 + $0x3c0] sm:$0xff]  }
  0x39   :  { %9344 = vmatprep.subr.bf16.mxu0 %v10257_v8  ;;  %9365 = vmatpush3.bf16.msra.mxu1 %v10256_v7  ;;  %v832_v7 = vpack.c.bf16 %v797_v1, %v797_v1  ;;  %v10301_v8 = vld [vmem:[%s13582_s1 + $0x300] sm:$0xff]  }
  0x3a   :  { %9366 = vmatprep.subr.bf16.mxu1 %v10258_v9  ;;  %v833_v9 = vpack.c.bf16 %v805_v4, %v805_v4  ;;  %v10338_v4 = vld [vmem:[%s13582_s1 + $0x408] sm:$0xff]  }
  0x3c   :  { %9345 = vmatpush3.bf16.msra.mxu0 %v10259_v10  ;;  %v806_v10 = vcombine.high %v804_v5, %v804_v5 }
  0x3d   :  { %9346 = vmatprep.subr.bf16.mxu0 %v10261_v12  ;;  %9367 = vmatpush3.bf16.msra.mxu1 %v10260_v11  ;;  %v10302_v11 = vld [vmem:[%s13582_s1 + $0x380] sm:$0xff]   ;;  %v834_v12 = vpack.c.bf16 %v804_v5, %v804_v5  ;;  %v10340_v5 = vld [vmem:[%s13582_s1 + $0x450] sm:$0xff]  }
  0x3e   :  { %9368 = vmatprep.subr.bf16.mxu1 %v10262_v13  ;;  %v10303_v13 = vld [vmem:[%s13582_s1 + $0x348] sm:$0xff]  }
  0x40   :  { %9347 = vmatpush3.bf16.msra.mxu0 %v10263_v14  ;;  %v835_v14 = vpack.c.bf16 %v806_v10, %v806_v10  ;;  %v10343_v10 = vld [vmem:[%s13582_s1 + $0x490] sm:$0xff]  }
  0x41   :  { %9376 = vmatprep.subr.bf16.mxu0 %v10266_v19  ;;  %9369 = vmatpush3.bf16.msra.mxu1 %v10264_v16  ;;  %v10305_v16 = vld [vmem:[%s13582_s1 + $0x308] sm:$0xff]   ;;  %v10307_v19 = vld [vmem:[%s13582_s1 + $0x350] sm:$0xff]  }
  0x42   :  { %9398 = vmatprep.subr.bf16.mxu1 %v10267_v22  ;;  %v10308_v22 = vld [vmem:[%s13582_s1 + $0x3d0] sm:$0xff]  }
  0x43   :  { %731 = vmatmul.mubr.bf16.vlgmr.msra.gmra.mrb[4].mxu0 %v102_v23  ;;  %v10309_v23 = vld [vmem:[%s13582_s1 + $0x310] sm:$0xff]  }
  0x44   :  { %9377 = vmatpush3.bf16.msra.mxu0 %v10268_v24  ;;  %771 = vmatmul.mubr.bf16.vlgmr.msra.gmra.mrb[4].mxu1 %v104_v28  ;;  %v10310_v24 = vld [vmem:[%s13582_s1 + $0x390] sm:$0xff]   ;;  %v10313_v28 = vld [vmem:[%s13582_s1 + $0x318] sm:$0xff]  }
  0x45   :  { %9378 = vmatprep.subr.bf16.mxu0 %v10270_v29  ;;  %9399 = vmatpush3.bf16.msra.mxu1 %v10269_v27  ;;  %v10312_v27 = vld [vmem:[%s13582_s1 + $0x3d8] sm:$0xff]  }
  0x46   :  { %9400 = vmatprep.subr.bf16.mxu1 %v10271_v32  ;;  %1385 = vmatprep.mubr.bf16.mxu0 %v833_v9  ;;  %v10314_v29 = vld [vmem:[%s13582_s1 + $0x398] sm:$0xff]   ;;  %v10316_v32 = vld [vmem:[%s13582_s1 + $0x3e0] sm:$0xff]  }
  0x47   :  { %1425 = vmatprep.mubr.bf16.mxu1 %v835_v14  ;;  %v10344_v9 = vld [vmem:[%s13582_s1 + $0x458] sm:$0xff]  }
  0x48   :  { %9379 = vmatpush3.bf16.msra.mxu0 %v10272_v33  ;;  %v10317_v33 = vld [vmem:[%s13582_s1 + $0x320] sm:$0xff]   ;;  %v10347_v14 = vld [vmem:[%s13582_s1 + $0x498] sm:$0xff]  }
  0x49   :  { %9380 = vmatprep.subr.bf16.mxu0 %v10274_v36  ;;  %9401 = vmatpush3.bf16.msra.mxu1 %v10273_v34  ;;  %v10318_v34 = vld [vmem:[%s13582_s1 + $0x3a0] sm:$0xff]   ;;  %v10319_v36 = vld [vmem:[%s13582_s1 + $0x368] sm:$0xff]  }
  0x4a   :  { %9402 = vmatprep.subr.bf16.mxu1 %v10275_v37  ;;  %v10320_v37 = vld [vmem:[%s13582_s1 + $0x3e8] sm:$0xff]  }
  0x4c   :  { %9381 = vmatpush3.bf16.msra.mxu0 %v10276_v38  ;;  %v10321_v38 = vld [vmem:[%s13582_s1 + $0x328] sm:$0xff]  }
  0x4d   :  { %9382 = vmatprep.subr.bf16.mxu0 %v10278_v41  ;;  %9403 = vmatpush3.bf16.msra.mxu1 %v10277_v40  ;;  %v10322_v40 = vld [vmem:[%s13582_s1 + $0x3a8] sm:$0xff]   ;;  %v10323_v41 = vld [vmem:[%s13582_s1 + $0x370] sm:$0xff]  }
  0x4e   :  { %9404 = vmatprep.subr.bf16.mxu1 %v10279_v42  ;;  %v10324_v42 = vld [vmem:[%s13582_s1 + $0x3f0] sm:$0xff]  }
  0x50   :  { %9383 = vmatpush3.bf16.msra.mxu0 %v10280_v45  ;;  %v10325_v45 = vld [vmem:[%s13582_s1 + $0x330] sm:$0xff]  }
  0x51   :  { %9384 = vmatprep.subr.bf16.mxu0 %v10282_v47  ;;  %9405 = vmatpush3.bf16.msra.mxu1 %v10281_v46  ;;  %v10326_v46 = vld [vmem:[%s13582_s1 + $0x3b0] sm:$0xff]   ;;  %v10327_v47 = vld [vmem:[%s13582_s1 + $0x378] sm:$0xff]  }
  0x52   :  { %9406 = vmatprep.subr.bf16.mxu1 %v10283_v49  ;;  %v10328_v49 = vld [vmem:[%s13582_s1 + $0x3f8] sm:$0xff]  }
  0x54   :  { %9385 = vmatpush3.bf16.msra.mxu0 %v10284_v50  ;;  %v10329_v50 = vld [vmem:[%s13582_s1 + $0x338] sm:$0xff]  }
  0x55   :  { %9386 = vmatprep.subr.bf16.mxu0 %v10286_v52  ;;  %9407 = vmatpush3.bf16.msra.mxu1 %v10285_v51  ;;  %v7824_v51 = vld [vmem:[%s13583_s0 + $0x18] sm:$0xff] }
  0x56   :  { %9408 = vmatprep.subr.bf16.mxu1 %v10287_v53  ;;  %v814_v52 = vrot.slane %v7824_v51, %v11099_v35  ;;  %v807_v53 = vcombine.high %v7824_v51, %v7824_v51 }
  0x58   :  { %9387 = vmatpush3.bf16.msra.mxu0 %v10288_v54  ;;  %v10332_v54 = vld [vmem:[%s13582_s1 + $0x440] sm:$0xff]  }
  0x59   :  { %9388 = vmatprep.subr.bf16.mxu0 %v10290_v56  ;;  %9409 = vmatpush3.bf16.msra.mxu1 %v10289_v55  ;;  %v10330_v55 = vld [vmem:[%s13582_s1 + $0x3b8] sm:$0xff]   ;;  %v822_v56 = vcombine.high %v814_v52, %v814_v52 }
  0x5a   :  { %9410 = vmatprep.subr.bf16.mxu1 %v10291_v57  ;;  %v821_v57 = vrot.slane %v807_v53, %v11099_v35 }
  0x5c   :  { %9389 = vmatpush3.bf16.msra.mxu0 %v10292_v58  ;;  %v10333_v58 = vld [vmem:[%s13582_s1 + $0x4c0] sm:$0xff]   ;;  %v838_v63 = vpack.c.bf16 %v821_v57, %v821_v57 }
  0x5d   :  { %9390 = vmatprep.subr.bf16.mxu0 %v10294_v60  ;;  %9411 = vmatpush3.bf16.msra.mxu1 %v10293_v59  ;;  %v836_v59 = vpack.c.bf16 %v814_v52, %v814_v52  ;;  %v837_v60 = vpack.c.bf16 %v822_v56, %v822_v56  ;;  %v10369_v52 = vld [vmem:[%s13582_s1 + $0x548] sm:$0xff]  }
  0x5e   :  { %9412 = vmatprep.subr.bf16.mxu1 %v10295_v61  ;;  %v823_v61 = vcombine.high %v821_v57, %v821_v57  ;;  %v10371_v56 = vld [vmem:[%s13582_s1 + $0x508] sm:$0xff]   ;;  %v10373_v57 = vld [vmem:[%s13582_s1 + $0x550] sm:$0xff]  }
  0x60   :  { %9391 = vmatpush3.bf16.msra.mxu0 %v10296_v62  ;;  %v10334_v62 = vld [vmem:[%s13582_s1 + $0x400] sm:$0xff]   ;;  %v839_v1 = vpack.c.bf16 %v823_v61, %v823_v61  ;;  %v10377_v61 = vld [vmem:[%s13582_s1 + $0x558] sm:$0xff]  }
  0x61   :  { %9420 = vmatprep.subr.bf16.mxu0 %v10299_v3  ;;  %9413 = vmatpush3.bf16.msra.mxu1 %v10297_v0  ;;  %v10336_v0 = vld [vmem:[%s13582_s1 + $0x448] sm:$0xff]  }
  0x62   :  { %9442 = vmatprep.subr.bf16.mxu1 %v10300_v6  ;;  %v10337_v3 = vld [vmem:[%s13582_s1 + $0x4c8] sm:$0xff]  }
  0x63   :  { %1386 = vmatmul.mubr.bf16.vlgmr.msra.gmra.mrb[8].mxu0 %v832_v7  ;;  %v10339_v6 = vld [vmem:[%s13582_s1 + $0x488] sm:$0xff]   ;;  %v10341_v7 = vld [vmem:[%s13582_s1 + $0x4d0] sm:$0xff]  }
  0x64   :  { %9421 = vmatpush3.bf16.msra.mxu0 %v10301_v8  ;;  %1426 = vmatmul.mubr.bf16.vlgmr.msra.gmra.mrb[8].mxu1 %v834_v12  ;;  %v10342_v8 = vld [vmem:[%s13582_s1 + $0x410] sm:$0xff]   ;;  %v10346_v12 = vld [vmem:[%s13582_s1 + $0x418] sm:$0xff]  }
  0x65   :  { %9422 = vmatprep.subr.bf16.mxu0 %v10303_v13  ;;  %9443 = vmatpush3.bf16.msra.mxu1 %v10302_v11  ;;  %v10345_v11 = vld [vmem:[%s13582_s1 + $0x4d8] sm:$0xff]   ;;  %v10348_v13 = vld [vmem:[%s13582_s1 + $0x460] sm:$0xff]  }
  0x66   :  { %9444 = vmatprep.subr.bf16.mxu1 %v10304_v15  ;;  %1465 = vmatprep.mubr.bf16.mxu0 %v837_v60  ;;  %v10349_v15 = vld [vmem:[%s13582_s1 + $0x4e0] sm:$0xff]   ;;  %v10375_v60 = vld [vmem:[%s13582_s1 + $0x510] sm:$0xff]  }
  0x67   :  { %1505 = vmatprep.mubr.bf16.mxu1 %v839_v1  ;;  %v10381_v1 = vld [vmem:[%s13582_s1 + $0x560] sm:$0xff]  }
  0x68   :  { %9423 = vmatpush3.bf16.msra.mxu0 %v10305_v16  ;;  %v10350_v16 = vld [vmem:[%s13582_s1 + $0x420] sm:$0xff]  }
  0x69   :  { %9424 = vmatprep.subr.bf16.mxu0 %v10307_v19  ;;  %9445 = vmatpush3.bf16.msra.mxu1 %v10306_v18  ;;  %v10352_v18 = vld [vmem:[%s13582_s1 + $0x468] sm:$0xff]   ;;  %v10351_v19 = vld [vmem:[%s13582_s1 + $0x4a0] sm:$0xff]  }
  0x6a   :  { %9446 = vmatprep.subr.bf16.mxu1 %v10308_v22  ;;  %v10353_v22 = vld [vmem:[%s13582_s1 + $0x4e8] sm:$0xff]  }
  0x6c   :  { %9425 = vmatpush3.bf16.msra.mxu0 %v10309_v23  ;;  %v10354_v23 = vld [vmem:[%s13582_s1 + $0x428] sm:$0xff]  }
  0x6d   :  { %9426 = vmatprep.subr.bf16.mxu0 %v10311_v25  ;;  %9447 = vmatpush3.bf16.msra.mxu1 %v10310_v24  ;;  %v10356_v24 = vld [vmem:[%s13582_s1 + $0x470] sm:$0xff]   ;;  %v10355_v25 = vld [vmem:[%s13582_s1 + $0x4a8] sm:$0xff]  }
  0x6e   :  { %9448 = vmatprep.subr.bf16.mxu1 %v10312_v27  ;;  %v10357_v27 = vld [vmem:[%s13582_s1 + $0x4f0] sm:$0xff]  }
  0x70   :  { %9427 = vmatpush3.bf16.msra.mxu0 %v10313_v28  ;;  %v10358_v28 = vld [vmem:[%s13582_s1 + $0x430] sm:$0xff]  }
  0x71   :  { %9428 = vmatprep.subr.bf16.mxu0 %v10315_v31  ;;  %9449 = vmatpush3.bf16.msra.mxu1 %v10314_v29  ;;  %v10360_v29 = vld [vmem:[%s13582_s1 + $0x478] sm:$0xff]   ;;  %v10359_v31 = vld [vmem:[%s13582_s1 + $0x4b0] sm:$0xff]  }
  0x72   :  { %9450 = vmatprep.subr.bf16.mxu1 %v10316_v32  ;;  %v10361_v32 = vld [vmem:[%s13582_s1 + $0x4f8] sm:$0xff]  }
  0x74   :  { %9429 = vmatpush3.bf16.msra.mxu0 %v10317_v33  ;;  %v8017_v33 = vld [vmem:[%s13583_s0 + $0x20] sm:$0xff] }
  0x75   :  { %9430 = vmatprep.subr.bf16.mxu0 %v10319_v36  ;;  %9451 = vmatpush3.bf16.msra.mxu1 %v10318_v34  ;;  %v10362_v34 = vld [vmem:[%s13582_s1 + $0x438] sm:$0xff]   ;;  %v11552_v36 = vrot.slane %v8017_v33, %v11099_v35 }
  0x76   :  { %9452 = vmatprep.subr.bf16.mxu1 %v10320_v37  ;;  %v1519_v37 = vcombine.high %v8017_v33, %v8017_v33 }
  0x78   :  { %9431 = vmatpush3.bf16.msra.mxu0 %v10321_v38  ;;  %v10365_v38 = vld [vmem:[%s13582_s1 + $0x540] sm:$0xff]  }
  0x79   :  { %9432 = vmatprep.subr.bf16.mxu0 %v10323_v41  ;;  %9453 = vmatpush3.bf16.msra.mxu1 %v10322_v40  ;;  %v10363_v40 = vld [vmem:[%s13582_s1 + $0x4b8] sm:$0xff]   ;;  %v11562_v41 = vcombine.high %v11552_v36, %v11552_v36 }
  0x7a   :  { %9454 = vmatprep.subr.bf16.mxu1 %v10324_v42  ;;  %v11565_v42 = vrot.slane %v1519_v37, %v11099_v35 }
  0x7c   :  { %9433 = vmatpush3.bf16.msra.mxu0 %v10325_v45  ;;  %v1561_v45 = vpack.c.bf16 %v11552_v36, %v11552_v36  ;;  %v1563_v51 = vpack.c.bf16 %v11565_v42, %v11565_v42 }
  0x7d   :  { %9434 = vmatprep.subr.bf16.mxu0 %v10327_v47  ;;  %9455 = vmatpush3.bf16.msra.mxu1 %v10326_v46  ;;  %v10366_v46 = vld [vmem:[%s13582_s1 + $0x5c0] sm:$0xff]   ;;  %v1562_v47 = vpack.c.bf16 %v11562_v41, %v11562_v41 }
  0x7e   :  { %9456 = vmatprep.subr.bf16.mxu1 %v10328_v49  ;;  %v11576_v49 = vcombine.high %v11565_v42, %v11565_v42 }
  0x80   :  { %9435 = vmatpush3.bf16.msra.mxu0 %v10329_v50  ;;  %v10367_v50 = vld [vmem:[%s13582_s1 + $0x500] sm:$0xff]   ;;  %v1564_v53 = vpack.c.bf16 %v11576_v49, %v11576_v49 }
  0x81   :  { %9464 = vmatprep.subr.bf16.mxu0 %v10332_v54  ;;  %9457 = vmatpush3.bf16.msra.mxu1 %v10330_v55  ;;  %v10368_v54 = vld [vmem:[%s13582_s1 + $0x580] sm:$0xff]   ;;  %v10370_v55 = vld [vmem:[%s13582_s1 + $0x5c8] sm:$0xff]  }
  0x82   :  { %9486 = vmatprep.subr.bf16.mxu1 %v10333_v58  ;;  %v10372_v58 = vld [vmem:[%s13582_s1 + $0x588] sm:$0xff]  }
  0x83   :  { %1466 = vmatmul.mubr.bf16.vlgmr.msra.gmra.mrb[12].mxu0 %v836_v59  ;;  %v10374_v59 = vld [vmem:[%s13582_s1 + $0x5d0] sm:$0xff]  }
  0x84   :  { %9465 = vmatpush3.bf16.msra.mxu0 %v10334_v62  ;;  %1506 = vmatmul.mubr.bf16.vlgmr.msra.gmra.mrb[12].mxu1 %v838_v63  ;;  %v10376_v62 = vld [vmem:[%s13582_s1 + $0x590] sm:$0xff]   ;;  %v10378_v63 = vld [vmem:[%s13582_s1 + $0x5d8] sm:$0xff]  }
  0x85   :  { %9466 = vmatprep.subr.bf16.mxu0 %v10336_v0  ;;  %9487 = vmatpush3.bf16.msra.mxu1 %v10335_v2  ;;  %v10379_v0 = vld [vmem:[%s13582_s1 + $0x518] sm:$0xff]  }
  0x86   :  { %9488 = vmatprep.subr.bf16.mxu1 %v10337_v3  ;;  %2114 = vmatprep.mubr.bf16.mxu0 %v1562_v47  ;;  %v10380_v2 = vld [vmem:[%s13582_s1 + $0x598] sm:$0xff]   ;;  %v10382_v3 = vld [vmem:[%s13582_s1 + $0x5e0] sm:$0xff]  }
  0x87   :  { %2154 = vmatprep.mubr.bf16.mxu1 %v1564_v53  ;;  %v2244_v53 = vld [vmem:[%s13584_s3] sm:$0xff] }
  0x88   :  { %9467 = vmatpush3.bf16.msra.mxu0 %v10338_v4  ;;  %v10383_v4 = vld [vmem:[%s13582_s1 + $0x520] sm:$0xff]  }
  0x89   :  { %9468 = vmatprep.subr.bf16.mxu0 %v10340_v5  ;;  %9489 = vmatpush3.bf16.msra.mxu1 %v10339_v6  ;;  %v10385_v5 = vld [vmem:[%s13582_s1 + $0x568] sm:$0xff]   ;;  %v10384_v6 = vld [vmem:[%s13582_s1 + $0x5a0] sm:$0xff]  }
  0x8a   :  { %9490 = vmatprep.subr.bf16.mxu1 %v10341_v7  ;;  %v10386_v7 = vld [vmem:[%s13582_s1 + $0x5e8] sm:$0xff]  }
  0x8c   :  { %9469 = vmatpush3.bf16.msra.mxu0 %v10342_v8  ;;  %v10387_v8 = vld [vmem:[%s13582_s1 + $0x528] sm:$0xff]  }
  0x8d   :  { %9470 = vmatprep.subr.bf16.mxu0 %v10344_v9  ;;  %9491 = vmatpush3.bf16.msra.mxu1 %v10343_v10  ;;  %v10389_v9 = vld [vmem:[%s13582_s1 + $0x570] sm:$0xff]   ;;  %v10388_v10 = vld [vmem:[%s13582_s1 + $0x5a8] sm:$0xff]  }
  0x8e   :  { %9492 = vmatprep.subr.bf16.mxu1 %v10345_v11  ;;  %v10390_v11 = vld [vmem:[%s13582_s1 + $0x5f0] sm:$0xff]  }
  0x90   :  { %9471 = vmatpush3.bf16.msra.mxu0 %v10346_v12  ;;  %v10391_v12 = vld [vmem:[%s13582_s1 + $0x530] sm:$0xff]  }
  0x91   :  { %9472 = vmatprep.subr.bf16.mxu0 %v10348_v13  ;;  %9493 = vmatpush3.bf16.msra.mxu1 %v10347_v14  ;;  %v10393_v13 = vld [vmem:[%s13582_s1 + $0x578] sm:$0xff]   ;;  %v10392_v14 = vld [vmem:[%s13582_s1 + $0x5b0] sm:$0xff]  }
  0x92   :  { %9494 = vmatprep.subr.bf16.mxu1 %v10349_v15  ;;  %v10394_v15 = vld [vmem:[%s13582_s1 + $0x5f8] sm:$0xff]  }
  0x94   :  { %9473 = vmatpush3.bf16.msra.mxu0 %v10350_v16  ;;  %v8018_v16 = vld [vmem:[%s13583_s0 + $0x28] sm:$0xff] }
  0x95   :  { %9474 = vmatprep.subr.bf16.mxu0 %v10352_v18  ;;  %9495 = vmatpush3.bf16.msra.mxu1 %v10351_v19  ;;  %v10395_v18 = vld [vmem:[%s13582_s1 + $0x538] sm:$0xff]   ;;  %v11673_v19 = vrot.slane %v8018_v16, %v11099_v35 }
  0x96   :  { %9496 = vmatprep.subr.bf16.mxu1 %v10353_v22  ;;  %v1536_v22 = vcombine.high %v8018_v16, %v8018_v16 }
  0x98   :  { %9475 = vmatpush3.bf16.msra.mxu0 %v10354_v23  ;;  %v10396_v23 = vld [vmem:[%s13582_s1 + $0x5b8] sm:$0xff]  }
  0x99   :  { %9476 = vmatprep.subr.bf16.mxu0 %v10356_v24  ;;  %9497 = vmatpush3.bf16.msra.mxu1 %v10355_v25  ;;  %v11680_v24 = vcombine.high %v11673_v19, %v11673_v19  ;;  %v1550_v25 = vrot.slane %v1536_v22, %v11099_v35 }
  0x9a   :  { %9498 = vmatprep.subr.bf16.mxu1 %v10357_v27  ;;  %v1565_v27 = vpack.c.bf16 %v11673_v19, %v11673_v19 }
  0x9c   :  { %9477 = vmatpush3.bf16.msra.mxu0 %v10358_v28  ;;  %v1566_v28 = vpack.c.bf16 %v11680_v24, %v11680_v24 }
  0x9d   :  { %9478 = vmatprep.subr.bf16.mxu0 %v10360_v29  ;;  %9499 = vmatpush3.bf16.msra.mxu1 %v10359_v31  ;;  %v1552_v29 = vcombine.high %v1550_v25, %v1550_v25  ;;  %v1567_v31 = vpack.c.bf16 %v1550_v25, %v1550_v25  ;;  %v2280_v25 = vld [vmem:[%s13584_s3 + $0x120] sm:$0xff] }
  0x9e   :  { %9500 = vmatprep.subr.bf16.mxu1 %v10361_v32 }
  0x9f   :  { %v1568_v32 = vpack.c.bf16 %v1552_v29, %v1552_v29 }
  0xa0   :  { %9479 = vmatpush3.bf16.msra.mxu0 %v10362_v34 }
  0xa1   :  { %9508 = vmatprep.subr.bf16.mxu0 %v10365_v38  ;;  %9501 = vmatpush3.bf16.msra.mxu1 %v10363_v40 }
  0xa2   :  { %9530 = vmatprep.subr.bf16.mxu1 %v10366_v46 }
  0xa3   :  { %2115 = vmatmul.mubr.bf16.vlgmr.msra.gmra.mrb[16].mxu0 %v1561_v45 }
  0xa4   :  { %9509 = vmatpush3.bf16.msra.mxu0 %v10367_v50  ;;  %2155 = vmatmul.mubr.bf16.vlgmr.msra.gmra.mrb[16].mxu1 %v1563_v51 }
  0xa5   :  { %9510 = vmatprep.subr.bf16.mxu0 %v10369_v52  ;;  %9531 = vmatpush3.bf16.msra.mxu1 %v10368_v54  ;;  %v2248_v54 = vld [vmem:[%s13584_s3 + $0x20] sm:$0xff] }
  0xa6   :  { %9532 = vmatprep.subr.bf16.mxu1 %v10370_v55  ;;  %2194 = vmatprep.mubr.bf16.mxu0 %v1566_v28  ;;  %v2245_v55 = vld [vmem:[%s13584_s3 + $0x8] sm:$0xff] }
  0xa7   :  { %2234 = vmatprep.mubr.bf16.mxu1 %v1568_v32  ;;  %v2281_v28 = vld [vmem:[%s13584_s3 + $0x128] sm:$0xff] }
  0xa8   :  { %9511 = vmatpush3.bf16.msra.mxu0 %v10371_v56  ;;  %v8211_v56 = vcombine.low %v2244_v53, %v2248_v54 }
  0xa9   :  { %9512 = vmatprep.subr.bf16.mxu0 %v10373_v57  ;;  %9533 = vmatpush3.bf16.msra.mxu1 %v10372_v58  ;;  %v8212_v57 = vcombine.high %v2244_v53, %v2248_v54  ;;  %v2249_v58 = vld [vmem:[%s13584_s3 + $0x28] sm:$0xff] }
  0xaa   :  { %9534 = vmatprep.subr.bf16.mxu1 %v10374_v59  ;;  %v2252_v59 = vld [vmem:[%s13584_s3 + $0x40] sm:$0xff] }
  0xac   :  { %9513 = vmatpush3.bf16.msra.mxu0 %v10375_v60  ;;  %v2256_v60 = vld [vmem:[%s13584_s3 + $0x60] sm:$0xff] }
  0xad   :  { %9514 = vmatprep.subr.bf16.mxu0 %v10377_v61  ;;  %9535 = vmatpush3.bf16.msra.mxu1 %v10376_v62  ;;  %v8213_v61 = vcombine.low %v2245_v55, %v2249_v58  ;;  %v8214_v62 = vcombine.high %v2245_v55, %v2249_v58 }
  0xae   :  { %9536 = vmatprep.subr.bf16.mxu1 %v10378_v63  ;;  %v8220_v63 = vcombine.high %v2252_v59, %v2256_v60 }
  0xb0   :  { %9515 = vmatpush3.bf16.msra.mxu0 %v10379_v0  ;;  %v2253_v0 = vld [vmem:[%s13584_s3 + $0x48] sm:$0xff] }
  0xb1   :  { %9516 = vmatprep.subr.bf16.mxu0 %v10381_v1  ;;  %9537 = vmatpush3.bf16.msra.mxu1 %v10380_v2  ;;  %v2257_v1 = vld [vmem:[%s13584_s3 + $0x68] sm:$0xff]  ;;  %v2260_v2 = vld [vmem:[%s13584_s3 + $0x80] sm:$0xff] }
  0xb2   :  { %9538 = vmatprep.subr.bf16.mxu1 %v10382_v3  ;;  %v8222_v3 = vcombine.high %v2253_v0, %v2257_v1 }
  0xb4   :  { %9517 = vmatpush3.bf16.msra.mxu0 %v10383_v4  ;;  %v2264_v4 = vld [vmem:[%s13584_s3 + $0xa0] sm:$0xff] }
  0xb5   :  { %9518 = vmatprep.subr.bf16.mxu0 %v10385_v5  ;;  %9539 = vmatpush3.bf16.msra.mxu1 %v10384_v6  ;;  %v2261_v5 = vld [vmem:[%s13584_s3 + $0x88] sm:$0xff] }
  0xb6   :  { %9540 = vmatprep.subr.bf16.mxu1 %v10386_v7  ;;  %v2265_v6 = vld [vmem:[%s13584_s3 + $0xa8] sm:$0xff]  ;;  %v8219_v7 = vcombine.low %v2252_v59, %v2256_v60 }
  0xb7   :  { %v8229_v16 = vcombine.low %v2261_v5, %v2265_v6 }
  0xb8   :  { %9519 = vmatpush3.bf16.msra.mxu0 %v10387_v8  ;;  %v8221_v8 = vcombine.low %v2253_v0, %v2257_v1 }
  0xb9   :  { %9520 = vmatprep.subr.bf16.mxu0 %v10389_v9  ;;  %9541 = vmatpush3.bf16.msra.mxu1 %v10388_v10  ;;  %v8228_v9 = vcombine.high %v2260_v2, %v2264_v4  ;;  %v8230_v10 = vcombine.high %v2261_v5, %v2265_v6 }
  0xba   :  { %9542 = vmatprep.subr.bf16.mxu1 %v10390_v11  ;;  %v2268_v11 = vld [vmem:[%s13584_s3 + $0xc0] sm:$0xff] }
  0xbc   :  { %9521 = vmatpush3.bf16.msra.mxu0 %v10391_v12  ;;  %v2272_v12 = vld [vmem:[%s13584_s3 + $0xe0] sm:$0xff] }
  0xbd   :  { %9522 = vmatprep.subr.bf16.mxu0 %v10393_v13  ;;  %9543 = vmatpush3.bf16.msra.mxu1 %v10392_v14  ;;  %v2269_v13 = vld [vmem:[%s13584_s3 + $0xc8] sm:$0xff]  ;;  %v8235_v29 = vcombine.low %v2268_v11, %v2272_v12 }
  0xbe   :  { %9544 = vmatprep.subr.bf16.mxu1 %v10394_v15  ;;  %v2273_v14 = vld [vmem:[%s13584_s3 + $0xe8] sm:$0xff]  ;;  %v8227_v15 = vcombine.low %v2260_v2, %v2264_v4 }
  0xbf   :  { %v8238_v22 = vcombine.high %v2269_v13, %v2273_v14  ;;  %v2297_v4 = vld [vmem:[%s13584_s3 + $0x1a8] sm:$0xff] }
  0xc0   :  { %9523 = vmatpush3.bf16.msra.mxu0 %v10395_v18  ;;  %v8236_v18 = vcombine.high %v2268_v11, %v2272_v12  ;;  %v2301_v11 = vld [vmem:[%s13584_s3 + $0x1c8] sm:$0xff] }
  0xc1   :  { %9545 = vmatpush3.bf16.msra.mxu1 %v10396_v23  ;;  %2670 = vmatprep.subr.bf16.mxu0 %v8212_v57  ;;  %v2276_v23 = vld [vmem:[%s13584_s3 + $0x100] sm:$0xff] }
  0xc2   :  { %2711 = vmatprep.subr.bf16.mxu1 %v8214_v62  ;;  %v8244_v32 = vcombine.high %v2276_v23, %v2280_v25  ;;  %v2296_v62 = vld [vmem:[%s13584_s3 + $0x1a0] sm:$0xff] }
  0xc3   :  { %2195 = vmatmul.mubr.bf16.vlgmr.msra.gmra.mrb[20].mxu0 %v1565_v27  ;;  %v2277_v27 = vld [vmem:[%s13584_s3 + $0x108] sm:$0xff] }
  0xc4   :  { %2235 = vmatmul.mubr.bf16.vlgmr.msra.gmra.mrb[20].mxu1 %v1567_v31  ;;  %2671 = vmatpush1.bf16.msra.mxu0 %v8211_v56  ;;  %v8237_v31 = vcombine.low %v2269_v13, %v2273_v14  ;;  %v2305_v13 = vld [vmem:[%s13584_s3 + $0x1e8] sm:$0xff] }
  0xc5   :  { %2712 = vmatpush1.bf16.msra.mxu1 %v8213_v61  ;;  %2672 = vmatprep.subr.bf16.mxu0 %v8220_v63  ;;  %v2292_v61 = vld [vmem:[%s13584_s3 + $0x180] sm:$0xff]  ;;  %v2293_v63 = vld [vmem:[%s13584_s3 + $0x188] sm:$0xff] }
  0xc6   :  { %2713 = vmatprep.subr.bf16.mxu1 %v8222_v3  ;;  %v8260_v3 = vcombine.high %v2292_v61, %v2296_v62  ;;  %v8259_v6 = vcombine.low %v2292_v61, %v2296_v62 }
  0xc8   :  { %2673 = vmatpush1.bf16.msra.mxu0 %v8219_v7  ;;  %v8261_v7 = vcombine.low %v2293_v63, %v2297_v4 }
  0xc9   :  { %2714 = vmatpush1.bf16.msra.mxu1 %v8221_v8  ;;  %2674 = vmatprep.subr.bf16.mxu0 %v8228_v9  ;;  %v8262_v8 = vcombine.high %v2293_v63, %v2297_v4 }
  0xca   :  { %2715 = vmatprep.subr.bf16.mxu1 %v8230_v10  ;;  %v2300_v10 = vld [vmem:[%s13584_s3 + $0x1c0] sm:$0xff] }
  0xcc   :  { %2675 = vmatpush1.bf16.msra.mxu0 %v8227_v15  ;;  %v8269_v15 = vcombine.low %v2301_v11, %v2305_v13 }
  0xcd   :  { %2716 = vmatpush1.bf16.msra.mxu1 %v8229_v16  ;;  %2676 = vmatprep.subr.bf16.mxu0 %v8236_v18  ;;  %v8270_v16 = vcombine.high %v2301_v11, %v2305_v13  ;;  %v11789_v18 = vld [vmem:[%s13584_s3 + $0x10] sm:$0xff] }
  0xce   :  { %2717 = vmatprep.subr.bf16.mxu1 %v8238_v22  ;;  %v11794_v22 = vld [vmem:[%s13584_s3 + $0x30] sm:$0xff] }
  0xd0   :  { %2677 = vmatpush1.bf16.msra.mxu0 %v8235_v29  ;;  %v11809_v29 = vld [vmem:[%s13584_s3 + $0x38] sm:$0xff] }
  0xd1   :  { %2718 = vmatpush1.bf16.msra.mxu1 %v8237_v31  ;;  %2678 = vmatprep.subr.bf16.mxu0 %v8244_v32 }
  0xf6   :  { %v9304_v33 = vpop.f32.mrb[0].mxu0 }
  0xf7   :  { %v9305_v34 = vpop.f32.mrb[1].mxu0  ;;  %v9326_v37 = vpop.f32.mrb[0].mxu1 }
  0xf8   :  { %v9306_v38 = vadd.f32 %v9305_v34, %v9304_v33  ;;  %v9307_v40 = vpop.f32.mrb[2].mxu0  ;;  %v9327_v45 = vpop.f32.mrb[1].mxu1  ;;  %v8246_v33 = vcombine.high %v2277_v27, %v2281_v28  ;;  %v2284_v34 = vld [vmem:[%s13584_s3 + $0x140] sm:$0xff] }
  0xf9   :  { %v9308_v46 = vpop.f32.mrb[3].mxu0  ;;  %v9328_v47 = vadd.f32 %v9327_v45, %v9326_v37  ;;  %v9329_v50 = vpop.f32.mrb[2].mxu1  ;;  %v2288_v37 = vld [vmem:[%s13584_s3 + $0x160] sm:$0xff]  ;;  %v2289_v40 = vld [vmem:[%s13584_s3 + $0x168] sm:$0xff]  ;;  %v8243_v45 = vcombine.low %v2276_v23, %v2280_v25  ;;  %v11799_v23 = vld [vmem:[%s13584_s3 + $0x18] sm:$0xff]  ;;  %v10923_v25 = vmov 0  }
  0xfa   :  { %v9330_v51 = vpop.f32.mrb[3].mxu1  ;;  %v8245_v46 = vcombine.low %v2277_v27, %v2281_v28  ;;  %2719 = vmatprep.subr.bf16.mxu1 %v8246_v33  ;;  %2702 = vmatprep.mubr.bf16.mxu0 %v10923_v25  ;;  %v8215_v27 = vcombine.low %v11789_v18, %v11794_v22  ;;  %v8216_v28 = vcombine.high %v11789_v18, %v11794_v22  ;;  %v2271_v18 = vld [vmem:[%s13584_s3 + $0xd8] sm:$0xff] }
  0xfb   :  { %v11687_v52 = vadd.f32 %v9328_v47, %v9306_v38  ;;  %v2285_v38 = vld [vmem:[%s13584_s3 + $0x148] sm:$0xff]  ;;  %v8252_v47 = vcombine.high %v2284_v34, %v2288_v37  ;;  %2679 = vmatpush1.bf16.msra.mxu0 %v8243_v45  ;;  %v8251_v51 = vcombine.low %v2284_v34, %v2288_v37  ;;  %2743 = vmatprep.mubr.bf16.mxu1 %v10923_v25  ;;  %v2275_v22 = vld [vmem:[%s13584_s3 + $0xf8] sm:$0xff] }
  0xfc   :  { %v8254_v50 = vcombine.high %v2285_v38, %v2289_v40  ;;  %2720 = vmatpush1.bf16.msra.mxu1 %v8245_v46  ;;  %v8253_v53 = vcombine.low %v2285_v38, %v2289_v40  ;;  %v8217_v31 = vcombine.low %v11799_v23, %v11809_v29  ;;  %v8218_v32 = vcombine.high %v11799_v23, %v11809_v29 }
  0xfd   :  { %2680 = vmatprep.subr.bf16.mxu0 %v8252_v47 }
  0xfe   :  { %2721 = vmatprep.subr.bf16.mxu1 %v8254_v50 }
  0xff   :  { %2681 = vmatpush1.bf16.msra.mxu0 %v8251_v51 }
 0x100   :  { %2722 = vmatpush1.bf16.msra.mxu1 %v8253_v53  ;;  %2682 = vmatprep.subr.bf16.mxu0 %v8260_v3 }
 0x101   :  { %2723 = vmatprep.subr.bf16.mxu1 %v8262_v8 }
 0x103   :  { %2683 = vmatpush1.bf16.msra.mxu0 %v8259_v6 }
 0x104   :  { %2724 = vmatpush1.bf16.msra.mxu1 %v8261_v7 }
 0x105   :  { %2725 = vmatprep.subr.bf16.mxu1 %v8270_v16 }
 0x108   :  { %2726 = vmatpush1.bf16.msra.mxu1 %v8269_v15 }
 0x109   :  { %2793 = vmatprep.subr.bf16.mxu1 %v8218_v32 }
 0x116   :  { %v9348_v54 = vpop.f32.mrb[4].mxu0 }
 0x117   :  { %v9349_v55 = vpop.f32.mrb[5].mxu0  ;;  %v9370_v56 = vpop.f32.mrb[4].mxu1 }
 0x118   :  { %v9350_v57 = vadd.f32 %v9349_v55, %v9348_v54  ;;  %v9351_v58 = vpop.f32.mrb[6].mxu0  ;;  %v9371_v59 = vpop.f32.mrb[5].mxu1 }
 0x119   :  { %v9352_v60 = vpop.f32.mrb[7].mxu0  ;;  %v9372_v1 = vadd.f32 %v9371_v59, %v9370_v56  ;;  %v9373_v2 = vpop.f32.mrb[6].mxu1  ;;  %v7822_v59 = vld [vmem:[%s13585_s2] ss:$0 sm:$0xff] }
 0x11a   :  { %v733_v0 = vadd.f32 %v9350_v57, %v11687_v52  ;;  %v9374_v5 = vpop.f32.mrb[7].mxu1  ;;  %v2304_v52 = vld [vmem:[%s13584_s3 + $0x1e0] sm:$0xff] }
 0x11b   :  { %v8268_v12 = vcombine.high %v2300_v10, %v2304_v52  ;;  %v8267_v14 = vcombine.low %v2300_v10, %v2304_v52 }
 0x11c   :  { %v773_v9 = vadd.f32 %v9372_v1, %v733_v0 }
 0x11d   :  { %2684 = vmatprep.subr.bf16.mxu0 %v8268_v12 }
 0x11e   :  { %2685 = vmatpush1.bf16.msra.mxu0 %v8267_v14  ;;  %v784_v2 = vadd.f32 %v7822_v59, %v773_v9  ;;  %v2262_v59 = vld [vmem:[%s13584_s3 + $0x90] sm:$0xff] }
 0x11f   :  { %2752 = vmatprep.subr.bf16.mxu0 %v8216_v28 }
 0x136   :  { %v9392_v33 = vpop.f32.mrb[8].mxu0 }
 0x137   :  { %v9393_v34 = vpop.f32.mrb[9].mxu0  ;;  %v9414_v37 = vpop.f32.mrb[8].mxu1 }
 0x138   :  { %v9394_v38 = vadd.f32 %v9393_v34, %v9392_v33  ;;  %v9395_v40 = vpop.f32.mrb[10].mxu0  ;;  %v9415_v45 = vpop.f32.mrb[9].mxu1 }
 0x139   :  { %v9396_v46 = vpop.f32.mrb[11].mxu0  ;;  %v9416_v47 = vadd.f32 %v9415_v45, %v9414_v37  ;;  %v9417_v50 = vpop.f32.mrb[10].mxu1 }
 0x13a   :  { %v9418_v51 = vpop.f32.mrb[11].mxu1  ;;  %v2254_v50 = vld [vmem:[%s13584_s3 + $0x50] sm:$0xff] }
 0x13b   :  { %v1428_v53 = vadd.f32 %v9416_v47, %v9394_v38  ;;  %v2258_v51 = vld [vmem:[%s13584_s3 + $0x70] sm:$0xff] }
 0x156   :  { %v9436_v54 = vpop.f32.mrb[12].mxu0 }
 0x157   :  { %v9437_v55 = vpop.f32.mrb[13].mxu0  ;;  %v9458_v56 = vpop.f32.mrb[12].mxu1 }
 0x158   :  { %v9438_v57 = vadd.f32 %v9437_v55, %v9436_v54  ;;  %v9439_v58 = vpop.f32.mrb[14].mxu0  ;;  %v9459_v60 = vpop.f32.mrb[13].mxu1  ;;  %v2259_v54 = vld [vmem:[%s13584_s3 + $0x78] sm:$0xff] }
 0x159   :  { %v9440_v61 = vpop.f32.mrb[15].mxu0  ;;  %v9460_v63 = vadd.f32 %v9459_v60, %v9458_v56  ;;  %v9461_v0 = vpop.f32.mrb[14].mxu1  ;;  %v2266_v60 = vld [vmem:[%s13584_s3 + $0xb0] sm:$0xff] }
 0x15a   :  { %v1468_v62 = vadd.f32 %v9438_v57, %v1428_v53  ;;  %v9462_v1 = vpop.f32.mrb[15].mxu1  ;;  %v2255_v53 = vld [vmem:[%s13584_s3 + $0x58] sm:$0xff]  ;;  %v8224_v57 = vcombine.high %v2254_v50, %v2258_v51  ;;  %v8231_v23 = vcombine.low %v2262_v59, %v2266_v60 }
 0x15b   :  { %v8226_v58 = vcombine.high %v2255_v53, %v2259_v54  ;;  %v2263_v61 = vld [vmem:[%s13584_s3 + $0x98] sm:$0xff]  ;;  %v8225_v0 = vcombine.low %v2255_v53, %v2259_v54  ;;  %v8232_v1 = vcombine.high %v2262_v59, %v2266_v60 }
 0x15c   :  { %v1508_v3 = vadd.f32 %v9460_v63, %v1468_v62  ;;  %v2267_v62 = vld [vmem:[%s13584_s3 + $0xb8] sm:$0xff]  ;;  %v8223_v63 = vcombine.low %v2254_v50, %v2258_v51  ;;  %v2302_v50 = vld [vmem:[%s13584_s3 + $0x1d0] sm:$0xff] }
 0x15d   :  { %v2306_v51 = vld [vmem:[%s13584_s3 + $0x1f0] sm:$0xff]  ;;  %v2303_v53 = vld [vmem:[%s13584_s3 + $0x1d8] sm:$0xff] }
 0x15e   :  { %v1513_v4 = vadd.f32 %v1508_v3, %v784_v2  ;;  %v8234_v2 = vcombine.high %v2263_v61, %v2267_v62  ;;  %v2270_v3 = vld [vmem:[%s13584_s3 + $0xd0] sm:$0xff]  ;;  %v2307_v54 = vld [vmem:[%s13584_s3 + $0x1f8] sm:$0xff]  ;;  %v8271_v60 = vcombine.low %v2302_v50, %v2306_v51 }
 0x15f   :  { %v8274_v59 = vcombine.high %v2303_v53, %v2307_v54 }
 0x176   :  { %v9480_v5 = vpop.f32.mrb[16].mxu0 }
 0x177   :  { %v9481_v6 = vpop.f32.mrb[17].mxu0  ;;  %v9502_v7 = vpop.f32.mrb[16].mxu1 }
 0x178   :  { %v9482_v8 = vadd.f32 %v9481_v6, %v9480_v5  ;;  %v9483_v10 = vpop.f32.mrb[18].mxu0  ;;  %v9503_v52 = vpop.f32.mrb[17].mxu1  ;;  %v2278_v5 = vld [vmem:[%s13584_s3 + $0x110] sm:$0xff] }
 0x179   :  { %v9484_v11 = vpop.f32.mrb[19].mxu0  ;;  %v9504_v12 = vadd.f32 %v9503_v52, %v9502_v7  ;;  %v9505_v13 = vpop.f32.mrb[18].mxu1  ;;  %v2282_v6 = vld [vmem:[%s13584_s3 + $0x130] sm:$0xff]  ;;  %v2283_v7 = vld [vmem:[%s13584_s3 + $0x138] sm:$0xff]  ;;  %v8241_v10 = vcombine.low %v2271_v18, %v2275_v22 }
 0x17a   :  { %v9506_v14 = vpop.f32.mrb[19].mxu1  ;;  %v8248_v52 = vcombine.high %v2278_v5, %v2282_v6  ;;  %v2290_v13 = vld [vmem:[%s13584_s3 + $0x170] sm:$0xff] }
 0x17b   :  { %v2157_v15 = vadd.f32 %v9504_v12, %v9482_v8  ;;  %v2286_v12 = vld [vmem:[%s13584_s3 + $0x150] sm:$0xff]  ;;  %v2287_v14 = vld [vmem:[%s13584_s3 + $0x158] sm:$0xff] }
 0x196   :  { %v9524_v16 = vpop.f32.mrb[20].mxu0 }
 0x197   :  { %v9525_v28 = vpop.f32.mrb[21].mxu0  ;;  %v9546_v32 = vpop.f32.mrb[20].mxu1 }
 0x198   :  { %v9526_v33 = vadd.f32 %v9525_v28, %v9524_v16  ;;  %v9527_v34 = vpop.f32.mrb[22].mxu0  ;;  %v9547_v37 = vpop.f32.mrb[21].mxu1  ;;  %v8247_v16 = vcombine.low %v2278_v5, %v2282_v6  ;;  %v10413_v5 = vld [vmem:[%s13586_s5 + $0x18] sm:$0xff]  }
 0x199   :  { %v9528_v9 = vpop.f32.mrb[23].mxu0  ;;  %v9548_v40 = vadd.f32 %v9547_v37, %v9546_v32  ;;  %v9549_v45 = vpop.f32.mrb[22].mxu1  ;;  %v8256_v32 = vcombine.high %v2286_v12, %v2290_v13  ;;  %v2294_v34 = vld [vmem:[%s13584_s3 + $0x190] sm:$0xff]  ;;  %v10414_v6 = vld [vmem:[%s13586_s5 + $0x98] sm:$0xff]  }
 0x19a   :  { %v2197_v38 = vadd.f32 %v9526_v33, %v2157_v15  ;;  %v9550_v46 = vpop.f32.mrb[23].mxu1  ;;  %v2291_v15 = vld [vmem:[%s13584_s3 + $0x178] sm:$0xff]  ;;  %v2298_v37 = vld [vmem:[%s13584_s3 + $0x1b0] sm:$0xff] }
 0x19b   :  { %v8258_v33 = vcombine.high %v2287_v14, %v2291_v15  ;;  %v2295_v9 = vld [vmem:[%s13584_s3 + $0x198] sm:$0xff]  ;;  %v8257_v45 = vcombine.low %v2287_v14, %v2291_v15  ;;  %v8264_v46 = vcombine.high %v2294_v34, %v2298_v37  ;;  %v10423_v14 = vld [vmem:[%s13586_s5 + $0x70] sm:$0xff]  }
 0x19c   :  { %v2237_v47 = vadd.f32 %v9548_v40, %v2197_v38  ;;  %v2299_v38 = vld [vmem:[%s13584_s3 + $0x1b8] sm:$0xff]  ;;  %v8255_v40 = vcombine.low %v2286_v12, %v2290_v13  ;;  %v10421_v12 = vld [vmem:[%s13586_s5 + $0x28] sm:$0xff]   ;;  %v10424_v15 = vld [vmem:[%s13586_s5 + $0xf0] sm:$0xff]  }
 0x19d   :  { %v10422_v13 = vld [vmem:[%s13586_s5 + $0xa8] sm:$0xff]  }
 0x19e   :  { %v2242_v55 = vadd.f32 %v2237_v47, %v1513_v4  ;;  %v2274_v4 = vld [vmem:[%s13584_s3 + $0xf0] sm:$0xff]  ;;  %v8266_v47 = vcombine.high %v2295_v9, %v2299_v38 }
 0x19f   :  { %v8240_v29 = vcombine.high %v2270_v3, %v2274_v4  ;;  %v8239_v8 = vcombine.low %v2270_v3, %v2274_v4  ;;  %v10405_v3 = vld [vmem:[%s13586_s5 + $0x8] sm:$0xff]  }
 0x1a0   :  { %v11831_v56 = vpack.c.bf16 %v2242_v55, %v2242_v55  ;;  %v8263_v55 = vcombine.low %v2294_v34, %v2298_v37  ;;  %v10406_v4 = vld [vmem:[%s13586_s5 + $0x88] sm:$0xff]   ;;  %v10431_v34 = vld [vmem:[%s13586_s5 + $0x38] sm:$0xff]  }
 0x1a1   :  { %v10432_v37 = vld [vmem:[%s13586_s5 + $0xb8] sm:$0xff]  }
 0x1a2   :  { %2703 = vmatmul.mubr.bf16.vlgmr.msra.gmra.mrb[24].mxu0 %v11831_v56  ;;  %2744 = vmatmul.mubr.bf16.vlgmr.msra.gmra.mrb[24].mxu1 %v11831_v56 }
 0x1a3   :  { %2753 = vmatpush1.bf16.msra.mxu0 %v8215_v27  ;;  %2794 = vmatpush1.bf16.msra.mxu1 %v8217_v31  ;;  %v8233_v27 = vcombine.low %v2263_v61, %v2267_v62  ;;  %v8242_v31 = vcombine.high %v2271_v18, %v2275_v22  ;;  %v8273_v61 = vcombine.low %v2303_v53, %v2307_v54  ;;  %v10399_v62 = vld [vmem:[%s13586_s5 + $0x40] sm:$0xff]   ;;  %v10407_v18 = vld [vmem:[%s13586_s5 + $0x50] sm:$0xff]  }
 0x1a4   :  { %2754 = vmatprep.subr.bf16.mxu0 %v8224_v57  ;;  %2795 = vmatprep.subr.bf16.mxu1 %v8226_v58  ;;  %v8265_v57 = vcombine.low %v2295_v9, %v2299_v38  ;;  %v8272_v58 = vcombine.high %v2302_v50, %v2306_v51  ;;  %v10408_v22 = vld [vmem:[%s13586_s5 + $0xd0] sm:$0xff]   ;;  %v10433_v9 = vld [vmem:[%s13586_s5 + $0x140] sm:$0xff]   ;;  %v2316_v50 = vsub.s32 1, %v11084_v30  ;;  %v2324_v51 = vsub.s32 3, %v11084_v30 }
 0x1a5   :  { %2784 = vmatprep.mubr.bf16.mxu0 %v10923_v25  ;;  %2825 = vmatprep.mubr.bf16.mxu1 %v10923_v25  ;;  %v2279_v25 = vld [vmem:[%s13584_s3 + $0x118] sm:$0xff]  ;;  %v10434_v38 = vld [vmem:[%s13586_s5 + $0x1c0] sm:$0xff]  }
 0x1a6   :  { %v8250_v11 = vcombine.high %v2279_v25, %v2283_v7  ;;  %v8249_v28 = vcombine.low %v2279_v25, %v2283_v7  ;;  %v10415_v25 = vld [vmem:[%s13586_s5 + $0x60] sm:$0xff]  }
 0x1a7   :  { %2755 = vmatpush1.bf16.msra.mxu0 %v8223_v63  ;;  %2796 = vmatpush1.bf16.msra.mxu1 %v8225_v0  ;;  %v10400_v63 = vld [vmem:[%s13586_s5 + $0xc0] sm:$0xff]  }
 0x1a8   :  { %2756 = vmatprep.subr.bf16.mxu0 %v8232_v1  ;;  %2797 = vmatprep.subr.bf16.mxu1 %v8234_v2  ;;  %v10401_v0 = vld [vmem:[%s13586_s5] sm:$0xff]   ;;  %v10404_v2 = vld [vmem:[%s13586_s5 + $0xc8] sm:$0xff]  }
 0x1a9   :  { %v10402_v1 = vld [vmem:[%s13586_s5 + $0x80] sm:$0xff]  }
 0x1aa   :  { %v10416_v7 = vld [vmem:[%s13586_s5 + $0xe0] sm:$0xff]  }
 0x1ab   :  { %2757 = vmatpush1.bf16.msra.mxu0 %v8231_v23  ;;  %2798 = vmatpush1.bf16.msra.mxu1 %v8233_v27  ;;  %v10409_v23 = vld [vmem:[%s13586_s5 + $0x10] sm:$0xff]  }
 0x1ac   :  { %2758 = vmatprep.subr.bf16.mxu0 %v8240_v29  ;;  %2799 = vmatprep.subr.bf16.mxu1 %v8242_v31  ;;  %v10410_v27 = vld [vmem:[%s13586_s5 + $0x90] sm:$0xff]   ;;  %v10411_v29 = vld [vmem:[%s13586_s5 + $0x58] sm:$0xff]  }
 0x1ad   :  { %v10412_v31 = vld [vmem:[%s13586_s5 + $0xd8] sm:$0xff]  }
 0x1af   :  { %2759 = vmatpush1.bf16.msra.mxu0 %v8239_v8  ;;  %2800 = vmatpush1.bf16.msra.mxu1 %v8241_v10  ;;  %v10417_v8 = vld [vmem:[%s13586_s5 + $0x20] sm:$0xff]  }
 0x1b0   :  { %2760 = vmatprep.subr.bf16.mxu0 %v8248_v52  ;;  %2801 = vmatprep.subr.bf16.mxu1 %v8250_v11  ;;  %v10418_v10 = vld [vmem:[%s13586_s5 + $0xa0] sm:$0xff]   ;;  %v10419_v52 = vld [vmem:[%s13586_s5 + $0x68] sm:$0xff]  }
 0x1b1   :  { %v10420_v11 = vld [vmem:[%s13586_s5 + $0xe8] sm:$0xff]  }
 0x1b3   :  { %2761 = vmatpush1.bf16.msra.mxu0 %v8247_v16  ;;  %2802 = vmatpush1.bf16.msra.mxu1 %v8249_v28  ;;  %v10427_v16 = vld [vmem:[%s13586_s5 + $0x30] sm:$0xff]  }
 0x1b4   :  { %2762 = vmatprep.subr.bf16.mxu0 %v8256_v32  ;;  %2803 = vmatprep.subr.bf16.mxu1 %v8258_v33  ;;  %v10428_v28 = vld [vmem:[%s13586_s5 + $0xb0] sm:$0xff]   ;;  %v10429_v32 = vld [vmem:[%s13586_s5 + $0x78] sm:$0xff]  }
 0x1b5   :  { %v10430_v33 = vld [vmem:[%s13586_s5 + $0xf8] sm:$0xff]  }
 0x1b7   :  { %2763 = vmatpush1.bf16.msra.mxu0 %v8255_v40  ;;  %2804 = vmatpush1.bf16.msra.mxu1 %v8257_v45  ;;  %v2312_v40 = vsub.s32 0, %v11084_v30  ;;  %v12023_v45 = vld [vmem:[%s13587_s4] sm:$0xff] }
 0x1b8   :  { %2764 = vmatprep.subr.bf16.mxu0 %v8264_v46  ;;  %2805 = vmatprep.subr.bf16.mxu1 %v8266_v47  ;;  %v8359_v46 = vld [vmem:[%s13583_s0 + $0x10] sm:$0xff]  ;;  %v2320_v47 = vsub.s32 2, %v11084_v30 }
 0x1b9   :  { %v3853_v53 = vcombine.high %v8359_v46, %v8359_v46  ;;  %v2313_v54 = vrot.slane %v12023_v45, %v2312_v40 }
 0x1bb   :  { %2765 = vmatpush1.bf16.msra.mxu0 %v8263_v55  ;;  %2806 = vmatpush1.bf16.msra.mxu1 %v8265_v57  ;;  %v2321_v55 = vrot.slane %v12023_v45, %v2320_v47  ;;  %v2317_v57 = vrot.slane %v12023_v45, %v2316_v50  ;;  %v2328_v50 = vsub.s32 4, %v11084_v30 }
 0x1bc   :  { %2766 = vmatprep.subr.bf16.mxu0 %v8272_v58  ;;  %2807 = vmatprep.subr.bf16.mxu1 %v8274_v59  ;;  %v2325_v58 = vrot.slane %v12023_v45, %v2324_v51  ;;  %v12036_v59 = vrot.slane %v8359_v46, %v11099_v35 }
 0x1bf   :  { %2767 = vmatpush1.bf16.msra.mxu0 %v8271_v60  ;;  %2808 = vmatpush1.bf16.msra.mxu1 %v8273_v61 }
 0x1c0   :  { %9552 = vmatprep.subr.bf16.mxu0 %v10399_v62  ;;  %9574 = vmatprep.subr.bf16.mxu1 %v10400_v63  ;;  %v12039_v62 = vrot.slane %v3853_v53, %v11099_v35  ;;  %v8360_v53 = vld [vmem:[%s13583_s0 + $0x18] sm:$0xff] }
 0x1c2   :  { %2785 = vmatmul.mubr.bf16.vlgmr.msra.gmra.mrb[28].mxu0 %v11831_v56  ;;  %2826 = vmatmul.mubr.bf16.vlgmr.msra.gmra.mrb[28].mxu1 %v11831_v56  ;;  %v10403_v56 = vld [vmem:[%s13586_s5 + $0x48] sm:$0xff]  }
 0x1c3   :  { %9553 = vmatpush3.bf16.msra.mxu0 %v10401_v0  ;;  %9575 = vmatpush3.bf16.msra.mxu1 %v10402_v1 }
 0x1c4   :  { %9554 = vmatprep.subr.bf16.mxu0 %v10403_v56  ;;  %9576 = vmatprep.subr.bf16.mxu1 %v10404_v2 }
 0x1c7   :  { %9555 = vmatpush3.bf16.msra.mxu0 %v10405_v3  ;;  %9577 = vmatpush3.bf16.msra.mxu1 %v10406_v4 }
 0x1c8   :  { %9556 = vmatprep.subr.bf16.mxu0 %v10407_v18  ;;  %9578 = vmatprep.subr.bf16.mxu1 %v10408_v22 }
 0x1cb   :  { %9557 = vmatpush3.bf16.msra.mxu0 %v10409_v23  ;;  %9579 = vmatpush3.bf16.msra.mxu1 %v10410_v27 }
 0x1cc   :  { %9558 = vmatprep.subr.bf16.mxu0 %v10411_v29  ;;  %9580 = vmatprep.subr.bf16.mxu1 %v10412_v31 }
 0x1cf   :  { %9559 = vmatpush3.bf16.msra.mxu0 %v10413_v5  ;;  %9581 = vmatpush3.bf16.msra.mxu1 %v10414_v6  ;;  %v12059_v6 = vcombine.high %v12039_v62, %v12039_v62 }
 0x1d0   :  { %9560 = vmatprep.subr.bf16.mxu0 %v10415_v25  ;;  %9582 = vmatprep.subr.bf16.mxu1 %v10416_v7 }
 0x1d3   :  { %9561 = vmatpush3.bf16.msra.mxu0 %v10417_v8  ;;  %9583 = vmatpush3.bf16.msra.mxu1 %v10418_v10 }
 0x1d4   :  { %9562 = vmatprep.subr.bf16.mxu0 %v10419_v52  ;;  %9584 = vmatprep.subr.bf16.mxu1 %v10420_v11 }
 0x1d7   :  { %9563 = vmatpush3.bf16.msra.mxu0 %v10421_v12  ;;  %9585 = vmatpush3.bf16.msra.mxu1 %v10422_v13 }
 0x1d8   :  { %9564 = vmatprep.subr.bf16.mxu0 %v10423_v14  ;;  %9586 = vmatprep.subr.bf16.mxu1 %v10424_v15 }
 0x1db   :  { %9565 = vmatpush3.bf16.msra.mxu0 %v10427_v16  ;;  %9587 = vmatpush3.bf16.msra.mxu1 %v10428_v28  ;;  %v12069_v16 = vcombine.high %v12036_v59, %v12036_v59 }
 0x1dc   :  { %9566 = vmatprep.subr.bf16.mxu0 %v10429_v32  ;;  %9588 = vmatprep.subr.bf16.mxu1 %v10430_v33 }
 0x1df   :  { %9567 = vmatpush3.bf16.msra.mxu0 %v10431_v34  ;;  %9589 = vmatpush3.bf16.msra.mxu1 %v10432_v37 }
 0x1e0   :  { %9596 = vmatprep.subr.bf16.mxu0 %v10433_v9  ;;  %9618 = vmatprep.subr.bf16.mxu1 %v10434_v38 }
 0x275   :  { %v2704_v60 = vpop.f32.mrb[24].mxu0  ;;  %v2745_v61 = vpop.f32.mrb[24].mxu1 }
 0x276   :  { %v12041_v63 = vadd.f32 %v2704_v60, %v2313_v54  ;;  %v12043_v0 = vadd.f32 %v2745_v61, %v2321_v55  ;;  %v2706_v1 = vpop.f32.mrb[25].mxu0  ;;  %v2747_v56 = vpop.f32.mrb[25].mxu1  ;;  %v2336_v54 = vsub.s32 6, %v11084_v30 }
 0x277   :  { %v12045_v2 = vadd.f32 %v2706_v1, %v2317_v57  ;;  %v12047_v3 = vadd.f32 %v2747_v56, %v2325_v58  ;;  %v2708_v4 = vpop.f32.mrb[26].mxu0  ;;  %v2749_v18 = vpop.f32.mrb[26].mxu1  ;;  %v2332_v57 = vsub.s32 5, %v11084_v30  ;;  %v2340_v58 = vsub.s32 7, %v11084_v30 }
 0x278   :  { %v2834_v22 = vmul.f32 %v12041_v63, %v11111_v39  ;;  %v3895_v23 = vmul.f32 %v12036_v59, %v12041_v63  ;;  %v2836_v27 = vmul.f32 %v12043_v0, %v11124_v44  ;;  %v2709_v29 = vpop.f32.mrb[27].mxu0  ;;  %v2750_v31 = vpop.f32.mrb[27].mxu1  ;;  %v3897_v5 = vmul.f32 %v12039_v62, %v12043_v0  ;;  %v10921_v4 = vld [vmem:[%s13583_s0 + $0x28] sm:$0xff] }
 0x279   :  { %v2835_v8 = vmul.f32 %v12045_v2, %v11121_v43  ;;  %v2837_v52 = vmul.f32 %v12047_v3, %v11135_v48  ;;  %v3898_v11 = vmul.f32 %v12059_v6, %v12047_v3  ;;  %v3896_v33 = vmul.f32 %v12069_v16, %v12045_v2 }
 0x27a   :  { %v8275_v25 = vmul.f32 -1.442695, %v2834_v22  ;;  %v8361_v7 = vmul.f32 -1.442695, %v3895_v23  ;;  %v8277_v10 = vmul.f32 -1.442695, %v2836_v27  ;;  %v3870_v56 = vcombine.high %v8360_v53, %v8360_v53 }
 0x27b   :  { %v8276_v12 = vmul.f32 -1.442695, %v2835_v8  ;;  %v8363_v13 = vmul.f32 -1.442695, %v3897_v5  ;;  %v8278_v14 = vmul.f32 -1.442695, %v2837_v52  ;;  %v6026_v18 = vcombine.high %v10921_v4, %v10921_v4 }
 0x27c   :  { %10817 = vpow2.f32 %v8275_v25  ;;  %v8364_v15 = vmul.f32 -1.442695, %v3898_v11  ;;  %v8362_v40 = vmul.f32 -1.442695, %v3896_v33  ;;  %v2329_v23 = vrot.slane %v12023_v45, %v2328_v50 }
 0x27d   :  { %10819 = vpow2.f32 %v8361_v7  ;;  %v2337_v27 = vrot.slane %v12023_v45, %v2336_v54  ;;  %v2333_v29 = vrot.slane %v12023_v45, %v2332_v57  ;;  %v2341_v30 = vrot.slane %v12023_v45, %v2340_v58 }
 0x27e   :  { %10821 = vpow2.f32 %v8277_v10  ;;  %v12088_v5 = vrot.slane %v8360_v53, %v11099_v35  ;;  %v12091_v8 = vrot.slane %v3870_v56, %v11099_v35  ;;  %v12094_v10 = vrot.slane %v6026_v18, %v11099_v35 }
 0x27f   :  { %10823 = vpow2.f32 %v8276_v12 }
 0x280   :  { %10825 = vpow2.f32 %v8363_v13  ;;  %v12117_v53 = vcombine.high %v12091_v8, %v12091_v8 }
 0x281   :  { %10827 = vpow2.f32 %v8278_v14 }
 0x282   :  { %10829 = vpow2.f32 %v8364_v15 }
 0x286   :  { %v10818_v28 = vpop.eup %10817 }
 0x287   :  { %v10820_v32 = vpop.eup %10819  ;;  %v2866_v9 = vadd.f32 1.0, %v10818_v28 }
 0x288   :  { %v3927_v34 = vadd.f32 1.0, %v10820_v32  ;;  %v10822_v37 = vpop.eup %10821 }
 0x289   :  { %v2868_v38 = vadd.f32 1.0, %v10822_v37  ;;  %v10824_v46 = vpop.eup %10823 }
 0x28a   :  { %10831 = vrcp.f32 %v3927_v34  ;;  %v2867_v47 = vadd.f32 1.0, %v10824_v46  ;;  %v10826_v51 = vpop.eup %10825 }
 0x28b   :  { %10833 = vrcp.f32 %v2866_v9  ;;  %v10828_v55 = vpop.eup %10827  ;;  %v3929_v22 = vadd.f32 1.0, %v10826_v51 }
 0x28c   :  { %10835 = vrcp.f32 %v2868_v38  ;;  %v10830_v60 = vpop.eup %10829  ;;  %v2869_v61 = vadd.f32 1.0, %v10828_v55 }
 0x28d   :  { %10837 = vpow2.f32 %v8362_v40  ;;  %v3930_v1 = vadd.f32 1.0, %v10830_v60 }
 0x28e   :  { %10839 = vrcp.f32 %v2867_v47 }
 0x28f   :  { %10841 = vrcp.f32 %v2869_v61 }
 0x290   :  { %10843 = vrcp.f32 %v3930_v1 }
 0x291   :  { %10845 = vrcp.f32 %v3929_v22 }
 0x294   :  { %v10832_v31 = vpop.eup %10831 }
 0x295   :  { %v2786_v25 = vpop.f32.mrb[28].mxu0  ;;  %v2827_v7 = vpop.f32.mrb[28].mxu1  ;;  %v3951_v52 = vmul.f32 %v10832_v31, %v12036_v59 }
 0x296   :  { %v12097_v11 = vadd.f32 %v2786_v25, %v2329_v23  ;;  %v2828_v12 = vadd.f32 %v2827_v7, %v2337_v27  ;;  %v2788_v45 = vpop.f32.mrb[29].mxu0  ;;  %v2829_v13 = vpop.f32.mrb[29].mxu1 }
 0x297   :  { %v10834_v14 = vpop.eup %10833  ;;  %v12099_v15 = vadd.f32 %v2788_v45, %v2333_v29  ;;  %v12101_v28 = vadd.f32 %v2829_v13, %v2341_v30  ;;  %v2790_v32 = vpop.f32.mrb[30].mxu0  ;;  %v12104_v34 = vadd.f32 %v3951_v52, %v12036_v59 }
 0x298   :  { %v2831_v33 = vpop.f32.mrb[30].mxu1  ;;  %v10836_v35 = vpop.eup %10835  ;;  %v2838_v37 = vmul.f32 %v12097_v11, %v11232_v17  ;;  %v3899_v9 = vmul.f32 %v12088_v5, %v12097_v11  ;;  %v2840_v38 = vmul.f32 %v2828_v12, %v11242_v21  ;;  %v3901_v50 = vmul.f32 %v12091_v8, %v2828_v12  ;;  %v10435_v32 = vld [vmem:[%s13586_s5 + $0x100] sm:$0xff]  }
 0x299   :  { %v2791_v40 = vpop.f32.mrb[31].mxu0  ;;  %v2832_v46 = vpop.f32.mrb[31].mxu1  ;;  %v6057_v51 = vmul.f32 %v12094_v10, %v2828_v12  ;;  %v2839_v59 = vmul.f32 %v12099_v15, %v11239_v20  ;;  %v2890_v57 = vmul.f32 %v10834_v14, %v11111_v39  ;;  %v2841_v61 = vmul.f32 %v12101_v28, %v11256_v26  ;;  %v10436_v33 = vld [vmem:[%s13586_s5 + $0x180] sm:$0xff]  }
 0x29a   :  { %v10838_v47 = vpop.eup %10837  ;;  %v8279_v54 = vmul.f32 -1.442695, %v2838_v37  ;;  %v8365_v55 = vmul.f32 -1.442695, %v3899_v9  ;;  %v8281_v60 = vmul.f32 -1.442695, %v2840_v38  ;;  %v2892_v1 = vmul.f32 %v10836_v35, %v11124_v44 }
 0x29b   :  { %v10840_v58 = vpop.eup %10839  ;;  %v3928_v4 = vadd.f32 1.0, %v10838_v47  ;;  %v8367_v18 = vmul.f32 -1.442695, %v3901_v50  ;;  %v8857_v22 = vmul.f32 -1.442695, %v6057_v51  ;;  %v3902_v27 = vmul.f32 %v12117_v53, %v12101_v28  ;;  %v10439_v46 = vld [vmem:[%s13586_s5 + $0x108] sm:$0xff]  }
 0x29c   :  { %v10842_v56 = vpop.eup %10841  ;;  %10847 = vpow2.f32 %v8279_v54  ;;  %v8280_v23 = vmul.f32 -1.442695, %v2839_v59  ;;  %v2891_v30 = vmul.f32 %v10840_v58, %v11121_v43  ;;  %v2898_v25 = vadd.f32 %v2890_v57, %v11111_v39  ;;  %v10437_v39 = vld [vmem:[%s13586_s5 + $0x148] sm:$0xff]   ;;  %v10443_v58 = vld [vmem:[%s13586_s5 + $0x110] sm:$0xff]  }
 0x29d   :  { %10849 = vpow2.f32 %v8365_v55  ;;  %v10844_v29 = vpop.eup %10843  ;;  %v2893_v31 = vmul.f32 %v10842_v56, %v11135_v48  ;;  %v8282_v7 = vmul.f32 -1.442695, %v2841_v61  ;;  %v8368_v52 = vmul.f32 -1.442695, %v3902_v27  ;;  %v10440_v47 = vld [vmem:[%s13586_s5 + $0x188] sm:$0xff]   ;;  %v10442_v55 = vld [vmem:[%s13586_s5 + $0x1d0] sm:$0xff]  }
 0x29e   :  { %10851 = vpow2.f32 %v8281_v60  ;;  %v2900_v12 = vadd.f32 %v2892_v1, %v11124_v44  ;;  %v10846_v45 = vpop.eup %10845  ;;  %v2899_v13 = vadd.f32 %v2891_v30, %v11121_v43  ;;  %v10438_v44 = vld [vmem:[%s13586_s5 + $0x1c8] sm:$0xff]   ;;  %v3954_v43 = vmul.f32 %v10844_v29, %v12059_v6  ;;  %v10445_v56 = vld [vmem:[%s13586_s5 + $0x158] sm:$0xff]  }
 0x29f   :  { %10853 = vpow2.f32 %v8367_v18  ;;  %v2901_v14 = vadd.f32 %v2893_v31, %v11135_v48  ;;  %v12148_v37 = vpack.c.bf16 %v2898_v25, %v2898_v25  ;;  %v3953_v40 = vmul.f32 %v10846_v45, %v12039_v62  ;;  %v10447_v29 = vld [vmem:[%s13586_s5 + $0x118] sm:$0xff]   ;;  %v10449_v25 = vld [vmem:[%s13586_s5 + $0x160] sm:$0xff]  }
 0x2a0   :  { %10855 = vpow2.f32 %v8857_v22  ;;  %v12144_v48 = vpack.c.bf16 %v2899_v13, %v2899_v13  ;;  %v12150_v9 = vpack.c.bf16 %v2900_v12, %v2900_v12  ;;  %v12153_v38 = vadd.f32 %v3954_v43, %v12059_v6  ;;  %v10441_v6 = vld [vmem:[%s13586_s5 + $0x150] sm:$0xff]   ;;  %v10448_v31 = vld [vmem:[%s13586_s5 + $0x198] sm:$0xff]   ;;  %v10451_v13 = vld [vmem:[%s13586_s5 + $0x120] sm:$0xff]  }
 0x2a1   :  { %10857 = vpow2.f32 %v8280_v23  ;;  %v12146_v35 = vpack.c.bf16 %v2901_v14, %v2901_v14  ;;  %v12170_v50 = vadd.f32 %v3953_v40, %v12039_v62  ;;  %v10444_v62 = vld [vmem:[%s13586_s5 + $0x190] sm:$0xff]   ;;  %v10452_v14 = vld [vmem:[%s13586_s5 + $0x1a0] sm:$0xff]  }
 0x2a2   :  { %3458 = vmatprep.mubr.bf16.mxu0 %v12144_v48  ;;  %10859 = vpow2.f32 %v8282_v7 }
 0x2a3   :  { %3498 = vmatprep.mubr.bf16.mxu1 %v12146_v35  ;;  %3459 = vmatmul.mubr.bf16.vlgmr.msra.gmra.mrb[32].mxu0 %v12148_v37  ;;  %10861 = vpow2.f32 %v8368_v52  ;;  %v10450_v52 = vld [vmem:[%s13586_s5 + $0x1e0] sm:$0xff]  }
 0x2a4   :  { %3499 = vmatmul.mubr.bf16.vlgmr.msra.gmra.mrb[32].mxu1 %v12150_v9  ;;  %9597 = vmatpush3.bf16.msra.mxu0 %v10435_v32  ;;  %10863 = vrcp.f32 %v3928_v4  ;;  %v10446_v4 = vld [vmem:[%s13586_s5 + $0x1d8] sm:$0xff]  }
 0x2a5   :  { %9619 = vmatpush3.bf16.msra.mxu1 %v10436_v33  ;;  %9598 = vmatprep.subr.bf16.mxu0 %v10437_v39  ;;  %v10453_v33 = vld [vmem:[%s13586_s5 + $0x168] sm:$0xff]   ;;  %v12210_v39 = vcombine.high %v12088_v5, %v12088_v5 }
 0x2a6   :  { %v10848_v51 = vpop.eup %10847  ;;  %9620 = vmatprep.subr.bf16.mxu1 %v10438_v44  ;;  %v10454_v44 = vld [vmem:[%s13586_s5 + $0x1e8] sm:$0xff]  }
 0x2a7   :  { %v10850_v59 = vpop.eup %10849  ;;  %v2870_v54 = vadd.f32 1.0, %v10848_v51  ;;  %v3900_v51 = vmul.f32 %v12210_v39, %v12099_v15 }
 0x2a8   :  { %v3931_v57 = vadd.f32 1.0, %v10850_v59  ;;  %v10852_v60 = vpop.eup %10851  ;;  %9599 = vmatpush3.bf16.msra.mxu0 %v10439_v46  ;;  %v10455_v59 = vld [vmem:[%s13586_s5 + $0x128] sm:$0xff]  }
 0x2a9   :  { %v10854_v61 = vpop.eup %10853  ;;  %v2872_v1 = vadd.f32 1.0, %v10852_v60  ;;  %9621 = vmatpush3.bf16.msra.mxu1 %v10440_v47  ;;  %9600 = vmatprep.subr.bf16.mxu0 %v10441_v6 }
 0x2aa   :  { %10865 = vrcp.f32 %v3931_v57  ;;  %v10856_v18 = vpop.eup %10855  ;;  %v3933_v22 = vadd.f32 1.0, %v10854_v61  ;;  %9622 = vmatprep.subr.bf16.mxu1 %v10442_v55  ;;  %v10457_v57 = vld [vmem:[%s13586_s5 + $0x170] sm:$0xff]  }
 0x2ab   :  { %10867 = vrcp.f32 %v2870_v54  ;;  %v10858_v23 = vpop.eup %10857  ;;  %v6089_v27 = vadd.f32 1.0, %v10856_v18  ;;  %v10456_v54 = vld [vmem:[%s13586_s5 + $0x1a8] sm:$0xff]   ;;  %v8366_v18 = vmul.f32 -1.442695, %v3900_v51 }
 0x2ac   :  { %10869 = vrcp.f32 %v2872_v1  ;;  %v2871_v30 = vadd.f32 1.0, %v10858_v23  ;;  %9601 = vmatpush3.bf16.msra.mxu0 %v10443_v58  ;;  %v10860_v7 = vpop.eup %10859  ;;  %v10458_v58 = vld [vmem:[%s13586_s5 + $0x1f0] sm:$0xff]   ;;  %v10468_v51 = vld [vmem:[%s13586_s5 + $0x208] sm:$0xff]  }
 0x2ad   :  { %10871 = vrcp.f32 %v3933_v22  ;;  %9623 = vmatpush3.bf16.msra.mxu1 %v10444_v62  ;;  %9602 = vmatprep.subr.bf16.mxu0 %v10445_v56  ;;  %v10862_v12 = vpop.eup %10861  ;;  %v2873_v45 = vadd.f32 1.0, %v10860_v7  ;;  %v10459_v22 = vld [vmem:[%s13586_s5 + $0x130] sm:$0xff]  }
 0x2ae   :  { %10873 = vrcp.f32 %v6089_v27  ;;  %9624 = vmatprep.subr.bf16.mxu1 %v10446_v4  ;;  %v3934_v32 = vadd.f32 1.0, %v10862_v12  ;;  %v10864_v43 = vpop.eup %10863  ;;  %v10460_v4 = vld [vmem:[%s13586_s5 + $0x1b0] sm:$0xff]   ;;  %v10461_v27 = vld [vmem:[%s13586_s5 + $0x178] sm:$0xff]  }
 0x2af   :  { %10875 = vrcp.f32 %v2871_v30 }
 0x2b0   :  { %10877 = vrcp.f32 %v2873_v45  ;;  %9603 = vmatpush3.bf16.msra.mxu0 %v10447_v29  ;;  %v10462_v29 = vld [vmem:[%s13586_s5 + $0x1f8] sm:$0xff]  }
 0x2b1   :  { %9625 = vmatpush3.bf16.msra.mxu1 %v10448_v31  ;;  %10879 = vrcp.f32 %v3934_v32  ;;  %9604 = vmatprep.subr.bf16.mxu0 %v10449_v25 }
 0x2b2   :  { %9626 = vmatprep.subr.bf16.mxu1 %v10450_v52  ;;  %v3952_v52 = vmul.f32 %v10864_v43, %v12069_v16  ;;  %10881 = vpow2.f32 %v8366_v18  ;;  %v10476_v18 = vld [vmem:[%s13586_s5 + $0x228] sm:$0xff]  }
 0x2b4   :  { %v10866_v40 = vpop.eup %10865  ;;  %9605 = vmatpush3.bf16.msra.mxu0 %v10451_v13  ;;  %v10463_v13 = vld [vmem:[%s13586_s5 + $0x138] sm:$0xff]  }
 0x2b5   :  { %v10868_v46 = vpop.eup %10867  ;;  %v3955_v47 = vmul.f32 %v10866_v40, %v12088_v5  ;;  %9627 = vmatpush3.bf16.msra.mxu1 %v10452_v14  ;;  %9606 = vmatprep.subr.bf16.mxu0 %v10453_v33  ;;  %v10464_v14 = vld [vmem:[%s13586_s5 + $0x1b8] sm:$0xff]   ;;  %v10465_v40 = vld [vmem:[%s13586_s5 + $0x240] sm:$0xff]  }
 0x2b6   :  { %v10870_v6 = vpop.eup %10869  ;;  %9628 = vmatprep.subr.bf16.mxu1 %v10454_v44  ;;  %v2894_v30 = vmul.f32 %v10868_v46, %v11232_v17  ;;  %v3960_v46 = vadd.f32 %v3952_v52, %v12069_v16  ;;  %v10467_v16 = vld [vmem:[%s13586_s5 + $0x248] sm:$0xff]   ;;  %v12346_v52 = vpack.c.bf16 %v12104_v34, %v12104_v34  ;;  %v10485_v34 = vld [vmem:[%s13586_s5 + $0x350] sm:$0xff]  }
 0x2b7   :  { %v10872_v55 = vpop.eup %10871  ;;  %v12231_v60 = vadd.f32 %v3955_v47, %v12088_v5  ;;  %v2896_v31 = vmul.f32 %v10870_v6, %v11242_v21 }
 0x2b8   :  { %v10874_v62 = vpop.eup %10873  ;;  %v3957_v61 = vmul.f32 %v10872_v55, %v12091_v8  ;;  %9607 = vmatpush3.bf16.msra.mxu0 %v10455_v59  ;;  %v2902_v44 = vadd.f32 %v2894_v30, %v11232_v17  ;;  %v10466_v17 = vld [vmem:[%s13586_s5 + $0x200] sm:$0xff]   ;;  %v10469_v59 = vld [vmem:[%s13586_s5 + $0x250] sm:$0xff]   ;;  %v10480_v30 = vld [vmem:[%s13586_s5 + $0x238] sm:$0xff]  }
 0x2b9   :  { %v10876_v1 = vpop.eup %10875  ;;  %v6113_v56 = vmul.f32 %v10874_v62, %v12094_v10  ;;  %9629 = vmatpush3.bf16.msra.mxu1 %v10456_v54  ;;  %9608 = vmatprep.subr.bf16.mxu0 %v10457_v57  ;;  %v2904_v43 = vadd.f32 %v2896_v31, %v11242_v21  ;;  %v10470_v55 = vld [vmem:[%s13586_s5 + $0x210] sm:$0xff]   ;;  %v10472_v62 = vld [vmem:[%s13586_s5 + $0x218] sm:$0xff]   ;;  %v10481_v31 = vld [vmem:[%s13586_s5 + $0x340] sm:$0xff]  }
 0x2ba   :  { %v2895_v5 = vmul.f32 %v10876_v1, %v11239_v20  ;;  %v12243_v23 = vadd.f32 %v3957_v61, %v12091_v8  ;;  %9630 = vmatprep.subr.bf16.mxu1 %v10458_v58  ;;  %v10878_v7 = vpop.eup %10877  ;;  %v12285_v21 = vpack.c.bf16 %v2902_v44, %v2902_v44  ;;  %v10471_v58 = vld [vmem:[%s13586_s5 + $0x258] sm:$0xff]   ;;  %v10473_v61 = vld [vmem:[%s13586_s5 + $0x260] sm:$0xff]  }
 0x2bb   :  { %v12254_v25 = vadd.f32 %v6113_v56, %v12094_v10  ;;  %v10880_v12 = vpop.eup %10879  ;;  %v2897_v45 = vmul.f32 %v10878_v7, %v11256_v26  ;;  %v10474_v1 = vld [vmem:[%s13586_s5 + $0x220] sm:$0xff]   ;;  %v10475_v56 = vld [vmem:[%s13586_s5 + $0x268] sm:$0xff]  }
 0x2bc   :  { %v2903_v8 = vadd.f32 %v2895_v5, %v11239_v20  ;;  %9609 = vmatpush3.bf16.msra.mxu0 %v10459_v22  ;;  %v3958_v20 = vmul.f32 %v10880_v12, %v12117_v53  ;;  %v10882_v54 = vpop.eup %10881  ;;  %v10477_v22 = vld [vmem:[%s13586_s5 + $0x270] sm:$0xff]   ;;  %v10483_v12 = vld [vmem:[%s13586_s5 + $0x348] sm:$0xff]   ;;  %v10490_v44 = vld [vmem:[%s13586_s5 + $0x320] sm:$0xff]  }
 0x2bd   :  { %9631 = vmatpush3.bf16.msra.mxu1 %v10460_v4  ;;  %9610 = vmatprep.subr.bf16.mxu0 %v10461_v27  ;;  %v2905_v33 = vadd.f32 %v2897_v45, %v11256_v26  ;;  %v12287_v26 = vpack.c.bf16 %v2904_v43, %v2904_v43  ;;  %v3932_v57 = vadd.f32 1.0, %v10882_v54  ;;  %v10478_v5 = vld [vmem:[%s13586_s5 + $0x230] sm:$0xff]   ;;  %v10479_v27 = vld [vmem:[%s13586_s5 + $0x278] sm:$0xff]   ;;  %v10491_v43 = vld [vmem:[%s13586_s5 + $0x368] sm:$0xff]   ;;  %v12397_v54 = vpack.c.bf16 %v12231_v60, %v12231_v60 }
 0x2be   :  { %v12265_v32 = vpack.c.bf16 %v2903_v8, %v2903_v8  ;;  %9632 = vmatprep.subr.bf16.mxu1 %v10462_v29  ;;  %v12277_v47 = vadd.f32 %v3958_v20, %v12117_v53  ;;  %v12292_v53 = vpack.c.bf16 %v3960_v46, %v3960_v46  ;;  %v10482_v8 = vld [vmem:[%s13586_s5 + $0x300] sm:$0xff]   ;;  %v10488_v20 = vld [vmem:[%s13586_s5 + $0x318] sm:$0xff]   ;;  %v10493_v46 = vld [vmem:[%s13586_s5 + $0x370] sm:$0xff]  }
 0x2bf   :  { %v12279_v6 = vpack.c.bf16 %v2905_v33, %v2905_v33  ;;  %10883 = vrcp.f32 %v3932_v57  ;;  %v10489_v33 = vld [vmem:[%s13586_s5 + $0x360] sm:$0xff]   ;;  %v10498_v57 = vld [vmem:[%s13588_s8 + $0x8] sm:$0xff]   ;;  %v10499_v60 = vld [vmem:[%s13588_s8 + $0x10] sm:$0xff]  }
 0x2c0   :  { %3538 = vmatprep.mubr.bf16.mxu0 %v12265_v32  ;;  %9611 = vmatpush3.bf16.msra.mxu0 %v10463_v13  ;;  %v10486_v13 = vld [vmem:[%s13586_s5 + $0x310] sm:$0xff]  }
 0x2c1   :  { %9633 = vmatpush3.bf16.msra.mxu1 %v10464_v14  ;;  %3578 = vmatprep.mubr.bf16.mxu1 %v12279_v6  ;;  %v10487_v14 = vld [vmem:[%s13586_s5 + $0x358] sm:$0xff]  }
 0x2c2   :  { %9649 = vmatprep.subr.bf16.mxu1 %v10465_v40  ;;  %v10492_v40 = vld [vmem:[%s13586_s5 + $0x328] sm:$0xff]  }
 0x2c3   :  { %3539 = vmatmul.mubr.bf16.vlgmr.msra.gmra.mrb[36].mxu0 %v12285_v21 }
 0x2c4   :  { %3579 = vmatmul.mubr.bf16.vlgmr.msra.gmra.mrb[36].mxu1 %v12287_v26 }
 0x2c5   :  { %9650 = vmatpush3.bf16.msra.mxu1 %v10466_v17  ;;  %4520 = vmatprep.mubr.bf16.mxu1 %v12292_v53  ;;  %v10494_v17 = vld [vmem:[%s13586_s5 + $0x330] sm:$0xff]  }
 0x2c6   :  { %9651 = vmatprep.subr.bf16.mxu1 %v10467_v16  ;;  %v10495_v16 = vld [vmem:[%s13586_s5 + $0x378] sm:$0xff]  }
 0x2c9   :  { %9652 = vmatpush3.bf16.msra.mxu1 %v10468_v51  ;;  %v10884_v4 = vpop.eup %10883  ;;  %v10924_v51 = vmov 0.0  }
 0x2ca   :  { %9653 = vmatprep.subr.bf16.mxu1 %v10469_v59  ;;  %v3956_v29 = vmul.f32 %v10884_v4, %v12210_v39  ;;  %10116 = vmatprep.subr.bf16.mxu0 %v10924_v51  ;;  %v10496_v59 = vld [vmem:[%s13586_s5 + $0x338] sm:$0xff]  }
 0x2cb   :  { %10132 = vmatprep.mubr.msk.bf16.mxu0 %vm10925_vm0, %v10924_v51 }
 0x2cc   :  { %v3964_v7 = vadd.f32 %v3956_v29, %v12210_v39  ;;  %v10484_v39 = vld [vmem:[%s13586_s5 + $0x308] sm:$0xff]  }
 0x2cd   :  { %9654 = vmatpush3.bf16.msra.mxu1 %v10470_v55  ;;  %v10497_v55 = vld [vmem:[%s13588_s8] sm:$0xff]  }
 0x2ce   :  { %9655 = vmatprep.subr.bf16.mxu1 %v10471_v58  ;;  %v12351_v45 = vpack.c.bf16 %v3964_v7, %v3964_v7  ;;  %10117 = vmatpush3.bf16.msra.mxu0 %v10497_v55  ;;  %v10500_v58 = vld [vmem:[%s13588_s8 + $0x18] sm:$0xff]  }
 0x2cf   :  { %10118 = vmatprep.subr.bf16.mxu0 %v10924_v51 }
 0x2d1   :  { %9656 = vmatpush3.bf16.msra.mxu1 %v10472_v62  ;;  %v10501_v62 = vld [vmem:[%s13588_s8 + $0x20] sm:$0xff]  }
 0x2d2   :  { %9657 = vmatprep.subr.bf16.mxu1 %v10473_v61  ;;  %10119 = vmatpush3.bf16.msra.mxu0 %v10498_v57  ;;  %v10502_v61 = vld [vmem:[%s13588_s8 + $0x28] sm:$0xff]   ;;  %v8348_v57 = vld [vmem:[%s13591_s7] ss:$0 sm:$0xff] }
 0x2d3   :  { %10120 = vmatprep.subr.bf16.mxu0 %v10924_v51 }
 0x2d5   :  { %9658 = vmatpush3.bf16.msra.mxu1 %v10474_v1  ;;  %v10503_v1 = vld [vmem:[%s13588_s8 + $0x30] sm:$0xff]  }
 0x2d6   :  { %9659 = vmatprep.subr.bf16.mxu1 %v10475_v56  ;;  %10121 = vmatpush3.bf16.msra.mxu0 %v10499_v60  ;;  %v10504_v56 = vld [vmem:[%s13588_s8 + $0x38] sm:$0xff]  }
 0x2d7   :  { %10122 = vmatprep.subr.bf16.mxu0 %v10924_v51 }
 0x2d9   :  { %9660 = vmatpush3.bf16.msra.mxu1 %v10476_v18  ;;  %v10505_v18 = vld [vmem:[%s13586_s5 + $0x2c0] sm:$0xff]  }
 0x2da   :  { %9661 = vmatprep.subr.bf16.mxu1 %v10477_v22  ;;  %10123 = vmatpush3.bf16.msra.mxu0 %v10500_v58 }
 0x2db   :  { %10124 = vmatprep.subr.bf16.mxu0 %v10924_v51 }
 0x2dd   :  { %9662 = vmatpush3.bf16.msra.mxu1 %v10478_v5 }
 0x2de   :  { %9663 = vmatprep.subr.bf16.mxu1 %v10479_v27  ;;  %10125 = vmatpush3.bf16.msra.mxu0 %v10501_v62 }
 0x2df   :  { %10126 = vmatprep.subr.bf16.mxu0 %v10924_v51 }
 0x2e1   :  { %9664 = vmatpush3.bf16.msra.mxu1 %v10480_v30 }
 0x2e2   :  { %9693 = vmatprep.subr.bf16.mxu1 %v10481_v31  ;;  %10127 = vmatpush3.bf16.msra.mxu0 %v10502_v61 }
 0x2e3   :  { %10128 = vmatprep.subr.bf16.mxu0 %v10924_v51 }
 0x2e4   :  { %4521 = vmatmul.mubr.bf16.vlgmr.msra.gmra.mrb[40].mxu1 %v12346_v52 }
 0x2e5   :  { %9694 = vmatpush3.bf16.msra.mxu1 %v10482_v8  ;;  %4600 = vmatprep.mubr.bf16.mxu1 %v12351_v45 }
 0x2e6   :  { %9695 = vmatprep.subr.bf16.mxu1 %v10483_v12  ;;  %10129 = vmatpush3.bf16.msra.mxu0 %v10503_v1 }
 0x2e7   :  { %10130 = vmatprep.subr.bf16.mxu0 %v10924_v51 }
 0x2e9   :  { %9696 = vmatpush3.bf16.msra.mxu1 %v10484_v39 }
 0x2ea   :  { %9697 = vmatprep.subr.bf16.mxu1 %v10485_v34  ;;  %10131 = vmatpush3.bf16.msra.mxu0 %v10504_v56 }
 0x2eb   :  { %9671 = vmatprep.subr.bf16.mxu0 %v10505_v18  ;;  %v10506_v18 = vld [vmem:[%s13586_s5 + $0x280] sm:$0xff]  }
 0x2ed   :  { %9698 = vmatpush3.bf16.msra.mxu1 %v10486_v13 }
 0x2ee   :  { %9699 = vmatprep.subr.bf16.mxu1 %v10487_v14 }
 0x2f1   :  { %9700 = vmatpush3.bf16.msra.mxu1 %v10488_v20 }
 0x2f2   :  { %9701 = vmatprep.subr.bf16.mxu1 %v10489_v33 }
 0x2f5   :  { %9702 = vmatpush3.bf16.msra.mxu1 %v10490_v44 }
 0x2f6   :  { %9703 = vmatprep.subr.bf16.mxu1 %v10491_v43 }
 0x2f9   :  { %9704 = vmatpush3.bf16.msra.mxu1 %v10492_v40 }
 0x2fa   :  { %9705 = vmatprep.subr.bf16.mxu1 %v10493_v46 }
 0x2fd   :  { %9706 = vmatpush3.bf16.msra.mxu1 %v10494_v17 }
 0x2fe   :  { %9707 = vmatprep.subr.bf16.mxu1 %v10495_v16 }
 0x301   :  { %9708 = vmatpush3.bf16.msra.mxu1 %v10496_v59  ;;  %v8347_v59 = vld [vmem:[%s13590_s6] ss:$0 sm:$0xff] }
 0x302   :  { %10136 = vmatprep.subr.bf16.mxu1 %v10924_v51 }
 0x304   :  { %4601 = vmatmul.mubr.bf16.vlgmr.msra.gmra.mrb[44].mxu1 %v12397_v54 }
 0x305   :  { %10152 = vmatprep.mubr.msk.bf16.mxu1 %vm10925_vm0, %v10924_v51 }
 0x376   :  { %v9568_v22 = vpop.f32.mrb[32].mxu0 }
 0x377   :  { %v9590_v4 = vpop.f32.mrb[32].mxu1  ;;  %v9569_v5 = vpop.f32.mrb[33].mxu0 }
 0x378   :  { %v9591_v27 = vpop.f32.mrb[33].mxu1  ;;  %v9570_v29 = vadd.f32 %v9569_v5, %v9568_v22  ;;  %v9571_v31 = vpop.f32.mrb[34].mxu0  ;;  %v10507_v22 = vld [vmem:[%s13586_s5 + $0x2c8] sm:$0xff]  }
 0x379   :  { %v9592_v30 = vadd.f32 %v9591_v27, %v9590_v4  ;;  %v9593_v7 = vpop.f32.mrb[34].mxu1  ;;  %v9572_v8 = vpop.f32.mrb[35].mxu0  ;;  %v12453_v27 = vpack.c.bf16 %v12153_v38, %v12153_v38  ;;  %v10508_v31 = vld [vmem:[%s13586_s5 + $0x288] sm:$0xff]  }
 0x37a   :  { %v9594_v12 = vpop.f32.mrb[35].mxu1 }
 0x37b   :  { %v3501_v39 = vadd.f32 %v9592_v30, %v9570_v29  ;;  %v10509_v12 = vld [vmem:[%s13586_s5 + $0x2d0] sm:$0xff]  }
 0x396   :  { %v9612_v34 = vpop.f32.mrb[36].mxu0 }
 0x397   :  { %v9634_v13 = vpop.f32.mrb[36].mxu1  ;;  %v9613_v14 = vpop.f32.mrb[37].mxu0 }
 0x398   :  { %v9635_v20 = vpop.f32.mrb[37].mxu1  ;;  %v9614_v33 = vadd.f32 %v9613_v14, %v9612_v34  ;;  %v9615_v43 = vpop.f32.mrb[38].mxu0  ;;  %v10511_v34 = vld [vmem:[%s13586_s5 + $0x2d8] sm:$0xff]   ;;  %v10513_v14 = vld [vmem:[%s13586_s5 + $0x2e0] sm:$0xff]  }
 0x399   :  { %v9636_v44 = vadd.f32 %v9635_v20, %v9634_v13  ;;  %v9637_v40 = vpop.f32.mrb[38].mxu1  ;;  %v9616_v46 = vpop.f32.mrb[39].mxu0  ;;  %v10512_v13 = vld [vmem:[%s13586_s5 + $0x298] sm:$0xff]   ;;  %v10514_v20 = vld [vmem:[%s13586_s5 + $0x2a0] sm:$0xff]   ;;  %v10517_v43 = vld [vmem:[%s13586_s5 + $0x2f0] sm:$0xff]  }
 0x39a   :  { %v9638_v17 = vpop.f32.mrb[39].mxu1  ;;  %v3541_v16 = vadd.f32 %v9614_v33, %v3501_v39  ;;  %v10510_v39 = vld [vmem:[%s13586_s5 + $0x290] sm:$0xff]   ;;  %v10515_v33 = vld [vmem:[%s13586_s5 + $0x2e8] sm:$0xff]   ;;  %v10519_v46 = vld [vmem:[%s13586_s5 + $0x2f8] sm:$0xff]  }
 0x39b   :  { %v10518_v40 = vld [vmem:[%s13586_s5 + $0x2b0] sm:$0xff]   ;;  %v10520_v17 = vld [vmem:[%s13586_s5 + $0x2b8] sm:$0xff]  }
 0x39c   :  { %v3581_v55 = vadd.f32 %v9636_v44, %v3541_v16  ;;  %v10516_v44 = vld [vmem:[%s13586_s5 + $0x2a8] sm:$0xff]   ;;  %v10521_v16 = vld [vmem:[%s13586_s5 + $0x3c0] sm:$0xff]  }
 0x39e   :  { %v3593_v60 = vmul.f32 %v8347_v59, %v3581_v55  ;;  %v10522_v59 = vld [vmem:[%s13586_s5 + $0x380] sm:$0xff]   ;;  %v10523_v55 = vld [vmem:[%s13586_s5 + $0x3c8] sm:$0xff]  }
 0x3a0   :  { %v3601_v58 = vadd.f32 %v8348_v57, %v3593_v60  ;;  %v12508_v57 = vpack.c.bf16 %v12170_v50, %v12170_v50  ;;  %v12512_v60 = vpack.c.bf16 %v12277_v47, %v12277_v47  ;;  %v10525_v47 = vld [vmem:[%s13586_s5 + $0x3d0] sm:$0xff]  }
 0x3a2   :  { %v3603_v62 = vmin.f32 %v3601_v58, 0.0  ;;  %vm3602_vm1 = vcmp.gt.f32.partialorder %v3601_v58, 0.0 }
 0x3a4   :  { %v3604_v61 = vmul.f32 1.442695, %v3603_v62 }
 0x3a6   :  { %10885 = vpow2.f32 %v3604_v61  ;;  %v10524_v61 = vld [vmem:[%s13586_s5 + $0x388] sm:$0xff]  }
 0x3b0   :  { %v10886_v1 = vpop.eup %10885 }
 0x3b1   :  { %v8349_v56 = vadd.f32 -1.0, %v10886_v1 }
 0x3b3   :  { %v3607_v4 = vsel %vm3602_vm1, %v3601_v58, %v8349_v56 }
 0x3b4   :  { %v3608_v5 = vpack.c.bf16 %v3607_v4, %v3607_v4  ;;  %v10528_v4 = vld [vmem:[%s13586_s5 + $0x398] sm:$0xff]  }
 0x3b6   :  { %10133 = vmatmul.mubr.bf16.vlgmr.msra.gmra.mrb[40].mxu0 %v3608_v5  ;;  %v10529_v5 = vld [vmem:[%s13586_s5 + $0x3e0] sm:$0xff]  }
 0x3b7   :  { %v9665_v29 = vpop.f32.mrb[40].mxu1  ;;  %9672 = vmatpush3.bf16.msra.mxu0 %v10506_v18  ;;  %4560 = vmatprep.mubr.bf16.mxu0 %v12453_v27  ;;  %v10526_v18 = vld [vmem:[%s13586_s5 + $0x390] sm:$0xff]  }
 0x3b8   :  { %v9666_v30 = vpop.f32.mrb[41].mxu1  ;;  %9673 = vmatprep.subr.bf16.mxu0 %v10507_v22  ;;  %v10527_v22 = vld [vmem:[%s13586_s5 + $0x3d8] sm:$0xff]  }
 0x3b9   :  { %v12459_v7 = vadd.f32 %v9666_v30, %v9665_v29  ;;  %v9668_v8 = vpop.f32.mrb[42].mxu1  ;;  %v10530_v29 = vld [vmem:[%s13586_s5 + $0x3a0] sm:$0xff]   ;;  %v10531_v30 = vld [vmem:[%s13586_s5 + $0x3e8] sm:$0xff]  }
 0x3ba   :  { %v9669_v38 = vpop.f32.mrb[43].mxu1  ;;  %v10533_v8 = vld [vmem:[%s13586_s5 + $0x3f0] sm:$0xff]  }
 0x3bb   :  { %9674 = vmatpush3.bf16.msra.mxu0 %v10508_v31  ;;  %v10532_v31 = vld [vmem:[%s13586_s5 + $0x3a8] sm:$0xff]   ;;  %v10535_v38 = vld [vmem:[%s13586_s5 + $0x3f8] sm:$0xff]  }
 0x3bc   :  { %9675 = vmatprep.subr.bf16.mxu0 %v10509_v12  ;;  %v10534_v12 = vld [vmem:[%s13586_s5 + $0x3b0] sm:$0xff]  }
 0x3bf   :  { %9676 = vmatpush3.bf16.msra.mxu0 %v10510_v39  ;;  %v10536_v39 = vld [vmem:[%s13586_s5 + $0x3b8] sm:$0xff]  }
 0x3c0   :  { %9677 = vmatprep.subr.bf16.mxu0 %v10511_v34  ;;  %v10537_v34 = vld [vmem:[%s13589_s10 + $0x240] sm:$0xff]  }
 0x3c3   :  { %9678 = vmatpush3.bf16.msra.mxu0 %v10512_v13  ;;  %v10538_v13 = vld [vmem:[%s13589_s10 + $0x200] sm:$0xff]  }
 0x3c4   :  { %9679 = vmatprep.subr.bf16.mxu0 %v10513_v14  ;;  %v10539_v14 = vld [vmem:[%s13589_s10 + $0x248] sm:$0xff]  }
 0x3c7   :  { %9680 = vmatpush3.bf16.msra.mxu0 %v10514_v20  ;;  %v12568_v20 = vpack.c.bf16 %v12243_v23, %v12243_v23  ;;  %v10542_v23 = vld [vmem:[%s13589_s10 + $0x210] sm:$0xff]  }
 0x3c8   :  { %9681 = vmatprep.subr.bf16.mxu0 %v10515_v33  ;;  %v10540_v33 = vld [vmem:[%s13589_s10 + $0x208] sm:$0xff]  }
 0x3cb   :  { %9682 = vmatpush3.bf16.msra.mxu0 %v10516_v44  ;;  %v10541_v44 = vld [vmem:[%s13589_s10 + $0x250] sm:$0xff]  }
 0x3cc   :  { %9683 = vmatprep.subr.bf16.mxu0 %v10517_v43  ;;  %v10543_v43 = vld [vmem:[%s13589_s10 + $0x258] sm:$0xff]  }
 0x3cf   :  { %9684 = vmatpush3.bf16.msra.mxu0 %v10518_v40  ;;  %v10545_v40 = vld [vmem:[%s13589_s10 + $0x260] sm:$0xff]  }
 0x3d0   :  { %9685 = vmatprep.subr.bf16.mxu0 %v10519_v46  ;;  %v10546_v46 = vld [vmem:[%s13589_s10 + $0x220] sm:$0xff]  }
 0x3d3   :  { %9686 = vmatpush3.bf16.msra.mxu0 %v10520_v17  ;;  %v10547_v17 = vld [vmem:[%s13589_s10 + $0x268] sm:$0xff]  }
 0x3d4   :  { %9715 = vmatprep.subr.bf16.mxu0 %v10521_v16  ;;  %v10548_v16 = vld [vmem:[%s13589_s10 + $0x228] sm:$0xff]  }
 0x3d6   :  { %4561 = vmatmul.mubr.bf16.vlgmr.msra.gmra.mrb[44].mxu0 %v12508_v57 }
 0x3d7   :  { %v9709_v58 = vpop.f32.mrb[44].mxu1  ;;  %9716 = vmatpush3.bf16.msra.mxu0 %v10522_v59  ;;  %4640 = vmatprep.mubr.bf16.mxu0 %v12512_v60  ;;  %v10549_v59 = vld [vmem:[%s13589_s10 + $0x270] sm:$0xff]  }
 0x3d8   :  { %v9710_v62 = vpop.f32.mrb[45].mxu1  ;;  %9717 = vmatprep.subr.bf16.mxu0 %v10523_v55  ;;  %v10550_v55 = vld [vmem:[%s13589_s10 + $0x230] sm:$0xff]  }
 0x3d9   :  { %v12519_v1 = vadd.f32 %v9710_v62, %v9709_v58  ;;  %v9712_v50 = vpop.f32.mrb[46].mxu1  ;;  %v10551_v58 = vld [vmem:[%s13589_s10 + $0x278] sm:$0xff]  }
 0x3da   :  { %v9713_v56 = vpop.f32.mrb[47].mxu1  ;;  %v10552_v62 = vld [vmem:[%s13589_s10 + $0x238] sm:$0xff]   ;;  %v10554_v50 = vld [vmem:[%s13589_s10 + $0x300] sm:$0xff]  }
 0x3db   :  { %9718 = vmatpush3.bf16.msra.mxu0 %v10524_v61  ;;  %v10553_v61 = vld [vmem:[%s13589_s10 + $0x340] sm:$0xff]   ;;  %v10556_v56 = vld [vmem:[%s13589_s10 + $0x308] sm:$0xff]  }
 0x3dc   :  { %9719 = vmatprep.subr.bf16.mxu0 %v10525_v47  ;;  %v10555_v47 = vld [vmem:[%s13589_s10 + $0x348] sm:$0xff]  }
 0x3df   :  { %9720 = vmatpush3.bf16.msra.mxu0 %v10526_v18  ;;  %v10557_v18 = vld [vmem:[%s13589_s10 + $0x350] sm:$0xff]  }
 0x3e0   :  { %9721 = vmatprep.subr.bf16.mxu0 %v10527_v22  ;;  %v10558_v22 = vld [vmem:[%s13589_s10 + $0x310] sm:$0xff]  }
 0x3e3   :  { %9722 = vmatpush3.bf16.msra.mxu0 %v10528_v4  ;;  %v10561_v4 = vld [vmem:[%s13589_s10 + $0x360] sm:$0xff]  }
 0x3e4   :  { %9723 = vmatprep.subr.bf16.mxu0 %v10529_v5  ;;  %v10562_v5 = vld [vmem:[%s13589_s10 + $0x320] sm:$0xff]  }
 0x3e7   :  { %9724 = vmatpush3.bf16.msra.mxu0 %v10530_v29  ;;  %v10563_v29 = vld [vmem:[%s13589_s10 + $0x368] sm:$0xff]  }
 0x3e8   :  { %9725 = vmatprep.subr.bf16.mxu0 %v10531_v30  ;;  %v10564_v30 = vld [vmem:[%s13589_s10 + $0x328] sm:$0xff]  }
 0x3eb   :  { %9726 = vmatpush3.bf16.msra.mxu0 %v10532_v31  ;;  %v10565_v31 = vld [vmem:[%s13589_s10 + $0x370] sm:$0xff]  }
 0x3ec   :  { %9727 = vmatprep.subr.bf16.mxu0 %v10533_v8  ;;  %v10566_v8 = vld [vmem:[%s13589_s10 + $0x330] sm:$0xff]  }
 0x3ef   :  { %9728 = vmatpush3.bf16.msra.mxu0 %v10534_v12  ;;  %v10567_v12 = vld [vmem:[%s13589_s10 + $0x378] sm:$0xff]  }
 0x3f0   :  { %9729 = vmatprep.subr.bf16.mxu0 %v10535_v38  ;;  %v10568_v38 = vld [vmem:[%s13589_s10 + $0x338] sm:$0xff]  }
 0x3f3   :  { %9730 = vmatpush3.bf16.msra.mxu0 %v10536_v39  ;;  %v10569_v39 = vld [vmem:[%s13589_s10 + $0x40] sm:$0xff]  }
 0x3f4   :  { %9746 = vmatprep.subr.bf16.mxu0 %v10537_v34  ;;  %v10570_v34 = vld [vmem:[%s13589_s10] sm:$0xff]  }
 0x3f6   :  { %4641 = vmatmul.mubr.bf16.vlgmr.msra.gmra.mrb[48].mxu0 %v12568_v20 }
 0x3f7   :  { %9747 = vmatpush3.bf16.msra.mxu0 %v10538_v13  ;;  %5333 = vmatprep.mubr.bf16.mxu0 %v12292_v53  ;;  %v10544_v53 = vld [vmem:[%s13589_s10 + $0x218] sm:$0xff]   ;;  %v10571_v13 = vld [vmem:[%s13589_s10 + $0x48] sm:$0xff]  }
 0x3f8   :  { %9748 = vmatprep.subr.bf16.mxu0 %v10539_v14  ;;  %v10633_v14 = vld [vmem:[%s13588_s8 + $0x40] sm:$0xff]  }
 0x3f9   :  { %10137 = vmatpush3.bf16.msra.mxu1 %v10633_v14  ;;  %v6056_v14 = vmul.f32 %v12099_v15, %v11680_v24  ;;  %v10599_v15 = vld [vmem:[%s13589_s10 + $0x178] sm:$0xff]  }
 0x3fa   :  { %10138 = vmatprep.subr.bf16.mxu1 %v10924_v51 }
 0x3fb   :  { %9749 = vmatpush3.bf16.msra.mxu0 %v10540_v33  ;;  %v10572_v33 = vld [vmem:[%s13589_s10 + $0x8] sm:$0xff]  }
 0x3fc   :  { %9750 = vmatprep.subr.bf16.mxu0 %v10541_v44  ;;  %v10573_v44 = vld [vmem:[%s13589_s10 + $0x50] sm:$0xff]  }
 0x3ff   :  { %9751 = vmatpush3.bf16.msra.mxu0 %v10542_v23  ;;  %v10576_v23 = vld [vmem:[%s13589_s10 + $0x18] sm:$0xff]  }
 0x400   :  { %9752 = vmatprep.subr.bf16.mxu0 %v10543_v43  ;;  %v10577_v43 = vld [vmem:[%s13589_s10 + $0x60] sm:$0xff]  }
 0x403   :  { %9753 = vmatpush3.bf16.msra.mxu0 %v10544_v53  ;;  %v10578_v53 = vld [vmem:[%s13589_s10 + $0x20] sm:$0xff]  }
 0x404   :  { %9754 = vmatprep.subr.bf16.mxu0 %v10545_v40  ;;  %v10579_v40 = vld [vmem:[%s13589_s10 + $0x68] sm:$0xff]  }
 0x407   :  { %9755 = vmatpush3.bf16.msra.mxu0 %v10546_v46  ;;  %v6052_v46 = vmul.f32 %v12045_v2, %v11562_v41  ;;  %v10583_v2 = vld [vmem:[%s13589_s10 + $0x78] sm:$0xff]  }
 0x408   :  { %9756 = vmatprep.subr.bf16.mxu0 %v10547_v17  ;;  %v10580_v17 = vld [vmem:[%s13589_s10 + $0x28] sm:$0xff]  }
 0x40b   :  { %9757 = vmatpush3.bf16.msra.mxu0 %v10548_v16  ;;  %v10581_v16 = vld [vmem:[%s13589_s10 + $0x70] sm:$0xff]  }
 0x40c   :  { %9758 = vmatprep.subr.bf16.mxu0 %v10549_v59  ;;  %v8852_v59 = vmul.f32 -1.442695, %v6052_v46 }
 0x40e   :  { %10887 = vpow2.f32 %v8852_v59 }
 0x40f   :  { %9759 = vmatpush3.bf16.msra.mxu0 %v10550_v55  ;;  %v10582_v55 = vld [vmem:[%s13589_s10 + $0x30] sm:$0xff]  }
 0x410   :  { %9760 = vmatprep.subr.bf16.mxu0 %v10551_v58  ;;  %v10634_v58 = vld [vmem:[%s13588_s8 + $0x48] sm:$0xff]  }
 0x411   :  { %10139 = vmatpush3.bf16.msra.mxu1 %v10634_v58 }
 0x412   :  { %10140 = vmatprep.subr.bf16.mxu1 %v10924_v51 }
 0x413   :  { %9761 = vmatpush3.bf16.msra.mxu0 %v10552_v62  ;;  %v10584_v62 = vld [vmem:[%s13589_s10 + $0x38] sm:$0xff]  }
 0x414   :  { %9790 = vmatprep.subr.bf16.mxu0 %v10553_v61  ;;  %v10585_v61 = vld [vmem:[%s13589_s10 + $0x140] sm:$0xff]  }
 0x416   :  { %5334 = vmatmul.mubr.bf16.vlgmr.msra.gmra.mrb[52].mxu0 %v12346_v52  ;;  %v10559_v52 = vld [vmem:[%s13589_s10 + $0x358] sm:$0xff]  }
 0x417   :  { %9791 = vmatpush3.bf16.msra.mxu0 %v10554_v50  ;;  %5413 = vmatprep.mubr.bf16.mxu0 %v12351_v45  ;;  %v10560_v45 = vld [vmem:[%s13589_s10 + $0x318] sm:$0xff]   ;;  %v10635_v50 = vld [vmem:[%s13588_s8 + $0x50] sm:$0xff]  }
 0x418   :  { %9792 = vmatprep.subr.bf16.mxu0 %v10555_v47  ;;  %v10586_v47 = vld [vmem:[%s13589_s10 + $0x100] sm:$0xff]   ;;  %10141 = vmatpush3.bf16.msra.mxu1 %v10635_v50  ;;  %v10607_v50 = vld [vmem:[%s13586_s5 + $0x458] sm:$0xff]  }
 0x419   :  { %10142 = vmatprep.subr.bf16.mxu1 %v10924_v51 }
 0x41b   :  { %9793 = vmatpush3.bf16.msra.mxu0 %v10556_v56  ;;  %v10587_v56 = vld [vmem:[%s13589_s10 + $0x148] sm:$0xff]  }
 0x41c   :  { %9794 = vmatprep.subr.bf16.mxu0 %v10557_v18  ;;  %v10636_v18 = vld [vmem:[%s13588_s8 + $0x58] sm:$0xff]  }
 0x41d   :  { %10143 = vmatpush3.bf16.msra.mxu1 %v10636_v18  ;;  %v10610_v18 = vld [vmem:[%s13586_s5 + $0x420] sm:$0xff]  }
 0x41e   :  { %10144 = vmatprep.subr.bf16.mxu1 %v10924_v51 }
 0x41f   :  { %9795 = vmatpush3.bf16.msra.mxu0 %v10558_v22  ;;  %v10588_v22 = vld [vmem:[%s13589_s10 + $0x108] sm:$0xff]  }
 0x420   :  { %9796 = vmatprep.subr.bf16.mxu0 %v10559_v52  ;;  %v10589_v52 = vld [vmem:[%s13589_s10 + $0x150] sm:$0xff]  }
 0x423   :  { %9797 = vmatpush3.bf16.msra.mxu0 %v10560_v45  ;;  %v10637_v45 = vld [vmem:[%s13588_s8 + $0x60] sm:$0xff]  }
 0x424   :  { %9798 = vmatprep.subr.bf16.mxu0 %v10561_v4  ;;  %v10888_v4 = vpop.eup %10887  ;;  %10145 = vmatpush3.bf16.msra.mxu1 %v10637_v45  ;;  %v8350_v45 = vld [vmem:[%s13592_s9] ss:$0 sm:$0xff] }
 0x425   :  { %10146 = vmatprep.subr.bf16.mxu1 %v10924_v51 }
 0x427   :  { %9799 = vmatpush3.bf16.msra.mxu0 %v10562_v5  ;;  %v10591_v5 = vld [vmem:[%s13589_s10 + $0x158] sm:$0xff]  }
 0x428   :  { %9800 = vmatprep.subr.bf16.mxu0 %v10563_v29  ;;  %v10638_v29 = vld [vmem:[%s13588_s8 + $0x68] sm:$0xff]  }
 0x429   :  { %10147 = vmatpush3.bf16.msra.mxu1 %v10638_v29 }
 0x42a   :  { %10148 = vmatprep.subr.bf16.mxu1 %v10924_v51 }
 0x42b   :  { %9801 = vmatpush3.bf16.msra.mxu0 %v10564_v30  ;;  %v10592_v30 = vld [vmem:[%s13589_s10 + $0x118] sm:$0xff]  }
 0x42c   :  { %9802 = vmatprep.subr.bf16.mxu0 %v10565_v31  ;;  %v10593_v31 = vld [vmem:[%s13589_s10 + $0x160] sm:$0xff]  }
 0x42f   :  { %9803 = vmatpush3.bf16.msra.mxu0 %v10566_v8  ;;  %v10639_v8 = vld [vmem:[%s13588_s8 + $0x70] sm:$0xff]  }
 0x430   :  { %9804 = vmatprep.subr.bf16.mxu0 %v10567_v12  ;;  %v10594_v12 = vld [vmem:[%s13589_s10 + $0x120] sm:$0xff]   ;;  %10149 = vmatpush3.bf16.msra.mxu1 %v10639_v8 }
 0x431   :  { %10150 = vmatprep.subr.bf16.mxu1 %v10924_v51 }
 0x433   :  { %9805 = vmatpush3.bf16.msra.mxu0 %v10568_v38  ;;  %v10595_v38 = vld [vmem:[%s13589_s10 + $0x168] sm:$0xff]  }
 0x434   :  { %9834 = vmatprep.subr.bf16.mxu0 %v10569_v39  ;;  %v10640_v39 = vld [vmem:[%s13588_s8 + $0x78] sm:$0xff]  }
 0x435   :  { %10151 = vmatpush3.bf16.msra.mxu1 %v10640_v39  ;;  %v10615_v39 = vld [vmem:[%s13586_s5 + $0x478] sm:$0xff]  }
 0x436   :  { %5414 = vmatmul.mubr.bf16.vlgmr.msra.gmra.mrb[56].mxu0 %v12397_v54  ;;  %v10574_v54 = vld [vmem:[%s13589_s10 + $0x10] sm:$0xff]  }
 0x437   :  { %9835 = vmatpush3.bf16.msra.mxu0 %v10570_v34  ;;  %5877 = vmatprep.mubr.bf16.mxu0 %v12144_v48  ;;  %v10575_v48 = vld [vmem:[%s13589_s10 + $0x58] sm:$0xff]   ;;  %v10641_v34 = vld [vmem:[%s13589_s10 + $0x2c0] sm:$0xff]  }
 0x438   :  { %9836 = vmatprep.subr.bf16.mxu0 %v10571_v13  ;;  %v6051_v13 = vmul.f32 %v12041_v63, %v11552_v36  ;;  %9768 = vmatprep.subr.bf16.mxu1 %v10641_v34  ;;  %v10598_v63 = vld [vmem:[%s13589_s10 + $0x130] sm:$0xff]  }
 0x43b   :  { %9837 = vmatpush3.bf16.msra.mxu0 %v10572_v33  ;;  %v10596_v33 = vld [vmem:[%s13589_s10 + $0x128] sm:$0xff]  }
 0x43c   :  { %9838 = vmatprep.subr.bf16.mxu0 %v10573_v44  ;;  %v10597_v44 = vld [vmem:[%s13589_s10 + $0x170] sm:$0xff]  }
 0x43f   :  { %9839 = vmatpush3.bf16.msra.mxu0 %v10574_v54 }
 0x440   :  { %9840 = vmatprep.subr.bf16.mxu0 %v10575_v48  ;;  %v8851_v48 = vmul.f32 -1.442695, %v6051_v13 }
 0x443   :  { %9841 = vmatpush3.bf16.msra.mxu0 %v10576_v23  ;;  %v8856_v23 = vmul.f32 -1.442695, %v6056_v14  ;;  %v10616_v14 = vld [vmem:[%s13586_s5 + $0x438] sm:$0xff]  }
 0x444   :  { %9842 = vmatprep.subr.bf16.mxu0 %v10577_v43 }
 0x447   :  { %9843 = vmatpush3.bf16.msra.mxu0 %v10578_v53  ;;  %v10600_v53 = vld [vmem:[%s13589_s10 + $0x138] sm:$0xff]  }
 0x448   :  { %9844 = vmatprep.subr.bf16.mxu0 %v10579_v40  ;;  %v10601_v40 = vld [vmem:[%s13586_s5 + $0x440] sm:$0xff]  }
 0x44b   :  { %9845 = vmatpush3.bf16.msra.mxu0 %v10580_v17  ;;  %v10602_v17 = vld [vmem:[%s13586_s5 + $0x400] sm:$0xff]  }
 0x44c   :  { %9846 = vmatprep.subr.bf16.mxu0 %v10581_v16  ;;  %v10603_v16 = vld [vmem:[%s13586_s5 + $0x448] sm:$0xff]  }
 0x44f   :  { %9847 = vmatpush3.bf16.msra.mxu0 %v10582_v55 }
 0x450   :  { %9848 = vmatprep.subr.bf16.mxu0 %v10583_v2  ;;  %v10605_v2 = vld [vmem:[%s13586_s5 + $0x450] sm:$0xff]  }
 0x453   :  { %9849 = vmatpush3.bf16.msra.mxu0 %v10584_v62 }
 0x454   :  { %9878 = vmatprep.subr.bf16.mxu0 %v10585_v61 }
 0x456   :  { %5878 = vmatmul.mubr.bf16.vlgmr.msra.gmra.mrb[60].mxu0 %v12148_v37  ;;  %v10590_v37 = vld [vmem:[%s13589_s10 + $0x110] sm:$0xff]  }
 0x457   :  { %9879 = vmatpush3.bf16.msra.mxu0 %v10586_v47  ;;  %5957 = vmatprep.mubr.bf16.mxu0 %v12265_v32  ;;  %v6084_v32 = vadd.f32 1.0, %v10888_v4  ;;  %v10608_v47 = vld [vmem:[%s13586_s5 + $0x418] sm:$0xff]   ;;  %v10612_v4 = vld [vmem:[%s13586_s5 + $0x428] sm:$0xff]  }
 0x458   :  { %9880 = vmatprep.subr.bf16.mxu0 %v10587_v56  ;;  %v10609_v56 = vld [vmem:[%s13586_s5 + $0x460] sm:$0xff]  }
 0x459   :  { %10889 = vrcp.f32 %v6084_v32 }
 0x45a   :  { %10891 = vpow2.f32 %v8851_v48  ;;  %v10618_v48 = vld [vmem:[%s13586_s5 + $0x500] sm:$0xff]  }
 0x45b   :  { %9881 = vmatpush3.bf16.msra.mxu0 %v10588_v22  ;;  %10893 = vpow2.f32 %v8856_v23  ;;  %v10611_v22 = vld [vmem:[%s13586_s5 + $0x468] sm:$0xff]  }
 0x45c   :  { %9882 = vmatprep.subr.bf16.mxu0 %v10589_v52  ;;  %v6055_v52 = vmul.f32 %v12097_v11, %v11673_v19 }
 0x45f   :  { %9883 = vmatpush3.bf16.msra.mxu0 %v10590_v37  ;;  %v10613_v37 = vld [vmem:[%s13586_s5 + $0x470] sm:$0xff]  }
 0x460   :  { %9884 = vmatprep.subr.bf16.mxu0 %v10591_v5 }
 0x463   :  { %9885 = vmatpush3.bf16.msra.mxu0 %v10592_v30  ;;  %v10890_v54 = vpop.eup %10889  ;;  %v8855_v30 = vmul.f32 -1.442695, %v6055_v52 }
 0x464   :  { %9886 = vmatprep.subr.bf16.mxu0 %v10593_v31  ;;  %v6108_v43 = vmul.f32 %v10890_v54, %v11562_v41  ;;  %v10892_v55 = vpop.eup %10891 }
 0x465   :  { %v10894_v58 = vpop.eup %10893  ;;  %v6083_v62 = vadd.f32 1.0, %v10892_v55  ;;  %v10627_v55 = vld [vmem:[%s13586_s5 + $0x568] sm:$0xff]  }
 0x466   :  { %v6116_v46 = vadd.f32 %v6108_v43, %v11562_v41  ;;  %v10604_v41 = vld [vmem:[%s13586_s5 + $0x408] sm:$0xff]   ;;  %v6088_v61 = vadd.f32 1.0, %v10894_v58  ;;  %v10621_v43 = vld [vmem:[%s13586_s5 + $0x550] sm:$0xff]  }
 0x467   :  { %9887 = vmatpush3.bf16.msra.mxu0 %v10594_v12  ;;  %10895 = vrcp.f32 %v6083_v62  ;;  %v10614_v12 = vld [vmem:[%s13586_s5 + $0x430] sm:$0xff]  }
 0x468   :  { %9888 = vmatprep.subr.bf16.mxu0 %v10595_v38  ;;  %v12812_v59 = vpack.c.bf16 %v6116_v46, %v6116_v46  ;;  %10897 = vrcp.f32 %v6088_v61  ;;  %v10623_v46 = vld [vmem:[%s13586_s5 + $0x558] sm:$0xff]   ;;  %v10629_v58 = vld [vmem:[%s13586_s5 + $0x570] sm:$0xff]  }
 0x469   :  { %10899 = vpow2.f32 %v8855_v30 }
 0x46b   :  { %9889 = vmatpush3.bf16.msra.mxu0 %v10596_v33 }
 0x46c   :  { %9890 = vmatprep.subr.bf16.mxu0 %v10597_v44  ;;  %v10617_v44 = vld [vmem:[%s13586_s5 + $0x540] sm:$0xff]  }
 0x46f   :  { %9891 = vmatpush3.bf16.msra.mxu0 %v10598_v63  ;;  %v10619_v63 = vld [vmem:[%s13586_s5 + $0x548] sm:$0xff]  }
 0x470   :  { %9892 = vmatprep.subr.bf16.mxu0 %v10599_v15 }
 0x471   :  { %v10896_v32 = vpop.eup %10895 }
 0x472   :  { %v10898_v29 = vpop.eup %10897  ;;  %v6107_v34 = vmul.f32 %v10896_v32, %v11552_v36 }
 0x473   :  { %9893 = vmatpush3.bf16.msra.mxu0 %v10600_v53  ;;  %v6112_v13 = vmul.f32 %v10898_v29, %v11680_v24 }
 0x474   :  { %9922 = vmatprep.subr.bf16.mxu0 %v10601_v40  ;;  %v6115_v33 = vadd.f32 %v6107_v34, %v11552_v36  ;;  %v10620_v36 = vld [vmem:[%s13586_s5 + $0x508] sm:$0xff]   ;;  %v10622_v40 = vld [vmem:[%s13586_s5 + $0x510] sm:$0xff]  }
 0x475   :  { %v6120_v54 = vadd.f32 %v6112_v13, %v11680_v24  ;;  %v10900_v24 = vpop.eup %10899 }
 0x476   :  { %5958 = vmatmul.mubr.bf16.vlgmr.msra.gmra.mrb[64].mxu0 %v12285_v21  ;;  %v10606_v21 = vld [vmem:[%s13586_s5 + $0x410] sm:$0xff]   ;;  %v12873_v23 = vpack.c.bf16 %v6115_v33, %v6115_v33  ;;  %v6087_v53 = vadd.f32 1.0, %v10900_v24 }
 0x477   :  { %9923 = vmatpush3.bf16.msra.mxu0 %v10602_v17  ;;  %6676 = vmatprep.mubr.bf16.mxu0 %v12812_v59  ;;  %v12878_v15 = vpack.c.bf16 %v6120_v54, %v6120_v54  ;;  %v10624_v17 = vld [vmem:[%s13586_s5 + $0x518] sm:$0xff]   ;;  %v10645_v24 = vld [vmem:[%s13589_s10 + $0x2d0] sm:$0xff]  }
 0x478   :  { %9924 = vmatprep.subr.bf16.mxu0 %v10603_v16  ;;  %10901 = vrcp.f32 %v6087_v53  ;;  %v10625_v16 = vld [vmem:[%s13586_s5 + $0x560] sm:$0xff]  }
 0x47b   :  { %9925 = vmatpush3.bf16.msra.mxu0 %v10604_v41  ;;  %v10626_v41 = vld [vmem:[%s13586_s5 + $0x520] sm:$0xff]  }
 0x47c   :  { %9926 = vmatprep.subr.bf16.mxu0 %v10605_v2  ;;  %v10628_v2 = vld [vmem:[%s13586_s5 + $0x528] sm:$0xff]  }
 0x47f   :  { %9927 = vmatpush3.bf16.msra.mxu0 %v10606_v21 }
 0x480   :  { %9928 = vmatprep.subr.bf16.mxu0 %v10607_v50 }
 0x482   :  { %v10902_v62 = vpop.eup %10901 }
 0x483   :  { %9929 = vmatpush3.bf16.msra.mxu0 %v10608_v47  ;;  %v6111_v52 = vmul.f32 %v10902_v62, %v11673_v19  ;;  %v10653_v62 = vld [vmem:[%s13589_s10 + $0x2f0] sm:$0xff]  }
 0x484   :  { %9930 = vmatprep.subr.bf16.mxu0 %v10609_v56  ;;  %v10630_v56 = vld [vmem:[%s13586_s5 + $0x530] sm:$0xff]  }
 0x485   :  { %v6119_v32 = vadd.f32 %v6111_v52, %v11673_v19 }
 0x487   :  { %9931 = vmatpush3.bf16.msra.mxu0 %v10610_v18 }
 0x488   :  { %9932 = vmatprep.subr.bf16.mxu0 %v10611_v22  ;;  %v10631_v22 = vld [vmem:[%s13586_s5 + $0x578] sm:$0xff]  }
 0x489   :  { %v3714_v5 = vpop.f32.mrb[40].mxu0 }
 0x48a   :  { %v3715_v31 = vadd.f32 %v8350_v45, %v3714_v5  ;;  %v10134_v11 = vpop.f32.mrb[41].mxu0  ;;  %v12925_v5 = vpack.c.bf16 %v6119_v32, %v6119_v32 }
 0x48b   :  { %9933 = vmatpush3.bf16.msra.mxu0 %v10612_v4  ;;  %v3717_v8 = vpop.f32.mrb[42].mxu0  ;;  %v10632_v4 = vld [vmem:[%s13586_s5 + $0x538] sm:$0xff]  }
 0x48c   :  { %3720 = vst [vmem:[%s13593_s15] sm:$0x3] %v3715_v31  ;;  %v10135_v38 = vpop.f32.mrb[43].mxu0  ;;  %9934 = vmatprep.subr.bf16.mxu0 %v10613_v37  ;;  %v8564_v8 = vld [vmem:[%s13591_s7 + $0x1] ss:$0 sm:$0xff] }
 0x48f   :  { %9935 = vmatpush3.bf16.msra.mxu0 %v10614_v12 }
 0x490   :  { %9936 = vmatprep.subr.bf16.mxu0 %v10615_v39 }
 0x493   :  { %9937 = vmatpush3.bf16.msra.mxu0 %v10616_v14 }
 0x494   :  { %9966 = vmatprep.subr.bf16.mxu0 %v10617_v44  ;;  %v10642_v44 = vld [vmem:[%s13589_s10 + $0x280] sm:$0xff]  }
 0x496   :  { %6677 = vmatmul.mubr.bf16.vlgmr.msra.gmra.mrb[68].mxu0 %v12873_v23 }
 0x497   :  { %9967 = vmatpush3.bf16.msra.mxu0 %v10618_v48  ;;  %6756 = vmatprep.mubr.bf16.mxu0 %v12878_v15  ;;  %v10643_v48 = vld [vmem:[%s13589_s10 + $0x2c8] sm:$0xff]  }
 0x498   :  { %9968 = vmatprep.subr.bf16.mxu0 %v10619_v63  ;;  %v10644_v63 = vld [vmem:[%s13589_s10 + $0x288] sm:$0xff]  }
 0x49b   :  { %9969 = vmatpush3.bf16.msra.mxu0 %v10620_v36 }
 0x49c   :  { %9970 = vmatprep.subr.bf16.mxu0 %v10621_v43 }
 0x49f   :  { %9971 = vmatpush3.bf16.msra.mxu0 %v10622_v40 }
 0x4a0   :  { %9972 = vmatprep.subr.bf16.mxu0 %v10623_v46 }
 0x4a3   :  { %9973 = vmatpush3.bf16.msra.mxu0 %v10624_v17  ;;  %v10647_v17 = vld [vmem:[%s13589_s10 + $0x2d8] sm:$0xff]  }
 0x4a4   :  { %9974 = vmatprep.subr.bf16.mxu0 %v10625_v16  ;;  %v10648_v16 = vld [vmem:[%s13589_s10 + $0x298] sm:$0xff]  }
 0x4a7   :  { %9975 = vmatpush3.bf16.msra.mxu0 %v10626_v41  ;;  %v10649_v41 = vld [vmem:[%s13589_s10 + $0x2e0] sm:$0xff]  }
 0x4a8   :  { %9976 = vmatprep.subr.bf16.mxu0 %v10627_v55  ;;  %v10650_v55 = vld [vmem:[%s13589_s10 + $0x2a0] sm:$0xff]  }
 0x4a9   :  { %v9687_v21 = vpop.f32.mrb[44].mxu0 }
 0x4aa   :  { %v9688_v61 = vpop.f32.mrb[45].mxu0 }
 0x4ab   :  { %v9689_v50 = vadd.f32 %v9688_v61, %v9687_v21  ;;  %v9690_v47 = vpop.f32.mrb[46].mxu0  ;;  %9977 = vmatpush3.bf16.msra.mxu0 %v10628_v2  ;;  %v10651_v2 = vld [vmem:[%s13589_s10 + $0x2e8] sm:$0xff]   ;;  %v10654_v21 = vld [vmem:[%s13589_s10 + $0x2b0] sm:$0xff]   ;;  %v10655_v61 = vld [vmem:[%s13589_s10 + $0x2f8] sm:$0xff]  }
 0x4ac   :  { %v9691_v18 = vpop.f32.mrb[47].mxu0  ;;  %9978 = vmatprep.subr.bf16.mxu0 %v10629_v58  ;;  %v10652_v58 = vld [vmem:[%s13589_s10 + $0x2a8] sm:$0xff]   ;;  %v10657_v47 = vld [vmem:[%s13589_s10 + $0x3c0] sm:$0xff]  }
 0x4ad   :  { %v4563_v45 = vadd.f32 %v9689_v50, %v12459_v7  ;;  %v10656_v50 = vld [vmem:[%s13589_s10 + $0x2b8] sm:$0xff]   ;;  %v10659_v18 = vld [vmem:[%s13589_s10 + $0x3c8] sm:$0xff]  }
 0x4af   :  { %9979 = vmatpush3.bf16.msra.mxu0 %v10630_v56  ;;  %v4603_v37 = vadd.f32 %v12519_v1, %v4563_v45  ;;  %v8562_v1 = vld [vmem:[%s13590_s6 + $0x1] ss:$0 sm:$0xff]  ;;  %v10661_v45 = vld [vmem:[%s13589_s10 + $0x3d0] sm:$0xff]  }
 0x4b0   :  { %9980 = vmatprep.subr.bf16.mxu0 %v10631_v22  ;;  %v10658_v56 = vld [vmem:[%s13589_s10 + $0x380] sm:$0xff]   ;;  %v10660_v22 = vld [vmem:[%s13589_s10 + $0x388] sm:$0xff]  }
 0x4b3   :  { %9981 = vmatpush3.bf16.msra.mxu0 %v10632_v4 }
 0x4b4   :  { %10156 = vmatprep.subr.bf16.mxu0 %v10924_v51 }
 0x4b6   :  { %6757 = vmatmul.mubr.bf16.vlgmr.msra.gmra.mrb[72].mxu0 %v12925_v5 }
 0x4b7   :  { %10172 = vmatprep.mubr.msk.bf16.mxu0 %vm10925_vm0, %v10924_v51 }
 0x4c9   :  { %v9731_v7 = vpop.f32.mrb[48].mxu0 }
 0x4ca   :  { %v9732_v29 = vpop.f32.mrb[49].mxu0 }
 0x4cb   :  { %v9733_v30 = vadd.f32 %v9732_v29, %v9731_v7  ;;  %v9734_v31 = vpop.f32.mrb[50].mxu0  ;;  %v10664_v29 = vld [vmem:[%s13589_s10 + $0x398] sm:$0xff]  }
 0x4cc   :  { %v9735_v11 = vpop.f32.mrb[51].mxu0  ;;  %v10666_v31 = vld [vmem:[%s13589_s10 + $0x3a0] sm:$0xff]  }
 0x4cd   :  { %v4643_v19 = vadd.f32 %v9733_v30, %v4603_v37  ;;  %v10665_v30 = vld [vmem:[%s13589_s10 + $0x3e0] sm:$0xff]   ;;  %v10668_v11 = vld [vmem:[%s13589_s10 + $0x3a8] sm:$0xff]  }
 0x4cf   :  { %v4656_v12 = vmul.f32 %v8562_v1, %v4643_v19  ;;  %v10667_v1 = vld [vmem:[%s13589_s10 + $0x3e8] sm:$0xff]   ;;  %v10669_v19 = vld [vmem:[%s13589_s10 + $0x3f0] sm:$0xff]  }
 0x4d1   :  { %v4665_v38 = vadd.f32 %v8564_v8, %v4656_v12  ;;  %v10670_v8 = vld [vmem:[%s13589_s10 + $0x3b0] sm:$0xff]   ;;  %v10671_v12 = vld [vmem:[%s13589_s10 + $0x3f8] sm:$0xff]  }
 0x4d3   :  { %v4667_v39 = vmin.f32 %v4665_v38, 0.0  ;;  %vm4666_vm2 = vcmp.gt.f32.partialorder %v4665_v38, 0.0 }
 0x4d5   :  { %v4668_v34 = vmul.f32 1.442695, %v4667_v39  ;;  %v10673_v39 = vld [vmem:[%s13589_s10 + $0xc0] sm:$0xff]  }
 0x4d7   :  { %10903 = vpow2.f32 %v4668_v34  ;;  %v10674_v34 = vld [vmem:[%s13589_s10 + $0x80] sm:$0xff]  }
 0x4e1   :  { %v10904_v13 = vpop.eup %10903 }
 0x4e2   :  { %v8565_v14 = vadd.f32 -1.0, %v10904_v13  ;;  %v10675_v13 = vld [vmem:[%s13589_s10 + $0xc8] sm:$0xff]  }
 0x4e4   :  { %v4671_v33 = vsel %vm4666_vm2, %v4665_v38, %v8565_v14  ;;  %v10672_v38 = vld [vmem:[%s13589_s10 + $0x3b8] sm:$0xff]   ;;  %v10676_v14 = vld [vmem:[%s13589_s10 + $0x88] sm:$0xff]  }
 0x4e5   :  { %v4672_v54 = vpack.c.bf16 %v4671_v33, %v4671_v33 }
 0x4e7   :  { %10153 = vmatmul.mubr.bf16.vlgmr.msra.gmra.mrb[48].mxu1 %v4672_v54 }
 0x4e8   :  { %9769 = vmatpush3.bf16.msra.mxu1 %v10642_v44  ;;  %5373 = vmatprep.mubr.bf16.mxu1 %v12453_v27  ;;  %v10646_v27 = vld [vmem:[%s13589_s10 + $0x290] sm:$0xff]  }
 0x4e9   :  { %v9762_v36 = vpop.f32.mrb[52].mxu0  ;;  %9770 = vmatprep.subr.bf16.mxu1 %v10643_v48  ;;  %v10677_v44 = vld [vmem:[%s13589_s10 + $0xd0] sm:$0xff]  }
 0x4ea   :  { %v9763_v43 = vpop.f32.mrb[53].mxu0 }
 0x4eb   :  { %v12950_v53 = vadd.f32 %v9763_v43, %v9762_v36  ;;  %v9765_v40 = vpop.f32.mrb[54].mxu0  ;;  %v10681_v43 = vld [vmem:[%s13589_s10 + $0xe0] sm:$0xff]  }
 0x4ec   :  { %9771 = vmatpush3.bf16.msra.mxu1 %v10644_v63  ;;  %v9766_v46 = vpop.f32.mrb[55].mxu0  ;;  %v10682_v40 = vld [vmem:[%s13589_s10 + $0xa0] sm:$0xff]  }
 0x4ed   :  { %9772 = vmatprep.subr.bf16.mxu1 %v10645_v24  ;;  %v10680_v24 = vld [vmem:[%s13589_s10 + $0x98] sm:$0xff]   ;;  %v10683_v46 = vld [vmem:[%s13589_s10 + $0xe8] sm:$0xff]  }
 0x4f0   :  { %9773 = vmatpush3.bf16.msra.mxu1 %v10646_v27  ;;  %v6054_v27 = vmul.f32 %v12047_v3, %v11576_v49  ;;  %v10687_v3 = vld [vmem:[%s13589_s10 + $0xf8] sm:$0xff]  }
 0x4f1   :  { %9774 = vmatprep.subr.bf16.mxu1 %v10647_v17  ;;  %v10684_v17 = vld [vmem:[%s13589_s10 + $0xa8] sm:$0xff]  }
 0x4f4   :  { %9775 = vmatpush3.bf16.msra.mxu1 %v10648_v16  ;;  %v10685_v16 = vld [vmem:[%s13589_s10 + $0xf0] sm:$0xff]  }
 0x4f5   :  { %9776 = vmatprep.subr.bf16.mxu1 %v10649_v41  ;;  %v8854_v41 = vmul.f32 -1.442695, %v6054_v27  ;;  %v10711_v27 = vld [vmem:[%s13586_s5 + $0x4d8] sm:$0xff]  }
 0x4f7   :  { %10905 = vpow2.f32 %v8854_v41  ;;  %v10714_v41 = vld [vmem:[%s13586_s5 + $0x4a0] sm:$0xff]  }
 0x4f8   :  { %9777 = vmatpush3.bf16.msra.mxu1 %v10650_v55  ;;  %v10686_v55 = vld [vmem:[%s13589_s10 + $0xb0] sm:$0xff]  }
 0x4f9   :  { %9778 = vmatprep.subr.bf16.mxu1 %v10651_v2  ;;  %v10688_v2 = vld [vmem:[%s13589_s10 + $0xb8] sm:$0xff]  }
 0x4fc   :  { %9779 = vmatpush3.bf16.msra.mxu1 %v10652_v58  ;;  %v10689_v58 = vld [vmem:[%s13589_s10 + $0x1c0] sm:$0xff]  }
 0x4fd   :  { %9780 = vmatprep.subr.bf16.mxu1 %v10653_v62  ;;  %v10690_v62 = vld [vmem:[%s13589_s10 + $0x180] sm:$0xff]  }
 0x500   :  { %9781 = vmatpush3.bf16.msra.mxu1 %v10654_v21  ;;  %v10691_v21 = vld [vmem:[%s13589_s10 + $0x1c8] sm:$0xff]  }
 0x501   :  { %9782 = vmatprep.subr.bf16.mxu1 %v10655_v61  ;;  %v10692_v61 = vld [vmem:[%s13589_s10 + $0x188] sm:$0xff]  }
 0x504   :  { %9783 = vmatpush3.bf16.msra.mxu1 %v10656_v50 }
 0x505   :  { %9812 = vmatprep.subr.bf16.mxu1 %v10657_v47  ;;  %v10693_v47 = vld [vmem:[%s13589_s10 + $0x1d0] sm:$0xff]  }
 0x507   :  { %5374 = vmatmul.mubr.bf16.vlgmr.msra.gmra.mrb[52].mxu1 %v12508_v57  ;;  %v10662_v57 = vld [vmem:[%s13589_s10 + $0x390] sm:$0xff]  }
 0x508   :  { %9813 = vmatpush3.bf16.msra.mxu1 %v10658_v56  ;;  %5453 = vmatprep.mubr.bf16.mxu1 %v12512_v60  ;;  %v10663_v60 = vld [vmem:[%s13589_s10 + $0x3d8] sm:$0xff]   ;;  %v10906_v56 = vpop.eup %10905 }
 0x509   :  { %v9806_v52 = vpop.f32.mrb[56].mxu0  ;;  %9814 = vmatprep.subr.bf16.mxu1 %v10659_v18 }
 0x50a   :  { %v9807_v4 = vpop.f32.mrb[57].mxu0 }
 0x50b   :  { %v13002_v37 = vadd.f32 %v9807_v4, %v9806_v52  ;;  %v9809_v32 = vpop.f32.mrb[58].mxu0  ;;  %v10695_v4 = vld [vmem:[%s13589_s10 + $0x1d8] sm:$0xff]  }
 0x50c   :  { %9815 = vmatpush3.bf16.msra.mxu1 %v10660_v22  ;;  %v9810_v7 = vpop.f32.mrb[59].mxu0  ;;  %v10696_v32 = vld [vmem:[%s13589_s10 + $0x198] sm:$0xff]  }
 0x50d   :  { %9816 = vmatprep.subr.bf16.mxu1 %v10661_v45  ;;  %v6086_v45 = vadd.f32 1.0, %v10906_v56  ;;  %v10697_v7 = vld [vmem:[%s13589_s10 + $0x1e0] sm:$0xff]   ;;  %v10720_v56 = vld [vmem:[%s13586_s5 + $0x4b8] sm:$0xff]  }
 0x50f   :  { %10907 = vrcp.f32 %v6086_v45 }
 0x510   :  { %9817 = vmatpush3.bf16.msra.mxu1 %v10662_v57  ;;  %v13124_v57 = vcombine.high %v12094_v10, %v12094_v10  ;;  %v10700_v10 = vld [vmem:[%s13589_s10 + $0x1a8] sm:$0xff]  }
 0x511   :  { %9818 = vmatprep.subr.bf16.mxu1 %v10663_v60  ;;  %v10698_v60 = vld [vmem:[%s13589_s10 + $0x1a0] sm:$0xff]  }
 0x514   :  { %9819 = vmatpush3.bf16.msra.mxu1 %v10664_v29  ;;  %v10699_v29 = vld [vmem:[%s13589_s10 + $0x1e8] sm:$0xff]  }
 0x515   :  { %9820 = vmatprep.subr.bf16.mxu1 %v10665_v30  ;;  %v6053_v30 = vmul.f32 %v12043_v0, %v11565_v42  ;;  %v10702_v0 = vld [vmem:[%s13589_s10 + $0x1b0] sm:$0xff]  }
 0x518   :  { %9821 = vmatpush3.bf16.msra.mxu1 %v10666_v31  ;;  %v6058_v31 = vmul.f32 %v13124_v57, %v12101_v28  ;;  %v10703_v28 = vld [vmem:[%s13589_s10 + $0x1f8] sm:$0xff]  }
 0x519   :  { %9822 = vmatprep.subr.bf16.mxu1 %v10667_v1  ;;  %v10701_v1 = vld [vmem:[%s13589_s10 + $0x1f0] sm:$0xff]  }
 0x51c   :  { %9823 = vmatpush3.bf16.msra.mxu1 %v10668_v11  ;;  %v10908_v11 = vpop.eup %10907 }
 0x51d   :  { %9824 = vmatprep.subr.bf16.mxu1 %v10669_v19  ;;  %v8853_v19 = vmul.f32 -1.442695, %v6053_v30 }
 0x51f   :  { %10909 = vpow2.f32 %v8853_v19  ;;  %v10729_v19 = vld [vmem:[%s13586_s5 + $0x5e0] sm:$0xff]  }
 0x520   :  { %9825 = vmatpush3.bf16.msra.mxu1 %v10670_v8  ;;  %v8858_v8 = vmul.f32 -1.442695, %v6058_v31 }
 0x521   :  { %9826 = vmatprep.subr.bf16.mxu1 %v10671_v12  ;;  %v6110_v12 = vmul.f32 %v10908_v11, %v11576_v49  ;;  %v10728_v11 = vld [vmem:[%s13586_s5 + $0x598] sm:$0xff]  }
 0x522   :  { %10911 = vpow2.f32 %v8858_v8  ;;  %v10730_v8 = vld [vmem:[%s13586_s5 + $0x5a0] sm:$0xff]  }
 0x524   :  { %9827 = vmatpush3.bf16.msra.mxu1 %v10672_v38  ;;  %v10704_v38 = vld [vmem:[%s13589_s10 + $0x1b8] sm:$0xff]  }
 0x525   :  { %9856 = vmatprep.subr.bf16.mxu1 %v10673_v39  ;;  %v10705_v39 = vld [vmem:[%s13586_s5 + $0x4c0] sm:$0xff]  }
 0x527   :  { %5454 = vmatmul.mubr.bf16.vlgmr.msra.gmra.mrb[56].mxu1 %v12568_v20  ;;  %v10679_v20 = vld [vmem:[%s13589_s10 + $0xd8] sm:$0xff]  }
 0x528   :  { %9857 = vmatpush3.bf16.msra.mxu1 %v10674_v34  ;;  %5917 = vmatprep.mubr.bf16.mxu1 %v12146_v35  ;;  %v10678_v35 = vld [vmem:[%s13589_s10 + $0x90] sm:$0xff]   ;;  %v6118_v34 = vadd.f32 %v6110_v12, %v11576_v49  ;;  %v10708_v49 = vld [vmem:[%s13586_s5 + $0x488] sm:$0xff]  }
 0x529   :  { %v9850_v33 = vpop.f32.mrb[60].mxu0  ;;  %9858 = vmatprep.subr.bf16.mxu1 %v10675_v13  ;;  %v10706_v13 = vld [vmem:[%s13586_s5 + $0x480] sm:$0xff]   ;;  %v10733_v12 = vld [vmem:[%s13586_s5 + $0x5f0] sm:$0xff]  }
 0x52a   :  { %v9851_v54 = vpop.f32.mrb[61].mxu0 }
 0x52b   :  { %v13054_v48 = vadd.f32 %v9851_v54, %v9850_v33  ;;  %v9853_v63 = vpop.f32.mrb[62].mxu0  ;;  %v13162_v33 = vpack.c.bf16 %v6118_v34, %v6118_v34  ;;  %v10736_v34 = vld [vmem:[%s13586_s5 + $0x5b8] sm:$0xff]  }
 0x52c   :  { %9859 = vmatpush3.bf16.msra.mxu1 %v10676_v14  ;;  %v9854_v36 = vpop.f32.mrb[63].mxu0  ;;  %v10707_v14 = vld [vmem:[%s13586_s5 + $0x4c8] sm:$0xff]   ;;  %v10709_v63 = vld [vmem:[%s13586_s5 + $0x4d0] sm:$0xff]  }
 0x52d   :  { %9860 = vmatprep.subr.bf16.mxu1 %v10677_v44  ;;  %v10910_v44 = vpop.eup %10909 }
 0x52e   :  { %v10912_v36 = vpop.eup %10911 }
 0x530   :  { %9861 = vmatpush3.bf16.msra.mxu1 %v10678_v35 }
 0x531   :  { %9862 = vmatprep.subr.bf16.mxu1 %v10679_v20 }
 0x534   :  { %9863 = vmatpush3.bf16.msra.mxu1 %v10680_v24 }
 0x535   :  { %9864 = vmatprep.subr.bf16.mxu1 %v10681_v43 }
 0x538   :  { %9865 = vmatpush3.bf16.msra.mxu1 %v10682_v40  ;;  %v10710_v40 = vld [vmem:[%s13586_s5 + $0x490] sm:$0xff]  }
 0x539   :  { %9866 = vmatprep.subr.bf16.mxu1 %v10683_v46  ;;  %v6090_v46 = vadd.f32 1.0, %v10912_v36  ;;  %v10743_v36 = vld [vmem:[%s13589_s10 + $0x458] sm:$0xff]  }
 0x53c   :  { %9867 = vmatpush3.bf16.msra.mxu1 %v10684_v17  ;;  %v10712_v17 = vld [vmem:[%s13586_s5 + $0x498] sm:$0xff]  }
 0x53d   :  { %9868 = vmatprep.subr.bf16.mxu1 %v10685_v16  ;;  %v10713_v16 = vld [vmem:[%s13586_s5 + $0x4e0] sm:$0xff]  }
 0x540   :  { %9869 = vmatpush3.bf16.msra.mxu1 %v10686_v55  ;;  %v10715_v55 = vld [vmem:[%s13586_s5 + $0x4e8] sm:$0xff]  }
 0x541   :  { %9870 = vmatprep.subr.bf16.mxu1 %v10687_v3  ;;  %v10716_v3 = vld [vmem:[%s13586_s5 + $0x4a8] sm:$0xff]  }
 0x544   :  { %9871 = vmatpush3.bf16.msra.mxu1 %v10688_v2  ;;  %v10717_v2 = vld [vmem:[%s13586_s5 + $0x4f0] sm:$0xff]  }
 0x545   :  { %9900 = vmatprep.subr.bf16.mxu1 %v10689_v58 }
 0x547   :  { %5918 = vmatmul.mubr.bf16.vlgmr.msra.gmra.mrb[60].mxu1 %v12150_v9 }
 0x548   :  { %9901 = vmatpush3.bf16.msra.mxu1 %v10690_v62  ;;  %5997 = vmatprep.mubr.bf16.mxu1 %v12279_v6  ;;  %v10694_v6 = vld [vmem:[%s13589_s10 + $0x190] sm:$0xff]  }
 0x549   :  { %v9894_v50 = vpop.f32.mrb[64].mxu0  ;;  %9902 = vmatprep.subr.bf16.mxu1 %v10691_v21  ;;  %v10718_v21 = vld [vmem:[%s13586_s5 + $0x4b0] sm:$0xff]  }
 0x54a   :  { %v9895_v18 = vpop.f32.mrb[65].mxu0 }
 0x54b   :  { %v13108_v22 = vadd.f32 %v9895_v18, %v9894_v50  ;;  %v9897_v52 = vpop.f32.mrb[66].mxu0 }
 0x54c   :  { %9903 = vmatpush3.bf16.msra.mxu1 %v10692_v61  ;;  %v9898_v9 = vpop.f32.mrb[67].mxu0  ;;  %v10719_v61 = vld [vmem:[%s13586_s5 + $0x4f8] sm:$0xff]   ;;  %v10721_v52 = vld [vmem:[%s13586_s5 + $0x5c0] sm:$0xff]  }
 0x54d   :  { %9904 = vmatprep.subr.bf16.mxu1 %v10693_v47 }
 0x550   :  { %9905 = vmatpush3.bf16.msra.mxu1 %v10694_v6  ;;  %v10722_v6 = vld [vmem:[%s13586_s5 + $0x580] sm:$0xff]  }
 0x551   :  { %9906 = vmatprep.subr.bf16.mxu1 %v10695_v4  ;;  %v10723_v4 = vld [vmem:[%s13586_s5 + $0x5c8] sm:$0xff]  }
 0x554   :  { %9907 = vmatpush3.bf16.msra.mxu1 %v10696_v32 }
 0x555   :  { %9908 = vmatprep.subr.bf16.mxu1 %v10697_v7 }
 0x558   :  { %9909 = vmatpush3.bf16.msra.mxu1 %v10698_v60 }
 0x559   :  { %9910 = vmatprep.subr.bf16.mxu1 %v10699_v29 }
 0x55c   :  { %9911 = vmatpush3.bf16.msra.mxu1 %v10700_v10  ;;  %v10726_v10 = vld [vmem:[%s13586_s5 + $0x590] sm:$0xff]  }
 0x55d   :  { %9912 = vmatprep.subr.bf16.mxu1 %v10701_v1  ;;  %v10727_v1 = vld [vmem:[%s13586_s5 + $0x5d8] sm:$0xff]  }
 0x560   :  { %9913 = vmatpush3.bf16.msra.mxu1 %v10702_v0  ;;  %v10731_v0 = vld [vmem:[%s13586_s5 + $0x5e8] sm:$0xff]  }
 0x561   :  { %9914 = vmatprep.subr.bf16.mxu1 %v10703_v28  ;;  %v10732_v28 = vld [vmem:[%s13586_s5 + $0x5a8] sm:$0xff]  }
 0x564   :  { %9915 = vmatpush3.bf16.msra.mxu1 %v10704_v38  ;;  %v10734_v38 = vld [vmem:[%s13586_s5 + $0x5b0] sm:$0xff]  }
 0x565   :  { %9944 = vmatprep.subr.bf16.mxu1 %v10705_v39  ;;  %v10735_v39 = vld [vmem:[%s13586_s5 + $0x5f8] sm:$0xff]  }
 0x567   :  { %5998 = vmatmul.mubr.bf16.vlgmr.msra.gmra.mrb[64].mxu1 %v12287_v26  ;;  %v6085_v26 = vadd.f32 1.0, %v10910_v44  ;;  %v10739_v44 = vld [vmem:[%s13589_s10 + $0x448] sm:$0xff]  }
 0x568   :  { %9945 = vmatpush3.bf16.msra.mxu1 %v10706_v13  ;;  %6716 = vmatprep.mubr.bf16.mxu1 %v13162_v33  ;;  %v10737_v13 = vld [vmem:[%s13589_s10 + $0x440] sm:$0xff]  }
 0x569   :  { %v9938_v54 = vpop.f32.mrb[68].mxu0  ;;  %9946 = vmatprep.subr.bf16.mxu1 %v10707_v14  ;;  %10913 = vrcp.f32 %v6085_v26  ;;  %v10738_v14 = vld [vmem:[%s13589_s10 + $0x400] sm:$0xff]   ;;  %v10747_v26 = vld [vmem:[%s13589_s10 + $0x468] sm:$0xff]  }
 0x56a   :  { %v9939_v35 = vpop.f32.mrb[69].mxu0  ;;  %10915 = vrcp.f32 %v6090_v46  ;;  %v10749_v46 = vld [vmem:[%s13589_s10 + $0x470] sm:$0xff]  }
 0x56b   :  { %v13172_v20 = vadd.f32 %v9939_v35, %v9938_v54  ;;  %v9941_v24 = vpop.f32.mrb[70].mxu0  ;;  %v10740_v54 = vld [vmem:[%s13589_s10 + $0x408] sm:$0xff]   ;;  %v10745_v35 = vld [vmem:[%s13589_s10 + $0x460] sm:$0xff]  }
 0x56c   :  { %9947 = vmatpush3.bf16.msra.mxu1 %v10708_v49  ;;  %v9942_v43 = vpop.f32.mrb[71].mxu0  ;;  %v13275_v49 = vpack.c.bf16 %v12254_v25, %v12254_v25  ;;  %v10741_v25 = vld [vmem:[%s13589_s10 + $0x450] sm:$0xff]   ;;  %v10746_v24 = vld [vmem:[%s13589_s10 + $0x420] sm:$0xff]  }
 0x56d   :  { %9948 = vmatprep.subr.bf16.mxu1 %v10709_v63  ;;  %v10742_v63 = vld [vmem:[%s13589_s10 + $0x410] sm:$0xff]   ;;  %v8583_v43 = vld [vmem:[%s13592_s9 + $0x1] ss:$0 sm:$0xff] }
 0x570   :  { %9949 = vmatpush3.bf16.msra.mxu1 %v10710_v40  ;;  %v10748_v40 = vld [vmem:[%s13589_s10 + $0x428] sm:$0xff]  }
 0x571   :  { %9950 = vmatprep.subr.bf16.mxu1 %v10711_v27 }
 0x573   :  { %v10914_v58 = vpop.eup %10913 }
 0x574   :  { %9951 = vmatpush3.bf16.msra.mxu1 %v10712_v17  ;;  %v10916_v62 = vpop.eup %10915  ;;  %v6109_v50 = vmul.f32 %v10914_v58, %v11565_v42  ;;  %v10752_v58 = vld [vmem:[%s13589_s10 + $0x438] sm:$0xff]  }
 0x575   :  { %9952 = vmatprep.subr.bf16.mxu1 %v10713_v16  ;;  %v6114_v47 = vmul.f32 %v10916_v62, %v13124_v57  ;;  %v10753_v62 = vld [vmem:[%s13589_s10 + $0x540] sm:$0xff]  }
 0x576   :  { %v6117_v18 = vadd.f32 %v6109_v50, %v11565_v42  ;;  %v10724_v42 = vld [vmem:[%s13586_s5 + $0x588] sm:$0xff]  }
 0x577   :  { %v6122_v9 = vadd.f32 %v6114_v47, %v13124_v57  ;;  %v10725_v57 = vld [vmem:[%s13586_s5 + $0x5d0] sm:$0xff]   ;;  %v10756_v50 = vld [vmem:[%s13589_s10 + $0x508] sm:$0xff]  }
 0x578   :  { %9953 = vmatpush3.bf16.msra.mxu1 %v10714_v41  ;;  %v13217_v45 = vpack.c.bf16 %v6117_v18, %v6117_v18  ;;  %v10757_v47 = vld [vmem:[%s13589_s10 + $0x550] sm:$0xff]   ;;  %v10761_v18 = vld [vmem:[%s13589_s10 + $0x560] sm:$0xff]  }
 0x579   :  { %9954 = vmatprep.subr.bf16.mxu1 %v10715_v55  ;;  %v13222_v32 = vpack.c.bf16 %v6122_v9, %v6122_v9  ;;  %v10750_v55 = vld [vmem:[%s13589_s10 + $0x430] sm:$0xff]   ;;  %v10763_v9 = vld [vmem:[%s13589_s10 + $0x568] sm:$0xff]  }
 0x57c   :  { %9955 = vmatpush3.bf16.msra.mxu1 %v10716_v3 }
 0x57d   :  { %9956 = vmatprep.subr.bf16.mxu1 %v10717_v2  ;;  %v10751_v2 = vld [vmem:[%s13589_s10 + $0x478] sm:$0xff]  }
 0x580   :  { %9957 = vmatpush3.bf16.msra.mxu1 %v10718_v21  ;;  %v10754_v21 = vld [vmem:[%s13589_s10 + $0x500] sm:$0xff]  }
 0x581   :  { %9958 = vmatprep.subr.bf16.mxu1 %v10719_v61  ;;  %v10755_v61 = vld [vmem:[%s13589_s10 + $0x548] sm:$0xff]  }
 0x584   :  { %9959 = vmatpush3.bf16.msra.mxu1 %v10720_v56  ;;  %v10758_v56 = vld [vmem:[%s13589_s10 + $0x510] sm:$0xff]  }
 0x585   :  { %9988 = vmatprep.subr.bf16.mxu1 %v10721_v52  ;;  %v10762_v52 = vld [vmem:[%s13589_s10 + $0x520] sm:$0xff]  }
 0x587   :  { %6717 = vmatmul.mubr.bf16.vlgmr.msra.gmra.mrb[68].mxu1 %v13217_v45 }
 0x588   :  { %9989 = vmatpush3.bf16.msra.mxu1 %v10722_v6  ;;  %6796 = vmatprep.mubr.bf16.mxu1 %v13222_v32  ;;  %v10764_v6 = vld [vmem:[%s13589_s10 + $0x528] sm:$0xff]  }
 0x589   :  { %v9982_v7 = vpop.f32.mrb[72].mxu0  ;;  %9990 = vmatprep.subr.bf16.mxu1 %v10723_v4  ;;  %v10765_v4 = vld [vmem:[%s13589_s10 + $0x570] sm:$0xff]  }
 0x58a   :  { %v9983_v60 = vpop.f32.mrb[73].mxu0 }
 0x58b   :  { %v13232_v29 = vadd.f32 %v9983_v60, %v9982_v7  ;;  %v9985_v30 = vpop.f32.mrb[74].mxu0 }
 0x58c   :  { %9991 = vmatpush3.bf16.msra.mxu1 %v10724_v42  ;;  %v9986_v31 = vpop.f32.mrb[75].mxu0  ;;  %v10766_v30 = vld [vmem:[%s13589_s10 + $0x530] sm:$0xff]  }
 0x58d   :  { %9992 = vmatprep.subr.bf16.mxu1 %v10725_v57 }
 0x590   :  { %9993 = vmatpush3.bf16.msra.mxu1 %v10726_v10  ;;  %v10767_v10 = vld [vmem:[%s13589_s10 + $0x578] sm:$0xff]  }
 0x591   :  { %9994 = vmatprep.subr.bf16.mxu1 %v10727_v1 }
 0x594   :  { %9995 = vmatpush3.bf16.msra.mxu1 %v10728_v11  ;;  %v10769_v11 = vld [vmem:[%s13588_s8 + $0x80] sm:$0xff]  }
 0x595   :  { %9996 = vmatprep.subr.bf16.mxu1 %v10729_v19  ;;  %v10768_v19 = vld [vmem:[%s13589_s10 + $0x538] sm:$0xff]   ;;  %10157 = vmatpush3.bf16.msra.mxu0 %v10769_v11 }
 0x596   :  { %10158 = vmatprep.subr.bf16.mxu0 %v10924_v51 }
 0x598   :  { %9997 = vmatpush3.bf16.msra.mxu1 %v10730_v8 }
 0x599   :  { %9998 = vmatprep.subr.bf16.mxu1 %v10731_v0 }
 0x59c   :  { %9999 = vmatpush3.bf16.msra.mxu1 %v10732_v28 }
 0x59d   :  { %10000 = vmatprep.subr.bf16.mxu1 %v10733_v12 }
 0x5a0   :  { %10001 = vmatpush3.bf16.msra.mxu1 %v10734_v38 }
 0x5a1   :  { %10002 = vmatprep.subr.bf16.mxu1 %v10735_v39 }
 0x5a4   :  { %10003 = vmatpush3.bf16.msra.mxu1 %v10736_v34  ;;  %v10770_v34 = vld [vmem:[%s13588_s8 + $0x88] sm:$0xff]  }
 0x5a5   :  { %10019 = vmatprep.subr.bf16.mxu1 %v10737_v13  ;;  %10159 = vmatpush3.bf16.msra.mxu0 %v10770_v34  ;;  %v10772_v13 = vld [vmem:[%s13588_s8 + $0x98] sm:$0xff]   ;;  %v10789_v34 = vld [vmem:[%s13589_s10 + $0x4f0] sm:$0xff]  }
 0x5a6   :  { %10160 = vmatprep.subr.bf16.mxu0 %v10924_v51 }
 0x5a7   :  { %6797 = vmatmul.mubr.bf16.vlgmr.msra.gmra.mrb[72].mxu1 %v13275_v49 }
 0x5a8   :  { %10020 = vmatpush3.bf16.msra.mxu1 %v10738_v14  ;;  %7489 = vmatprep.mubr.bf16.mxu1 %v12812_v59  ;;  %v10744_v59 = vld [vmem:[%s13589_s10 + $0x418] sm:$0xff]   ;;  %v10774_v14 = vld [vmem:[%s13588_s8 + $0xa8] sm:$0xff]  }
 0x5a9   :  { %10021 = vmatprep.subr.bf16.mxu1 %v10739_v44  ;;  %v10775_v44 = vld [vmem:[%s13588_s8 + $0xb0] sm:$0xff]  }
 0x5ac   :  { %10022 = vmatpush3.bf16.msra.mxu1 %v10740_v54  ;;  %v10776_v54 = vld [vmem:[%s13588_s8 + $0xb8] sm:$0xff]  }
 0x5ad   :  { %10023 = vmatprep.subr.bf16.mxu1 %v10741_v25  ;;  %v10777_v25 = vld [vmem:[%s13589_s10 + $0x4c0] sm:$0xff]  }
 0x5b0   :  { %10024 = vmatpush3.bf16.msra.mxu1 %v10742_v63 }
 0x5b1   :  { %10025 = vmatprep.subr.bf16.mxu1 %v10743_v36 }
 0x5b4   :  { %10026 = vmatpush3.bf16.msra.mxu1 %v10744_v59 }
 0x5b5   :  { %10027 = vmatprep.subr.bf16.mxu1 %v10745_v35 }
 0x5b8   :  { %10028 = vmatpush3.bf16.msra.mxu1 %v10746_v24 }
 0x5b9   :  { %10029 = vmatprep.subr.bf16.mxu1 %v10747_v26 }
 0x5ba   :  { %v4780_v27 = vpop.f32.mrb[48].mxu1 }
 0x5bb   :  { %v4781_v17 = vadd.f32 %v8583_v43, %v4780_v27  ;;  %v10154_v16 = vpop.f32.mrb[49].mxu1 }
 0x5bc   :  { %10030 = vmatpush3.bf16.msra.mxu1 %v10748_v40  ;;  %v4783_v41 = vpop.f32.mrb[50].mxu1 }
 0x5bd   :  { %8592 = vst [vmem:[%s13593_s15 + $0x2] sm:$0x3] %v4781_v17  ;;  %v10155_v3 = vpop.f32.mrb[51].mxu1  ;;  %10031 = vmatprep.subr.bf16.mxu1 %v10749_v46 }
 0x5c0   :  { %10032 = vmatpush3.bf16.msra.mxu1 %v10750_v55 }
 0x5c1   :  { %10033 = vmatprep.subr.bf16.mxu1 %v10751_v2 }
 0x5c4   :  { %10034 = vmatpush3.bf16.msra.mxu1 %v10752_v58 }
 0x5c5   :  { %10063 = vmatprep.subr.bf16.mxu1 %v10753_v62 }
 0x5c7   :  { %7490 = vmatmul.mubr.bf16.vlgmr.msra.gmra.mrb[76].mxu1 %v12873_v23  ;;  %v10759_v23 = vld [vmem:[%s13589_s10 + $0x558] sm:$0xff]  }
 0x5c8   :  { %10064 = vmatpush3.bf16.msra.mxu1 %v10754_v21  ;;  %7569 = vmatprep.mubr.bf16.mxu1 %v12878_v15  ;;  %v10760_v15 = vld [vmem:[%s13589_s10 + $0x518] sm:$0xff]  }
 0x5c9   :  { %10065 = vmatprep.subr.bf16.mxu1 %v10755_v61 }
 0x5cc   :  { %10066 = vmatpush3.bf16.msra.mxu1 %v10756_v50 }
 0x5cd   :  { %10067 = vmatprep.subr.bf16.mxu1 %v10757_v47 }
 0x5d0   :  { %10068 = vmatpush3.bf16.msra.mxu1 %v10758_v56 }
 0x5d1   :  { %10069 = vmatprep.subr.bf16.mxu1 %v10759_v23  ;;  %v9052_v23 = vld [vmem:[%s13590_s6 + $0x2] ss:$0 sm:$0xff] }
 0x5d4   :  { %10070 = vmatpush3.bf16.msra.mxu1 %v10760_v15 }
 0x5d5   :  { %10071 = vmatprep.subr.bf16.mxu1 %v10761_v18 }
 0x5d8   :  { %10072 = vmatpush3.bf16.msra.mxu1 %v10762_v52  ;;  %v9054_v52 = vld [vmem:[%s13591_s7 + $0x2] ss:$0 sm:$0xff] }
 0x5d9   :  { %10073 = vmatprep.subr.bf16.mxu1 %v10763_v9 }
 0x5da   :  { %v9784_v42 = vpop.f32.mrb[52].mxu1 }
 0x5db   :  { %v9785_v7 = vpop.f32.mrb[53].mxu1 }
 0x5dc   :  { %v9786_v57 = vadd.f32 %v9785_v7, %v9784_v42  ;;  %v9787_v60 = vpop.f32.mrb[54].mxu1  ;;  %10074 = vmatpush3.bf16.msra.mxu1 %v10764_v6 }
 0x5dd   :  { %v9788_v31 = vpop.f32.mrb[55].mxu1  ;;  %10075 = vmatprep.subr.bf16.mxu1 %v10765_v4 }
 0x5de   :  { %v5376_v1 = vadd.f32 %v9786_v57, %v12950_v53  ;;  %v10778_v57 = vld [vmem:[%s13589_s10 + $0x480] sm:$0xff]   ;;  %v10780_v31 = vld [vmem:[%s13589_s10 + $0x488] sm:$0xff]  }
 0x5e0   :  { %10076 = vmatpush3.bf16.msra.mxu1 %v10766_v30  ;;  %v5416_v8 = vadd.f32 %v13002_v37, %v5376_v1  ;;  %v10779_v30 = vld [vmem:[%s13589_s10 + $0x4c8] sm:$0xff]   ;;  %v10781_v1 = vld [vmem:[%s13589_s10 + $0x4d0] sm:$0xff]  }
 0x5e1   :  { %10077 = vmatprep.subr.bf16.mxu1 %v10767_v10 }
 0x5e4   :  { %10078 = vmatpush3.bf16.msra.mxu1 %v10768_v19 }
 0x5e5   :  { %10176 = vmatprep.subr.bf16.mxu1 %v10924_v51 }
 0x5e7   :  { %7570 = vmatmul.mubr.bf16.vlgmr.msra.gmra.mrb[80].mxu1 %v12925_v5  ;;  %v10771_v5 = vld [vmem:[%s13588_s8 + $0x90] sm:$0xff]  }
 0x5e8   :  { %10192 = vmatprep.mubr.msk.bf16.mxu1 %vm10925_vm0, %v10924_v51  ;;  %10161 = vmatpush3.bf16.msra.mxu0 %v10771_v5  ;;  %v10790_v5 = vld [vmem:[%s13589_s10 + $0x4b0] sm:$0xff]  }
 0x5e9   :  { %10162 = vmatprep.subr.bf16.mxu0 %v10924_v51 }
 0x5ec   :  { %10163 = vmatpush3.bf16.msra.mxu0 %v10772_v13  ;;  %v10791_v13 = vld [vmem:[%s13589_s10 + $0x4f8] sm:$0xff]  }
 0x5ed   :  { %10164 = vmatprep.subr.bf16.mxu0 %v10924_v51 }
 0x5fa   :  { %v9828_v53 = vpop.f32.mrb[56].mxu1 }
 0x5fb   :  { %v9829_v0 = vpop.f32.mrb[57].mxu1 }
 0x5fc   :  { %v9830_v28 = vadd.f32 %v9829_v0, %v9828_v53  ;;  %v9831_v12 = vpop.f32.mrb[58].mxu1  ;;  %v10783_v0 = vld [vmem:[%s13589_s10 + $0x4d8] sm:$0xff]  }
 0x5fd   :  { %v9832_v38 = vpop.f32.mrb[59].mxu1  ;;  %v10785_v12 = vld [vmem:[%s13589_s10 + $0x4e0] sm:$0xff]  }
 0x5fe   :  { %v5456_v39 = vadd.f32 %v9830_v28, %v5416_v8  ;;  %v10784_v28 = vld [vmem:[%s13589_s10 + $0x498] sm:$0xff]   ;;  %v10786_v38 = vld [vmem:[%s13589_s10 + $0x4a0] sm:$0xff]  }
 0x600   :  { %v5880_v37 = vadd.f32 %v13054_v48, %v5456_v39  ;;  %v10773_v48 = vld [vmem:[%s13588_s8 + $0xa0] sm:$0xff]   ;;  %v10787_v39 = vld [vmem:[%s13589_s10 + $0x4e8] sm:$0xff]  }
 0x601   :  { %10165 = vmatpush3.bf16.msra.mxu0 %v10773_v48  ;;  %v10792_v48 = vld [vmem:[%s13589_s10 + $0x4b8] sm:$0xff]  }
 0x602   :  { %10166 = vmatprep.subr.bf16.mxu0 %v10924_v51 }
 0x605   :  { %10167 = vmatpush3.bf16.msra.mxu0 %v10774_v14  ;;  %v10793_v14 = vld [vmem:[%s13589_s10 + $0x5c0] sm:$0xff]  }
 0x606   :  { %10168 = vmatprep.subr.bf16.mxu0 %v10924_v51 }
 0x609   :  { %10169 = vmatpush3.bf16.msra.mxu0 %v10775_v44  ;;  %v10794_v44 = vld [vmem:[%s13589_s10 + $0x580] sm:$0xff]  }
 0x60a   :  { %10170 = vmatprep.subr.bf16.mxu0 %v10924_v51 }
 0x60d   :  { %10171 = vmatpush3.bf16.msra.mxu0 %v10776_v54  ;;  %v10795_v54 = vld [vmem:[%s13589_s10 + $0x5c8] sm:$0xff]  }
 0x60e   :  { %10041 = vmatprep.subr.bf16.mxu0 %v10777_v25  ;;  %v10796_v25 = vld [vmem:[%s13589_s10 + $0x588] sm:$0xff]  }
 0x61a   :  { %v9872_v63 = vpop.f32.mrb[60].mxu1 }
 0x61b   :  { %v9873_v36 = vpop.f32.mrb[61].mxu1 }
 0x61c   :  { %v9874_v59 = vadd.f32 %v9873_v36, %v9872_v63  ;;  %v9875_v35 = vpop.f32.mrb[62].mxu1  ;;  %v10797_v36 = vld [vmem:[%s13589_s10 + $0x5d0] sm:$0xff]  }
 0x61d   :  { %v9876_v24 = vpop.f32.mrb[63].mxu1 }
 0x61e   :  { %v5920_v26 = vadd.f32 %v9874_v59, %v5880_v37  ;;  %v10788_v37 = vld [vmem:[%s13589_s10 + $0x4a8] sm:$0xff]  }
 0x620   :  { %v5960_v43 = vadd.f32 %v13108_v22, %v5920_v26 }
 0x63a   :  { %v9916_v40 = vpop.f32.mrb[64].mxu1 }
 0x63b   :  { %v9917_v46 = vpop.f32.mrb[65].mxu1 }
 0x63c   :  { %v9918_v27 = vadd.f32 %v9917_v46, %v9916_v40  ;;  %v9919_v17 = vpop.f32.mrb[66].mxu1  ;;  %v10801_v40 = vld [vmem:[%s13589_s10 + $0x5e0] sm:$0xff]  }
 0x63d   :  { %v9920_v16 = vpop.f32.mrb[67].mxu1  ;;  %v10802_v46 = vld [vmem:[%s13589_s10 + $0x5a0] sm:$0xff]   ;;  %v10804_v17 = vld [vmem:[%s13589_s10 + $0x5a8] sm:$0xff]  }
 0x63e   :  { %v13419_v41 = vadd.f32 %v9918_v27, %v5960_v43  ;;  %v10800_v43 = vld [vmem:[%s13589_s10 + $0x598] sm:$0xff]   ;;  %v10803_v27 = vld [vmem:[%s13589_s10 + $0x5e8] sm:$0xff]   ;;  %v10805_v16 = vld [vmem:[%s13589_s10 + $0x5f0] sm:$0xff]  }
 0x65a   :  { %v9960_v55 = vpop.f32.mrb[68].mxu1 }
 0x65b   :  { %v9961_v3 = vpop.f32.mrb[69].mxu1 }
 0x65c   :  { %v9962_v2 = vadd.f32 %v9961_v3, %v9960_v55  ;;  %v9963_v58 = vpop.f32.mrb[70].mxu1  ;;  %v10806_v55 = vld [vmem:[%s13589_s10 + $0x5b0] sm:$0xff]   ;;  %v10807_v3 = vld [vmem:[%s13589_s10 + $0x5f8] sm:$0xff]  }
 0x65d   :  { %v9964_v62 = vpop.f32.mrb[71].mxu1  ;;  %v10809_v58 = vld [vmem:[%s13594_s13] sm:$0xff]  }
 0x65e   :  { %v6719_v21 = vadd.f32 %v9962_v2, %v13172_v20  ;;  %v10808_v2 = vld [vmem:[%s13589_s10 + $0x5b8] sm:$0xff]   ;;  %10177 = vmatpush3.bf16.msra.mxu1 %v10809_v58  ;;  %v10810_v62 = vld [vmem:[%s13594_s13 + $0x8] sm:$0xff]  }
 0x65f   :  { %10178 = vmatprep.subr.bf16.mxu1 %v10924_v51 }
 0x660   :  { %v6759_v61 = vadd.f32 %v13232_v29, %v6719_v21  ;;  %v10811_v21 = vld [vmem:[%s13594_s13 + $0x10] sm:$0xff]  }
 0x662   :  { %10179 = vmatpush3.bf16.msra.mxu1 %v10810_v62 }
 0x663   :  { %10180 = vmatprep.subr.bf16.mxu1 %v10924_v51 }
 0x666   :  { %10181 = vmatpush3.bf16.msra.mxu1 %v10811_v21 }
 0x667   :  { %10182 = vmatprep.subr.bf16.mxu1 %v10924_v51 }
 0x67a   :  { %v10004_v50 = vpop.f32.mrb[72].mxu1 }
 0x67b   :  { %v10005_v47 = vpop.f32.mrb[73].mxu1 }
 0x67c   :  { %v10006_v56 = vadd.f32 %v10005_v47, %v10004_v50  ;;  %v10007_v22 = vpop.f32.mrb[74].mxu1  ;;  %v10814_v50 = vld [vmem:[%s13594_s13 + $0x28] sm:$0xff]   ;;  %v10815_v47 = vld [vmem:[%s13594_s13 + $0x30] sm:$0xff]  }
 0x67d   :  { %v10008_v15 = vpop.f32.mrb[75].mxu1  ;;  %v9073_v22 = vld [vmem:[%s13592_s9 + $0x2] ss:$0 sm:$0xff] }
 0x67e   :  { %v6799_v18 = vadd.f32 %v10006_v56, %v6759_v61  ;;  %v10813_v61 = vld [vmem:[%s13594_s13 + $0x20] sm:$0xff]   ;;  %v10816_v56 = vld [vmem:[%s13594_s13 + $0x38] sm:$0xff]  }
 0x680   :  { %v6812_v9 = vmul.f32 %v9052_v23, %v6799_v18 }
 0x682   :  { %v6821_v6 = vadd.f32 %v9054_v52, %v6812_v9 }
 0x684   :  { %v6823_v4 = vmin.f32 %v6821_v6, 0.0  ;;  %vm6822_vm3 = vcmp.gt.f32.partialorder %v6821_v6, 0.0 }
 0x686   :  { %v6824_v20 = vmul.f32 1.442695, %v6823_v4 }
 0x688   :  { %10917 = vpow2.f32 %v6824_v20 }
 0x692   :  { %v10918_v29 = vpop.eup %10917 }
 0x693   :  { %v9055_v42 = vadd.f32 -1.0, %v10918_v29 }
 0x695   :  { %v6827_v7 = vsel %vm6822_vm3, %v6821_v6, %v9055_v42 }
 0x696   :  { %v6828_v60 = vpack.c.bf16 %v6827_v7, %v6827_v7 }
 0x698   :  { %10173 = vmatmul.mubr.bf16.vlgmr.msra.gmra.mrb[76].mxu0 %v6828_v60 }
 0x699   :  { %10042 = vmatpush3.bf16.msra.mxu0 %v10778_v57  ;;  %7529 = vmatprep.mubr.bf16.mxu0 %v13162_v33  ;;  %v10782_v33 = vld [vmem:[%s13589_s10 + $0x490] sm:$0xff]  }
 0x69a   :  { %v10035_v10 = vpop.f32.mrb[76].mxu1  ;;  %10043 = vmatprep.subr.bf16.mxu0 %v10779_v30 }
 0x69b   :  { %v10036_v11 = vpop.f32.mrb[77].mxu1 }
 0x69c   :  { %v13442_v19 = vadd.f32 %v10036_v11, %v10035_v10  ;;  %v10038_v8 = vpop.f32.mrb[78].mxu1  ;;  %v9275_v11 = vld [vmem:[%s13595_s11] ss:$0 sm:$0xff] }
 0x69d   :  { %10044 = vmatpush3.bf16.msra.mxu0 %v10780_v31  ;;  %v10039_v53 = vpop.f32.mrb[79].mxu1 }
 0x69e   :  { %10045 = vmatprep.subr.bf16.mxu0 %v10781_v1  ;;  %v9276_v53 = vld [vmem:[%s13596_s12] ss:$0 sm:$0xff] }
 0x6a1   :  { %10046 = vmatpush3.bf16.msra.mxu0 %v10782_v33 }
 0x6a2   :  { %10047 = vmatprep.subr.bf16.mxu0 %v10783_v0 }
 0x6a5   :  { %10048 = vmatpush3.bf16.msra.mxu0 %v10784_v28 }
 0x6a6   :  { %10049 = vmatprep.subr.bf16.mxu0 %v10785_v12 }
 0x6a9   :  { %10050 = vmatpush3.bf16.msra.mxu0 %v10786_v38 }
 0x6aa   :  { %10051 = vmatprep.subr.bf16.mxu0 %v10787_v39 }
 0x6ad   :  { %10052 = vmatpush3.bf16.msra.mxu0 %v10788_v37 }
 0x6ae   :  { %10053 = vmatprep.subr.bf16.mxu0 %v10789_v34  ;;  %v9278_v34 = vld [vmem:[%s13597_s14] ss:$0 sm:$0xff] }
 0x6b1   :  { %10054 = vmatpush3.bf16.msra.mxu0 %v10790_v5 }
 0x6b2   :  { %10055 = vmatprep.subr.bf16.mxu0 %v10791_v13 }
 0x6b5   :  { %10056 = vmatpush3.bf16.msra.mxu0 %v10792_v48 }
 0x6b6   :  { %10085 = vmatprep.subr.bf16.mxu0 %v10793_v14 }
 0x6b8   :  { %7530 = vmatmul.mubr.bf16.vlgmr.msra.gmra.mrb[80].mxu0 %v13217_v45  ;;  %v10798_v45 = vld [vmem:[%s13589_s10 + $0x590] sm:$0xff]  }
 0x6b9   :  { %10086 = vmatpush3.bf16.msra.mxu0 %v10794_v44  ;;  %7609 = vmatprep.mubr.bf16.mxu0 %v13222_v32  ;;  %v10799_v32 = vld [vmem:[%s13589_s10 + $0x5d8] sm:$0xff]  }
 0x6ba   :  { %v10079_v63 = vpop.f32.mrb[80].mxu1  ;;  %10087 = vmatprep.subr.bf16.mxu0 %v10795_v54 }
 0x6bb   :  { %v10080_v59 = vpop.f32.mrb[81].mxu1 }
 0x6bc   :  { %v13494_v35 = vadd.f32 %v10080_v59, %v10079_v63  ;;  %v10082_v24 = vpop.f32.mrb[82].mxu1 }
 0x6bd   :  { %10088 = vmatpush3.bf16.msra.mxu0 %v10796_v25  ;;  %v10083_v26 = vpop.f32.mrb[83].mxu1 }
 0x6be   :  { %10089 = vmatprep.subr.bf16.mxu0 %v10797_v36 }
 0x6c1   :  { %10090 = vmatpush3.bf16.msra.mxu0 %v10798_v45 }
 0x6c2   :  { %10091 = vmatprep.subr.bf16.mxu0 %v10799_v32 }
 0x6c5   :  { %10092 = vmatpush3.bf16.msra.mxu0 %v10800_v43 }
 0x6c6   :  { %10093 = vmatprep.subr.bf16.mxu0 %v10801_v40 }
 0x6c9   :  { %10094 = vmatpush3.bf16.msra.mxu0 %v10802_v46 }
 0x6ca   :  { %10095 = vmatprep.subr.bf16.mxu0 %v10803_v27 }
 0x6cd   :  { %10096 = vmatpush3.bf16.msra.mxu0 %v10804_v17 }
 0x6ce   :  { %10097 = vmatprep.subr.bf16.mxu0 %v10805_v16 }
 0x6d1   :  { %10098 = vmatpush3.bf16.msra.mxu0 %v10806_v55 }
 0x6d2   :  { %10099 = vmatprep.subr.bf16.mxu0 %v10807_v3 }
 0x6d5   :  { %10100 = vmatpush3.bf16.msra.mxu0 %v10808_v2 }
 0x6d8   :  { %7610 = vmatmul.mubr.bf16.vlgmr.msra.gmra.mrb[84].mxu0 %v13275_v49  ;;  %v10812_v49 = vld [vmem:[%s13594_s13 + $0x18] sm:$0xff]  }
 0x6d9   :  { %10183 = vmatpush3.bf16.msra.mxu1 %v10812_v49 }
 0x6da   :  { %10184 = vmatprep.subr.bf16.mxu1 %v10924_v51 }
 0x6dd   :  { %10185 = vmatpush3.bf16.msra.mxu1 %v10813_v61 }
 0x6de   :  { %10186 = vmatprep.subr.bf16.mxu1 %v10924_v51 }
 0x6e1   :  { %10187 = vmatpush3.bf16.msra.mxu1 %v10814_v50 }
 0x6e2   :  { %10188 = vmatprep.subr.bf16.mxu1 %v10924_v51 }
 0x6e5   :  { %10189 = vmatpush3.bf16.msra.mxu1 %v10815_v47 }
 0x6e6   :  { %10190 = vmatprep.subr.bf16.mxu1 %v10924_v51 }
 0x6e9   :  { %10191 = vmatpush3.bf16.msra.mxu1 %v10816_v56 }
 0x76b   :  { %v6936_v23 = vpop.f32.mrb[76].mxu0 }
 0x76c   :  { %v6937_v15 = vadd.f32 %v9073_v22, %v6936_v23  ;;  %v10174_v18 = vpop.f32.mrb[77].mxu0 }
 0x76d   :  { %v6939_v52 = vpop.f32.mrb[78].mxu0 }
 0x76e   :  { %9082 = vst [vmem:[%s13593_s15 + $0x4] sm:$0x3] %v6937_v15  ;;  %v10175_v9 = vpop.f32.mrb[79].mxu0 }
 0x78b   :  { %v10057_v6 = vpop.f32.mrb[80].mxu0 }
 0x78c   :  { %v10058_v4 = vpop.f32.mrb[81].mxu0 }
 0x78d   :  { %v10059_v20 = vadd.f32 %v10058_v4, %v10057_v6  ;;  %v10060_v29 = vpop.f32.mrb[82].mxu0 }
 0x78e   :  { %v10061_v42 = vpop.f32.mrb[83].mxu0 }
 0x78f   :  { %v7532_v51 = vadd.f32 %v10059_v20, %v13442_v19 }
 0x791   :  { %v7572_v7 = vadd.f32 %v13494_v35, %v7532_v51 }
 0x7ab   :  { %v10101_v57 = vpop.f32.mrb[84].mxu0 }
 0x7ac   :  { %v10102_v60 = vpop.f32.mrb[85].mxu0 }
 0x7ad   :  { %v10103_v30 = vadd.f32 %v10102_v60, %v10101_v57  ;;  %v10104_v31 = vpop.f32.mrb[86].mxu0 }
 0x7ae   :  { %v10105_v10 = vpop.f32.mrb[87].mxu0 }
 0x7af   :  { %v7612_v1 = vadd.f32 %v10103_v30, %v7572_v7 }
 0x7b1   :  { %v7617_v8 = vadd.f32 %v7612_v1, %v13419_v41 }
 0x7b3   :  { %v7625_v33 = vmul.f32 %v9275_v11, %v7617_v8 }
 0x7b5   :  { %v7633_v19 = vadd.f32 %v9276_v53, %v7625_v33 }
 0x7b7   :  { %v7635_v0 = vmin.f32 %v7633_v19, 0.0  ;;  %vm7634_vm4 = vcmp.gt.f32.partialorder %v7633_v19, 0.0 }
 0x7b9   :  { %v7636_v28 = vmul.f32 1.442695, %v7635_v0 }
 0x7bb   :  { %10919 = vpow2.f32 %v7636_v28 }
 0x7c5   :  { %v10920_v12 = vpop.eup %10919 }
 0x7c6   :  { %v9277_v38 = vadd.f32 -1.0, %v10920_v12 }
 0x7c8   :  { %v7639_v39 = vsel %vm7634_vm4, %v7633_v19, %v9277_v38 }
 0x7c9   :  { %v7640_v37 = vpack.c.bf16 %v7639_v39, %v7639_v39 }
 0x7cb   :  { %10193 = vmatmul.mubr.bf16.vlgmr.msra.gmra.mrb[84].mxu1 %v7640_v37 }
 0x89e   :  { %v7746_v41 = vpop.f32.mrb[84].mxu1 }
 0x89f   :  { %v7747_v5 = vadd.f32 %v9278_v34, %v7746_v41  ;;  %v10194_v13 = vpop.f32.mrb[85].mxu1 }
 0x8a0   :  { %v7749_v48 = vpop.f32.mrb[86].mxu1 }
 0x8a1   :  { %9287 = vst [vmem:[%s13593_s15 + $0x6] sm:$0x3] %v7747_v5  ;;  %v10195_v14 = vpop.f32.mrb[87].mxu1 }

</bundles_post_ra>
